<compile_context>
chip_gen: v7x
topology: tpu7x:2x2x1
jax: 0.10.0
libtpu: 0.0.40
codegen_flags: <defaults>
</compile_context>

<pallas_src>
import math
import functools

import jax
import jax.numpy as jnp
import numpy as np
from jax.experimental import pallas as pl
from jax.experimental.pallas import tpu as pltpu


# ----------------------------------------------------------------------------
# Shared small math helpers (pure jnp: usable both inside kernels and on host)
# ----------------------------------------------------------------------------
def _layer_norm(h, gamma, beta, eps):
    mu = jnp.mean(h, axis=-1, keepdims=True)
    d = h - mu
    var = jnp.mean(d * d, axis=-1, keepdims=True)
    return d * jax.lax.rsqrt(var + eps) * gamma + beta


def _gelu_tanh(x):
    c = 0.7978845608028654  # sqrt(2/pi)
    return 0.5 * x * (1.0 + jnp.tanh(c * (x + 0.044715 * x * x * x)))


def _round_up(n, m):
    return ((n + m - 1) // m) * m


def _pad_rows(x, rows):
    pad = rows - x.shape[0]
    if pad == 0:
        return x
    return jnp.pad(x, ((0, pad),) + ((0, 0),) * (x.ndim - 1))


def _default_vmem_limit():
    # ~3/4 of physical VMEM: ~96 MiB on v5e/v6e (128 MiB), ~48 MiB on v7x (64).
    try:
        cap = int(pltpu.get_tpu_info().vmem_capacity_bytes)
    except Exception:
        cap = 64 * 1024 * 1024
    return int(min(cap * 3 // 4, 96 * 1024 * 1024))


def _build_path_masks(edge_lists, num_q, num_k):
    """(L, P, S) int8 0/1 adjacency masks; (P, S) kept as the trailing dims so
    query-block tiling never violates the (8,128)/full-dim block rule."""
    num_paths = len(edge_lists)
    m = jnp.zeros((num_q, num_paths, num_k), jnp.int8)
    for p, e in enumerate(edge_lists):
        m = m.at[e[0], p, e[1]].set(1)  # duplicates collapse (see TODO above)
    return m


# ----------------------------------------------------------------------------
# Kernel 1: meta-path sparse attention (all heads + all paths in one step)
# ----------------------------------------------------------------------------
def _metapath_attn_kernel(pw_ref, q_ref, k_ref, v_ref, mask_ref, o_ref, *,
                          temp, num_paths, heads):
    # pw_ref   : (P,)        f32, SMEM (path weights)
    # q_ref    : (BL, H, E)  bf16
    # k_ref    : (S,  H, E)  bf16 (resident across grid steps)
    # v_ref    : (S,  H, D)  bf16 (resident across grid steps)
    # mask_ref : (BL, P, S)  int8 0/1
    # o_ref    : (BL, H*D)   bf16 (lane-dense)
    q = q_ref[...]
    k = k_ref[...]
    v = v_ref[...]
    mask = mask_ref[...].astype(jnp.float32)                       # (BL, P, S)

    # One batched QK^T for all heads (dot_general batch dim = H); scores are
    # shared across all meta-paths.  f32 accumulation on the MXU.
    scores = jnp.einsum("lhe,she->hls", q, k,
                        preferred_element_type=jnp.float32) * temp  # (H, BL, S)

    # exp hoisted out of the path loop: the global row-max is a valid shift for
    # every path's softmax (exact in real arithmetic; with f32 exp it is safe
    # for any realistic score spread < ~80 nats).
    rowmax = jnp.max(scores, axis=-1, keepdims=True)                # (H, BL, 1)
    ex = jnp.exp(scores - rowmax)                                   # (H, BL, S)

    # Accumulate the weighted attention matrices (path weight folded into the
    # per-row column scale), then issue a SINGLE alpha @ V matmul.
    alpha = jnp.zeros_like(ex)
    for p in range(num_paths):                        # P is small & static
        mex = ex * mask[:, p, :][None, :, :]          # zero where no edge
        den = jnp.sum(mex, axis=-1, keepdims=True)    # (H, BL, 1)
        # Rows with no edge in this path have den == 0 AND mex == 0, so the
        # floored reciprocal gives an exact-0 contribution (no NaN, no -1e30).
        inv = pl.reciprocal(jnp.maximum(den, 1e-30), approx=True)   # EUP slot
        alpha = alpha + mex * (pw_ref[p] * inv)

    out = jnp.einsum("hls,shd->hld", alpha.astype(jnp.bfloat16), v,
                     preferred_element_type=jnp.float32)            # (H, BL, D)

    # Merge heads along the lane axis and do ONE full-width dense store.
    merged = jnp.concatenate([out[h] for h in range(heads)], axis=-1)
    o_ref[...] = merged.astype(o_ref.dtype)


def sparse_attention_metapath(queries, keys, values, edge_lists, path_weights,
                              softmax_temp=None, block_l=128):
    """sum_p path_weights[p] * SparseAttention(q, k, v, edges_p), heads merged.

    queries: (L, H, E), keys: (S, H, E), values: (S, H, D)
    edge_lists: sequence of (2, n_edges) int32 arrays, row 0 = dst (query idx),
                row 1 = src (key idx).
    returns: (L, H*D) bfloat16
    """
    num_q, heads, e_dim = queries.shape
    num_k = keys.shape[0]
    d_dim = values.shape[-1]
    num_paths = len(edge_lists)
    # NOTE: use `is None` (the PyTorch ref's `or` silently drops temp == 0.0).
    temp = float(softmax_temp) if softmax_temp is not None \
        else 1.0 / math.sqrt(e_dim)

    # Large query blocks; pad L up instead of shrinking the block.
    bl = block_l
    l_pad = _round_up(num_q, bl)
    grid = (l_pad // bl,)

    # Padded query rows have an all-zero mask -> their output is exactly 0.
    masks = _build_path_masks(edge_lists, l_pad, num_k)       # (Lp, P, S) int8
    qb = _pad_rows(queries.astype(jnp.bfloat16), l_pad)
    kb = keys.astype(jnp.bfloat16)
    vb = values.astype(jnp.bfloat16)
    pw = jnp.asarray(path_weights, jnp.float32)

    # TODO(synk): for real graph sizes (S >> a few thousand) add a second
    # "arbitrary" grid axis over S with flash-style online softmax so the
    # (H, BL, S) scores / ex never materialize (mandatory on v7x's 64 MiB VMEM).
    kernel = functools.partial(_metapath_attn_kernel, temp=temp,
                               num_paths=num_paths, heads=heads)
    out = pl.pallas_call(
        kernel,
        out_shape=jax.ShapeDtypeStruct((l_pad, heads * d_dim), jnp.bfloat16),
        grid_spec=pltpu.PrefetchScalarGridSpec(
            num_scalar_prefetch=0,
            grid=grid,
            in_specs=[
                pl.BlockSpec(memory_space=pltpu.MemorySpace.SMEM),         # path weights
                pl.BlockSpec((bl, heads, e_dim), lambda i: (i, 0, 0)),     # Q block
                pl.BlockSpec((num_k, heads, e_dim), lambda i: (0, 0, 0)),  # K (resident)
                pl.BlockSpec((num_k, heads, d_dim), lambda i: (0, 0, 0)),  # V (resident)
                pl.BlockSpec((bl, num_paths, num_k), lambda i: (i, 0, 0)), # masks (int8)
            ],
            out_specs=pl.BlockSpec((bl, heads * d_dim), lambda i: (i, 0)),
        ),
        compiler_params=pltpu.CompilerParams(
            dimension_semantics=("parallel",),          # real L -> many blocks
            vmem_limit_bytes=_default_vmem_limit()),
    )(pw, qb, kb, vb, masks)
    return out[:num_q]


# ----------------------------------------------------------------------------
# Kernel 2: fused AddNorm -> FeedForward -> AddNorm tail (per stream)
# ----------------------------------------------------------------------------
def _addnorm_ffn_kernel(x_ref, y_ref, ln1w_ref, ln1b_ref, w1_ref, b1_ref,
                        w2_ref, b2_ref, ln2w_ref, ln2b_ref, o_ref, *, eps):
    x = x_ref[...]                                   # (BL, C) f32 residual
    y = y_ref[...].astype(jnp.float32)               # (BL, C) bf16 attention out
    h1 = _layer_norm(x + y, ln1w_ref[...], ln1b_ref[...], eps)
    # bf16 operands on the MXU, f32 accumulation; bias/GELU/LN stay f32.
    z = jnp.dot(h1.astype(jnp.bfloat16), w1_ref[...],
                preferred_element_type=jnp.float32) + b1_ref[...]
    g = _gelu_tanh(z)
    f = jnp.dot(g.astype(jnp.bfloat16), w2_ref[...],
                preferred_element_type=jnp.float32) + b2_ref[...]
    o_ref[...] = _layer_norm(h1 + f, ln2w_ref[...], ln2b_ref[...], eps)


def addnorm_ffn(x, y, ln1_w, ln1_b, w1, b1, w2, b2, ln2_w, ln2_b,
                block_l=128, eps=1e-5):
    n, channels = x.shape
    hidden = w1.shape[1]
    bl = block_l
    n_pad = _round_up(n, bl)
    grid = (n_pad // bl,)
    row = lambda i: (i, 0)
    rep = lambda i: (0, 0)
    # TODO(synk): the weight / LN specs below are grid-invariant; at real sizes
    # give them pipeline_mode=pl.Buffered(1) to reclaim the double-buffer VMEM.
    out = pl.pallas_call(
        functools.partial(_addnorm_ffn_kernel, eps=eps),
        out_shape=jax.ShapeDtypeStruct((n_pad, channels), jnp.float32),
        grid_spec=pltpu.PrefetchScalarGridSpec(
            num_scalar_prefetch=0,
            grid=grid,
            in_specs=[
                pl.BlockSpec((bl, channels), row),       # x (residual, f32)
                pl.BlockSpec((bl, channels), row),       # y (attention out, bf16)
                pl.BlockSpec((1, channels), rep),        # ln1 gamma
                pl.BlockSpec((1, channels), rep),        # ln1 beta
                pl.BlockSpec((channels, hidden), rep),   # W1 (bf16, resident)
                pl.BlockSpec((1, hidden), rep),          # b1
                pl.BlockSpec((hidden, channels), rep),   # W2 (bf16, resident)
                pl.BlockSpec((1, channels), rep),        # b2
                pl.BlockSpec((1, channels), rep),        # ln2 gamma
                pl.BlockSpec((1, channels), rep),        # ln2 beta
            ],
            out_specs=pl.BlockSpec((bl, channels), row),
        ),
        compiler_params=pltpu.CompilerParams(
            dimension_semantics=("parallel",),
            vmem_limit_bytes=_default_vmem_limit()),
    )(_pad_rows(x.astype(jnp.float32), n_pad),
      _pad_rows(y.astype(jnp.bfloat16), n_pad),
      ln1_w.reshape(1, channels).astype(jnp.float32),
      ln1_b.reshape(1, channels).astype(jnp.float32),
      w1.astype(jnp.bfloat16),
      b1.reshape(1, hidden).astype(jnp.float32),
      w2.astype(jnp.bfloat16),
      b2.reshape(1, channels).astype(jnp.float32),
      ln2_w.reshape(1, channels).astype(jnp.float32),
      ln2_b.reshape(1, channels).astype(jnp.float32))
    return out[:n]


# ----------------------------------------------------------------------------
# EncoderLayer.forward
# ----------------------------------------------------------------------------
def encoder_layer_forward(params, v_nodes, c_nodes,
                          meta_paths_var, meta_paths_cls, heads):
    def stream(x, p, edge_lists):
        n, channels = x.shape
        hd = channels // heads
        qkv = jnp.dot(x, p["w_qkv"]) + p["b_qkv"]          # XLA glue (nn.Linear)
        q, k, vv = [t.reshape(n, heads, hd) for t in jnp.split(qkv, 3, axis=-1)]
        att = sparse_attention_metapath(q, k, vv, edge_lists, p["path_w"])
        return addnorm_ffn(x, att,
                           p["ln1_w"], p["ln1_b"],
                           p["ffn_w1"], p["ffn_b1"], p["ffn_w2"], p["ffn_b2"],
                           p["ln2_w"], p["ln2_b"])
    return (stream(v_nodes, params["var"], meta_paths_var),
            stream(c_nodes, params["cls"], meta_paths_cls))


# ----------------------------------------------------------------------------
# Pure-JAX references (for correctness checks only)
# ----------------------------------------------------------------------------
def _segment_attention_reference(q, k, v, edges, temp):
    """Faithful port of the PyTorch segment-softmax + spmm path (f32)."""
    dst, src = edges[0], edges[1]
    num_q = q.shape[0]
    qk = jnp.sum(q[dst] * k[src], axis=-1)                         # (n, H)
    x = temp * qk
    m = jax.ops.segment_max(x, dst, num_segments=num_q)
    m = jnp.where(jnp.isfinite(m), m, 0.0)
    ex = jnp.exp(x - m[dst])
    den = jax.ops.segment_sum(ex, dst, num_segments=num_q)
    alpha = ex / jnp.where(den[dst] > 0, den[dst], 1.0)
    return jax.ops.segment_sum(alpha[..., None] * v[src], dst,
                               num_segments=num_q)                 # (L, H, D)


def _dense_attention_mirror(q, k, v, masks, path_weights, temp):
    """Mirrors the kernel math (bf16 matmuls, hoisted exp, combined alpha)."""
    num_q, heads, _ = q.shape
    d_dim = v.shape[-1]
    qb, kb, vb = (t.astype(jnp.bfloat16) for t in (q, k, v))
    scores = jnp.einsum("lhe,she->hls", qb, kb,
                        preferred_element_type=jnp.float32) * temp
    rowmax = jnp.max(scores, axis=-1, keepdims=True)
    ex = jnp.exp(scores - rowmax)
    alpha = jnp.zeros_like(ex)
    for p in range(masks.shape[1]):
        mp = masks[:, p, :].astype(jnp.float32)
        mex = ex * mp[None, :, :]
        den = jnp.sum(mex, axis=-1, keepdims=True)
        alpha = alpha + mex * (path_weights[p] / jnp.maximum(den, 1e-30))
    out = jnp.einsum("hls,shd->hld", alpha.astype(jnp.bfloat16), vb,
                     preferred_element_type=jnp.float32)
    return jnp.transpose(out, (1, 0, 2)).reshape(num_q, heads * d_dim)


def _encoder_stream_reference(x, p, edge_lists, heads, eps=1e-5):
    n, channels = x.shape
    hd = channels // heads
    qkv = jnp.dot(x, p["w_qkv"]) + p["b_qkv"]
    q, k, vv = [t.reshape(n, heads, hd) for t in jnp.split(qkv, 3, axis=-1)]
    masks = _build_path_masks(edge_lists, n, n)
    att = _dense_attention_mirror(q, k, vv, masks, p["path_w"],
                                  1.0 / math.sqrt(hd))
    att = att.astype(jnp.bfloat16).astype(jnp.float32)   # kernel hand-off dtype
    h1 = _layer_norm(att + x, p["ln1_w"][None, :], p["ln1_b"][None, :], eps)
    z = jnp.dot(h1.astype(jnp.bfloat16), p["ffn_w1"].astype(jnp.bfloat16),
                preferred_element_type=jnp.float32) + p["ffn_b1"]
    f = jnp.dot(_gelu_tanh(z).astype(jnp.bfloat16),
                p["ffn_w2"].astype(jnp.bfloat16),
                preferred_element_type=jnp.float32) + p["ffn_b2"]
    return _layer_norm(h1 + f, p["ln2_w"][None, :], p["ln2_b"][None, :], eps)


# ----------------------------------------------------------------------------
# Example / self-test
# ----------------------------------------------------------------------------
def _make_edges(key, n_dst, n_src, prob, self_loops):
    adj = np.asarray(jax.random.bernoulli(key, prob, (n_dst, n_src)))
    if self_loops:
        adj = adj | np.eye(n_dst, n_src, dtype=bool)
    d, s = np.nonzero(adj)
    if d.size == 0:
        d, s = np.array([0]), np.array([0])
    return jnp.stack([jnp.asarray(d, jnp.int32),
                      jnp.asarray(s, jnp.int32)], axis=0)


def _make_stream_params(key, channels, num_paths):
    ks = jax.random.split(key, 8)
    lin = lambda k, fan_in, shape: (jax.random.normal(k, shape, jnp.float32)
                                    / np.sqrt(fan_in))
    return dict(
        w_qkv=lin(ks[0], channels, (channels, 3 * channels)),
        b_qkv=0.02 * jax.random.normal(ks[1], (3 * channels,), jnp.float32),
        path_w=jnp.linspace(0.75, 1.25, num_paths).astype(jnp.float32),
        ln1_w=1.0 + 0.1 * jax.random.normal(ks[2], (channels,), jnp.float32),
        ln1_b=0.05 * jax.random.normal(ks[3], (channels,), jnp.float32),
        ffn_w1=lin(ks[4], channels, (channels, channels)),
        ffn_b1=jnp.zeros((channels,), jnp.float32),
        ffn_w2=lin(ks[5], channels, (channels, channels)),
        ffn_b2=jnp.zeros((channels,), jnp.float32),
        ln2_w=1.0 + 0.1 * jax.random.normal(ks[6], (channels,), jnp.float32),
        ln2_b=0.05 * jax.random.normal(ks[7], (channels,), jnp.float32),
    )


if __name__ == "__main__":
    C = 128            # in_channels == hd_channels (residual add requires it)
    heads = 4
    hd = C // heads    # 32 -> H*D = 128 (lane-dense output block)
    P = 2              # num_meta_paths
    Lv, Lc = 16, 16    # graph nodes per stream (padded up to the query block)

    root = jax.random.PRNGKey(0)
    (k_feat_v, k_feat_c, k_par_v, k_par_c,
     k_e1, k_e2, k_e3, k_e4) = jax.random.split(root, 8)

    v_nodes = jax.random.normal(k_feat_v, (Lv, C), jnp.float32)
    c_nodes = jax.random.normal(k_feat_c, (Lc, C), jnp.float32)

    # path 1 deliberately has no self loops -> some query rows have no edges
    meta_paths_var = (_make_edges(k_e1, Lv, Lv, 0.30, self_loops=True),
                      _make_edges(k_e2, Lv, Lv, 0.15, self_loops=False))
    meta_paths_cls = (_make_edges(k_e3, Lc, Lc, 0.25, self_loops=True),
                      _make_edges(k_e4, Lc, Lc, 0.20, self_loops=False))

    params = {"var": _make_stream_params(k_par_v, C, P),
              "cls": _make_stream_params(k_par_c, C, P)}

    v_out, c_out = encoder_layer_forward(params, v_nodes, c_nodes,
                                         meta_paths_var, meta_paths_cls,
                                         heads=heads)
    v_out, c_out = jax.block_until_ready((v_out, c_out))
    assert v_out.shape == (Lv, C) and c_out.shape == (Lc, C)

    # ---- correctness checks (dropout omitted -> deterministic) --------------
    pv = params["var"]
    qkv = v_nodes @ pv["w_qkv"] + pv["b_qkv"]
    q, k, vv = [t.reshape(Lv, heads, hd) for t in jnp.split(qkv, 3, axis=-1)]
    temp = 1.0 / math.sqrt(hd)

    att_kernel = jax.block_until_ready(
        sparse_attention_metapath(q, k, vv, meta_paths_var, pv["path_w"]))
    att_kernel_f32 = np.asarray(att_kernel.astype(jnp.float32))

    # (1) vs. the faithful segment-softmax formulation (f32) -- loose tol
    #     because the kernel runs its matmuls in bf16 and emits bf16.
    att_seg = sum(pv["path_w"][p] *
                  _segment_attention_reference(q, k, vv, meta_paths_var[p], temp)
                  for p in range(P)).reshape(Lv, C)
    np.testing.assert_allclose(att_kernel_f32, np.asarray(att_seg),
                               rtol=1e-1, atol=1e-1)

    # (2) vs. a bf16-mirrored dense reference -- tight
    masks_var = _build_path_masks(meta_paths_var, Lv, Lv)
    att_mirror = _dense_attention_mirror(q, k, vv, masks_var, pv["path_w"], temp)
    np.testing.assert_allclose(att_kernel_f32, np.asarray(att_mirror),
                               rtol=3e-2, atol=3e-2)

    # (3) full EncoderLayer vs. pure-JAX reference with mirrored numerics
    v_ref = _encoder_stream_reference(v_nodes, pv, meta_paths_var, heads)
    c_ref = _encoder_stream_reference(c_nodes, params["cls"], meta_paths_cls, heads)
    np.testing.assert_allclose(np.asarray(v_out), np.asarray(v_ref),
                               rtol=3e-2, atol=3e-2)
    np.testing.assert_allclose(np.asarray(c_out), np.asarray(c_ref),
                               rtol=3e-2, atol=3e-2)

    print("KERNEL_OK")
</pallas_src>

<mosaic_0001>
module attributes {stable_mosaic.version = 11 : i64} {
  func.func @_metapath_attn_kernel(%arg0: i32, %arg1: memref<2xf32, #tpu.memory_space<smem>>, %arg2: memref<128x4x32xbf16, #tpu.memory_space<vmem>>, %arg3: memref<16x4x32xbf16, #tpu.memory_space<vmem>>, %arg4: memref<16x4x32xbf16, #tpu.memory_space<vmem>>, %arg5: memref<128x2x16xi8, #tpu.memory_space<vmem>>, %arg6: memref<128x128xbf16, #tpu.memory_space<vmem>>) attributes {dimension_semantics = [#tpu.dimension_semantics<parallel>], iteration_bounds = array<i64: 1>, scalar_prefetch = 0 : i64, scratch_operands = 0 : i64, tpu.core_type = #tpu.core_type<tc>, window_params = [{transform_indices = @transform_0, window_bounds = array<i64: 2>}, {transform_indices = @transform_1, window_bounds = array<i64: 128, 4, 32>}, {pipeline_mode = #tpu.pipeline_mode<synchronous>, transform_indices = @transform_2, window_bounds = array<i64: 16, 4, 32>}, {pipeline_mode = #tpu.pipeline_mode<synchronous>, transform_indices = @transform_3, window_bounds = array<i64: 16, 4, 32>}, {transform_indices = @transform_4, window_bounds = array<i64: 128, 2, 16>}, {transform_indices = @transform_5, window_bounds = array<i64: 128, 128>}]} {
    %c0 = arith.constant 0 : index
    %c0_0 = arith.constant 0 : index
    %c0_1 = arith.constant 0 : index
    %0 = vector.load %arg2[%c0, %c0_0, %c0_1] : memref<128x4x32xbf16, #tpu.memory_space<vmem>>, vector<128x4x32xbf16>
    %c0_2 = arith.constant 0 : index
    %c0_3 = arith.constant 0 : index
    %c0_4 = arith.constant 0 : index
    %1 = vector.load %arg3[%c0_2, %c0_3, %c0_4] : memref<16x4x32xbf16, #tpu.memory_space<vmem>>, vector<16x4x32xbf16>
    %c0_5 = arith.constant 0 : index
    %c0_6 = arith.constant 0 : index
    %c0_7 = arith.constant 0 : index
    %2 = vector.load %arg4[%c0_5, %c0_6, %c0_7] : memref<16x4x32xbf16, #tpu.memory_space<vmem>>, vector<16x4x32xbf16>
    %c0_8 = arith.constant 0 : index
    %c0_9 = arith.constant 0 : index
    %c0_10 = arith.constant 0 : index
    %3 = vector.load %arg5[%c0_8, %c0_9, %c0_10] : memref<128x2x16xi8, #tpu.memory_space<vmem>>, vector<128x2x16xi8>
    %4 = arith.sitofp %3 : vector<128x2x16xi8> to vector<128x2x16xf32>
    "tpu.trace_start"() <{level = 10 : i32, message = "lhe,she->hls"}> : () -> ()
    %cst = arith.constant dense<0.000000e+00> : vector<4x128x16xf32>
    %5 = tpu.matmul %0, %1, %cst {dimension_numbers = #tpu.dot_dimension_numbers<[2], [2], [0], [0], [0, 1, 0, 0, 1, 0], [1], [1]>} : vector<128x4x32xbf16>, vector<16x4x32xbf16>, vector<4x128x16xf32> -> vector<4x128x16xf32>
    "tpu.trace_stop"() : () -> ()
    %cst_11 = arith.constant 0.176776692 : f32
    %6 = vector.broadcast %cst_11 : f32 to vector<4x128x16xf32>
    %7 = arith.mulf %5, %6 : vector<4x128x16xf32>
    %cst_12 = arith.constant dense<0xFF800000> : vector<4x128xf32>
    %8 = vector.multi_reduction <maximumf>, %7, %cst_12 [2] : vector<4x128x16xf32> to vector<4x128xf32>
    %9 = vector.shape_cast %8 : vector<4x128xf32> to vector<4x128x1xf32>
    %10 = vector.broadcast %9 : vector<4x128x1xf32> to vector<4x128x16xf32>
    %11 = arith.subf %7, %10 : vector<4x128x16xf32>
    %12 = math.exp %11 : vector<4x128x16xf32>
    %cst_13 = arith.constant 0.000000e+00 : f32
    %13 = vector.broadcast %cst_13 : f32 to vector<4x128x16xf32>
    %14 = vector.extract_strided_slice %4 {offsets = [0, 0, 0], sizes = [128, 1, 16], strides = [1, 1, 1]} : vector<128x2x16xf32> to vector<128x1x16xf32>
    %15 = vector.shape_cast %14 : vector<128x1x16xf32> to vector<128x16xf32>
    %16 = vector.shape_cast %15 : vector<128x16xf32> to vector<1x128x16xf32>
    %17 = vector.broadcast %16 : vector<1x128x16xf32> to vector<4x128x16xf32>
    %18 = arith.mulf %12, %17 : vector<4x128x16xf32>
    %cst_14 = arith.constant dense<0.000000e+00> : vector<4x128xf32>
    %19 = vector.multi_reduction <add>, %18, %cst_14 [2] : vector<4x128x16xf32> to vector<4x128xf32>
    %20 = vector.shape_cast %19 : vector<4x128xf32> to vector<4x128x1xf32>
    %cst_15 = arith.constant 1.000000e-30 : f32
    %21 = vector.broadcast %cst_15 : f32 to vector<4x128x1xf32>
    %22 = arith.maximumf %20, %21 : vector<4x128x1xf32>
    %23 = tpu.reciprocal %22 {approx = true} : vector<4x128x1xf32> -> vector<4x128x1xf32>
    %c0_16 = arith.constant 0 : index
    %24 = memref.load %arg1[%c0_16] : memref<2xf32, #tpu.memory_space<smem>>
    %25 = vector.broadcast %24 : f32 to vector<4x128x1xf32>
    %26 = arith.mulf %25, %23 : vector<4x128x1xf32>
    %27 = vector.broadcast %26 : vector<4x128x1xf32> to vector<4x128x16xf32>
    %28 = arith.mulf %18, %27 : vector<4x128x16xf32>
    %29 = arith.addf %13, %28 : vector<4x128x16xf32>
    %30 = vector.extract_strided_slice %4 {offsets = [0, 1, 0], sizes = [128, 1, 16], strides = [1, 1, 1]} : vector<128x2x16xf32> to vector<128x1x16xf32>
    %31 = vector.shape_cast %30 : vector<128x1x16xf32> to vector<128x16xf32>
    %32 = vector.shape_cast %31 : vector<128x16xf32> to vector<1x128x16xf32>
    %33 = vector.broadcast %32 : vector<1x128x16xf32> to vector<4x128x16xf32>
    %34 = arith.mulf %12, %33 : vector<4x128x16xf32>
    %cst_17 = arith.constant dense<0.000000e+00> : vector<4x128xf32>
    %35 = vector.multi_reduction <add>, %34, %cst_17 [2] : vector<4x128x16xf32> to vector<4x128xf32>
    %36 = vector.shape_cast %35 : vector<4x128xf32> to vector<4x128x1xf32>
    %cst_18 = arith.constant 1.000000e-30 : f32
    %37 = vector.broadcast %cst_18 : f32 to vector<4x128x1xf32>
    %38 = arith.maximumf %36, %37 : vector<4x128x1xf32>
    %39 = tpu.reciprocal %38 {approx = true} : vector<4x128x1xf32> -> vector<4x128x1xf32>
    %c1 = arith.constant 1 : index
    %40 = memref.load %arg1[%c1] : memref<2xf32, #tpu.memory_space<smem>>
    %41 = vector.broadcast %40 : f32 to vector<4x128x1xf32>
    %42 = arith.mulf %41, %39 : vector<4x128x1xf32>
    %43 = vector.broadcast %42 : vector<4x128x1xf32> to vector<4x128x16xf32>
    %44 = arith.mulf %34, %43 : vector<4x128x16xf32>
    %45 = arith.addf %29, %44 : vector<4x128x16xf32>
    %46 = arith.truncf %45 : vector<4x128x16xf32> to vector<4x128x16xbf16>
    "tpu.trace_start"() <{level = 10 : i32, message = "hls,shd->hld"}> : () -> ()
    %cst_19 = arith.constant dense<0.000000e+00> : vector<4x128x32xf32>
    %47 = tpu.matmul %46, %2, %cst_19 {dimension_numbers = #tpu.dot_dimension_numbers<[2], [0], [1], [2], [0, 0, 0, 1, 1, 2], [0], [1]>} : vector<4x128x16xbf16>, vector<16x4x32xbf16>, vector<4x128x32xf32> -> vector<4x128x32xf32>
    "tpu.trace_stop"() : () -> ()
    %48 = vector.extract_strided_slice %47 {offsets = [0, 0, 0], sizes = [1, 128, 32], strides = [1, 1, 1]} : vector<4x128x32xf32> to vector<1x128x32xf32>
    %49 = vector.shape_cast %48 : vector<1x128x32xf32> to vector<128x32xf32>
    %50 = vector.extract_strided_slice %47 {offsets = [1, 0, 0], sizes = [1, 128, 32], strides = [1, 1, 1]} : vector<4x128x32xf32> to vector<1x128x32xf32>
    %51 = vector.shape_cast %50 : vector<1x128x32xf32> to vector<128x32xf32>
    %52 = vector.extract_strided_slice %47 {offsets = [2, 0, 0], sizes = [1, 128, 32], strides = [1, 1, 1]} : vector<4x128x32xf32> to vector<1x128x32xf32>
    %53 = vector.shape_cast %52 : vector<1x128x32xf32> to vector<128x32xf32>
    %54 = vector.extract_strided_slice %47 {offsets = [3, 0, 0], sizes = [1, 128, 32], strides = [1, 1, 1]} : vector<4x128x32xf32> to vector<1x128x32xf32>
    %55 = vector.shape_cast %54 : vector<1x128x32xf32> to vector<128x32xf32>
    %56 = tpu.concatenate %49, %51, %53, %55 in 1 : vector<128x32xf32>, vector<128x32xf32>, vector<128x32xf32>, vector<128x32xf32> -> vector<128x128xf32>
    %57 = arith.truncf %56 : vector<128x128xf32> to vector<128x128xbf16>
    %c0_20 = arith.constant 0 : index
    %c0_21 = arith.constant 0 : index
    %58 = vector.load %arg6[%c0_20, %c0_21] : memref<128x128xbf16, #tpu.memory_space<vmem>>, vector<128x128xbf16>
    tpu.vector_store %arg6[%c0_20, %c0_21], %57 {strides = array<i32>} : memref<128x128xbf16, #tpu.memory_space<vmem>>, vector<128x128xbf16>,
    return
  }
  func.func @transform_0(%arg0: i32) -> i32 {
    %c0_i32 = arith.constant 0 : i32
    %c0_i32_0 = arith.constant 0 : i32
    return %c0_i32 : i32
  }
  func.func @transform_1(%arg0: i32) -> (i32, i32, i32) {
    %c0_i32 = arith.constant 0 : i32
    %c0_i32_0 = arith.constant 0 : i32
    %c0_i32_1 = arith.constant 0 : i32
    return %arg0, %c0_i32, %c0_i32_0 : i32, i32, i32
  }
  func.func @transform_2(%arg0: i32) -> (i32, i32, i32) {
    %c0_i32 = arith.constant 0 : i32
    %c0_i32_0 = arith.constant 0 : i32
    %c0_i32_1 = arith.constant 0 : i32
    %c0_i32_2 = arith.constant 0 : i32
    return %c0_i32, %c0_i32_0, %c0_i32_1 : i32, i32, i32
  }
  func.func @transform_3(%arg0: i32) -> (i32, i32, i32) {
    %c0_i32 = arith.constant 0 : i32
    %c0_i32_0 = arith.constant 0 : i32
    %c0_i32_1 = arith.constant 0 : i32
    %c0_i32_2 = arith.constant 0 : i32
    return %c0_i32, %c0_i32_0, %c0_i32_1 : i32, i32, i32
  }
  func.func @transform_4(%arg0: i32) -> (i32, i32, i32) {
    %c0_i32 = arith.constant 0 : i32
    %c0_i32_0 = arith.constant 0 : i32
    %c0_i32_1 = arith.constant 0 : i32
    return %arg0, %c0_i32, %c0_i32_0 : i32, i32, i32
  }
  func.func @transform_5(%arg0: i32) -> (i32, i32) {
    %c0_i32 = arith.constant 0 : i32
    %c0_i32_0 = arith.constant 0 : i32
    return %arg0, %c0_i32 : i32, i32
  }
}

</mosaic_0001>

<bundles_post_ra>
// kernel: tpu_custom_call.1
= control target key start
LH: loop header
LB: loop body
LE: loop exit
PB: predicated region body
PF: predicated region fallthrough
CT: control target
= control target key end

     0   :  { %10 = vsyncpa [#allocation4], 0  ;;  %s14515_s0 = inlined_call_operand.vmem [shape: f32[2], index: 0, kind: input, shape index: {}]   ;;  %s14516_s1 = inlined_call_operand.vmem [shape: bf16[128,4,32], index: 1, kind: input, shape index: {}]   ;;  %s14517_s2 = inlined_call_operand.vmem [shape: bf16[16,4,32], index: 2, kind: input, shape index: {}]   ;;  %s14518_s3 = inlined_call_operand.vmem [shape: bf16[16,4,32], index: 3, kind: input, shape index: {}]   ;;  %s14519_s4 = inlined_call_operand.vmem [shape: s8[128,2,16], index: 4, kind: input, shape index: {}]   ;;  %s14520_s5 = inlined_call_operand.hbm [shape: bf16[128,128], index: 5, kind: output, shape index: {}]  }
   0x1   :  { %11 = vsyncpa [#allocation3], 0  ;;  %s18_s20 = sshll.u32 %s14515_s0, 4  ;;  %s19_s20 = int_to_ptr.vmem [resolvable:$true] %s18_s20 }
   0x2   :  { %s9336_s21 = scalar_lea.vmem %s19_s20, 16  ;;  %p9341_p1 = scmp.lt.s32.totalorder %s19_s20, %s19_s20 }
   0x3   :  { %p9337_p0 = scmp.ne.s32.totalorder %s19_s20, %s9336_s21  ;;  %p9342_p2 = scmp.lt.s32.totalorder %s9336_s21, %s9336_s21 }
   0x5   :  { %p9343_p3 = por %p9342_p2, %p9341_p1 }
   0x7   :  { %p9344_p4 = pnand %p9343_p3, %p9337_p0 }
   0x9   :  { %9347 = shalt.err (!%p9344_p4)
}
   0xa   :  { %s9374_s22 = smov [#allocation2]  }
   0xb   :  { %21 = dma.vmem_to_smem %s19_s20, 16, %s9374_s22, [#allocation4]  }
   0xc   :  { %9370 = dma.done.wait [#allocation4], 16  }
   0xd   :  { %9371 = vsyncadd [#allocation4], 4294967280 }
   0xe   :  { %33 = sfence }
   0xf   :  { %v165_v0 = vld [vmem:[%s14517_s2 + $0x4] sm:$0x3]  ;;  %v163_v1 = vld [vmem:[%s14517_s2] sm:$0x3]  ;;  %v166_v2 = vld [vmem:[%s14517_s2 + $0x6] sm:$0x3]  ;;  %v583_v40 = vlaneseq }
  0x10   :  { %1571 = vxpose.xlu1.c.b16.start.end [1/1] (short) (narrow) %v165_v0, 32  ;;  %1539 = vxpose.xlu0.c.b16.start.end [1/1] (short) (narrow) %v163_v1, 32  ;;  %v164_v3 = vld [vmem:[%s14517_s2 + $0x2] sm:$0x3]  ;;  %v168_v4 = vld [vmem:[%s14517_s2 + $0xa] sm:$0x3] }
  0x11   :  { %v167_v5 = vld [vmem:[%s14517_s2 + $0x8] sm:$0x3]  ;;  %v170_v6 = vld [vmem:[%s14517_s2 + $0xe] sm:$0x3]  ;;  %v169_v7 = vld [vmem:[%s14517_s2 + $0xc] sm:$0x3] }
  0x12   :  { %v172_v8 = vld [vmem:[%s14517_s2 + $0x12] sm:$0x3]  ;;  %v171_v9 = vld [vmem:[%s14517_s2 + $0x10] sm:$0x3]  ;;  %v174_v10 = vld [vmem:[%s14517_s2 + $0x16] sm:$0x3] }
  0x13   :  { %v173_v11 = vld [vmem:[%s14517_s2 + $0x14] sm:$0x3]  ;;  %v176_v12 = vld [vmem:[%s14517_s2 + $0x1a] sm:$0x3]  ;;  %v175_v13 = vld [vmem:[%s14517_s2 + $0x18] sm:$0x3] }
  0x14   :  { %v178_v14 = vld [vmem:[%s14517_s2 + $0x1e] sm:$0x3]  ;;  %v177_v15 = vld [vmem:[%s14517_s2 + $0x1c] sm:$0x3]  ;;  %v9375_v41 = vmov 1983009808  }
  0x15   :  { %1587 = vxpose.xlu1.c.b16.start.end [1/1] (short) (narrow) %v166_v2, 32  ;;  %1555 = vxpose.xlu0.c.b16.start.end [1/1] (short) (narrow) %v164_v3, 32  ;;  %v1798_v42 = vunpack.c.l.s4 %v9375_v41  ;;  %v9500_v45 = vshrl.u32 %v583_v40, 7  ;;  %v9376_v47 = vmov 1934713408   ;;  %vm3347_vm0 = vcmask 261120  }
  0x16   :  { %v581_v48 = vunpack.c.l.s4 %v9376_v47  ;;  %vm4304_vm1 = vcmask 130048   ;;  %vm5329_vm2 = vcmask 1041409   ;;  %vm5331_vm3 = vcmask 1042434   ;;  %s13449_s25 = sld [smem:[#allocation2 + $0x1]]  ;;  %s9379_s15 = smov 64  }
  0x17   :  { %14857 = vst [vmem:[#allocation8_spill] sm:$0xff] %v9500_v45  ;;  %v1799_v46 = vunpack.c.0.s8 %v1798_v42  ;;  %vm5333_vm4 = vcmask 1043459   ;;  %vm5335_vm5 = vcmask 1044484   ;;  %vm5337_vm6 = vcmask 1045509   ;;  %s9380_s16 = smov 96   ;;  %s9381_s17 = smov [#allocation5]  }
  0x18   :  { %v582_v56 = vunpack.c.0.s8 %v581_v48  ;;  %vm5339_vm7 = vcmask 1046534   ;;  %vm5341_vm8 = vcmask 1047559   ;;  %vm8176_vm9 = vcmask 523264   ;;  %s8295_s18 = sshll.u32 %s9381_s17, 4  ;;  %s8296_s18 = int_to_ptr.vmem [resolvable:$true] %s8295_s18 }
  0x19   :  { %v9509_v53 = vsub.s32 %v1799_v46, %v9500_v45  ;;  %vm8193_vm10 = vcmask 785408   ;;  %s9348_s19 = scalar_lea.vmem %s8296_s18, 1024  ;;  %p9353_p6 = scmp.lt.s32.totalorder %s8296_s18, %s8296_s18 }
  0x1a   :  { %1619 = vxpose.xlu1.c.b16.start.end [1/1] (short) (narrow) %v168_v4, 32  ;;  %1603 = vxpose.xlu0.c.b16.start.end [1/1] (short) (narrow) %v167_v5, 32  ;;  %v9520_v5 = vsub.s32 %v582_v56, %v9500_v45  ;;  %v9932_v45 = vld.sshfl [vmem:[%s14516_s1 + $0x92] sm:$0x33 pattern:$0x73516240]  ;;  %p9349_p5 = scmp.ne.s32.totalorder %s8296_s18, %s9348_s19  ;;  %p9354_p7 = scmp.lt.s32.totalorder %s9348_s19, %s9348_s19 }
  0x1b   :  { %14858 = vst [vmem:[#allocation9_spill] sm:$0xff] %v9509_v53  ;;  %14893 = vst [vmem:[#allocation44_spill] sm:$0xff] %v9932_v45 }
  0x1c   :  { %14859 = vst [vmem:[#allocation10_spill] sm:$0xff] %v9520_v5  ;;  %p9355_p8 = por %p9354_p7, %p9353_p6 }
  0x1e   :  { %p9356_p9 = pnand %p9355_p8, %p9349_p5 }
  0x1f   :  { %1651 = vxpose.xlu1.c.b16.start.end [1/1] (short) (narrow) %v170_v6, 32  ;;  %1635 = vxpose.xlu0.c.b16.start.end [1/1] (short) (narrow) %v169_v7, 32 }
  0x24   :  { %1683 = vxpose.xlu1.c.b16.start.end [1/1] (short) (narrow) %v172_v8, 32  ;;  %1667 = vxpose.xlu0.c.b16.start.end [1/1] (short) (narrow) %v171_v9, 32 }
  0x29   :  { %1715 = vxpose.xlu1.c.b16.start.end [1/1] (short) (narrow) %v174_v10, 32  ;;  %1699 = vxpose.xlu0.c.b16.start.end [1/1] (short) (narrow) %v173_v11, 32 }
  0x2e   :  { %1747 = vxpose.xlu1.c.b16.start.end [1/1] (short) (narrow) %v176_v12, 32  ;;  %1731 = vxpose.xlu0.c.b16.start.end [1/1] (short) (narrow) %v175_v13, 32 }
  0x33   :  { %1779 = vxpose.xlu1.c.b16.start.end [1/1] (short) (narrow) %v178_v14, 32  ;;  %1763 = vxpose.xlu0.c.b16.start.end [1/1] (short) (narrow) %v177_v15, 32 }
  0x76   :  { %v9464_v16 = vpop.trf.xlu1  ;;  %v9466_v17 = vpop.trf.xlu0 }
  0x7a   :  { %v9468_v18 = vpop.trf.xlu1  ;;  %v9470_v19 = vpop.trf.xlu0 }
  0x7e   :  { %v1595_v20 = vpop.trf.xlu1  ;;  %v1563_v21 = vpop.trf.xlu0 }
  0x82   :  { %v9472_v22 = vpop.trf.xlu1  ;;  %v9474_v23 = vpop.trf.xlu0 }
  0x86   :  { %v1627_v24 = vpop.trf.xlu1  ;;  %v9476_v25 = vpop.trf.xlu0 }
  0x87   :  { %v1931_v54 = vcombine.low %v1563_v21, %v1627_v24  ;;  %v1795_v55 = vcombine.low %v9466_v17, %v9476_v25  ;;  %v1932_v57 = vcombine.high %v1563_v21, %v1627_v24  ;;  %v1796_v7 = vcombine.high %v9466_v17, %v9476_v25 }
  0x89   :  { %v1939_v3 = vrot.slane %v1931_v54, %v9509_v53  ;;  %v1803_v4 = vrot.slane %v1795_v55, %v9509_v53  ;;  %v9523_v6 = vrot.slane %v1932_v57, %v9509_v53 }
  0x8a   :  { %v9478_v26 = vpop.trf.xlu1  ;;  %v9480_v27 = vpop.trf.xlu0 }
  0x8e   :  { %v1659_v28 = vpop.trf.xlu1  ;;  %v9482_v29 = vpop.trf.xlu0 }
  0x8f   :  { %v1947_v49 = vcombine.low %v1595_v20, %v1659_v28  ;;  %v1811_v50 = vcombine.low %v9464_v16, %v9482_v29  ;;  %v1948_v0 = vcombine.high %v1595_v20, %v1659_v28  ;;  %v1812_v15 = vcombine.high %v9464_v16, %v9482_v29 }
  0x91   :  { %v1955_v58 = vrot.slane %v1947_v49, %v9509_v53  ;;  %v1819_v59 = vrot.slane %v1811_v50, %v9509_v53  ;;  %v9532_v14 = vrot.slane %v1948_v0, %v9509_v53  ;;  %v9551_v54 = vrot.slane %v1812_v15, %v9509_v53 }
  0x92   :  { %v9484_v30 = vpop.trf.xlu1  ;;  %v9486_v31 = vpop.trf.xlu0 }
  0x93   :  { %v1859_v12 = vcombine.low %v1803_v4, %v1819_v59  ;;  %v1995_v13 = vcombine.low %v1939_v3, %v1955_v58  ;;  %v1860_v42 = vcombine.high %v1803_v4, %v1819_v59  ;;  %v1996_v46 = vcombine.high %v1939_v3, %v1955_v58 }
  0x95   :  { %v1867_v47 = vrot.slane %v1859_v12, %v9520_v5  ;;  %v2003_v49 = vrot.slane %v1995_v13, %v9520_v5  ;;  %v1874_v57 = vrot.slane %v1860_v42, %v9520_v5 }
  0x96   :  { %v9488_v32 = vpop.trf.xlu1  ;;  %v9490_v33 = vpop.trf.xlu0 }
  0x9a   :  { %v9492_v34 = vpop.trf.xlu1  ;;  %v9494_v35 = vpop.trf.xlu0 }
  0x9e   :  { %v1723_v36 = vpop.trf.xlu1  ;;  %v1707_v37 = vpop.trf.xlu0 }
  0xa2   :  { %v9496_v38 = vpop.trf.xlu1  ;;  %v9498_v39 = vpop.trf.xlu0 }
  0xa6   :  { %v1755_v43 = vpop.trf.xlu1  ;;  %v1739_v44 = vpop.trf.xlu0 }
  0xa7   :  { %v1963_v60 = vcombine.low %v9488_v32, %v1755_v43  ;;  %v1827_v61 = vcombine.low %v9490_v33, %v1739_v44  ;;  %v1964_v40 = vcombine.high %v9488_v32, %v1755_v43  ;;  %v1828_v41 = vcombine.high %v9490_v33, %v1739_v44 }
  0xa9   :  { %v1971_v10 = vrot.slane %v1963_v60, %v9509_v53  ;;  %v1835_v11 = vrot.slane %v1827_v61, %v9509_v53  ;;  %v1978_v55 = vrot.slane %v1964_v40, %v9509_v53  ;;  %v1842_v56 = vrot.slane %v1828_v41, %v9509_v53 }
  0xaa   :  { %v9504_v51 = vpop.trf.xlu1  ;;  %v9506_v52 = vpop.trf.xlu0  ;;  %v2010_v61 = vrot.slane %v1996_v46, %v9520_v5 }
  0xae   :  { %v1787_v62 = vpop.trf.xlu1  ;;  %v1771_v63 = vpop.trf.xlu0 }
  0xaf   :  { %v1979_v1 = vcombine.low %v1723_v36, %v1787_v62  ;;  %v1843_v2 = vcombine.low %v1707_v37, %v1771_v63  ;;  %v1980_v20 = vcombine.high %v1723_v36, %v1787_v62  ;;  %v1844_v21 = vcombine.high %v1707_v37, %v1771_v63 }
  0xb0   :  { %v1810_v62 = vrot.slane %v1796_v7, %v9509_v53 }
  0xb1   :  { %v1987_v8 = vrot.slane %v1979_v1, %v9509_v53  ;;  %v1851_v9 = vrot.slane %v1843_v2, %v9509_v53  ;;  %v9543_v29 = vrot.slane %v1980_v20, %v9509_v53  ;;  %v9546_v36 = vrot.slane %v1844_v21, %v9509_v53 }
  0xb2   :  { %v9563_v12 = vpop.trf.xlu1  ;;  %v9565_v7 = vpop.trf.xlu0 }
  0xb3   :  { %v1891_v24 = vcombine.low %v1835_v11, %v1851_v9  ;;  %v2027_v17 = vcombine.low %v1971_v10, %v1987_v8  ;;  %v1892_v25 = vcombine.high %v1835_v11, %v1851_v9  ;;  %v2028_v28 = vcombine.high %v1971_v10, %v1987_v8 }
  0xb4   :  { %v1907_v0 = vcombine.low %v1842_v56, %v9546_v36  ;;  %v2043_v1 = vcombine.low %v1978_v55, %v9543_v29  ;;  %v1875_v9 = vcombine.low %v1810_v62, %v9551_v54  ;;  %v2011_v11 = vcombine.low %v9523_v6, %v9532_v14 }
  0xb5   :  { %v1899_v48 = vrot.slane %v1891_v24, %v9520_v5  ;;  %v2035_v16 = vrot.slane %v2027_v17, %v9520_v5  ;;  %v1906_v32 = vrot.slane %v1892_v25, %v9520_v5  ;;  %v2042_v33 = vrot.slane %v2028_v28, %v9520_v5 }
  0xb6   :  { %v1915_v17 = vrot.slane %v1907_v0, %v9520_v5  ;;  %v2051_v25 = vrot.slane %v2043_v1, %v9520_v5  ;;  %v2203_v28 = vcombine.low %v9474_v23, %v9478_v26  ;;  %v1883_v40 = vrot.slane %v1875_v9, %v9520_v5 }
  0xb7   :  { %v1923_v37 = vcombine.low %v1867_v47, %v1899_v48  ;;  %v2059_v43 = vcombine.low %v2003_v49, %v2035_v16  ;;  %v1924_v44 = vcombine.high %v1867_v47, %v1899_v48  ;;  %v2060_v50 = vcombine.high %v2003_v49, %v2035_v16 }
  0xb8   :  { %v1925_v63 = vcombine.low %v1874_v57, %v1906_v32  ;;  %v2061_v8 = vcombine.low %v2010_v61, %v2042_v33  ;;  %v1926_v15 = vcombine.high %v1874_v57, %v1906_v32  ;;  %v2062_v20 = vcombine.high %v2010_v61, %v2042_v33 }
  0xb9   :  { %v2341_v58 = vpack.i.b16 %v2059_v43, %v1923_v37  ;;  %v2343_v59 = vshrl.u32 %v1923_v37, 16  ;;  %v2344_v60 = vshrl.u32 %v2059_v43, 16  ;;  %v2351_v3 = vshrl.u32 %v1924_v44, 16 }
  0xba   :  { %v2352_v4 = vshrl.u32 %v2060_v50, 16  ;;  %v2349_v10 = vpack.i.b16 %v2060_v50, %v1924_v44  ;;  %v2359_v13 = vshrl.u32 %v1925_v63, 16  ;;  %v2360_v24 = vshrl.u32 %v2061_v8, 16 }
  0xbb   :  { %2467 = vxpose.xlu0.c.b16.start.end [1/1] (short) (narrow) %v2341_v58, 16  ;;  %v2345_v2 = vpack.i.b16 %v2344_v60, %v2343_v59  ;;  %v2251_v41 = vcombine.low %v9496_v38, %v9563_v12  ;;  %v2115_v42 = vcombine.low %v9498_v39, %v9565_v7  ;;  %v2357_v46 = vpack.i.b16 %v2061_v8, %v1925_v63 }
  0xbc   :  { %v2353_v21 = vpack.i.b16 %v2352_v4, %v2351_v3  ;;  %v2019_v47 = vrot.slane %v2011_v11, %v9520_v5  ;;  %v2367_v48 = vshrl.u32 %v1926_v15, 16  ;;  %v2368_v49 = vshrl.u32 %v2062_v20, 16 }
  0xbd   :  { %2483 = vxpose.xlu1.c.b16.start.end [1/1] (short) (narrow) %v2345_v2, 16  ;;  %v1908_v16 = vcombine.high %v1842_v56, %v9546_v36  ;;  %v2044_v32 = vcombine.high %v1978_v55, %v9543_v29  ;;  %v2067_v33 = vcombine.low %v9470_v19, %v9480_v27  ;;  %v2361_v37 = vpack.i.b16 %v2360_v24, %v2359_v13 }
  0xbe   :  { %v1927_v43 = vcombine.low %v1883_v40, %v1915_v17  ;;  %v2063_v44 = vcombine.low %v2019_v47, %v2051_v25  ;;  %v2219_v50 = vcombine.low %v9472_v22, %v9484_v30  ;;  %v2099_v57 = vcombine.low %v9494_v35, %v9506_v52 }
  0xbf   :  { %2499 = vxpose.xlu0.c.b16.start.end [1/1] (short) (narrow) %v2349_v10, 16  ;;  %v1876_v58 = vcombine.high %v1810_v62, %v9551_v54  ;;  %v2012_v36 = vcombine.high %v9523_v6, %v9532_v14  ;;  %v2083_v29 = vcombine.low %v9468_v18, %v9486_v31  ;;  %v2235_v55 = vcombine.low %v9492_v34, %v9504_v51 }
  0xc0   :  { %v9593_v56 = vrot.slane %v2251_v41, %v9509_v53  ;;  %v2365_v59 = vpack.i.b16 %v2062_v20, %v1926_v15  ;;  %v9596_v60 = vrot.slane %v2115_v42, %v9509_v53  ;;  %v2369_v61 = vpack.i.b16 %v2368_v49, %v2367_v48 }
  0xc1   :  { %2515 = vxpose.xlu1.c.b16.start.end [1/1] (short) (narrow) %v2353_v21, 16  ;;  %v1922_v54 = vrot.slane %v1908_v16, %v9520_v5  ;;  %v2058_v62 = vrot.slane %v2044_v32, %v9520_v5  ;;  %v2375_v6 = vshrl.u32 %v1927_v43, 16  ;;  %v2376_v14 = vshrl.u32 %v2063_v44, 16 }
  0xc2   :  { %v1928_v63 = vcombine.high %v1883_v40, %v1915_v17  ;;  %v2064_v0 = vcombine.high %v2019_v47, %v2051_v25  ;;  %v9601_v1 = vrot.slane %v2203_v28, %v9509_v53  ;;  %v2107_v2 = vrot.slane %v2099_v57, %v9509_v53 }
  0xc3   :  { %2531 = vxpose.xlu0.c.b16.start.end [1/1] (short) (narrow) %v2357_v46, 16  ;;  %v1890_v3 = vrot.slane %v1876_v58, %v9520_v5  ;;  %v2026_v4 = vrot.slane %v2012_v36, %v9520_v5  ;;  %v9607_v8 = vrot.slane %v2219_v50, %v9509_v53  ;;  %v9610_v9 = vrot.slane %v2083_v29, %v9509_v53 }
  0xc4   :  { %v2243_v10 = vrot.slane %v2235_v55, %v9509_v53  ;;  %v2373_v11 = vpack.i.b16 %v2063_v44, %v1927_v43  ;;  %v2075_v13 = vrot.slane %v2067_v33, %v9509_v53  ;;  %v2163_v21 = vcombine.low %v2107_v2, %v9596_v60 }
  0xc5   :  { %2547 = vxpose.xlu1.c.b16.start.end [1/1] (short) (narrow) %v2361_v37, 16  ;;  %v1929_v15 = vcombine.low %v1890_v3, %v1922_v54  ;;  %v2065_v20 = vcombine.low %v2026_v4, %v2058_v62  ;;  %v2377_v24 = vpack.i.b16 %v2376_v14, %v2375_v6  ;;  %v2383_v17 = vshrl.u32 %v1928_v63, 16 }
  0xc6   :  { %v2384_v25 = vshrl.u32 %v2064_v0, 16  ;;  %v2299_v28 = vcombine.low %v2243_v10, %v9593_v56  ;;  %v2381_v40 = vpack.i.b16 %v2064_v0, %v1928_v63  ;;  %v2131_v41 = vcombine.low %v2075_v13, %v9610_v9 }
  0xc7   :  { %2563 = vxpose.xlu0.c.b16.start.end [1/1] (short) (narrow) %v2365_v59, 16  ;;  %v2267_v42 = vcombine.low %v9601_v1, %v9607_v8  ;;  %v2391_v46 = vshrl.u32 %v1929_v15, 16  ;;  %v1930_v47 = vcombine.high %v1890_v3, %v1922_v54  ;;  %v2066_v48 = vcombine.high %v2026_v4, %v2058_v62 }
  0xc8   :  { %v2385_v49 = vpack.i.b16 %v2384_v25, %v2383_v17  ;;  %v2392_v16 = vshrl.u32 %v2065_v20, 16  ;;  %v2171_v32 = vrot.slane %v2163_v21, %v9520_v5  ;;  %v2307_v33 = vrot.slane %v2299_v28, %v9520_v5 }
  0xc9   :  { %2579 = vxpose.xlu1.c.b16.start.end [1/1] (short) (narrow) %v2369_v61, 16  ;;  %v2204_v37 = vcombine.high %v9474_v23, %v9478_v26  ;;  %v2068_v43 = vcombine.high %v9470_v19, %v9480_v27  ;;  %v2252_v44 = vcombine.high %v9496_v38, %v9563_v12  ;;  %v2389_v50 = vpack.i.b16 %v2065_v20, %v1929_v15 }
  0xca   :  { %v2139_v57 = vrot.slane %v2131_v41, %v9520_v5  ;;  %v2275_v58 = vrot.slane %v2267_v42, %v9520_v5  ;;  %v2116_v36 = vcombine.high %v9498_v39, %v9565_v7  ;;  %v2399_v29 = vshrl.u32 %v1930_v47, 16 }
  0xcb   :  { %2595 = vxpose.xlu0.c.b16.start.end [1/1] (short) (narrow) %v2373_v11, 16  ;;  %v2400_v55 = vshrl.u32 %v2066_v48, 16  ;;  %v2164_v59 = vcombine.high %v2107_v2, %v9596_v60  ;;  %v2393_v23 = vpack.i.b16 %v2392_v16, %v2391_v46  ;;  %v2300_v27 = vcombine.high %v2243_v10, %v9593_v56 }
  0xcc   :  { %v2195_v26 = vcombine.low %v2139_v57, %v2171_v32  ;;  %v2331_v19 = vcombine.low %v2275_v58, %v2307_v33  ;;  %v2220_v38 = vcombine.high %v9472_v22, %v9484_v30  ;;  %v2236_v12 = vcombine.high %v9492_v34, %v9504_v51 }
  0xcd   :  { %2611 = vxpose.xlu1.c.b16.start.end [1/1] (short) (narrow) %v2377_v24, 16  ;;  %v2100_v61 = vcombine.high %v9494_v35, %v9506_v52  ;;  %v2132_v39 = vcombine.high %v2075_v13, %v9610_v9  ;;  %v2084_v7 = vcombine.high %v9468_v18, %v9486_v31  ;;  %v9643_v60 = vrot.slane %v2252_v44, %v9509_v53 }
  0xce   :  { %v2397_v54 = vpack.i.b16 %v2066_v48, %v1930_v47  ;;  %v2268_v56 = vcombine.high %v9601_v1, %v9607_v8  ;;  %v2130_v22 = vrot.slane %v2116_v36, %v9509_v53  ;;  %v2401_v30 = vpack.i.b16 %v2400_v55, %v2399_v29 }
  0xcf   :  { %2627 = vxpose.xlu0.c.b16.start.end [1/1] (short) (narrow) %v2381_v40, 16  ;;  %v2196_v34 = vcombine.high %v2139_v57, %v2171_v32  ;;  %v2178_v51 = vrot.slane %v2164_v59, %v9520_v5  ;;  %v2407_v35 = vshrl.u32 %v2195_v26, 16  ;;  %v2408_v52 = vshrl.u32 %v2331_v19, 16 }
  0xd0   :  { %v2332_v62 = vcombine.high %v2275_v58, %v2307_v33  ;;  %v2314_v18 = vrot.slane %v2300_v27, %v9520_v5  ;;  %v2218_v31 = vrot.slane %v2204_v37, %v9509_v53  ;;  %v2250_v6 = vrot.slane %v2236_v12, %v9509_v53 }
  0xd1   :  { %2643 = vxpose.xlu1.c.b16.start.end [1/1] (short) (narrow) %v2385_v49, 16  ;;  %v2114_v14 = vrot.slane %v2100_v61, %v9509_v53  ;;  %v2146_v63 = vrot.slane %v2132_v39, %v9520_v5  ;;  %v2234_v0 = vrot.slane %v2220_v38, %v9509_v53  ;;  %v2098_v1 = vrot.slane %v2084_v7, %v9509_v53 }
  0xd2   :  { %v2405_v2 = vpack.i.b16 %v2331_v19, %v2195_v26  ;;  %v2282_v3 = vrot.slane %v2268_v56, %v9520_v5  ;;  %v2082_v4 = vrot.slane %v2068_v43, %v9509_v53  ;;  %v2315_v10 = vcombine.low %v2250_v6, %v9643_v60 }
  0xd3   :  { %2659 = vxpose.xlu0.c.b16.start.end [1/1] (short) (narrow) %v2389_v50, 16  ;;  %v2197_v8 = vcombine.low %v2146_v63, %v2178_v51  ;;  %v2179_v9 = vcombine.low %v2114_v14, %v2130_v22  ;;  %v2409_v11 = vpack.i.b16 %v2408_v52, %v2407_v35  ;;  %v2415_v13 = vshrl.u32 %v2196_v34, 16  ;;  %v9676_v35 = vld.sshfl [vmem:[%s14516_s1 + $0x2] sm:$0x33 pattern:$0x73516240] }
  0xd4   :  { %v2416_v15 = vshrl.u32 %v2332_v62, 16  ;;  %v2333_v20 = vcombine.low %v2282_v3, %v2314_v18  ;;  %v2413_v21 = vpack.i.b16 %v2332_v62, %v2196_v34  ;;  %v2147_v24 = vcombine.low %v2082_v4, %v2098_v1  ;;  %v9681_v52 = vld.sshfl [vmem:[%s14516_s1 + $0x8] sm:$0x33 pattern:$0x73516240] }
  0xd5   :  { %2675 = vxpose.xlu1.c.b16.start.end [1/1] (short) (narrow) %v2393_v23, 16  ;;  %v2283_v17 = vcombine.low %v2218_v31, %v2234_v0  ;;  %v2423_v25 = vshrl.u32 %v2197_v8, 16  ;;  %v2198_v28 = vcombine.high %v2146_v63, %v2178_v51  ;;  %v2334_v40 = vcombine.high %v2282_v3, %v2314_v18  ;;  %v9671_v51 = vld.sshfl [vmem:[%s14516_s1] sm:$0x33 pattern:$0x73516240] }
  0xd6   :  { %v2417_v41 = vpack.i.b16 %v2416_v15, %v2415_v13  ;;  %v2424_v42 = vshrl.u32 %v2333_v20, 16  ;;  %v2187_v46 = vrot.slane %v2179_v9, %v9520_v5  ;;  %v2323_v47 = vrot.slane %v2315_v10, %v9520_v5  ;;  %v9691_v63 = vld.sshfl [vmem:[%s14516_s1 + $0x10] sm:$0x33 pattern:$0x73516240] }
  0xd7   :  { %2691 = vxpose.xlu0.c.b16.start.end [1/1] (short) (narrow) %v2397_v54, 16  ;;  %v2421_v48 = vpack.i.b16 %v2333_v20, %v2197_v8  ;;  %v2155_v49 = vrot.slane %v2147_v24, %v9520_v5  ;;  %v2291_v16 = vrot.slane %v2283_v17, %v9520_v5  ;;  %v2180_v32 = vcombine.high %v2114_v14, %v2130_v22  ;;  %v9686_v14 = vld.sshfl [vmem:[%s14516_s1 + $0xa] sm:$0x33 pattern:$0x73516240] }
  0xd8   :  { %v2431_v33 = vshrl.u32 %v2198_v28, 16  ;;  %v2432_v37 = vshrl.u32 %v2334_v40, 16  ;;  %v2148_v43 = vcombine.high %v2082_v4, %v2098_v1  ;;  %v2425_v44 = vpack.i.b16 %v2424_v42, %v2423_v25  ;;  %v9701_v1 = vld.sshfl [vmem:[%s14516_s1 + $0x18] sm:$0x33 pattern:$0x73516240] }
  0xd9   :  { %2707 = vxpose.xlu1.c.b16.start.end [1/1] (short) (narrow) %v2401_v30, 16  ;;  %v2199_v50 = vcombine.low %v2155_v49, %v2187_v46  ;;  %v2335_v57 = vcombine.low %v2291_v16, %v2323_v47  ;;  %v2316_v58 = vcombine.high %v2250_v6, %v9643_v60  ;;  %v2429_v36 = vpack.i.b16 %v2334_v40, %v2198_v28 }
  0xda   :  { %v2194_v29 = vrot.slane %v2180_v32, %v9520_v5  ;;  %v2284_v55 = vcombine.high %v2218_v31, %v2234_v0  ;;  %v2433_v59 = vpack.i.b16 %v2432_v37, %v2431_v33  ;;  %v2200_v23 = vcombine.high %v2155_v49, %v2187_v46  ;;  %v9696_v0 = vld.sshfl [vmem:[%s14516_s1 + $0x12] sm:$0x33 pattern:$0x73516240]  ;;  %14860 = vst [vmem:[#allocation11_spill] sm:$0xff] %v9701_v1 }
  0xdb   :  { %2723 = vxpose.xlu0.c.b16.start.end [1/1] (short) (narrow) %v2405_v2, 16  ;;  %v2162_v26 = vrot.slane %v2148_v43, %v9520_v5  ;;  %v2439_v19 = vshrl.u32 %v2199_v50, 16  ;;  %v2440_v27 = vshrl.u32 %v2335_v57, 16  ;;  %v2336_v38 = vcombine.high %v2291_v16, %v2323_v47 }
  0xdc   :  { %v2330_v12 = vrot.slane %v2316_v58, %v9520_v5  ;;  %v2437_v61 = vpack.i.b16 %v2335_v57, %v2199_v50  ;;  %v2298_v7 = vrot.slane %v2284_v55, %v9520_v5  ;;  %v2447_v54 = vshrl.u32 %v2200_v23, 16  ;;  %v9706_v2 = vld.sshfl [vmem:[%s14516_s1 + $0x1a] sm:$0x33 pattern:$0x73516240] }
  0xdd   :  { %2739 = vxpose.xlu1.c.b16.start.end [1/1] (short) (narrow) %v2409_v11, 16  ;;  %v2201_v39 = vcombine.low %v2162_v26, %v2194_v29  ;;  %v2441_v60 = vpack.i.b16 %v2440_v27, %v2439_v19  ;;  %v2448_v56 = vshrl.u32 %v2336_v38, 16  ;;  %v2445_v30 = vpack.i.b16 %v2336_v38, %v2200_v23  ;;  %14861 = vst [vmem:[#allocation12_spill] sm:$0xff] %v9706_v2 }
  0xde   :  { %v2337_v22 = vcombine.low %v2298_v7, %v2330_v12  ;;  %v2202_v31 = vcombine.high %v2162_v26, %v2194_v29  ;;  %v2338_v6 = vcombine.high %v2298_v7, %v2330_v12  ;;  %v1157_v4 = vpack.i.b16 %v9676_v35, %v9671_v51  ;;  %v9272_v55 = vld.sshfl [vmem:[%s14516_s1 + $0x20] sm:$0x33 pattern:$0x73516240] }
  0xdf   :  { %2755 = vxpose.xlu0.c.b16.start.end [1/1] (short) (narrow) %v2413_v21, 16  ;;  %v2455_v34 = vshrl.u32 %v2201_v39, 16  ;;  %v2449_v62 = vpack.i.b16 %v2448_v56, %v2447_v54  ;;  %v1169_v11 = vpack.i.b16 %v9686_v14, %v9681_v52  ;;  %v1181_v13 = vpack.i.b16 %v9696_v0, %v9691_v63  ;;  %v9274_v23 = vld.sshfl [vmem:[%s14516_s1 + $0x28] sm:$0x33 pattern:$0x73516240] }
  0xe0   :  { %v2456_v18 = vshrl.u32 %v2337_v22, 16  ;;  %v2453_v3 = vpack.i.b16 %v2337_v22, %v2201_v39  ;;  %v2463_v9 = vshrl.u32 %v2202_v31, 16  ;;  %v2464_v10 = vshrl.u32 %v2338_v6, 16 }
  0xe1   :  { %2771 = vxpose.xlu1.c.b16.start.end [1/1] (short) (narrow) %v2417_v41, 16  ;;  %v1193_v15 = vpack.i.b16 %v9706_v2, %v9701_v1  ;;  %v2461_v20 = vpack.i.b16 %v2338_v6, %v2202_v31  ;;  %v3211_v21 = vcombine.low %v1157_v4, %v1169_v11  ;;  %v1158_v41 = vshrl.u32 %v9671_v51, 16  ;;  %v9275_v26 = vld.sshfl [vmem:[%s14516_s1 + $0x2a] sm:$0x33 pattern:$0x73516240] }
  0xe2   :  { %v2457_v8 = vpack.i.b16 %v2456_v18, %v2455_v34  ;;  %v2465_v17 = vpack.i.b16 %v2464_v10, %v2463_v9  ;;  %v1159_v42 = vshrl.u32 %v9676_v35, 16  ;;  %v1170_v46 = vshrl.u32 %v9681_v52, 16  ;;  %v9276_v19 = vld.sshfl [vmem:[%s14516_s1 + $0x30] sm:$0x33 pattern:$0x73516240] }
  0xe3   :  { %2787 = vxpose.xlu0.c.b16.start.end [1/1] (short) (narrow) %v2421_v48, 16  ;;  %v3212_v24 = vcombine.low %v1181_v13, %v1193_v15  ;;  %v3219_v25 = vrot.slane %v3211_v21, %v9509_v53  ;;  %v1171_v47 = vshrl.u32 %v9686_v14, 16  ;;  %v1182_v48 = vshrl.u32 %v9691_v63, 16 }
  0xe4   :  { %v1183_v49 = vshrl.u32 %v9696_v0, 16  ;;  %v1160_v16 = vpack.i.b16 %v1159_v42, %v1158_v41  ;;  %v1194_v32 = vshrl.u32 %v9701_v1, 16  ;;  %v1195_v33 = vshrl.u32 %v9706_v2, 16 }
  0xe5   :  { %2803 = vxpose.xlu1.c.b16.start.end [1/1] (short) (narrow) %v2425_v44, 16  ;;  %v3226_v28 = vrot.slane %v3212_v24, %v9509_v53  ;;  %v1172_v37 = vpack.i.b16 %v1171_v47, %v1170_v46  ;;  %v9277_v27 = vld.sshfl [vmem:[%s14516_s1 + $0x32] sm:$0x33 pattern:$0x73516240]  ;;  %v1206_v6 = vshrl.u32 %v9272_v55, 16 }
  0xe6   :  { %v1184_v43 = vpack.i.b16 %v1183_v49, %v1182_v48  ;;  %v1196_v44 = vpack.i.b16 %v1195_v33, %v1194_v32  ;;  %v9278_v38 = vld.sshfl [vmem:[%s14516_s1 + $0x38] sm:$0x33 pattern:$0x73516240]  ;;  %v1218_v10 = vshrl.u32 %v9274_v23, 16  ;;  %v1219_v11 = vshrl.u32 %v9275_v26, 16 }
  0xe7   :  { %2819 = vxpose.xlu0.c.b16.start.end [1/1] (short) (narrow) %v2429_v36, 16  ;;  %v3227_v40 = vcombine.low %v3219_v25, %v3226_v28  ;;  %v3469_v50 = vcombine.low %v1160_v16, %v1172_v37  ;;  %v9279_v12 = vld.sshfl [vmem:[%s14516_s1 + $0x3a] sm:$0x33 pattern:$0x73516240]  ;;  %v1230_v13 = vshrl.u32 %v9276_v19, 16  ;;  %v1217_v16 = vpack.i.b16 %v9275_v26, %v9274_v23 }
  0xe8   :  { %v3470_v57 = vcombine.low %v1184_v43, %v1196_v44  ;;  %v9784_v4 = vld.sshfl [vmem:[%s14516_s1 + $0x42] sm:$0x33 pattern:$0x73516240]  ;;  %v1231_v15 = vshrl.u32 %v9277_v27, 16  ;;  %v1242_v24 = vshrl.u32 %v9278_v38, 16  ;;  %v1229_v32 = vpack.i.b16 %v9277_v27, %v9276_v19 }
  0xe9   :  { %2835 = vxpose.xlu1.c.b16.start.end [1/1] (short) (narrow) %v2433_v59, 16  ;;  %8531 = vmatprep.mubr.msk.bf16.mxu0 %vm3347_vm0, %v3227_v40  ;;  %v3477_v58 = vrot.slane %v3469_v50, %v9509_v53  ;;  %v9273_v59 = vld.sshfl [vmem:[%s14516_s1 + $0x22] sm:$0x33 pattern:$0x73516240]  ;;  %14869 = vst [vmem:[#allocation20_spill] sm:$0xff] %v9784_v4  ;;  %v1241_v33 = vpack.i.b16 %v9279_v12, %v9278_v38 }
  0xea   :  { %v3484_v36 = vrot.slane %v3470_v57, %v9509_v53  ;;  %v9794_v9 = vld.sshfl [vmem:[%s14516_s1 + $0x4a] sm:$0x33 pattern:$0x73516240]  ;;  %v1205_v41 = vpack.i.b16 %v9273_v59, %v9272_v55  ;;  %v1220_v57 = vpack.i.b16 %v1219_v11, %v1218_v10 }
  0xeb   :  { %2851 = vxpose.xlu0.c.b16.start.end [1/1] (short) (narrow) %v2437_v61, 16  ;;  %v14521_v61 = vmov 0   ;;  %14871 = vst [vmem:[#allocation22_spill] sm:$0xff] %v9794_v9 }
  0xec   :  { %v3485_v29 = vcombine.low %v3477_v58, %v3484_v36  ;;  %v9755_v39 = vcombine.high %v9272_v55, %v14521_v61  ;;  %v9758_v7 = vcombine.high %v9273_v59, %v14521_v61  ;;  %v9764_v54 = vcombine.high %v9275_v26, %v14521_v61  ;;  %v9804_v21 = vld.sshfl [vmem:[%s14516_s1 + $0x52] sm:$0x33 pattern:$0x73516240] }
  0xed   :  { %2867 = vxpose.xlu1.c.b16.start.end [1/1] (short) (narrow) %v2441_v60, 16  ;;  %v9761_v60 = vcombine.high %v9274_v23, %v14521_v61  ;;  %v9767_v56 = vcombine.high %v9276_v19, %v14521_v61  ;;  %v9770_v22 = vcombine.high %v9277_v27, %v14521_v61  ;;  %14873 = vst [vmem:[#allocation24_spill] sm:$0xff] %v9804_v21  ;;  %v9809_v25 = vld.sshfl [vmem:[%s14516_s1 + $0x58] sm:$0x33 pattern:$0x73516240] }
  0xee   :  { %8551 = vmatprep.mubr.msk.bf16.mxu1 %vm3347_vm0, %v3485_v29  ;;  %14862 = vst [vmem:[#allocation13_spill] sm:$0xff] %v9755_v39  ;;  %14863 = vst [vmem:[#allocation14_spill] sm:$0xff] %v9758_v7  ;;  %v9814_v28 = vld.sshfl [vmem:[%s14516_s1 + $0x5a] sm:$0x33 pattern:$0x73516240]  ;;  %v9817_v40 = vcombine.high %v9278_v38, %v14521_v61  ;;  %v9832_v49 = vcombine.high %v9279_v12, %v14521_v61  ;;  %v1232_v58 = vpack.i.b16 %v1231_v15, %v1230_v13 }
  0xef   :  { %2883 = vxpose.xlu0.c.b16.start.end [1/1] (short) (narrow) %v2445_v30, 16  ;;  %14864 = vst [vmem:[#allocation15_spill] sm:$0xff] %v9761_v60  ;;  %14865 = vst [vmem:[#allocation16_spill] sm:$0xff] %v9764_v54  ;;  %v9866_v19 = vcombine.low %v1205_v41, %v1217_v16  ;;  %v9868_v27 = vcombine.low %v1229_v32, %v1241_v33  ;;  %v1289_v11 = vpack.i.b16 %v9814_v28, %v9809_v25 }
  0xf0   :  { %14866 = vst [vmem:[#allocation17_spill] sm:$0xff] %v9767_v56  ;;  %14867 = vst [vmem:[#allocation18_spill] sm:$0xff] %v9770_v22  ;;  %v9824_v47 = vld.sshfl [vmem:[%s14516_s1 + $0x60] sm:$0x33 pattern:$0x73516240] }
  0xf1   :  { %2899 = vxpose.xlu1.c.b16.start.end [1/1] (short) (narrow) %v2449_v62, 16  ;;  %v9777_v62 = vld.sshfl [vmem:[%s14516_s1 + $0x40] sm:$0x33 pattern:$0x73516240]  ;;  %14874 = vst [vmem:[#allocation25_spill] sm:$0xff] %v9809_v25  ;;  %v3236_v31 = vrot.slane %v9866_v19, %v9509_v53  ;;  %v3243_v18 = vrot.slane %v9868_v27, %v9509_v53 }
  0xf2   :  { %14868 = vst [vmem:[#allocation19_spill] sm:$0xff] %v9777_v62  ;;  %14875 = vst [vmem:[#allocation26_spill] sm:$0xff] %v9814_v28  ;;  %v9829_v48 = vld.sshfl [vmem:[%s14516_s1 + $0x62] sm:$0x33 pattern:$0x73516240] }
  0xf3   :  { %2915 = vxpose.xlu0.c.b16.start.end [1/1] (short) (narrow) %v2453_v3, 16  ;;  %v1207_v3 = vshrl.u32 %v9273_v59, 16  ;;  %14876 = vst [vmem:[#allocation27_spill] sm:$0xff] %v9817_v40  ;;  %14877 = vst [vmem:[#allocation28_spill] sm:$0xff] %v9824_v47  ;;  %v1301_v13 = vpack.i.b16 %v9829_v48, %v9824_v47  ;;  %v1254_v41 = vshrl.u32 %v9777_v62, 16  ;;  %v1255_v16 = vshrl.u32 %v9784_v4, 16 }
  0xf4   :  { %14878 = vst [vmem:[#allocation29_spill] sm:$0xff] %v9829_v48  ;;  %14879 = vst [vmem:[#allocation30_spill] sm:$0xff] %v9832_v49  ;;  %v9837_v37 = vld.sshfl [vmem:[%s14516_s1 + $0x68] sm:$0x33 pattern:$0x73516240]  ;;  %v10020_v54 = vcombine.low %v3236_v31, %v3243_v18 }
  0xf5   :  { %2931 = vxpose.xlu1.c.b16.start.end [1/1] (short) (narrow) %v2457_v8, 16  ;;  %v9789_v8 = vld.sshfl [vmem:[%s14516_s1 + $0x48] sm:$0x33 pattern:$0x73516240]  ;;  %14880 = vst [vmem:[#allocation31_spill] sm:$0xff] %v9837_v37  ;;  %v1208_v50 = vpack.i.b16 %v1207_v3, %v1206_v6  ;;  %v1253_v6 = vpack.i.b16 %v9784_v4, %v9777_v62 }
  0xf6   :  { %14870 = vst [vmem:[#allocation21_spill] sm:$0xff] %v9789_v8  ;;  %v9842_v43 = vld.sshfl [vmem:[%s14516_s1 + $0x6a] sm:$0x33 pattern:$0x73516240]  ;;  %v1265_v3 = vpack.i.b16 %v9794_v9, %v9789_v8  ;;  %v1266_v32 = vshrl.u32 %v9789_v8, 16 }
  0xf7   :  { %2947 = vxpose.xlu0.c.b16.start.end [1/1] (short) (narrow) %v2461_v20, 16  ;;  %v9799_v20 = vld.sshfl [vmem:[%s14516_s1 + $0x50] sm:$0x33 pattern:$0x73516240]  ;;  %14881 = vst [vmem:[#allocation32_spill] sm:$0xff] %v9842_v43  ;;  %v3486_v38 = vcombine.low %v1208_v50, %v1220_v57  ;;  %v1313_v15 = vpack.i.b16 %v9842_v43, %v9837_v37 }
  0xf8   :  { %14872 = vst [vmem:[#allocation23_spill] sm:$0xff] %v9799_v20  ;;  %v9847_v44 = vld.sshfl [vmem:[%s14516_s1 + $0x70] sm:$0x33 pattern:$0x73516240]  ;;  %v1277_v10 = vpack.i.b16 %v9804_v21, %v9799_v20  ;;  %v1267_v33 = vshrl.u32 %v9794_v9, 16 }
  0xf9   :  { %2963 = vxpose.xlu1.c.b16.start.end [1/1] (short) (narrow) %v2465_v17, 16  ;;  %v1243_v17 = vshrl.u32 %v9279_v12, 16  ;;  %14882 = vst [vmem:[#allocation33_spill] sm:$0xff] %v9847_v44  ;;  %v1278_v50 = vshrl.u32 %v9799_v20, 16  ;;  %v1279_v57 = vshrl.u32 %v9804_v21, 16  ;;  %v9919_v34 = vrot.slane %v3486_v38, %v9509_v53  ;;  %14904 = vst [vmem:[#allocation55_spill] sm:$0xff] %v10020_v54 }
  0xfa   :  { %v9852_v36 = vld.sshfl [vmem:[%s14516_s1 + $0x72] sm:$0x33 pattern:$0x73516240]  ;;  %v1303_v62 = vshrl.u32 %v9829_v48, 16 }
  0xfb   :  { %14883 = vst [vmem:[#allocation34_spill] sm:$0xff] %v9852_v36  ;;  %v9857_v29 = vld.sshfl [vmem:[%s14516_s1 + $0x78] sm:$0x33 pattern:$0x73516240]  ;;  %v1244_v59 = vpack.i.b16 %v1243_v17, %v1242_v24  ;;  %v1325_v24 = vpack.i.b16 %v9852_v36, %v9847_v44  ;;  %14890 = vst [vmem:[#allocation41_spill] sm:$0xff] %v9919_v34 }
  0xfc   :  { %14884 = vst [vmem:[#allocation35_spill] sm:$0xff] %v9857_v29  ;;  %v9862_v55 = vld.sshfl [vmem:[%s14516_s1 + $0x7a] sm:$0x33 pattern:$0x73516240] }
  0xfd   :  { %14885 = vst [vmem:[#allocation36_spill] sm:$0xff] %v9862_v55  ;;  %v3487_v12 = vcombine.low %v1232_v58, %v1244_v59  ;;  %v1337_v17 = vpack.i.b16 %v9862_v55, %v9857_v29  ;;  %v1290_v58 = vshrl.u32 %v9809_v25, 16  ;;  %v1291_v59 = vshrl.u32 %v9814_v28, 16 }
  0xfe   :  { %v9897_v26 = vld.sshfl [vmem:[%s14516_s1 + $0x80] sm:$0x33 pattern:$0x73516240]  ;;  %v9948_v28 = vcombine.low %v1277_v10, %v1289_v11  ;;  %v9950_v25 = vcombine.low %v1301_v13, %v1313_v15  ;;  %v1256_v10 = vpack.i.b16 %v1255_v16, %v1254_v41  ;;  %v1268_v11 = vpack.i.b16 %v1267_v33, %v1266_v32 }
  0xff   :  { %14886 = vst [vmem:[#allocation37_spill] sm:$0xff] %v9897_v26  ;;  %v9902_v23 = vld.sshfl [vmem:[%s14516_s1 + $0x82] sm:$0x33 pattern:$0x73516240]  ;;  %v9922_v30 = vrot.slane %v3487_v12, %v9509_v53  ;;  %v9946_v12 = vcombine.low %v1253_v6, %v1265_v3  ;;  %v9952_v21 = vcombine.low %v1325_v24, %v1337_v17  ;;  %v1280_v13 = vpack.i.b16 %v1279_v57, %v1278_v50 }
 0x100   :  { %14887 = vst [vmem:[#allocation38_spill] sm:$0xff] %v9902_v23  ;;  %v9907_v46 = vld.sshfl [vmem:[%s14516_s1 + $0x88] sm:$0x33 pattern:$0x73516240]  ;;  %v1302_v15 = vshrl.u32 %v9824_v47, 16  ;;  %v1292_v4 = vpack.i.b16 %v1291_v59, %v1290_v58 }
 0x101   :  { %14888 = vst [vmem:[#allocation39_spill] sm:$0xff] %v9907_v46  ;;  %v9912_v42 = vld.sshfl [vmem:[%s14516_s1 + $0x8a] sm:$0x33 pattern:$0x73516240]  ;;  %14891 = vst [vmem:[#allocation42_spill] sm:$0xff] %v9922_v30 }
 0x102   :  { %14889 = vst [vmem:[#allocation40_spill] sm:$0xff] %v9912_v42  ;;  %v9927_v61 = vld.sshfl [vmem:[%s14516_s1 + $0x90] sm:$0x33 pattern:$0x73516240]  ;;  %v1314_v41 = vshrl.u32 %v9837_v37, 16  ;;  %v1304_v48 = vpack.i.b16 %v1303_v62, %v1302_v15  ;;  %v3503_v62 = vcombine.low %v1256_v10, %v1268_v11  ;;  %v3504_v30 = vcombine.low %v1280_v13, %v1292_v4 }
 0x103   :  { %14892 = vst [vmem:[#allocation43_spill] sm:$0xff] %v9927_v61  ;;  %v9937_v19 = vld.sshfl [vmem:[%s14516_s1 + $0x98] sm:$0x33 pattern:$0x73516240]  ;;  %v1315_v16 = vshrl.u32 %v9842_v43, 16 }
 0x104   :  { %14894 = vst [vmem:[#allocation45_spill] sm:$0xff] %v9937_v19  ;;  %v9942_v27 = vld.sshfl [vmem:[%s14516_s1 + $0x9a] sm:$0x33 pattern:$0x73516240]  ;;  %v1326_v33 = vshrl.u32 %v9847_v44, 16 }
 0x105   :  { %14895 = vst [vmem:[#allocation46_spill] sm:$0xff] %v9942_v27  ;;  %v9957_v20 = vld.sshfl [vmem:[%s14516_s1 + $0xa0] sm:$0x33 pattern:$0x73516240]  ;;  %v1327_v50 = vshrl.u32 %v9852_v36, 16  ;;  %v1316_v49 = vpack.i.b16 %v1315_v16, %v1314_v41  ;;  %v1373_v36 = vpack.i.b16 %v9932_v45, %v9927_v61  ;;  %v1385_v22 = vpack.i.b16 %v9942_v27, %v9937_v19 }
 0x106   :  { %14896 = vst [vmem:[#allocation47_spill] sm:$0xff] %v9957_v20  ;;  %v9962_v9 = vld.sshfl [vmem:[%s14516_s1 + $0xa2] sm:$0x33 pattern:$0x73516240]  ;;  %v1338_v57 = vshrl.u32 %v9857_v29, 16  ;;  %v1349_v29 = vpack.i.b16 %v9902_v23, %v9897_v26  ;;  %v3253_v41 = vrot.slane %v9946_v12, %v9509_v53  ;;  %v3260_v16 = vrot.slane %v9948_v28, %v9509_v53 }
 0x107   :  { %14897 = vst [vmem:[#allocation48_spill] sm:$0xff] %v9962_v9  ;;  %v9967_v6 = vld.sshfl [vmem:[%s14516_s1 + $0xa8] sm:$0x33 pattern:$0x73516240]  ;;  %v1339_v47 = vshrl.u32 %v9862_v55, 16  ;;  %v1328_v44 = vpack.i.b16 %v1327_v50, %v1326_v33  ;;  %v1361_v55 = vpack.i.b16 %v9912_v42, %v9907_v46  ;;  %v3270_v50 = vrot.slane %v9950_v25, %v9509_v53 }
 0x108   :  { %14898 = vst [vmem:[#allocation49_spill] sm:$0xff] %v9967_v6  ;;  %v9972_v3 = vld.sshfl [vmem:[%s14516_s1 + $0xaa] sm:$0x33 pattern:$0x73516240]  ;;  %v3520_v12 = vcombine.low %v1304_v48, %v1316_v49  ;;  %v10044_v28 = vcombine.low %v1373_v36, %v1385_v22  ;;  %v1350_v39 = vshrl.u32 %v9897_v26, 16  ;;  %v10060_v48 = vcombine.low %v3253_v41, %v3260_v16 }
 0x109   :  { %14899 = vst [vmem:[#allocation50_spill] sm:$0xff] %v9972_v3  ;;  %v9978_v24 = vld.sshfl [vmem:[%s14516_s1 + $0xb0] sm:$0x33 pattern:$0x73516240]  ;;  %v1340_v40 = vpack.i.b16 %v1339_v47, %v1338_v57  ;;  %v1397_v47 = vpack.i.b16 %v9962_v9, %v9957_v20  ;;  %v1409_v15 = vpack.i.b16 %v9972_v3, %v9967_v6  ;;  %v3277_v57 = vrot.slane %v9952_v21, %v9509_v53 }
 0x10a   :  { %14900 = vst [vmem:[#allocation51_spill] sm:$0xff] %v9978_v24  ;;  %v9983_v17 = vld.sshfl [vmem:[%s14516_s1 + $0xb2] sm:$0x33 pattern:$0x73516240]  ;;  %v10042_v54 = vcombine.low %v1349_v29, %v1361_v55  ;;  %14906 = vst [vmem:[#allocation57_spill] sm:$0xff] %v10044_v28  ;;  %v10067_v29 = vrot.slane %v3503_v62, %v9509_v53  ;;  %v10070_v55 = vrot.slane %v3504_v30, %v9509_v53 }
 0x10b   :  { %14901 = vst [vmem:[#allocation52_spill] sm:$0xff] %v9983_v17  ;;  %v9993_v32 = vld.sshfl [vmem:[%s14516_s1 + $0xb8] sm:$0x33 pattern:$0x73516240]  ;;  %v1421_v33 = vpack.i.b16 %v9983_v17, %v9978_v24  ;;  %v3521_v34 = vcombine.low %v1328_v44, %v1340_v40  ;;  %v10048_v7 = vcombine.low %v1397_v47, %v1409_v15  ;;  %v1351_v2 = vshrl.u32 %v9902_v23, 16 }
 0x10c   :  { %14902 = vst [vmem:[#allocation53_spill] sm:$0xff] %v9993_v32  ;;  %v10002_v58 = vld.sshfl [vmem:[%s14516_s1 + $0xba] sm:$0x33 pattern:$0x73516240]  ;;  %14905 = vst [vmem:[#allocation56_spill] sm:$0xff] %v10042_v54  ;;  %v10062_v49 = vcombine.low %v3270_v50, %v3277_v57  ;;  %v10073_v10 = vrot.slane %v3520_v12, %v9509_v53 }
 0x10d   :  { %14903 = vst [vmem:[#allocation54_spill] sm:$0xff] %v10002_v58  ;;  %v1433_v18 = vpack.i.b16 %v10002_v58, %v9993_v32  ;;  %14907 = vst [vmem:[#allocation58_spill] sm:$0xff] %v10048_v7  ;;  %v1362_v25 = vshrl.u32 %v9907_v46, 16  ;;  %v1363_v4 = vshrl.u32 %v9912_v42, 16  ;;  %v1374_v21 = vshrl.u32 %v9927_v61, 16 }
 0x10e   :  { %v1375_v40 = vshrl.u32 %v9932_v45, 16  ;;  %14909 = vst [vmem:[#allocation60_spill] sm:$0xff] %v10060_v48  ;;  %14910 = vst [vmem:[#allocation61_spill] sm:$0xff] %v10062_v49  ;;  %v1386_v44 = vshrl.u32 %v9937_v19, 16  ;;  %v1387_v36 = vshrl.u32 %v9942_v27, 16  ;;  %v10076_v11 = vrot.slane %v3521_v34, %v9509_v53 }
 0x10f   :  { %v10053_v1 = vcombine.low %v1421_v33, %v1433_v18  ;;  %14911 = vst [vmem:[#allocation62_spill] sm:$0xff] %v10067_v29  ;;  %14912 = vst [vmem:[#allocation63_spill] sm:$0xff] %v10073_v10  ;;  %v10081_v13 = vld.sshfl [vmem:[%s14516_s1 + $0xc0] sm:$0x33 pattern:$0x73516240]  ;;  %v10091_v41 = vpack.i.b16 %v1351_v2, %v1350_v39  ;;  %v10110_v2 = vpack.i.b16 %v1363_v4, %v1362_v25 }
 0x110   :  { %14913 = vst [vmem:[#allocation64_spill] sm:$0xff] %v10076_v11  ;;  %v10096_v34 = vld.sshfl [vmem:[%s14516_s1 + $0xc2] sm:$0x33 pattern:$0x73516240]  ;;  %v10112_v39 = vpack.i.b16 %v1375_v40, %v1374_v21  ;;  %v1398_v50 = vshrl.u32 %v9957_v20, 16  ;;  %v10125_v62 = vpack.i.b16 %v1387_v36, %v1386_v44 }
 0x111   :  { %14908 = vst [vmem:[#allocation59_spill] sm:$0xff] %v10053_v1  ;;  %v10101_v16 = vld.sshfl [vmem:[%s14516_s1 + $0xc8] sm:$0x33 pattern:$0x73516240]  ;;  %v1399_v25 = vshrl.u32 %v9962_v9, 16 }
 0x112   :  { %14914 = vst [vmem:[#allocation65_spill] sm:$0xff] %v10101_v16  ;;  %v10106_v33 = vld.sshfl [vmem:[%s14516_s1 + $0xca] sm:$0x33 pattern:$0x73516240]  ;;  %v1410_v4 = vshrl.u32 %v9967_v6, 16 }
 0x113   :  { %14915 = vst [vmem:[#allocation66_spill] sm:$0xff] %v10106_v33  ;;  %v10118_v57 = vld.sshfl [vmem:[%s14516_s1 + $0xd0] sm:$0x33 pattern:$0x73516240]  ;;  %v1411_v21 = vshrl.u32 %v9972_v3, 16  ;;  %v10157_v9 = vpack.i.b16 %v1399_v25, %v1398_v50 }
 0x114   :  { %14916 = vst [vmem:[#allocation67_spill] sm:$0xff] %v10118_v57  ;;  %v10123_v12 = vld.sshfl [vmem:[%s14516_s1 + $0xd2] sm:$0x33 pattern:$0x73516240]  ;;  %v1422_v40 = vshrl.u32 %v9978_v24, 16 }
 0x115   :  { %14917 = vst [vmem:[#allocation68_spill] sm:$0xff] %v10123_v12  ;;  %v1423_v18 = vshrl.u32 %v9983_v17, 16  ;;  %v1434_v30 = vshrl.u32 %v9993_v32, 16  ;;  %v1435_v20 = vshrl.u32 %v10002_v58, 16  ;;  %v10159_v27 = vpack.i.b16 %v1411_v21, %v1410_v4 }
 0x116   :  { %v10137_v49 = vld.sshfl [vmem:[%s14516_s1 + $0xd8] sm:$0x33 pattern:$0x73516240] }
 0x117   :  { %14918 = vst [vmem:[#allocation69_spill] sm:$0xff] %v10137_v49  ;;  %v10142_v36 = vld.sshfl [vmem:[%s14516_s1 + $0xda] sm:$0x33 pattern:$0x73516240]  ;;  %v10178_v50 = vpack.i.b16 %v1423_v18, %v1422_v40  ;;  %v10180_v25 = vpack.i.b16 %v1435_v20, %v1434_v30 }
 0x118   :  { %14919 = vst [vmem:[#allocation70_spill] sm:$0xff] %v10142_v36  ;;  %v10151_v58 = vld.sshfl [vmem:[%s14516_s1 + $0xe0] sm:$0x33 pattern:$0x73516240] }
 0x119   :  { %14920 = vst [vmem:[#allocation71_spill] sm:$0xff] %v10151_v58  ;;  %v10185_v4 = vld.sshfl [vmem:[%s14516_s1 + $0xf0] sm:$0x33 pattern:$0x73516240] }
 0x11a   :  { %14924 = vst [vmem:[#allocation75_spill] sm:$0xff] %v10185_v4  ;;  %v10201_v20 = vld.sshfl [vmem:[%s14516_s1 + $0xf8] sm:$0x33 pattern:$0x73516240] }
 0x11b   :  { %14926 = vst [vmem:[#allocation77_spill] sm:$0xff] %v10201_v20  ;;  %v1530_v48 = vshrl.u32 %v10201_v20, 16 }
 0x121   :  { %v9944_v38 = vpop.trf.xlu0 }
 0x123   :  { %v9985_v8 = vpop.trf.xlu1 }
 0x125   :  { %v10004_v59 = vpop.trf.xlu0 }
 0x127   :  { %v10006_v43 = vpop.trf.xlu1 }
 0x129   :  { %v10008_v37 = vpop.trf.xlu0 }
 0x12a   :  { %v2979_v32 = vcombine.low %v9944_v38, %v10008_v37  ;;  %v10174_v37 = vld.sshfl [vmem:[%s14516_s1 + $0xea] sm:$0x33 pattern:$0x73516240] }
 0x12b   :  { %v10018_v56 = vpop.trf.xlu1  ;;  %14923 = vst [vmem:[#allocation74_spill] sm:$0xff] %v10174_v37 }
 0x12c   :  { %v3029_v21 = vcombine.low %v9985_v8, %v10018_v56  ;;  %v10206_v56 = vld.sshfl [vmem:[%s14516_s1 + $0xfa] sm:$0x33 pattern:$0x73516240]  ;;  %v2986_v18 = vrot.slane %v2979_v32, %v9509_v53  ;;  %v1507_v32 = vshrl.u32 %v10174_v37, 16 }
 0x12d   :  { %v10036_v31 = vpop.trf.xlu0  ;;  %14927 = vst [vmem:[#allocation78_spill] sm:$0xff] %v10206_v56 }
 0x12e   :  { %v2987_v24 = vcombine.low %v10004_v59, %v10036_v31  ;;  %v10164_v59 = vld.sshfl [vmem:[%s14516_s1 + $0xe2] sm:$0x33 pattern:$0x73516240]  ;;  %v3036_v61 = vrot.slane %v3029_v21, %v9509_v53 }
 0x12f   :  { %v10046_v60 = vpop.trf.xlu1  ;;  %14921 = vst [vmem:[#allocation72_spill] sm:$0xff] %v10164_v59  ;;  %v10169_v31 = vld.sshfl [vmem:[%s14516_s1 + $0xe8] sm:$0x33 pattern:$0x73516240] }
 0x130   :  { %14922 = vst [vmem:[#allocation73_spill] sm:$0xff] %v10169_v31  ;;  %v3037_v38 = vcombine.low %v10006_v43, %v10046_v60  ;;  %v10196_v60 = vld.sshfl [vmem:[%s14516_s1 + $0xf2] sm:$0x33 pattern:$0x73516240]  ;;  %v2994_v8 = vrot.slane %v2987_v24, %v9509_v53  ;;  %v1506_v30 = vshrl.u32 %v10169_v31, 16 }
 0x131   :  { %v10058_v22 = vpop.trf.xlu0  ;;  %14925 = vst [vmem:[#allocation76_spill] sm:$0xff] %v10196_v60 }
 0x132   :  { %v3044_v17 = vrot.slane %v3037_v38, %v9509_v53  ;;  %v3011_v46 = vcombine.low %v2986_v18, %v2994_v8  ;;  %v1482_v18 = vshrl.u32 %v10137_v49, 16  ;;  %v1508_v11 = vpack.i.b16 %v1507_v32, %v1506_v30 }
 0x133   :  { %v10083_v47 = vpop.trf.xlu1 }
 0x135   :  { %v2635_v15 = vpop.trf.xlu0 }
 0x137   :  { %v2651_v44 = vpop.trf.xlu1 }
 0x139   :  { %v2667_v3 = vpop.trf.xlu0 }
 0x13a   :  { %v2995_v43 = vcombine.low %v10058_v22, %v2667_v3 }
 0x13b   :  { %v2683_v6 = vpop.trf.xlu1 }
 0x13c   :  { %v3045_v19 = vcombine.low %v10083_v47, %v2683_v6  ;;  %v3002_v23 = vrot.slane %v2995_v43, %v9509_v53  ;;  %v1446_v6 = vshrl.u32 %v10081_v13, 16  ;;  %v1447_v47 = vshrl.u32 %v10096_v34, 16 }
 0x13d   :  { %v2699_v40 = vpop.trf.xlu0 }
 0x13e   :  { %v3003_v45 = vcombine.low %v2635_v15, %v2699_v40  ;;  %v3061_v15 = vcombine.low %v3036_v61, %v3044_v17  ;;  %v3052_v21 = vrot.slane %v3045_v19, %v9509_v53  ;;  %v1458_v40 = vshrl.u32 %v10101_v16, 16 }
 0x13f   :  { %v2715_v42 = vpop.trf.xlu1  ;;  %v10238_v61 = vrot.slane %v3011_v46, %v9520_v5  ;;  %v1459_v19 = vshrl.u32 %v10106_v33, 16 }
 0x140   :  { %v3010_v24 = vrot.slane %v3003_v45, %v9509_v53  ;;  %v3053_v3 = vcombine.low %v2651_v44, %v2715_v42  ;;  %v1471_v44 = vshrl.u32 %v10123_v12, 16  ;;  %v10254_v46 = vrot.slane %v3061_v15, %v9520_v5 }
 0x141   :  { %v10218_v22 = vpop.trf.xlu0  ;;  %14930 = vst [vmem:[#allocation81_spill] sm:$0xff] %v10238_v61  ;;  %v1518_v15 = vshrl.u32 %v10185_v4, 16  ;;  %v1460_v54 = vpack.i.b16 %v1459_v19, %v1458_v40  ;;  %v14943_v40 = vpack.i.b16 %v10142_v36, %v10137_v49 }
 0x142   :  { %14928 = vst [vmem:[#allocation79_spill] sm:$0xff] %v10218_v22  ;;  %v3019_v8 = vcombine.low %v3002_v23, %v3010_v24  ;;  %v3060_v43 = vrot.slane %v3053_v3, %v9509_v53  ;;  %v10246_v24 = vpack.i.b16 %v1447_v47, %v1446_v6  ;;  %v1470_v3 = vshrl.u32 %v10118_v57, 16  ;;  %14933 = vst [vmem:[#allocation84_spill] sm:$0xff] %v10254_v46 }
 0x143   :  { %v10228_v45 = vpop.trf.xlu1  ;;  %v1494_v6 = vshrl.u32 %v10151_v58, 16  ;;  %v1495_v47 = vshrl.u32 %v10164_v59, 16 }
 0x144   :  { %14929 = vst [vmem:[#allocation80_spill] sm:$0xff] %v10228_v45  ;;  %v3069_v38 = vcombine.low %v3052_v21, %v3060_v43  ;;  %v10241_v23 = vrot.slane %v3019_v8, %v9520_v5  ;;  %v1483_v43 = vshrl.u32 %v10142_v36, 16  ;;  %v14970_v36 = vld [vmem:[#allocation58_spill] sm:$0xff] }
 0x145   :  { %v10244_v17 = vpop.trf.xlu0  ;;  %v1496_v10 = vpack.i.b16 %v1495_v47, %v1494_v6  ;;  %v14949_v47 = vpack.i.b16 %v10206_v56, %v10201_v20  ;;  %v14971_v49 = vrot.slane %v14970_v36, %v9509_v53 }
 0x146   :  { %14931 = vst [vmem:[#allocation82_spill] sm:$0xff] %v10241_v23  ;;  %14932 = vst [vmem:[#allocation83_spill] sm:$0xff] %v10244_v17  ;;  %v3027_v21 = vcombine.low %v10238_v61, %v10241_v23  ;;  %v10257_v8 = vrot.slane %v3069_v38, %v9520_v5  ;;  %v1519_v38 = vshrl.u32 %v10196_v60, 16  ;;  %v1531_v61 = vshrl.u32 %v10206_v56, 16 }
 0x147   :  { %v10260_v42 = vpop.trf.xlu1  ;;  %v14937_v23 = vmov 0   ;;  %v1484_v28 = vpack.i.b16 %v1483_v43, %v1482_v18  ;;  %v14948_v43 = vpack.i.b16 %v10164_v59, %v10151_v58  ;;  %v14968_v58 = vld [vmem:[#allocation59_spill] sm:$0xff] }
 0x148   :  { %14934 = vst [vmem:[#allocation85_spill] sm:$0xff] %v10257_v8  ;;  %14935 = vst [vmem:[#allocation86_spill] sm:$0xff] %v10260_v42  ;;  %v3077_v26 = vcombine.low %v10254_v46, %v10257_v8  ;;  %v10276_v45 = vcombine.high %v9671_v51, %v14937_v23  ;;  %v10280_v42 = vcombine.high %v9676_v35, %v14937_v23  ;;  %v3183_v22 = vshrl.u32 %v3027_v21, 16 }
 0x149   :  { %v10271_v5 = vpop.trf.xlu0  ;;  %v10284_v46 = vcombine.high %v9681_v52, %v14937_v23  ;;  %v10294_v51 = vcombine.high %v9691_v63, %v14937_v23  ;;  %v10298_v35 = vcombine.high %v9696_v0, %v14937_v23  ;;  %v14939_v52 = vld [vmem:[#allocation11_spill] sm:$0xff]  ;;  %v1520_v0 = vpack.i.b16 %v1519_v38, %v1518_v15 }
 0x14a   :  { %14936 = vst [vmem:[#allocation87_spill] sm:$0xff] %v10271_v5  ;;  %v3181_v8 = vpack.i.b16 %v3077_v26, %v3027_v21  ;;  %v3184_v17 = vshrl.u32 %v3077_v26, 16  ;;  %v10288_v5 = vcombine.high %v9686_v14, %v14937_v23  ;;  %v10302_v1 = vcombine.high %v14939_v52, %v14937_v23  ;;  %v14940_v26 = vld [vmem:[#allocation12_spill] sm:$0xff] }
 0x14b   :  { %v10290_v7 = vpop.trf.xlu1  ;;  %v10306_v21 = vcombine.high %v14940_v26, %v14937_v23  ;;  %v1532_v29 = vpack.i.b16 %v1531_v61, %v1530_v48  ;;  %v3554_v52 = vcombine.low %v10157_v9, %v10159_v27  ;;  %v3555_v26 = vcombine.low %v10178_v50, %v10180_v25 }
 0x14c   :  { %14938 = vst [vmem:[#allocation88_spill] sm:$0xff] %v10290_v7  ;;  %8527 = vmatprep.subr.bf16.mxu0 %v3181_v8  ;;  %v3185_v14 = vpack.i.b16 %v3184_v17, %v3183_v22  ;;  %v1472_v7 = vpack.i.b16 %v1471_v44, %v1470_v3  ;;  %v14941_v22 = vpack.i.b16 %v10106_v33, %v10101_v16 }
 0x14d   :  { %8528 = vmatpush3.bf16.msra.mxu0 %v3181_v8  ;;  %v10308_v63 = vpop.trf.xlu0  ;;  %v14942_v44 = vpack.i.b16 %v10096_v34, %v10081_v13  ;;  %v14944_v48 = vpack.i.b16 %v10123_v12, %v10118_v57  ;;  %v1163_v9 = vpack.i.b16 %v10280_v42, %v10276_v45  ;;  %v1175_v27 = vpack.i.b16 %v10288_v5, %v10284_v46 }
 0x14e   :  { %8547 = vmatprep.subr.bf16.mxu1 %v3185_v14  ;;  %v1187_v50 = vpack.i.b16 %v10298_v35, %v10294_v51  ;;  %v1199_v25 = vpack.i.b16 %v10306_v21, %v10302_v1  ;;  %v14945_v61 = vcombine.low %v10091_v41, %v10110_v2  ;;  %v14946_v17 = vcombine.low %v10112_v39, %v10125_v62 }
 0x14f   :  { %v3313_v18 = vcombine.low %v14942_v44, %v14941_v22  ;;  %v3314_v30 = vcombine.low %v14944_v48, %v14943_v40  ;;  %v10326_v32 = vpop.trf.xlu1  ;;  %8548 = vmatpush3.bf16.msra.mxu1 %v3185_v14  ;;  %v14947_v8 = vpack.i.b16 %v10174_v37, %v10169_v31  ;;  %v14950_v41 = vpack.i.b16 %v10196_v60, %v10185_v4  ;;  %v14951_v40 = vld [vmem:[#allocation13_spill] sm:$0xff]  ;;  %v14952_v48 = vld [vmem:[#allocation14_spill] sm:$0xff] }
 0x150   :  { %v10340_v19 = vrot.slane %v14945_v61, %v9509_v53  ;;  %v10346_v3 = vrot.slane %v14946_v17, %v9509_v53  ;;  %v3571_v62 = vcombine.low %v10246_v24, %v1460_v54  ;;  %v3572_v39 = vcombine.low %v1472_v7, %v1484_v28  ;;  %v14953_v17 = vld [vmem:[#allocation15_spill] sm:$0xff]  ;;  %v14956_v24 = vld [vmem:[#allocation18_spill] sm:$0xff]  ;;  %v14964_v4 = vld [vmem:[#allocation57_spill] sm:$0xff] }
 0x151   :  { %v3330_v6 = vcombine.low %v14948_v43, %v14947_v8  ;;  %v3331_v2 = vcombine.low %v14950_v41, %v14949_v47  ;;  %v10360_v15 = vpop.trf.xlu0  ;;  %v3588_v38 = vcombine.low %v1496_v10, %v1508_v11  ;;  %v3589_v14 = vcombine.low %v1520_v0, %v1532_v29  ;;  %v14954_v8 = vld [vmem:[#allocation16_spill] sm:$0xff]  ;;  %v14955_v11 = vld [vmem:[#allocation17_spill] sm:$0xff] }
 0x152   :  { %v10364_v22 = vrot.slane %v3554_v52, %v9509_v53  ;;  %v10367_v44 = vrot.slane %v3555_v26, %v9509_v53  ;;  %v1211_v61 = vpack.i.b16 %v14952_v48, %v14951_v40  ;;  %v1223_v43 = vpack.i.b16 %v14954_v8, %v14953_v17  ;;  %v14957_v52 = vld [vmem:[#allocation27_spill] sm:$0xff]  ;;  %v14958_v26 = vld [vmem:[#allocation30_spill] sm:$0xff] }
 0x153   :  { %v10373_v47 = vpop.trf.xlu1  ;;  %v3321_v41 = vrot.slane %v3313_v18, %v9509_v53  ;;  %v3328_v7 = vrot.slane %v3314_v30, %v9509_v53  ;;  %v3726_v54 = vcombine.low %v1163_v9, %v1175_v27  ;;  %v3727_v28 = vcombine.low %v1187_v50, %v1199_v25  ;;  %v14961_v27 = vld [vmem:[#allocation62_spill] sm:$0xff]  ;;  %v14962_v25 = vld [vmem:[#allocation64_spill] sm:$0xff] }
 0x154   :  { %v3338_v29 = vrot.slane %v3330_v6, %v9509_v53  ;;  %v3345_v10 = vrot.slane %v3331_v2, %v9509_v53  ;;  %v1235_v0 = vpack.i.b16 %v14956_v24, %v14955_v11  ;;  %v1247_v56 = vpack.i.b16 %v14958_v26, %v14957_v52  ;;  %v14963_v6 = vld [vmem:[#allocation63_spill] sm:$0xff] }
 0x155   :  { %v2891_v20 = vpop.trf.xlu0  ;;  %v10384_v60 = vrot.slane %v3571_v62, %v9509_v53  ;;  %v10387_v18 = vrot.slane %v3572_v39, %v9509_v53  ;;  %v10390_v30 = vrot.slane %v3588_v38, %v9509_v53  ;;  %v10393_v9 = vrot.slane %v3589_v14, %v9509_v53  ;;  %v14966_v62 = vld [vmem:[#allocation56_spill] sm:$0xff]  ;;  %v14974_v2 = vld [vmem:[#allocation79_spill] sm:$0xff] }
 0x156   :  { %v14965_v37 = vrot.slane %v14964_v4, %v9509_v53  ;;  %v14967_v31 = vrot.slane %v14966_v62, %v9509_v53  ;;  %v3743_v59 = vcombine.low %v1211_v61, %v1223_v43  ;;  %v14969_v14 = vrot.slane %v14968_v58, %v9509_v53 }
 0x157   :  { %14959 = vst [vmem:[#allocation11_spill] sm:$0xff] %v10390_v30  ;;  %14960 = vst [vmem:[#allocation12_spill] sm:$0xff] %v10393_v9  ;;  %v2907_v38 = vpop.trf.xlu1  ;;  %v3734_v4 = vrot.slane %v3726_v54, %v9509_v53  ;;  %v3741_v12 = vrot.slane %v3727_v28, %v9509_v53  ;;  %v10423_v43 = vcombine.low %v3321_v41, %v3328_v7  ;;  %v1164_v28 = vshrl.u32 %v10276_v45, 16  ;;  %v14976_v7 = vld [vmem:[#allocation88_spill] sm:$0xff] }
 0x158   :  { %v10405_v39 = vcombine.low %v14967_v31, %v14965_v37  ;;  %v10413_v50 = vcombine.low %v14971_v49, %v14969_v14  ;;  %v14972_v31 = vld [vmem:[#allocation83_spill] sm:$0xff]  ;;  %v3744_v58 = vcombine.low %v1235_v0, %v1247_v56  ;;  %v10425_v36 = vcombine.low %v3338_v29, %v3345_v10  ;;  %v14977_v29 = vld [vmem:[#allocation80_spill] sm:$0xff] }
 0x159   :  { %v3087_v37 = vcombine.low %v14972_v31, %v10308_v63  ;;  %v2923_v62 = vpop.trf.xlu0  ;;  %v14973_v14 = vld [vmem:[#allocation87_spill] sm:$0xff]  ;;  %v14975_v31 = vld [vmem:[#allocation86_spill] sm:$0xff]  ;;  %v3751_v41 = vrot.slane %v3743_v59, %v9509_v53  ;;  %v1165_v56 = vshrl.u32 %v10280_v42, 16  ;;  %v3129_v10 = vcombine.low %v14977_v29, %v14976_v7 }
 0x15a   :  { %v3079_v63 = vcombine.low %v14974_v2, %v14973_v14  ;;  %v3137_v61 = vcombine.low %v14975_v31, %v10326_v32  ;;  %v10440_v49 = vcombine.low %v3734_v4, %v3741_v12  ;;  %v1176_v54 = vshrl.u32 %v10284_v46, 16  ;;  %v14978_v14 = vld [vmem:[#allocation82_spill] sm:$0xff]  ;;  %v14979_v32 = vld [vmem:[#allocation81_spill] sm:$0xff] }
 0x15b   :  { %v2939_v0 = vpop.trf.xlu1  ;;  %v1177_v45 = vshrl.u32 %v10288_v5, 16  ;;  %v3094_v57 = vrot.slane %v3087_v37, %v9509_v53  ;;  %v3095_v2 = vcombine.low %v10360_v15, %v2923_v62  ;;  %v3028_v31 = vcombine.high %v14979_v32, %v14978_v14  ;;  %v14981_v14 = vld [vmem:[#allocation84_spill] sm:$0xff] }
 0x15c   :  { %v3758_v59 = vrot.slane %v3744_v58, %v9509_v53  ;;  %v1188_v9 = vshrl.u32 %v10294_v51, 16  ;;  %v1189_v7 = vshrl.u32 %v10298_v35, 16  ;;  %v1200_v12 = vshrl.u32 %v10302_v1, 16  ;;  %v14980_v58 = vld [vmem:[#allocation85_spill] sm:$0xff] }
 0x15d   :  { %v2955_v42 = vpop.trf.xlu0  ;;  %v1201_v46 = vshrl.u32 %v10306_v21, 16  ;;  %v3086_v5 = vrot.slane %v3079_v63, %v9509_v53  ;;  %v3144_v4 = vrot.slane %v3137_v61, %v9509_v53  ;;  %v3145_v15 = vcombine.low %v10373_v47, %v2939_v0 }
 0x15e   :  { %v3103_v37 = vcombine.low %v2891_v20, %v2955_v42  ;;  %v3136_v62 = vrot.slane %v3129_v10, %v9509_v53  ;;  %v3078_v32 = vcombine.high %v14981_v14, %v14980_v58  ;;  %v1166_v51 = vpack.i.b16 %v1165_v56, %v1164_v28  ;;  %v14996_v14 = vld [vmem:[#allocation23_spill] sm:$0xff] }
 0x15f   :  { %v2971_v29 = vpop.trf.xlu1  ;;  %v1178_v30 = vpack.i.b16 %v1177_v45, %v1176_v54  ;;  %v3111_v35 = vcombine.low %v3086_v5, %v3094_v57  ;;  %v3102_v1 = vrot.slane %v3095_v2, %v9509_v53  ;;  %v3191_v63 = vshrl.u32 %v3028_v31, 16 }
 0x160   :  { %v3110_v21 = vrot.slane %v3103_v37, %v9509_v53  ;;  %v3153_v33 = vcombine.low %v2907_v38, %v2971_v29  ;;  %v10461_v16 = vcombine.low %v3751_v41, %v3758_v59  ;;  %v1190_v61 = vpack.i.b16 %v1189_v7, %v1188_v9  ;;  %v14985_v38 = vld [vmem:[#allocation10_spill] sm:$0xff] }
 0x161   :  { %v1202_v47 = vpack.i.b16 %v1201_v46, %v1200_v12  ;;  %v3161_v20 = vcombine.low %v3136_v62, %v3144_v4  ;;  %v3152_v10 = vrot.slane %v3145_v15, %v9509_v53  ;;  %v3189_v58 = vpack.i.b16 %v3078_v32, %v3028_v31  ;;  %v14992_v4 = vld [vmem:[#allocation19_spill] sm:$0xff]  ;;  %v14994_v62 = vld [vmem:[#allocation21_spill] sm:$0xff] }
 0x162   :  { %14982 = vst [vmem:[#allocation13_spill] sm:$0xff] %v10461_v16  ;;  %v3119_v0 = vcombine.low %v3102_v1, %v3110_v21  ;;  %v3160_v42 = vrot.slane %v3153_v33, %v9509_v53  ;;  %v3192_v28 = vshrl.u32 %v3078_v32, 16  ;;  %v3983_v54 = vcombine.low %v1166_v51, %v1178_v30  ;;  %v14997_v51 = vld [vmem:[#allocation24_spill] sm:$0xff] }
 0x163   :  { %v14983_v57 = vshrl.u32 %v14951_v40, 16  ;;  %v14984_v56 = vshrl.u32 %v14952_v48, 16  ;;  %v3118_v41 = vrot.slane %v3111_v35, %v14985_v38  ;;  %v14986_v59 = vshrl.u32 %v14953_v17, 16 }
 0x164   :  { %v3126_v9 = vrot.slane %v3119_v0, %v14985_v38  ;;  %v3169_v2 = vcombine.low %v3152_v10, %v3160_v42  ;;  %v14987_v7 = vshrl.u32 %v14954_v8, 16  ;;  %v3984_v33 = vcombine.low %v1190_v61, %v1202_v47  ;;  %v14998_v0 = vld [vmem:[#allocation25_spill] sm:$0xff] }
 0x165   :  { %v10469_v45 = vpack.i.b16 %v14984_v56, %v14983_v57  ;;  %v14988_v30 = vshrl.u32 %v14955_v11, 16  ;;  %v14989_v40 = vshrl.u32 %v14956_v24, 16  ;;  %v14990_v48 = vshrl.u32 %v14957_v52, 16  ;;  %v14993_v11 = vld [vmem:[#allocation20_spill] sm:$0xff]  ;;  %v14999_v57 = vld [vmem:[#allocation26_spill] sm:$0xff] }
 0x166   :  { %v10477_v12 = vpack.i.b16 %v14987_v7, %v14986_v59  ;;  %v14991_v46 = vshrl.u32 %v14958_v26, 16  ;;  %v10493_v17 = vcombine.high %v14992_v4, %v14937_v23  ;;  %v3168_v8 = vrot.slane %v3161_v20, %v14985_v38  ;;  %v14995_v26 = vld [vmem:[#allocation22_spill] sm:$0xff] }
 0x167   :  { %v10483_v31 = vpack.i.b16 %v14989_v40, %v14988_v30  ;;  %v3176_v15 = vrot.slane %v3169_v2, %v14985_v38  ;;  %v3127_v37 = vcombine.low %v3118_v41, %v3126_v9  ;;  %v10499_v24 = vcombine.high %v14993_v11, %v14937_v23 }
 0x168   :  { %v10489_v5 = vpack.i.b16 %v14991_v46, %v14990_v48  ;;  %v10503_v52 = vcombine.high %v14994_v62, %v14937_v23  ;;  %v10507_v29 = vcombine.high %v14995_v26, %v14937_v23  ;;  %v10511_v32 = vcombine.high %v14996_v14, %v14937_v23  ;;  %v15001_v46 = vld [vmem:[#allocation29_spill] sm:$0xff]  ;;  %v15005_v14 = vld [vmem:[#allocation34_spill] sm:$0xff] }
 0x169   :  { %v10515_v35 = vcombine.high %v14997_v51, %v14937_v23  ;;  %v3177_v1 = vcombine.low %v3168_v8, %v3176_v15  ;;  %v3193_v21 = vpack.i.b16 %v3192_v28, %v3191_v63  ;;  %v10518_v61 = vrot.slane %v3983_v54, %v9509_v53  ;;  %v15004_v62 = vld [vmem:[#allocation33_spill] sm:$0xff] }
 0x16a   :  { %v10523_v20 = vrot.slane %v3984_v33, %v9509_v53  ;;  %v10529_v42 = vcombine.high %v14998_v0, %v14937_v23  ;;  %v10533_v56 = vcombine.high %v14999_v57, %v14937_v23  ;;  %v3199_v28 = vshrl.u32 %v3127_v37, 16  ;;  %v15000_v33 = vld [vmem:[#allocation28_spill] sm:$0xff] }
 0x16b   :  { %v3197_v63 = vpack.i.b16 %v3177_v1, %v3127_v37  ;;  %v3200_v54 = vshrl.u32 %v3177_v1, 16  ;;  %v3178_v38 = vcombine.high %v3168_v8, %v3176_v15  ;;  %v10543_v30 = vcombine.high %v15000_v33, %v14937_v23  ;;  %v15002_v8 = vld [vmem:[#allocation31_spill] sm:$0xff]  ;;  %v15003_v37 = vld [vmem:[#allocation32_spill] sm:$0xff] }
 0x16c   :  { %v3128_v48 = vcombine.high %v3118_v41, %v3126_v9  ;;  %v10547_v4 = vcombine.high %v15001_v46, %v14937_v23  ;;  %v10551_v15 = vcombine.high %v15002_v8, %v14937_v23  ;;  %v10555_v11 = vcombine.high %v15003_v37, %v14937_v23  ;;  %v15006_v9 = vld [vmem:[#allocation35_spill] sm:$0xff]  ;;  %v15007_v0 = vld [vmem:[#allocation36_spill] sm:$0xff] }
 0x16d   :  { %8529 = vmatprep.subr.bf16.mxu0 %v3197_v63  ;;  %v3201_v40 = vpack.i.b16 %v3200_v54, %v3199_v28  ;;  %v10559_v26 = vcombine.high %v15004_v62, %v14937_v23  ;;  %v10563_v41 = vcombine.high %v15005_v14, %v14937_v23  ;;  %v10567_v51 = vcombine.high %v15006_v9, %v14937_v23  ;;  %v15008_v37 = vld [vmem:[#allocation55_spill] sm:$0xff] }
 0x16e   :  { %8530 = vmatpush3.bf16.msra.mxu0 %v3197_v63  ;;  %v3208_v1 = vshrl.u32 %v3178_v38, 16  ;;  %v10571_v57 = vcombine.high %v15007_v0, %v14937_v23  ;;  %v1260_v63 = vshrl.u32 %v10493_v17, 16  ;;  %v1261_v28 = vshrl.u32 %v10499_v24, 16 }
 0x16f   :  { %8549 = vmatprep.subr.bf16.mxu1 %v3201_v40  ;;  %8567 = vmatprep.subr.bf16.mxu0 %v3189_v58  ;;  %v1272_v54 = vshrl.u32 %v10503_v52, 16  ;;  %v1273_v33 = vshrl.u32 %v10507_v29, 16  ;;  %v1284_v46 = vshrl.u32 %v10511_v32, 16  ;;  %v1285_v8 = vshrl.u32 %v10515_v35, 16 }
 0x170   :  { %8550 = vmatpush3.bf16.msra.mxu1 %v3201_v40  ;;  %v3205_v62 = vpack.i.b16 %v3178_v38, %v3128_v48  ;;  %v3207_v14 = vshrl.u32 %v3128_v48, 16  ;;  %v1296_v9 = vshrl.u32 %v10529_v42, 16  ;;  %v1297_v0 = vshrl.u32 %v10533_v56, 16  ;;  %v15009_v40 = vld [vmem:[#allocation60_spill] sm:$0xff]  ;;  %v15010_v38 = vld [vmem:[#allocation41_spill] sm:$0xff]  ;;  %v15011_v48 = vld [vmem:[#allocation42_spill] sm:$0xff] }
 0x171   :  { %8532 = vmatmul.mubr.msk.bf16.vlgmr.msra.gmra.mrb[0].mxu0 %vm3347_vm0, %v15008_v37  ;;  %8587 = vmatprep.subr.bf16.mxu1 %v3193_v21  ;;  %v1295_v7 = vpack.i.b16 %v10533_v56, %v10529_v42  ;;  %v1307_v2 = vpack.i.b16 %v10547_v4, %v10543_v30  ;;  %v1319_v37 = vpack.i.b16 %v10555_v11, %v10551_v15 }
 0x172   :  { %8568 = vmatpush3.bf16.msra.mxu0 %v3189_v58  ;;  %8535 = vmatprep.mubr.msk.bf16.mxu0 %vm3347_vm0, %v15009_v40  ;;  %v15012_v59 = vcombine.low %v15010_v38, %v15011_v48  ;;  %v3209_v10 = vpack.i.b16 %v3208_v1, %v3207_v14  ;;  %v1331_v58 = vpack.i.b16 %v10563_v41, %v10559_v26  ;;  %v1308_v38 = vshrl.u32 %v10543_v30, 16 }
 0x173   :  { %8569 = vmatprep.subr.bf16.mxu0 %v3205_v62  ;;  %v1343_v40 = vpack.i.b16 %v10571_v57, %v10567_v51  ;;  %v15013_v42 = vcombine.low %v14961_v27, %v10070_v55  ;;  %v1262_v56 = vpack.i.b16 %v1261_v28, %v1260_v63  ;;  %v1274_v47 = vpack.i.b16 %v1273_v33, %v1272_v54  ;;  %v15014_v28 = vld [vmem:[#allocation37_spill] sm:$0xff]  ;;  %v15015_v54 = vld [vmem:[#allocation38_spill] sm:$0xff] }
 0x174   :  { %8552 = vmatmul.mubr.msk.bf16.vlgmr.msra.gmra.mrb[0].mxu1 %vm3347_vm0, %v15012_v59  ;;  %v1286_v16 = vpack.i.b16 %v1285_v8, %v1284_v46  ;;  %v1298_v59 = vpack.i.b16 %v1297_v0, %v1296_v9  ;;  %v1309_v1 = vshrl.u32 %v10547_v4, 16  ;;  %v1320_v14 = vshrl.u32 %v10551_v15, 16  ;;  %v15016_v15 = vld [vmem:[#allocation39_spill] sm:$0xff]  ;;  %v15020_v8 = vld [vmem:[#allocation45_spill] sm:$0xff]  ;;  %v15021_v9 = vld [vmem:[#allocation46_spill] sm:$0xff] }
 0x175   :  { %8588 = vmatpush3.bf16.msra.mxu1 %v3193_v21  ;;  %8555 = vmatprep.mubr.msk.bf16.mxu1 %vm3347_vm0, %v15013_v42  ;;  %v1321_v48 = vshrl.u32 %v10555_v11, 16  ;;  %v1332_v21 = vshrl.u32 %v10559_v26, 16  ;;  %v1333_v55 = vshrl.u32 %v10563_v41, 16  ;;  %v1344_v27 = vshrl.u32 %v10567_v51, 16  ;;  %v15017_v26 = vld [vmem:[#allocation40_spill] sm:$0xff]  ;;  %v15018_v41 = vld [vmem:[#allocation43_spill] sm:$0xff] }
 0x176   :  { %8589 = vmatprep.subr.bf16.mxu1 %v3209_v10  ;;  %8570 = vmatpush3.bf16.msra.mxu0 %v3205_v62  ;;  %v1345_v63 = vshrl.u32 %v10571_v57, 16  ;;  %v10613_v30 = vcombine.high %v15014_v28, %v14937_v23  ;;  %v10617_v4 = vcombine.high %v15015_v54, %v14937_v23  ;;  %v10621_v11 = vcombine.high %v15016_v15, %v14937_v23  ;;  %v15019_v57 = vld [vmem:[#allocation44_spill] sm:$0xff]  ;;  %v15022_v42 = vld [vmem:[#allocation61_spill] sm:$0xff] }
 0x177   :  { %v10625_v33 = vcombine.high %v15017_v26, %v14937_v23  ;;  %v10629_v51 = vcombine.high %v15018_v41, %v14937_v23  ;;  %v10633_v46 = vcombine.high %v15019_v57, %v14937_v23  ;;  %v10637_v62 = vcombine.high %v15020_v8, %v14937_v23 }
 0x178   :  { %v10641_v0 = vcombine.high %v15021_v9, %v14937_v23  ;;  %v15024_v54 = vcombine.low %v10483_v31, %v10489_v5  ;;  %v15025_v26 = vpack.i.b16 %v10507_v29, %v10503_v52  ;;  %v15026_v41 = vpack.i.b16 %v10499_v24, %v10493_v17 }
 0x179   :  { %8590 = vmatpush3.bf16.msra.mxu1 %v3209_v10  ;;  %8536 = vmatmul.mubr.msk.bf16.gmra.mrb[4].mxu0 %vm3347_vm0, %v15022_v42  ;;  %v15023_v10 = vcombine.low %v10469_v45, %v10477_v12  ;;  %v15027_v8 = vpack.i.b16 %v10515_v35, %v10511_v32  ;;  %v3777_v45 = vcombine.low %v1307_v2, %v1319_v37  ;;  %v15030_v2 = vld [vmem:[#allocation47_spill] sm:$0xff]  ;;  %v15031_v37 = vld [vmem:[#allocation48_spill] sm:$0xff] }
 0x17a   :  { %v10655_v15 = vrot.slane %v15024_v54, %v9509_v53  ;;  %v3760_v57 = vcombine.low %v15026_v41, %v15025_v26  ;;  %8539 = vmatprep.mubr.msk.bf16.mxu0 %vm3347_vm0, %v10405_v39  ;;  %v3778_v12 = vcombine.low %v1331_v58, %v1343_v40  ;;  %v4017_v42 = vcombine.low %v1262_v56, %v1274_v47  ;;  %v15032_v40 = vld [vmem:[#allocation49_spill] sm:$0xff]  ;;  %v15034_v54 = vld [vmem:[#allocation51_spill] sm:$0xff]  ;;  %v15035_v41 = vld [vmem:[#allocation52_spill] sm:$0xff] }
 0x17b   :  { %v10649_v28 = vrot.slane %v15023_v10, %v9509_v53  ;;  %v3761_v9 = vcombine.low %v15027_v8, %v1295_v7  ;;  %v4018_v31 = vcombine.low %v1286_v16, %v1298_v59  ;;  %v15028_v5 = vcombine.low %v14963_v6, %v14962_v25  ;;  %v15036_v8 = vld [vmem:[#allocation53_spill] sm:$0xff] }
 0x17c   :  { %v1310_v52 = vpack.i.b16 %v1309_v1, %v1308_v38  ;;  %v1322_v29 = vpack.i.b16 %v1321_v48, %v1320_v14  ;;  %v1334_v17 = vpack.i.b16 %v1333_v55, %v1332_v21  ;;  %v1346_v24 = vpack.i.b16 %v1345_v63, %v1344_v27  ;;  %v15033_v38 = vld [vmem:[#allocation50_spill] sm:$0xff] }
 0x17d   :  { %8556 = vmatmul.mubr.msk.bf16.gmra.mrb[4].mxu1 %vm3347_vm0, %v15028_v5  ;;  %v15029_v32 = vcombine.low %v10340_v19, %v10346_v3  ;;  %v1355_v39 = vpack.i.b16 %v10617_v4, %v10613_v30  ;;  %v1367_v16 = vpack.i.b16 %v10625_v33, %v10621_v11  ;;  %v1379_v25 = vpack.i.b16 %v10633_v46, %v10629_v51 }
 0x17e   :  { %v1391_v6 = vpack.i.b16 %v10641_v0, %v10637_v62  ;;  %v3999_v35 = vcombine.low %v10518_v61, %v10523_v20  ;;  %v4016_v19 = vcombine.low %v10649_v28, %v10655_v15  ;;  %v3768_v3 = vrot.slane %v3760_v57, %v9509_v53 }
 0x17f   :  { %8559 = vmatprep.mubr.msk.bf16.mxu1 %vm3347_vm0, %v15029_v32  ;;  %v3775_v47 = vrot.slane %v3761_v9, %v9509_v53  ;;  %v10692_v7 = vcombine.high %v15030_v2, %v14937_v23  ;;  %v10696_v58 = vcombine.high %v15031_v37, %v14937_v23  ;;  %v10700_v56 = vcombine.high %v15032_v40, %v14937_v23 }
 0x180   :  { %v10704_v59 = vcombine.high %v15033_v38, %v14937_v23  ;;  %v3785_v1 = vrot.slane %v3777_v45, %v9509_v53  ;;  %v3792_v14 = vrot.slane %v3778_v12, %v9509_v53  ;;  %v10709_v48 = vrot.slane %v4017_v42, %v9509_v53  ;;  %v15037_v45 = vld [vmem:[#allocation54_spill] sm:$0xff] }
 0x181   :  { %v10712_v21 = vrot.slane %v4018_v31, %v9509_v53  ;;  %v4034_v55 = vcombine.low %v1310_v52, %v1322_v29  ;;  %v4035_v27 = vcombine.low %v1334_v17, %v1346_v24  ;;  %v3794_v63 = vcombine.low %v1355_v39, %v1367_v16  ;;  %8540 = vmatmul.mubr.msk.bf16.gmra.mrb[8].mxu0 %vm3347_vm0, %v10413_v50 }
 0x182   :  { %v3795_v10 = vcombine.low %v1379_v25, %v1391_v6  ;;  %v983_v26 = vcombine.high %v15034_v54, %v14937_v23  ;;  %v992_v57 = vcombine.high %v15035_v41, %v14937_v23  ;;  %v1001_v9 = vcombine.high %v15036_v8, %v14937_v23  ;;  %8543 = vmatprep.mubr.msk.bf16.mxu0 %vm3347_vm0, %v10423_v43 }
 0x183   :  { %v1010_v12 = vcombine.high %v15037_v45, %v14937_v23  ;;  %v1403_v42 = vpack.i.b16 %v10696_v58, %v10692_v7  ;;  %v1415_v50 = vpack.i.b16 %v10704_v59, %v10700_v56  ;;  %v1356_v31 = vshrl.u32 %v10613_v30, 16 }
 0x184   :  { %v1357_v5 = vshrl.u32 %v10617_v4, 16  ;;  %v15038_v52 = vcombine.low %v10364_v22, %v10367_v44  ;;  %v1368_v29 = vshrl.u32 %v10621_v11, 16  ;;  %v1369_v17 = vshrl.u32 %v10625_v33, 16 }
 0x185   :  { %v1380_v43 = vshrl.u32 %v10629_v51, 16  ;;  %v1381_v24 = vshrl.u32 %v10633_v46, 16  ;;  %v15039_v32 = vcombine.low %v10384_v60, %v10387_v18  ;;  %v3776_v30 = vcombine.low %v3768_v3, %v3775_v47 }
 0x186   :  { %8560 = vmatmul.mubr.msk.bf16.gmra.mrb[8].mxu1 %vm3347_vm0, %v15038_v52  ;;  %v10744_v4 = vcombine.low %v3785_v1, %v3792_v14  ;;  %v1392_v22 = vshrl.u32 %v10637_v62, 16  ;;  %v1393_v44 = vshrl.u32 %v10641_v0, 16  ;;  %v4033_v11 = vcombine.low %v10709_v48, %v10712_v21 }
 0x187   :  { %8563 = vmatprep.mubr.msk.bf16.mxu1 %vm3347_vm0, %v15039_v32  ;;  %v10751_v33 = vrot.slane %v4034_v55, %v9509_v53  ;;  %v10754_v51 = vrot.slane %v4035_v27, %v9509_v53  ;;  %v3802_v60 = vrot.slane %v3794_v63, %v9509_v53  ;;  %v3809_v18 = vrot.slane %v3795_v10, %v9509_v53  ;;  %v15043_v63 = vld [vmem:[#allocation12_spill] sm:$0xff] }
 0x188   :  { %v1427_v46 = vpack.i.b16 %v992_v57, %v983_v26  ;;  %v1439_v39 = vpack.i.b16 %v1010_v12, %v1001_v9  ;;  %v10758_v16 = vcombine.low %v1403_v42, %v1415_v50  ;;  %v1358_v62 = vpack.i.b16 %v1357_v5, %v1356_v31  ;;  %v15047_v50 = vld [vmem:[#allocation69_spill] sm:$0xff]  ;;  %v15048_v5 = vld [vmem:[#allocation70_spill] sm:$0xff] }
 0x189   :  { %v1370_v25 = vpack.i.b16 %v1369_v17, %v1368_v29  ;;  %v1382_v0 = vpack.i.b16 %v1381_v24, %v1380_v43  ;;  %v1404_v6 = vshrl.u32 %v10692_v7, 16  ;;  %v1394_v3 = vpack.i.b16 %v1393_v44, %v1392_v22  ;;  %8544 = vmatmul.mubr.msk.bf16.gmra.mrb[12].mxu0 %vm3347_vm0, %v10425_v36  ;;  %v15042_v36 = vld [vmem:[#allocation11_spill] sm:$0xff] }
 0x18a   :  { %v1405_v47 = vshrl.u32 %v10696_v58, 16  ;;  %v1416_v2 = vshrl.u32 %v10700_v56, 16  ;;  %v1417_v37 = vshrl.u32 %v10704_v59, 16  ;;  %v1428_v40 = vshrl.u32 %v983_v26, 16  ;;  %8571 = vmatprep.mubr.msk.bf16.mxu0 %vm3347_vm0, %v10440_v49  ;;  %v15040_v56 = vld [vmem:[#allocation65_spill] sm:$0xff]  ;;  %v15041_v59 = vld [vmem:[#allocation66_spill] sm:$0xff] }
 0x18b   :  { %v1429_v38 = vshrl.u32 %v992_v57, 16  ;;  %v1440_v1 = vshrl.u32 %v1001_v9, 16  ;;  %v1441_v14 = vshrl.u32 %v1010_v12, 16  ;;  %v1019_v7 = vcombine.high %v10081_v13, %v14937_v23  ;;  %v15045_v9 = vld [vmem:[#allocation67_spill] sm:$0xff]  ;;  %v15046_v12 = vld [vmem:[#allocation68_spill] sm:$0xff] }
 0x18c   :  { %v1028_v58 = vcombine.high %v10096_v34, %v14937_v23  ;;  %v1037_v55 = vcombine.high %v15040_v56, %v14937_v23  ;;  %v1046_v27 = vcombine.high %v15041_v59, %v14937_v23  ;;  %v15044_v10 = vcombine.low %v15042_v36, %v15043_v63  ;;  %v15056_v63 = vld [vmem:[#allocation77_spill] sm:$0xff] }
 0x18d   :  { %v4050_v49 = vcombine.low %v10751_v33, %v10754_v51  ;;  %v10782_v54 = vcombine.low %v3802_v60, %v3809_v18  ;;  %v10784_v13 = vcombine.low %v1427_v46, %v1439_v39  ;;  %v3819_v34 = vrot.slane %v10758_v16, %v9509_v53  ;;  %v15049_v46 = vld [vmem:[#allocation13_spill] sm:$0xff] }
 0x18e   :  { %8564 = vmatmul.mubr.msk.bf16.gmra.mrb[12].mxu1 %vm3347_vm0, %v15044_v10  ;;  %v4051_v26 = vcombine.low %v1358_v62, %v1370_v25  ;;  %v4052_v41 = vcombine.low %v1382_v0, %v1394_v3  ;;  %v1406_v57 = vpack.i.b16 %v1405_v47, %v1404_v6  ;;  %v1418_v8 = vpack.i.b16 %v1417_v37, %v1416_v2  ;;  %v15050_v47 = vld [vmem:[#allocation71_spill] sm:$0xff]  ;;  %v15051_v37 = vld [vmem:[#allocation72_spill] sm:$0xff] }
 0x18f   :  { %8591 = vmatprep.mubr.msk.bf16.mxu1 %vm3347_vm0, %v3999_v35  ;;  %v1055_v45 = vcombine.high %v15045_v9, %v14937_v23  ;;  %v1064_v42 = vcombine.high %v15046_v12, %v14937_v23  ;;  %v1073_v31 = vcombine.high %v15047_v50, %v14937_v23  ;;  %v1082_v52 = vcombine.high %v15048_v5, %v14937_v23 }
 0x190   :  { %v1430_v29 = vpack.i.b16 %v1429_v38, %v1428_v40  ;;  %v1442_v61 = vpack.i.b16 %v1441_v14, %v1440_v1  ;;  %v1451_v20 = vpack.i.b16 %v1028_v58, %v1019_v7  ;;  %v1463_v35 = vpack.i.b16 %v1046_v27, %v1037_v55  ;;  %v15052_v1 = vld [vmem:[#allocation73_spill] sm:$0xff] }
 0x191   :  { %v1452_v17 = vshrl.u32 %v1019_v7, 16  ;;  %v1453_v43 = vshrl.u32 %v1028_v58, 16  ;;  %v1464_v24 = vshrl.u32 %v1037_v55, 16  ;;  %v1465_v32 = vshrl.u32 %v1046_v27, 16  ;;  %8572 = vmatmul.mubr.msk.bf16.vlgmr.msra.gmra.mrb[16].mxu0 %vm3347_vm0, %v15049_v46  ;;  %v15053_v7 = vld [vmem:[#allocation74_spill] sm:$0xff]  ;;  %v15054_v58 = vld [vmem:[#allocation75_spill] sm:$0xff] }
 0x192   :  { %v1476_v22 = vshrl.u32 %v1055_v45, 16  ;;  %v1477_v44 = vshrl.u32 %v1064_v42, 16  ;;  %v1488_v60 = vshrl.u32 %v1073_v31, 16  ;;  %v1489_v18 = vshrl.u32 %v1082_v52, 16  ;;  %8575 = vmatprep.mubr.msk.bf16.mxu0 %vm3347_vm0, %v3776_v30  ;;  %v15055_v27 = vld [vmem:[#allocation76_spill] sm:$0xff] }
 0x193   :  { %v4059_v39 = vrot.slane %v4051_v26, %v9509_v53  ;;  %v4066_v62 = vrot.slane %v4052_v41, %v9509_v53  ;;  %v1475_v25 = vpack.i.b16 %v1064_v42, %v1055_v45  ;;  %v1487_v0 = vpack.i.b16 %v1082_v52, %v1073_v31  ;;  %v15057_v26 = vld [vmem:[#allocation78_spill] sm:$0xff] }
 0x194   :  { %v4068_v6 = vcombine.low %v1406_v57, %v1418_v8  ;;  %v4069_v3 = vcombine.low %v1430_v29, %v1442_v61  ;;  %v1091_v2 = vcombine.high %v15050_v47, %v14937_v23  ;;  %v1100_v40 = vcombine.high %v15051_v37, %v14937_v23 }
 0x195   :  { %v3828_v38 = vcombine.low %v1451_v20, %v1463_v35  ;;  %v1109_v14 = vcombine.high %v15052_v1, %v14937_v23  ;;  %v1118_v30 = vcombine.high %v15053_v7, %v14937_v23  ;;  %v1127_v56 = vcombine.high %v15054_v58, %v14937_v23 }
 0x196   :  { %8592 = vmatmul.mubr.msk.bf16.vlgmr.msra.gmra.mrb[16].mxu1 %vm3347_vm0, %v4016_v19  ;;  %v1454_v55 = vpack.i.b16 %v1453_v43, %v1452_v17  ;;  %v1466_v59 = vpack.i.b16 %v1465_v32, %v1464_v24  ;;  %v1478_v28 = vpack.i.b16 %v1477_v44, %v1476_v22  ;;  %v1490_v15 = vpack.i.b16 %v1489_v18, %v1488_v60 }
 0x197   :  { %8595 = vmatprep.mubr.msk.bf16.mxu1 %vm3347_vm0, %v4033_v11  ;;  %v3829_v19 = vcombine.low %v1475_v25, %v1487_v0  ;;  %v1136_v36 = vcombine.high %v15055_v27, %v14937_v23  ;;  %v1145_v10 = vcombine.high %v15056_v63, %v14937_v23  ;;  %v1154_v41 = vcombine.high %v15057_v26, %v14937_v23 }
 0x198   :  { %v1500_v57 = vshrl.u32 %v1091_v2, 16  ;;  %v1501_v8 = vshrl.u32 %v1100_v40, 16  ;;  %v1512_v9 = vshrl.u32 %v1109_v14, 16  ;;  %v1513_v48 = vshrl.u32 %v1118_v30, 16 }
 0x199   :  { %v1524_v21 = vshrl.u32 %v1127_v56, 16  ;;  %v1525_v11 = vshrl.u32 %v1136_v36, 16  ;;  %v1536_v45 = vshrl.u32 %v1145_v10, 16  ;;  %v1537_v12 = vshrl.u32 %v1154_v41, 16  ;;  %8576 = vmatmul.mubr.msk.bf16.gmra.mrb[20].mxu0 %vm3347_vm0, %v10744_v4 }
 0x19a   :  { %v3826_v42 = vrot.slane %v10784_v13, %v9509_v53  ;;  %v4067_v50 = vcombine.low %v4059_v39, %v4066_v62  ;;  %v4085_v31 = vcombine.low %v1454_v55, %v1466_v59  ;;  %v4086_v5 = vcombine.low %v1478_v28, %v1490_v15  ;;  %8579 = vmatprep.mubr.msk.bf16.mxu0 %vm3347_vm0, %v10782_v54 }
 0x19b   :  { %v1499_v52 = vpack.i.b16 %v1100_v40, %v1091_v2  ;;  %v1511_v29 = vpack.i.b16 %v1118_v30, %v1109_v14  ;;  %v1523_v61 = vpack.i.b16 %v1136_v36, %v1127_v56  ;;  %v1535_v20 = vpack.i.b16 %v1154_v41, %v1145_v10 }
 0x19c   :  { %v4076_v35 = vrot.slane %v4068_v6, %v9509_v53  ;;  %v4083_v17 = vrot.slane %v4069_v3, %v9509_v53  ;;  %v3836_v43 = vrot.slane %v3828_v38, %v9509_v53  ;;  %v3843_v13 = vrot.slane %v3829_v19, %v9509_v53 }
 0x19d   :  { %v1502_v4 = vpack.i.b16 %v1501_v8, %v1500_v57  ;;  %v1514_v24 = vpack.i.b16 %v1513_v48, %v1512_v9  ;;  %v1526_v32 = vpack.i.b16 %v1525_v11, %v1524_v21  ;;  %v1538_v22 = vpack.i.b16 %v1537_v12, %v1536_v45 }
 0x19e   :  { %8596 = vmatmul.mubr.msk.bf16.gmra.mrb[20].mxu1 %vm3347_vm0, %v4050_v49  ;;  %v4093_v54 = vrot.slane %v4085_v31, %v9509_v53  ;;  %v4100_v44 = vrot.slane %v4086_v5, %v9509_v53  ;;  %v3827_v60 = vcombine.low %v3819_v34, %v3826_v42  ;;  %v3845_v18 = vcombine.low %v1499_v52, %v1511_v29 }
 0x19f   :  { %8599 = vmatprep.mubr.msk.bf16.mxu1 %vm3347_vm0, %v4067_v50  ;;  %v3846_v46 = vcombine.low %v1523_v61, %v1535_v20  ;;  %v3844_v39 = vcombine.low %v3836_v43, %v3843_v13  ;;  %v4084_v33 = vcombine.low %v4076_v35, %v4083_v17  ;;  %v4102_v51 = vcombine.low %v1502_v4, %v1514_v24 }
 0x1a0   :  { %v4103_v49 = vcombine.low %v1526_v32, %v1538_v22  ;;  %v4101_v62 = vcombine.low %v4093_v54, %v4100_v44  ;;  %v3853_v25 = vrot.slane %v3845_v18, %v9509_v53 }
 0x1a1   :  { %8580 = vmatmul.mubr.msk.bf16.gmra.mrb[24].mxu0 %vm3347_vm0, %v3827_v60  ;;  %v3860_v0 = vrot.slane %v3846_v46, %v9509_v53  ;;  %v4110_v16 = vrot.slane %v4102_v51, %v9509_v53 }
 0x1a2   :  { %8583 = vmatprep.mubr.msk.bf16.mxu0 %vm3347_vm0, %v3844_v39  ;;  %v4117_v34 = vrot.slane %v4103_v49, %v9509_v53 }
 0x1a3   :  { %v3861_v6 = vcombine.low %v3853_v25, %v3860_v0 }
 0x1a4   :  { %v4118_v3 = vcombine.low %v4110_v16, %v4117_v34 }
 0x1a6   :  { %8600 = vmatmul.mubr.msk.bf16.gmra.mrb[24].mxu1 %vm3347_vm0, %v4084_v33 }
 0x1a7   :  { %8603 = vmatprep.mubr.msk.bf16.mxu1 %vm3347_vm0, %v4101_v62 }
 0x1a9   :  { %8584 = vmatmul.mubr.msk.bf16.gmra.mrb[28].mxu0 %vm3347_vm0, %v3861_v6 }
 0x1ae   :  { %8604 = vmatmul.mubr.msk.bf16.gmra.mrb[28].mxu1 %vm3347_vm0, %v4118_v3 }
 0x244   :  { %v8533_v47 = vpop.f32.mrb[0].mxu0 }
 0x245   :  { %v10859_v2 = vmul.f32 0.17677669, %v8533_v47  ;;  %v3406_v37 = vpop.f32.mrb[1].mxu0 }
 0x246   :  { %v8534_v40 = vpop.f32.mrb[2].mxu0  ;;  %v10861_v1 = vmul.f32 0.17677669, %v3406_v37 }
 0x247   :  { %v8553_v38 = vpop.f32.mrb[0].mxu1  ;;  %v10863_v14 = vmul.f32 0.17677669, %v8534_v40  ;;  %v3409_v7 = vpop.f32.mrb[3].mxu0  ;;  %v4311_v30 = vsel %vm4304_vm1, %v10859_v2, -inf }
 0x248   :  { %4312 = vmax.xlane.f32.xlu0 %v4311_v30  ;;  %v3663_v58 = vpop.f32.mrb[1].mxu1  ;;  %v10867_v56 = vmul.f32 0.17677669, %v3409_v7  ;;  %v10871_v59 = vmul.f32 0.17677669, %v8553_v38  ;;  %v4305_v19 = vsel %vm4304_vm1, %v10861_v1, -inf }
 0x249   :  { %v4314_v55 = vsel %vm4304_vm1, %v10863_v14, -inf  ;;  %v8554_v28 = vpop.f32.mrb[2].mxu1  ;;  %v10877_v63 = vmul.f32 0.17677669, %v3663_v58 }
 0x24a   :  { %4315 = vmax.xlane.f32.xlu1 %v4314_v55  ;;  %v3666_v15 = vpop.f32.mrb[3].mxu1  ;;  %v10875_v27 = vmul.f32 0.17677669, %v8554_v28  ;;  %v4308_v10 = vsel %vm4304_vm1, %v10867_v56, -inf  ;;  %v4359_v26 = vsel %vm4304_vm1, %v10871_v59, -inf }
 0x24b   :  { %15059 = vst [vmem:[#allocation15_spill] sm:$0xff] %v10877_v63  ;;  %v10883_v9 = vmul.f32 0.17677669, %v3666_v15  ;;  %v4353_v45 = vsel %vm4304_vm1, %v10877_v63, -inf }
 0x24c   :  { %15058 = vst [vmem:[#allocation14_spill] sm:$0xff] %v10875_v27  ;;  %4306 = vmax.xlane.f32.xlu0 %v4305_v19  ;;  %v8537_v36 = vpop.f32.mrb[4].mxu0  ;;  %v4362_v48 = vsel %vm4304_vm1, %v10875_v27, -inf }
 0x24d   :  { %v3422_v41 = vpop.f32.mrb[5].mxu0  ;;  %15060 = vst [vmem:[#allocation16_spill] sm:$0xff] %v10883_v9  ;;  %v10889_v12 = vmul.f32 0.17677669, %v8537_v36  ;;  %v4356_v31 = vsel %vm4304_vm1, %v10883_v9, -inf }
 0x24e   :  { %4309 = vmax.xlane.f32.xlu1 %v4308_v10  ;;  %v8538_v57 = vpop.f32.mrb[6].mxu0  ;;  %v10895_v29 = vmul.f32 0.17677669, %v3422_v41 }
 0x24f   :  { %v3425_v21 = vpop.f32.mrb[7].mxu0  ;;  %15061 = vst [vmem:[#allocation17_spill] sm:$0xff] %v10889_v12  ;;  %v10893_v5 = vmul.f32 0.17677669, %v8538_v57  ;;  %v4323_v61 = vsel %vm4304_vm1, %v10889_v12, -inf }
 0x250   :  { %v8557_v8 = vpop.f32.mrb[4].mxu1  ;;  %4360 = vmax.xlane.f32.xlu0 %v4359_v26  ;;  %15063 = vst [vmem:[#allocation27_spill] sm:$0xff] %v10895_v29  ;;  %v10901_v13 = vmul.f32 0.17677669, %v3425_v21  ;;  %v4317_v22 = vsel %vm4304_vm1, %v10895_v29, -inf  ;;  %v15075_v21 = vld [vmem:[#allocation8_spill] sm:$0xff] }
 0x251   :  { %v3679_v11 = vpop.f32.mrb[5].mxu1  ;;  %15062 = vst [vmem:[#allocation18_spill] sm:$0xff] %v10893_v5  ;;  %v4326_v43 = vsel %vm4304_vm1, %v10893_v5, -inf  ;;  %v10903_v32 = vmul.f32 0.17677669, %v8557_v8 }
 0x252   :  { %v8558_v42 = vpop.f32.mrb[6].mxu1  ;;  %4363 = vmax.xlane.f32.xlu1 %v4362_v48  ;;  %15064 = vst [vmem:[#allocation30_spill] sm:$0xff] %v10901_v13  ;;  %v4320_v18 = vsel %vm4304_vm1, %v10901_v13, -inf  ;;  %v10911_v39 = vmul.f32 0.17677669, %v3679_v11  ;;  %v10942_v11 = vsub.s32 0, %v15075_v21 }
 0x253   :  { %v3682_v50 = vpop.f32.mrb[7].mxu1  ;;  %15065 = vst [vmem:[#allocation62_spill] sm:$0xff] %v10903_v32  ;;  %v10907_v60 = vmul.f32 0.17677669, %v8558_v42  ;;  %v4371_v33 = vsel %vm4304_vm1, %v10903_v32, -inf }
 0x254   :  { %4354 = vmax.xlane.f32.xlu0 %v4353_v45  ;;  %v8541_v52 = vpop.f32.mrb[8].mxu0  ;;  %15067 = vst [vmem:[#allocation63_spill] sm:$0xff] %v10911_v39  ;;  %v10915_v25 = vmul.f32 0.17677669, %v3682_v50  ;;  %v4365_v6 = vsel %vm4304_vm1, %v10911_v39, -inf  ;;  %v10945_v45 = vsub.s32 1, %v15075_v21 }
 0x255   :  { %v3438_v20 = vpop.f32.mrb[9].mxu0  ;;  %15066 = vst [vmem:[#allocation64_spill] sm:$0xff] %v10907_v60  ;;  %v4374_v0 = vsel %vm4304_vm1, %v10907_v60, -inf  ;;  %v10921_v3 = vmul.f32 0.17677669, %v8541_v52 }
 0x256   :  { %4357 = vmax.xlane.f32.xlu1 %v4356_v31  ;;  %v8542_v35 = vpop.f32.mrb[10].mxu0  ;;  %15068 = vst [vmem:[#allocation57_spill] sm:$0xff] %v10915_v25  ;;  %v4368_v40 = vsel %vm4304_vm1, %v10915_v25, -inf  ;;  %v10927_v30 = vmul.f32 0.17677669, %v3438_v20 }
 0x257   :  { %v3441_v4 = vpop.f32.mrb[11].mxu0  ;;  %15069 = vst [vmem:[#allocation56_spill] sm:$0xff] %v10921_v3  ;;  %v10925_v38 = vmul.f32 0.17677669, %v8542_v35  ;;  %v4335_v58 = vsel %vm4304_vm1, %v10921_v3, -inf }
 0x258   :  { %4324 = vmax.xlane.f32.xlu0 %v4323_v61  ;;  %15071 = vst [vmem:[#allocation58_spill] sm:$0xff] %v10927_v30  ;;  %v10931_v28 = vmul.f32 0.17677669, %v3441_v4  ;;  %v4329_v57 = vsel %vm4304_vm1, %v10927_v30, -inf }
 0x259   :  { %v8561_v17 = vpop.f32.mrb[8].mxu1  ;;  %15070 = vst [vmem:[#allocation59_spill] sm:$0xff] %v10925_v38  ;;  %v4338_v36 = vsel %vm4304_vm1, %v10925_v38, -inf }
 0x25a   :  { %v3695_v24 = vpop.f32.mrb[9].mxu1  ;;  %4327 = vmax.xlane.f32.xlu1 %v4326_v43  ;;  %15072 = vst [vmem:[#allocation83_spill] sm:$0xff] %v10931_v28  ;;  %v10935_v26 = vmul.f32 0.17677669, %v8561_v17  ;;  %v4332_v50 = vsel %vm4304_vm1, %v10931_v28, -inf }
 0x25b   :  { %v8562_v54 = vpop.f32.mrb[10].mxu1  ;;  %v10939_v8 = vmul.f32 0.17677669, %v3695_v24 }
 0x25c   :  { %v3698_v44 = vpop.f32.mrb[11].mxu1  ;;  %4318 = vmax.xlane.f32.xlu0 %v4317_v22  ;;  %v8545_v46 = vpop.f32.mrb[12].mxu0  ;;  %15073 = vst [vmem:[#allocation87_spill] sm:$0xff] %v10935_v26  ;;  %v10947_v42 = vmul.f32 0.17677669, %v8562_v54  ;;  %v4383_v35 = vsel %vm4304_vm1, %v10935_v26, -inf }
 0x25d   :  { %v3454_v51 = vpop.f32.mrb[13].mxu0  ;;  %15074 = vst [vmem:[#allocation79_spill] sm:$0xff] %v10939_v8  ;;  %v10951_v52 = vmul.f32 0.17677669, %v3698_v44  ;;  %v10953_v61 = vmul.f32 0.17677669, %v8545_v46 }
 0x25e   :  { %4321 = vmax.xlane.f32.xlu1 %v4320_v18  ;;  %v8546_v49 = vpop.f32.mrb[14].mxu0  ;;  %15076 = vst [vmem:[#allocation86_spill] sm:$0xff] %v10947_v42  ;;  %v10955_v20 = vmul.f32 0.17677669, %v3454_v51  ;;  %v4377_v24 = vsel %vm4304_vm1, %v10939_v8, -inf }
 0x25f   :  { %v3457_v16 = vpop.f32.mrb[15].mxu0  ;;  %15077 = vst [vmem:[#allocation88_spill] sm:$0xff] %v10951_v52  ;;  %15078 = vst [vmem:[#allocation80_spill] sm:$0xff] %v10953_v61  ;;  %v10959_v17 = vmul.f32 0.17677669, %v8546_v49  ;;  %v4386_v49 = vsel %vm4304_vm1, %v10947_v42, -inf }
 0x260   :  { %4372 = vmax.xlane.f32.xlu0 %v4371_v33  ;;  %15079 = vst [vmem:[#allocation82_spill] sm:$0xff] %v10955_v20  ;;  %v10965_v22 = vmul.f32 0.17677669, %v3457_v16  ;;  %v4380_v16 = vsel %vm4304_vm1, %v10951_v52, -inf }
 0x261   :  { %v8565_v62 = vpop.f32.mrb[12].mxu1  ;;  %15080 = vst [vmem:[#allocation81_spill] sm:$0xff] %v10959_v17 }
 0x262   :  { %v3711_v34 = vpop.f32.mrb[13].mxu1  ;;  %4375 = vmax.xlane.f32.xlu1 %v4374_v0  ;;  %v10961_v43 = vmul.f32 0.17677669, %v8565_v62  ;;  %15082 = vst [vmem:[#allocation84_spill] sm:$0xff] %v10965_v22 }
 0x263   :  { %v8566_v47 = vpop.f32.mrb[14].mxu1  ;;  %v10967_v54 = vmul.f32 0.17677669, %v3711_v34  ;;  %v4347_v34 = vsel %vm4304_vm1, %v10953_v61, -inf }
 0x264   :  { %v3714_v37 = vpop.f32.mrb[15].mxu1  ;;  %4366 = vmax.xlane.f32.xlu0 %v4365_v6  ;;  %v8573_v7 = vpop.f32.mrb[16].mxu0  ;;  %15081 = vst [vmem:[#allocation85_spill] sm:$0xff] %v10961_v43  ;;  %v10969_v18 = vmul.f32 0.17677669, %v8566_v47  ;;  %v4341_v47 = vsel %vm4304_vm1, %v10955_v20, -inf }
 0x265   :  { %v3920_v55 = vpop.f32.mrb[17].mxu0  ;;  %15083 = vst [vmem:[#allocation10_spill] sm:$0xff] %v10967_v54  ;;  %v10971_v46 = vmul.f32 0.17677669, %v3714_v37  ;;  %v10975_v62 = vmul.f32 0.17677669, %v8573_v7 }
 0x266   :  { %4369 = vmax.xlane.f32.xlu1 %v4368_v40  ;;  %v8574_v15 = vpop.f32.mrb[18].mxu0  ;;  %15084 = vst [vmem:[#allocation19_spill] sm:$0xff] %v10969_v18  ;;  %v10977_v0 = vmul.f32 0.17677669, %v3920_v55  ;;  %v4350_v7 = vsel %vm4304_vm1, %v10959_v17, -inf  ;;  %v10995_v55 = vsel %vm4304_vm1, %v10961_v43, -inf }
 0x267   :  { %v3923_v10 = vpop.f32.mrb[19].mxu0  ;;  %15085 = vst [vmem:[#allocation20_spill] sm:$0xff] %v10971_v46  ;;  %15086 = vst [vmem:[#allocation21_spill] sm:$0xff] %v10975_v62  ;;  %v10985_v37 = vmul.f32 0.17677669, %v8574_v15  ;;  %v11001_v15 = vsel %vm4304_vm1, %v10969_v18, -inf }
 0x268   :  { %4336 = vmax.xlane.f32.xlu0 %v4335_v58  ;;  %15087 = vst [vmem:[#allocation22_spill] sm:$0xff] %v10977_v0  ;;  %v10991_v58 = vsel %vm4304_vm1, %v10965_v22, -inf  ;;  %v11005_v21 = vsel %vm4304_vm1, %v10967_v54, -inf  ;;  %v213_v22 = vld [vmem:[%s14519_s4 + $0x12] sm:$0x1] }
 0x269   :  { %v8593_v19 = vpop.f32.mrb[16].mxu1  ;;  %15088 = vst [vmem:[#allocation23_spill] sm:$0xff] %v10985_v37  ;;  %v341_v26 = vunpack.c.0.s8 %v213_v22 }
 0x26a   :  { %v4177_v41 = vpop.f32.mrb[17].mxu1  ;;  %4339 = vmax.xlane.f32.xlu1 %v4338_v36  ;;  %v10997_v36 = vmul.f32 0.17677669, %v8593_v19  ;;  %v11015_v19 = vsel %vm4304_vm1, %v10975_v62, -inf  ;;  %v211_v62 = vld [vmem:[%s14519_s4 + $0x10] sm:$0x1] }
 0x26b   :  { %v8594_v48 = vpop.f32.mrb[18].mxu1  ;;  %v11021_v53 = vmul.f32 0.17677669, %v4177_v41 }
 0x26c   :  { %v4180_v31 = vpop.f32.mrb[19].mxu1  ;;  %4330 = vmax.xlane.f32.xlu0 %v4329_v57  ;;  %v8577_v4 = vpop.f32.mrb[20].mxu0  ;;  %15089 = vst [vmem:[#allocation24_spill] sm:$0xff] %v10997_v36  ;;  %v11023_v18 = vmul.f32 0.17677669, %v8594_v48 }
 0x26d   :  { %v3936_v44 = vpop.f32.mrb[21].mxu0  ;;  %15091 = vst [vmem:[#allocation26_spill] sm:$0xff] %v11021_v53  ;;  %v11038_v41 = vmul.f32 0.17677669, %v8577_v4 }
 0x26e   :  { %4333 = vmax.xlane.f32.xlu1 %v4332_v50  ;;  %v8578_v33 = vpop.f32.mrb[22].mxu0  ;;  %v11009_v50 = vsel %vm4304_vm1, %v10971_v46, -inf  ;;  %15092 = vst [vmem:[#allocation28_spill] sm:$0xff] %v11023_v18  ;;  %v11027_v46 = vsel %vm4304_vm1, %v10985_v37, -inf  ;;  %v11043_v37 = vmul.f32 0.17677669, %v3936_v44 }
 0x26f   :  { %v3939_v6 = vpop.f32.mrb[23].mxu0  ;;  %15094 = vst [vmem:[#allocation31_spill] sm:$0xff] %v11038_v41  ;;  %v11054_v4 = vmul.f32 0.17677669, %v8578_v33  ;;  %v214_v44 = vld [vmem:[%s14519_s4 + $0x13] sm:$0x1] }
 0x270   :  { %4384 = vmax.xlane.f32.xlu0 %v4383_v35  ;;  %v11011_v35 = vmul.f32 0.17677669, %v3923_v10  ;;  %v11029_v10 = vmul.f32 0.17677669, %v4180_v31  ;;  %15095 = vst [vmem:[#allocation32_spill] sm:$0xff] %v11043_v37  ;;  %v11074_v8 = vsel %vm4304_vm1, %v11023_v18, -inf }
 0x271   :  { %v8597_v51 = vpop.f32.mrb[20].mxu1  ;;  %15096 = vst [vmem:[#allocation33_spill] sm:$0xff] %v11054_v4  ;;  %v215_v33 = vld [vmem:[%s14519_s4 + $0x14] sm:$0x1]  ;;  %v11076_v42 = vmul.f32 0.17677669, %v3939_v6  ;;  %v342_v6 = vunpack.c.0.s8 %v214_v44 }
 0x272   :  { %v4193_v40 = vpop.f32.mrb[21].mxu1  ;;  %4387 = vmax.xlane.f32.xlu1 %v4386_v49  ;;  %15090 = vst [vmem:[#allocation25_spill] sm:$0xff] %v11011_v35  ;;  %v11019_v49 = vsel %vm4304_vm1, %v10977_v0, -inf  ;;  %15093 = vst [vmem:[#allocation29_spill] sm:$0xff] %v11029_v10  ;;  %v11036_v0 = vsel %vm4304_vm1, %v10997_v36, -inf  ;;  %v11052_v36 = vsel %vm4304_vm1, %v11011_v35, -inf  ;;  %v339_v35 = vunpack.c.0.s8 %v211_v62 }
 0x273   :  { %v8598_v57 = vpop.f32.mrb[22].mxu1  ;;  %v11065_v17 = vmul.f32 0.17677669, %v8597_v51  ;;  %15098 = vst [vmem:[#allocation35_spill] sm:$0xff] %v11076_v42  ;;  %v11082_v51 = vsel %vm4304_vm1, %v11029_v10, -inf  ;;  %v11096_v22 = vsel %vm4304_vm1, %v11043_v37, -inf  ;;  %v343_v10 = vunpack.c.0.s8 %v215_v33 }
 0x274   :  { %v4196_v23 = vpop.f32.mrb[23].mxu1  ;;  %4378 = vmax.xlane.f32.xlu0 %v4377_v24  ;;  %v8581_v54 = vpop.f32.mrb[24].mxu0  ;;  %v212_v24 = vld [vmem:[%s14519_s4 + $0x11] sm:$0x1]  ;;  %v216_v62 = vld [vmem:[%s14519_s4 + $0x15] sm:$0x1] }
 0x275   :  { %v3952_v48 = vpop.f32.mrb[25].mxu0  ;;  %15097 = vst [vmem:[#allocation34_spill] sm:$0xff] %v11065_v17  ;;  %v340_v52 = vunpack.c.0.s8 %v212_v24  ;;  %v217_v24 = vld [vmem:[%s14519_s4 + $0x16] sm:$0x1]  ;;  %v11102_v18 = vsel %vm4304_vm1, %v11054_v4, -inf  ;;  %v344_v33 = vunpack.c.0.s8 %v216_v62  ;;  %v11126_v3 = vsel %vm4304_vm1, %v11076_v42, -inf }
 0x276   :  { %4381 = vmax.xlane.f32.xlu1 %v4380_v16  ;;  %v8582_v31 = vpop.f32.mrb[26].mxu0  ;;  %v11063_v16 = vsel %vm4304_vm1, %v11021_v53, -inf  ;;  %v11104_v30 = vmul.f32 0.17677669, %v4196_v23  ;;  %v218_v44 = vld [vmem:[%s14519_s4 + $0x17] sm:$0x1]  ;;  %v345_v4 = vunpack.c.0.s8 %v217_v24  ;;  %v11121_v23 = vcvt.s32.f32 %v341_v26 }
 0x277   :  { %v11056_v20 = vpop.f32.mrb[27].mxu0  ;;  %v11113_v37 = vcvt.s32.f32 %v340_v52  ;;  %v11138_v62 = vcvt.s32.f32 %v342_v6  ;;  %v346_v24 = vunpack.c.0.s8 %v218_v44  ;;  %v11146_v42 = vcvt.s32.f32 %v343_v10 }
 0x278   :  { %4348 = vmax.xlane.f32.xlu0 %v4347_v34  ;;  %v11078_v34 = vmul.f32 0.17677669, %v4193_v40  ;;  %v11092_v40 = vsel %vm4304_vm1, %v11038_v41, -inf  ;;  %15101 = vst [vmem:[#allocation60_spill] sm:$0xff] %v11104_v30  ;;  %v11111_v41 = vcvt.s32.f32 %v339_v35  ;;  %v11132_v35 = vmul.f32 0.17677669, %v8581_v54 }
 0x279   :  { %v11045_v43 = vpop.f32.mrb[24].mxu1  ;;  %v219_v54 = vld [vmem:[%s14519_s4 + $0x18] sm:$0x1]  ;;  %v11155_v6 = vmul.f32 0.17677669, %v3952_v48  ;;  %v4888_v44 = vrot.slane %v11113_v37, %v10942_v11  ;;  %v11171_v13 = vcvt.s32.f32 %v344_v33  ;;  %v4892_v48 = vrot.slane %v11121_v23, %v10942_v11 }
 0x27a   :  { %v11067_v61 = vpop.f32.mrb[25].mxu1  ;;  %15099 = vst [vmem:[#allocation36_spill] sm:$0xff] %v11078_v34  ;;  %4351 = vmax.xlane.f32.xlu1 %v4350_v7  ;;  %v11098_v7 = vmul.f32 0.17677669, %v8598_v57  ;;  %v11117_v57 = vsel %vm4304_vm1, %v11065_v17, -inf  ;;  %v11130_v52 = vsel %vm4304_vm1, %v11078_v34, -inf  ;;  %v4884_v10 = vrot.slane %v11111_v41, %v10942_v11 }
 0x27b   :  { %v8602_v53 = vpop.f32.mrb[26].mxu1  ;;  %15102 = vst [vmem:[#allocation41_spill] sm:$0xff] %v11132_v35  ;;  %v220_v34 = vld [vmem:[%s14519_s4 + $0x19] sm:$0x1]  ;;  %15103 = vst [vmem:[#allocation42_spill] sm:$0xff] %v11155_v6  ;;  %v11195_v9 = vcvt.s32.f32 %v346_v24 }
 0x27c   :  { %v4212_v28 = vpop.f32.mrb[27].mxu1  ;;  %15100 = vst [vmem:[#allocation55_spill] sm:$0xff] %v11098_v7  ;;  %4342 = vmax.xlane.f32.xlu0 %v4341_v47  ;;  %v11106_v38 = vpop.f32.mrb[28].mxu0  ;;  %v11142_v26 = vsel %vm4304_vm1, %v11098_v7, -inf  ;;  %v11159_v7 = vsel %vm4304_vm1, %v11104_v30, -inf  ;;  %v11180_v30 = vsel %vm4304_vm1, %v11132_v35, -inf  ;;  %v348_v5 = vunpack.c.0.s8 %v220_v34 }
 0x27d   :  { %v11119_v47 = vpop.f32.mrb[29].mxu0  ;;  %v11167_v60 = vmul.f32 0.17677669, %v8582_v31  ;;  %v4896_v31 = vrot.slane %v11138_v62, %v10942_v11  ;;  %v221_v33 = vld [vmem:[%s14519_s4 + $0x1a] sm:$0x1]  ;;  %v11200_v35 = vsel %vm4304_vm1, %v11155_v6, -inf }
 0x27e   :  { %4345 = vmax.xlane.f32.xlu1 %v10991_v58  ;;  %v11134_v17 = vpop.f32.mrb[30].mxu0  ;;  %v11190_v12 = vmul.f32 0.17677669, %v11056_v20  ;;  %v11203_v63 = vmul.f32 0.17677669, %v11067_v61  ;;  %v4900_v20 = vrot.slane %v11146_v42, %v10942_v11  ;;  %v349_v61 = vunpack.c.0.s8 %v221_v33 }
 0x27f   :  { %v11144_v58 = vpop.f32.mrb[31].mxu0  ;;  %15104 = vst [vmem:[#allocation37_spill] sm:$0xff] %v11167_v60  ;;  %v11213_v34 = vmul.f32 0.17677669, %v4212_v28  ;;  %v222_v24 = vld [vmem:[%s14519_s4 + $0x1b] sm:$0x1]  ;;  %v11224_v27 = vcvt.s32.f32 %v348_v5 }
 0x280   :  { %4396 = vmax.xlane.f32.xlu0 %v10995_v55  ;;  %v11173_v55 = vcvt.s32.f32 %v345_v4  ;;  %v347_v4 = vunpack.c.0.s8 %v219_v54  ;;  %15105 = vst [vmem:[#allocation38_spill] sm:$0xff] %v11190_v12  ;;  %15107 = vst [vmem:[#allocation40_spill] sm:$0xff] %v11203_v63  ;;  %v11205_v54 = vmul.f32 0.17677669, %v8602_v53  ;;  %v5350_v53 = vsel %vm5329_vm2, %v4888_v44, %v4884_v10  ;;  %v223_v44 = vld [vmem:[%s14519_s4 + $0x1c] sm:$0x1] }
 0x281   :  { %v11136_v25 = vpop.f32.mrb[28].mxu1  ;;  %15109 = vst [vmem:[#allocation44_spill] sm:$0xff] %v11213_v34  ;;  %v11228_v28 = vsel %vm4304_vm1, %v11190_v12, -inf  ;;  %v11245_v10 = vsel %vm4304_vm1, %v11203_v63, -inf  ;;  %v11251_v33 = vmul.f32 0.17677669, %v11106_v38 }
 0x282   :  { %v11161_v39 = vpop.f32.mrb[29].mxu1  ;;  %4399 = vmax.xlane.f32.xlu1 %v11001_v15  ;;  %v11193_v15 = vmul.f32 0.17677669, %v11045_v43  ;;  %15108 = vst [vmem:[#allocation43_spill] sm:$0xff] %v11205_v54  ;;  %v11211_v43 = vsel %vm4304_vm1, %v11167_v60, -inf  ;;  %v11222_v6 = vcvt.s32.f32 %v347_v4  ;;  %v11241_v5 = vsel %vm4304_vm1, %v11205_v54, -inf }
 0x283   :  { %v11169_v32 = vpop.f32.mrb[30].mxu1  ;;  %v350_v4 = vunpack.c.0.s8 %v222_v24  ;;  %v11259_v63 = vsel %vm4304_vm1, %v11213_v34, -inf  ;;  %v224_v54 = vld [vmem:[%s14519_s4 + $0x1d] sm:$0x1]  ;;  %v4920_v24 = vrot.slane %v11224_v27, %v10942_v11  ;;  %v11277_v34 = vmul.f32 0.17677669, %v11134_v17 }
 0x284   :  { %v11182_v29 = vpop.f32.mrb[31].mxu1  ;;  %15106 = vst [vmem:[#allocation39_spill] sm:$0xff] %v11193_v15  ;;  %4390 = vmax.xlane.f32.xlu0 %v11005_v21  ;;  %v11232_v21 = vsel %vm4304_vm1, %v11193_v15, -inf  ;;  %v4916_v38 = vrot.slane %v11222_v6, %v10942_v11  ;;  %v11280_v15 = vmul.f32 0.17677669, %v11136_v25  ;;  %v352_v60 = vunpack.c.0.s8 %v224_v54 }
 0x285   :  { %15111 = vst [vmem:[#allocation46_spill] sm:$0xff] %v11277_v34  ;;  %v225_v25 = vld [vmem:[%s14519_s4 + $0x1e] sm:$0x1] }
 0x286   :  { %4393 = vmax.xlane.f32.xlu1 %v11009_v50  ;;  %v11254_v50 = vcvt.s32.f32 %v349_v61  ;;  %v6109_v61 = vrot.slane %v11111_v41, %v10945_v45  ;;  %15112 = vst [vmem:[#allocation61_spill] sm:$0xff] %v11280_v15  ;;  %v11288_v41 = vmul.f32 0.17677669, %v11144_v58  ;;  %v5357_v17 = vsel %vm5329_vm2, %v4920_v24, %v4916_v38 }
 0x287   :  { %v6141_v58 = vrot.slane %v11222_v6, %v10945_v45  ;;  %v11317_v6 = vmul.f32 0.17677669, %v11161_v39  ;;  %v6121_v24 = vrot.slane %v11138_v62, %v10945_v45  ;;  %v195_v39 = vld [vmem:[%s14519_s4] sm:$0x1]  ;;  %v226_v62 = vld [vmem:[%s14519_s4 + $0x1f] sm:$0x1] }
 0x288   :  { %4408 = vmax.xlane.f32.xlu0 %v11015_v19  ;;  %v5351_v19 = vsel %vm5331_vm3, %v4892_v48, %v5350_v53  ;;  %v11269_v48 = vmul.f32 0.17677669, %v11119_v47  ;;  %v6113_v53 = vrot.slane %v11113_v37, %v10945_v45  ;;  %v478_v47 = vcvt.s32.f32 %v350_v4  ;;  %15113 = vst [vmem:[#allocation47_spill] sm:$0xff] %v11288_v41 }
 0x289   :  { %v5352_v12 = vsel %vm5333_vm4, %v4896_v31, %v5351_v19  ;;  %v4924_v37 = vrot.slane %v11254_v50, %v10942_v11  ;;  %v6145_v31 = vrot.slane %v11224_v27, %v10945_v45  ;;  %15114 = vst [vmem:[#allocation48_spill] sm:$0xff] %v11317_v6  ;;  %v11321_v27 = vsel %vm4304_vm1, %v11280_v15, -inf }
 0x28a   :  { %4411 = vmax.xlane.f32.xlu1 %v11027_v46  ;;  %15110 = vst [vmem:[#allocation45_spill] sm:$0xff] %v11269_v48  ;;  %v351_v46 = vunpack.c.0.s8 %v223_v44  ;;  %v11285_v44 = vsel %vm4304_vm1, %v11251_v33, -inf  ;;  %v11305_v54 = vsel %vm4304_vm1, %v11269_v48, -inf  ;;  %v6568_v19 = vsel %vm5329_vm2, %v6113_v53, %v6109_v61 }
 0x28b   :  { %v4928_v38 = vrot.slane %v478_v47, %v10942_v11  ;;  %v15115_v61 = vrot.slane %v11171_v13, %v10942_v11 }
 0x28c   :  { %4402 = vmax.xlane.f32.xlu0 %v11019_v49  ;;  %v6117_v49 = vrot.slane %v11121_v23, %v10945_v45  ;;  %v11308_v4 = vcvt.s32.f32 %v351_v46  ;;  %v11314_v23 = vsel %vm4304_vm1, %v11277_v34, -inf  ;;  %v196_v46 = vld [vmem:[%s14519_s4 + $0x1] sm:$0x1] }
 0x28e   :  { %4405 = vmax.xlane.f32.xlu1 %v11052_v36  ;;  %v5353_v36 = vsel %vm5335_vm5, %v4900_v20, %v5352_v12  ;;  %v353_v12 = vunpack.c.0.s8 %v225_v25  ;;  %v5358_v20 = vsel %vm5331_vm3, %v4924_v37, %v5357_v17  ;;  %v6569_v37 = vsel %vm5331_vm3, %v6117_v49, %v6568_v19 }
 0x28f   :  { %v5354_v53 = vsel %vm5337_vm6, %v15115_v61, %v5353_v36  ;;  %v6575_v25 = vsel %vm5329_vm2, %v6145_v31, %v6141_v58  ;;  %v11348_v17 = vmul.f32 0.17677669, %v11169_v32  ;;  %v4932_v36 = vrot.slane %v11308_v4, %v10942_v11  ;;  %v197_v32 = vld [vmem:[%s14519_s4 + $0x2] sm:$0x1] }
 0x290   :  { %4456 = vmax.xlane.f32.xlu0 %v11036_v0  ;;  %v6149_v0 = vrot.slane %v11254_v50, %v10945_v45  ;;  %v11343_v50 = vcvt.s32.f32 %v352_v60  ;;  %v6125_v61 = vrot.slane %v11146_v42, %v10945_v45  ;;  %v5359_v60 = vsel %vm5333_vm4, %v4928_v38, %v5358_v20 }
 0x291   :  { %15116 = vst [vmem:[#allocation49_spill] sm:$0xff] %v11348_v17  ;;  %v6153_v49 = vrot.slane %v478_v47, %v10945_v45  ;;  %v323_v58 = vunpack.c.0.s8 %v195_v39  ;;  %v324_v31 = vunpack.c.0.s8 %v196_v46  ;;  %v354_v19 = vunpack.c.0.s8 %v226_v62 }
 0x292   :  { %4459 = vmax.xlane.f32.xlu1 %v11074_v8  ;;  %v11352_v8 = vsel %vm4304_vm1, %v11288_v41, -inf  ;;  %v11364_v15 = vcvt.s32.f32 %v353_v12  ;;  %v6570_v41 = vsel %vm5333_vm4, %v6121_v24, %v6569_v37  ;;  %v6576_v48 = vsel %vm5331_vm3, %v6149_v0, %v6575_v25  ;;  %v198_v24 = vld [vmem:[%s14519_s4 + $0x3] sm:$0x1]  ;;  %v203_v25 = vld [vmem:[%s14519_s4 + $0x8] sm:$0x1] }
 0x293   :  { %v11370_v42 = vmul.f32 0.17677669, %v11182_v29  ;;  %v15118_v47 = vrot.slane %v11173_v55, %v10942_v11  ;;  %v4936_v12 = vrot.slane %v11343_v50, %v10942_v11  ;;  %v5360_v20 = vsel %vm5335_vm5, %v4932_v36, %v5359_v60  ;;  %v204_v36 = vld [vmem:[%s14519_s4 + $0x9] sm:$0x1] }
 0x294   :  { %4450 = vmax.xlane.f32.xlu0 %v11063_v16  ;;  %v11374_v16 = vsel %vm4304_vm1, %v11317_v6, -inf  ;;  %v6157_v29 = vrot.slane %v11308_v4, %v10945_v45  ;;  %v325_v0 = vunpack.c.0.s8 %v197_v32  ;;  %v6571_v39 = vsel %vm5335_vm5, %v6125_v61, %v6570_v41  ;;  %v200_v32 = vld [vmem:[%s14519_s4 + $0x5] sm:$0x1] }
 0x295   :  { %15117 = vst [vmem:[#allocation50_spill] sm:$0xff] %v11370_v42  ;;  %v5355_v38 = vsel %vm5339_vm7, %v15118_v47, %v5354_v53  ;;  %v6577_v46 = vsel %vm5333_vm4, %v6153_v49, %v6576_v48  ;;  %v199_v53 = vld [vmem:[%s14519_s4 + $0x4] sm:$0x1]  ;;  %v11396_v62 = vcvt.s32.f32 %v323_v58  ;;  %v11402_v4 = vsel %vm4304_vm1, %v11348_v17, -inf  ;;  %v201_v58 = vld [vmem:[%s14519_s4 + $0x6] sm:$0x1] }
 0x296   :  { %4453 = vmax.xlane.f32.xlu1 %v11082_v51  ;;  %v6129_v51 = vrot.slane %v11171_v13, %v10945_v45  ;;  %v11398_v13 = vcvt.s32.f32 %v324_v31  ;;  %v15119_v37 = vrot.slane %v11195_v9, %v10942_v11  ;;  %v11410_v41 = vcvt.s32.f32 %v354_v19 }
 0x297   :  { %v4940_v48 = vrot.slane %v11364_v15, %v10942_v11  ;;  %v5361_v61 = vsel %vm5337_vm6, %v4936_v12, %v5360_v20  ;;  %v6133_v60 = vrot.slane %v11173_v55, %v10945_v45  ;;  %v6161_v49 = vrot.slane %v11343_v50, %v10945_v45  ;;  %v202_v55 = vld [vmem:[%s14519_s4 + $0x7] sm:$0x1]  ;;  %v205_v20 = vld [vmem:[%s14519_s4 + $0xa] sm:$0x1] }
 0x298   :  { %4420 = vmax.xlane.f32.xlu0 %v11092_v40  ;;  %v11408_v40 = vsel %vm5341_vm8, %v15119_v37, %v5355_v38  ;;  %v326_v31 = vunpack.c.0.s8 %v198_v24  ;;  %v6572_v19 = vsel %vm5337_vm6, %v6129_v51, %v6571_v39  ;;  %v327_v47 = vunpack.c.0.s8 %v199_v53 }
 0x299   :  { %v11437_v38 = vcvt.s32.f32 %v325_v0  ;;  %v4820_v50 = vrot.slane %v11396_v62, %v10942_v11  ;;  %v4824_v12 = vrot.slane %v11398_v13, %v10942_v11  ;;  %v331_v51 = vunpack.c.0.s8 %v203_v25 }
 0x29a   :  { %4423 = vmax.xlane.f32.xlu1 %v11102_v18  ;;  %v6578_v18 = vsel %vm5335_vm5, %v6157_v29, %v6577_v46  ;;  %v332_v29 = vunpack.c.0.s8 %v204_v36  ;;  %v4944_v24 = vrot.slane %v11410_v41, %v10942_v11  ;;  %v6137_v0 = vrot.slane %v11195_v9, %v10945_v45  ;;  %v206_v9 = vld [vmem:[%s14519_s4 + $0xb] sm:$0x1] }
 0x29b   :  { %v328_v39 = vunpack.c.0.s8 %v200_v32  ;;  %v5362_v46 = vsel %vm5339_vm7, %v4940_v48, %v5361_v61  ;;  %v6165_v53 = vrot.slane %v11364_v15, %v10945_v45  ;;  %v330_v37 = vunpack.c.0.s8 %v202_v55 }
 0x29c   :  { %4414 = vmax.xlane.f32.xlu0 %v11096_v22  ;;  %v329_v22 = vunpack.c.0.s8 %v201_v58  ;;  %v11455_v6 = vcvt.s32.f32 %v326_v31  ;;  %v6573_v25 = vsel %vm5339_vm7, %v6133_v60, %v6572_v19  ;;  %v6579_v36 = vsel %vm5337_vm6, %v6161_v49, %v6578_v18 }
 0x29d   :  { %v4828_v17 = vrot.slane %v11437_v38, %v10942_v11  ;;  %v11465_v48 = vcvt.s32.f32 %v327_v47  ;;  %v5330_v15 = vsel %vm5329_vm2, %v4824_v12, %v4820_v50  ;;  %v11468_v61 = vcvt.s32.f32 %v331_v51 }
 0x29e   :  { %4417 = vmax.xlane.f32.xlu1 %v11126_v3  ;;  %v333_v3 = vunpack.c.0.s8 %v205_v20  ;;  %v11470_v32 = vcvt.s32.f32 %v332_v29  ;;  %v11474_v60 = vsel %vm4304_vm1, %v11370_v42, -inf  ;;  %v11477_v49 = vsel %vm5341_vm8, %v4944_v24, %v5362_v46  ;;  %v209_v24 = vld [vmem:[%s14519_s4 + $0xe] sm:$0x1] }
 0x29f   :  { %15120 = vst [vmem:[#allocation51_spill] sm:$0xff] %v11477_v49  ;;  %v11479_v58 = vcvt.s32.f32 %v328_v39  ;;  %v11481_v31 = vcvt.s32.f32 %v329_v22  ;;  %v11489_v18 = vcvt.s32.f32 %v330_v37  ;;  %v4832_v55 = vrot.slane %v11455_v6, %v10942_v11  ;;  %v243_v22 = vld [vmem:[%s14519_s4 + $0x30] sm:$0x1] }
 0x2a0   :  { %4468 = vmax.xlane.f32.xlu0 %v11117_v57  ;;  %v207_v57 = vld [vmem:[%s14519_s4 + $0xc] sm:$0x1]  ;;  %v334_v47 = vunpack.c.0.s8 %v206_v9  ;;  %v11494_v50 = vsel %vm5341_vm8, %v6137_v0, %v6573_v25  ;;  %v11497_v12 = vsel %vm5339_vm7, %v6165_v53, %v6579_v36  ;;  %v5332_v20 = vsel %vm5331_vm3, %v4828_v17, %v5330_v15  ;;  %v245_v36 = vld [vmem:[%s14519_s4 + $0x32] sm:$0x1] }
 0x2a1   :  { %15121 = vst [vmem:[#allocation52_spill] sm:$0xff] %v11494_v50  ;;  %v11503_v51 = vcvt.s32.f32 %v333_v3  ;;  %v4836_v29 = vrot.slane %v11465_v48, %v10942_v11  ;;  %v335_v0 = vunpack.c.0.s8 %v207_v57  ;;  %v4852_v39 = vrot.slane %v11468_v61, %v10942_v11 }
 0x2a2   :  { %4471 = vmax.xlane.f32.xlu1 %v11142_v26  ;;  %v208_v26 = vld [vmem:[%s14519_s4 + $0xd] sm:$0x1]  ;;  %v4856_v17 = vrot.slane %v11470_v32, %v10942_v11  ;;  %v4840_v46 = vrot.slane %v11479_v58, %v10942_v11  ;;  %v6045_v37 = vrot.slane %v11396_v62, %v10945_v45  ;;  %v6049_v25 = vrot.slane %v11398_v13, %v10945_v45  ;;  %v210_v62 = vld [vmem:[%s14519_s4 + $0xf] sm:$0x1] }
 0x2a3   :  { %v5334_v3 = vsel %vm5333_vm4, %v4832_v55, %v5332_v20  ;;  %v336_v15 = vunpack.c.0.s8 %v208_v26  ;;  %v11536_v57 = vcvt.s32.f32 %v334_v47  ;;  %v337_v19 = vunpack.c.0.s8 %v209_v24 }
 0x2a4   :  { %4462 = vmax.xlane.f32.xlu0 %v11130_v52  ;;  %v244_v52 = vld [vmem:[%s14519_s4 + $0x31] sm:$0x1]  ;;  %v4860_v13 = vrot.slane %v11503_v51, %v10942_v11  ;;  %v371_v53 = vunpack.c.0.s8 %v243_v22  ;;  %v11547_v55 = vcvt.s32.f32 %v335_v0  ;;  %v5343_v47 = vsel %vm5329_vm2, %v4856_v17, %v4852_v39 }
 0x2a5   :  { %v372_v42 = vunpack.c.0.s8 %v244_v52  ;;  %v6053_v20 = vrot.slane %v11437_v38, %v10945_v45  ;;  %v373_v26 = vunpack.c.0.s8 %v245_v36  ;;  %v5336_v24 = vsel %vm5335_vm5, %v4836_v29, %v5334_v3  ;;  %v247_v38 = vld [vmem:[%s14519_s4 + $0x34] sm:$0x1] }
 0x2a6   :  { %4465 = vmax.xlane.f32.xlu1 %v11159_v7  ;;  %v246_v7 = vld [vmem:[%s14519_s4 + $0x33] sm:$0x1]  ;;  %v6554_v9 = vsel %vm5329_vm2, %v6049_v25, %v6045_v37  ;;  %v6077_v34 = vrot.slane %v11468_v61, %v10945_v45  ;;  %v6081_v22 = vrot.slane %v11470_v32, %v10945_v45  ;;  %v4864_v0 = vrot.slane %v11536_v57, %v10942_v11 }
 0x2a7   :  { %v374_v39 = vunpack.c.0.s8 %v246_v7  ;;  %v11564_v29 = vcvt.s32.f32 %v371_v53  ;;  %v5344_v17 = vsel %vm5331_vm3, %v4860_v13, %v5343_v47  ;;  %v6057_v61 = vrot.slane %v11455_v6, %v10945_v45  ;;  %v248_v6 = vld [vmem:[%s14519_s4 + $0x35] sm:$0x1] }
 0x2a8   :  { %4432 = vmax.xlane.f32.xlu0 %v11180_v30  ;;  %v338_v30 = vunpack.c.0.s8 %v210_v62  ;;  %v11569_v52 = vcvt.s32.f32 %v372_v42  ;;  %v11571_v32 = vcvt.s32.f32 %v373_v26  ;;  %v4868_v37 = vrot.slane %v11547_v55, %v10942_v11 }
 0x2a9   :  { %v6555_v25 = vsel %vm5331_vm3, %v6053_v20, %v6554_v9  ;;  %v6085_v53 = vrot.slane %v11503_v51, %v10945_v45  ;;  %v6561_v36 = vsel %vm5329_vm2, %v6081_v22, %v6077_v34  ;;  %v375_v42 = vunpack.c.0.s8 %v247_v38 }
 0x2aa   :  { %4435 = vmax.xlane.f32.xlu1 %v11211_v43  ;;  %v11574_v43 = vcvt.s32.f32 %v336_v15  ;;  %v5016_v3 = vrot.slane %v11569_v52, %v10942_v11  ;;  %v11590_v15 = vcvt.s32.f32 %v337_v19  ;;  %v5345_v9 = vsel %vm5333_vm4, %v4864_v0, %v5344_v17  ;;  %v252_v17 = vld [vmem:[%s14519_s4 + $0x39] sm:$0x1] }
 0x2ab   :  { %v6061_v34 = vrot.slane %v11465_v48, %v10945_v45  ;;  %v11595_v51 = vcvt.s32.f32 %v374_v39  ;;  %v5338_v62 = vsel %vm5337_vm6, %v4840_v46, %v5336_v24  ;;  %v6556_v13 = vsel %vm5333_vm4, %v6057_v61, %v6555_v25  ;;  %v249_v48 = vld [vmem:[%s14519_s4 + $0x36] sm:$0x1] }
 0x2ac   :  { %4426 = vmax.xlane.f32.xlu0 %v11200_v35  ;;  %v5012_v35 = vrot.slane %v11564_v29, %v10942_v11  ;;  %v6089_v7 = vrot.slane %v11536_v57, %v10945_v45  ;;  %v5020_v47 = vrot.slane %v11571_v32, %v10942_v11  ;;  %v6562_v19 = vsel %vm5331_vm3, %v6085_v53, %v6561_v36 }
 0x2ad   :  { %v376_v46 = vunpack.c.0.s8 %v248_v6  ;;  %v11611_v26 = vcvt.s32.f32 %v338_v30  ;;  %v5346_v57 = vsel %vm5335_vm5, %v4868_v37, %v5345_v9  ;;  %v6065_v24 = vrot.slane %v11479_v58, %v10945_v45  ;;  %v251_v58 = vld [vmem:[%s14519_s4 + $0x38] sm:$0x1] }
 0x2ae   :  { %4429 = vmax.xlane.f32.xlu1 %v11228_v28  ;;  %v4872_v28 = vrot.slane %v11574_v43, %v10942_v11  ;;  %v5378_v20 = vsel %vm5329_vm2, %v5016_v3, %v5012_v35  ;;  %v11619_v22 = vcvt.s32.f32 %v375_v42  ;;  %v4876_v0 = vrot.slane %v11590_v15, %v10942_v11  ;;  %v253_v3 = vld [vmem:[%s14519_s4 + $0x3a] sm:$0x1] }
 0x2af   :  { %v6557_v38 = vsel %vm5335_vm5, %v6061_v34, %v6556_v13  ;;  %v6093_v30 = vrot.slane %v11547_v55, %v10945_v45  ;;  %v5024_v39 = vrot.slane %v11595_v51, %v10942_v11  ;;  %v6563_v61 = vsel %vm5333_vm4, %v6089_v7, %v6562_v19 }
 0x2b0   :  { %4480 = vmax.xlane.f32.xlu0 %v11232_v21  ;;  %v250_v21 = vld [vmem:[%s14519_s4 + $0x37] sm:$0x1]  ;;  %v377_v37 = vunpack.c.0.s8 %v249_v48  ;;  %v5379_v25 = vsel %vm5331_vm3, %v5020_v47, %v5378_v20  ;;  %v5347_v55 = vsel %vm5337_vm6, %v4872_v28, %v5346_v57  ;;  %v6097_v53 = vrot.slane %v11574_v43, %v10945_v45  ;;  %v255_v57 = vld [vmem:[%s14519_s4 + $0x3c] sm:$0x1] }
 0x2b1   :  { %v378_v36 = vunpack.c.0.s8 %v250_v21  ;;  %v11643_v6 = vcvt.s32.f32 %v376_v46  ;;  %v6558_v42 = vsel %vm5337_vm6, %v6065_v24, %v6557_v38  ;;  %v5028_v35 = vrot.slane %v11619_v22, %v10942_v11 }
 0x2b2   :  { %4483 = vmax.xlane.f32.xlu1 %v11241_v5  ;;  %v6069_v5 = vrot.slane %v11481_v31, %v10945_v45  ;;  %v379_v9 = vunpack.c.0.s8 %v251_v58  ;;  %v380_v34 = vunpack.c.0.s8 %v252_v17  ;;  %v4880_v13 = vrot.slane %v11611_v26, %v10942_v11 }
 0x2b3   :  { %v6564_v7 = vsel %vm5335_vm5, %v6093_v30, %v6563_v61  ;;  %v5380_v47 = vsel %vm5333_vm4, %v5024_v39, %v5379_v25  ;;  %v5348_v28 = vsel %vm5339_vm7, %v4876_v0, %v5347_v55  ;;  %v6073_v19 = vrot.slane %v11489_v18, %v10945_v45 }
 0x2b4   :  { %4474 = vmax.xlane.f32.xlu0 %v11245_v10  ;;  %v15122_v10 = vrot.slane %v11481_v31, %v10942_v11  ;;  %v11665_v48 = vcvt.s32.f32 %v377_v37  ;;  %v254_v31 = vld [vmem:[%s14519_s4 + $0x3b] sm:$0x1]  ;;  %v11672_v46 = vcvt.s32.f32 %v378_v36  ;;  %v5032_v20 = vrot.slane %v11643_v6, %v10942_v11  ;;  %v258_v37 = vld [vmem:[%s14519_s4 + $0x3f] sm:$0x1] }
 0x2b5   :  { %v6565_v24 = vsel %vm5337_vm6, %v6097_v53, %v6564_v7  ;;  %v5381_v21 = vsel %vm5335_vm5, %v5028_v35, %v5380_v47  ;;  %v507_v0 = vcvt.s32.f32 %v379_v9  ;;  %v508_v38 = vcvt.s32.f32 %v380_v34  ;;  %v227_v34 = vld [vmem:[%s14519_s4 + $0x20] sm:$0x1] }
 0x2b6   :  { %4477 = vmax.xlane.f32.xlu1 %v11259_v63  ;;  %v5340_v43 = vsel %vm5339_vm7, %v15122_v10, %v5338_v62  ;;  %v6101_v63 = vrot.slane %v11590_v15, %v10945_v45  ;;  %v6559_v62 = vsel %vm5339_vm7, %v6069_v5, %v6558_v42  ;;  %v381_v15 = vunpack.c.0.s8 %v253_v3 }
 0x2b7   :  { %v15125_v39 = vrot.slane %v11489_v18, %v10942_v11  ;;  %v11696_v17 = vsel %vm5341_vm8, %v4880_v13, %v5348_v28  ;;  %v382_v5 = vunpack.c.0.s8 %v254_v31  ;;  %v6105_v18 = vrot.slane %v11611_v26, %v10945_v45 }
 0x2b8   :  { %4444 = vmax.xlane.f32.xlu0 %v11285_v44  ;;  %v15123_v44 = vrot.slane %v11410_v41, %v10945_v45  ;;  %15127 = vst [vmem:[#allocation65_spill] sm:$0xff] %v11696_v17  ;;  %v257_v41 = vld [vmem:[%s14519_s4 + $0x3e] sm:$0x1]  ;;  %v5036_v61 = vrot.slane %v11665_v48, %v10942_v11  ;;  %v383_v25 = vunpack.c.0.s8 %v255_v57  ;;  %v6566_v55 = vsel %vm5339_vm7, %v6101_v63, %v6565_v24 }
 0x2b9   :  { %v11693_v58 = vsel %vm5341_vm8, %v15125_v39, %v5340_v43  ;;  %v5040_v53 = vrot.slane %v11672_v46, %v10942_v11  ;;  %v5382_v36 = vsel %vm5337_vm6, %v5032_v20, %v5381_v21  ;;  %v509_v42 = vcvt.s32.f32 %v381_v15 }
 0x2ba   :  { %4447 = vmax.xlane.f32.xlu1 %v11314_v23  ;;  %v11687_v30 = vsel %vm5341_vm8, %v15123_v44, %v11497_v12  ;;  %15126 = vst [vmem:[#allocation54_spill] sm:$0xff] %v11693_v58  ;;  %v256_v23 = vld [vmem:[%s14519_s4 + $0x3d] sm:$0x1]  ;;  %v11705_v12 = vsel %vm5341_vm8, %v6073_v19, %v6559_v62  ;;  %v385_v26 = vunpack.c.0.s8 %v257_v41  ;;  %v5044_v3 = vrot.slane %v507_v0, %v10942_v11 }
 0x2bb   :  { %15124 = vst [vmem:[#allocation53_spill] sm:$0xff] %v11687_v30  ;;  %15128 = vst [vmem:[#allocation66_spill] sm:$0xff] %v11705_v12  ;;  %v384_v35 = vunpack.c.0.s8 %v256_v23  ;;  %v5048_v9 = vrot.slane %v508_v38, %v10942_v11  ;;  %v386_v10 = vunpack.c.0.s8 %v258_v37  ;;  %v510_v43 = vcvt.s32.f32 %v382_v5  ;;  %v235_v37 = vld [vmem:[%s14519_s4 + $0x28] sm:$0x1] }
 0x2bc   :  { %4438 = vmax.xlane.f32.xlu0 %v11305_v54  ;;  %v228_v54 = vld [vmem:[%s14519_s4 + $0x21] sm:$0x1]  ;;  %v6237_v13 = vrot.slane %v11564_v29, %v10945_v45  ;;  %v6241_v7 = vrot.slane %v11569_v52, %v10945_v45  ;;  %v5383_v47 = vsel %vm5339_vm7, %v5036_v61, %v5382_v36  ;;  %v11733_v28 = vcvt.s32.f32 %v383_v25  ;;  %v229_v29 = vld [vmem:[%s14519_s4 + $0x22] sm:$0x1]  ;;  %v236_v25 = vld [vmem:[%s14519_s4 + $0x29] sm:$0x1] }
 0x2bd   :  { %v6269_v19 = vrot.slane %v507_v0, %v10945_v45  ;;  %v6273_v63 = vrot.slane %v508_v38, %v10945_v45  ;;  %v5052_v31 = vrot.slane %v509_v42, %v10942_v11  ;;  %v355_v52 = vunpack.c.0.s8 %v227_v34 }
 0x2be   :  { %4441 = vmax.xlane.f32.xlu1 %v11352_v8  ;;  %v11739_v8 = vsel %vm5341_vm8, %v6105_v18, %v6566_v55  ;;  %v356_v62 = vunpack.c.0.s8 %v228_v54  ;;  %v11745_v20 = vcvt.s32.f32 %v384_v35  ;;  %v11747_v57 = vcvt.s32.f32 %v385_v26  ;;  %v231_v26 = vld [vmem:[%s14519_s4 + $0x24] sm:$0x1] }
 0x2bf   :  { %15129 = vst [vmem:[#allocation11_spill] sm:$0xff] %v11739_v8  ;;  %v5385_v15 = vsel %vm5329_vm2, %v5048_v9, %v5044_v3  ;;  %v11754_v24 = vsel %vm5341_vm8, %v5040_v53, %v5383_v47  ;;  %v11756_v21 = vcvt.s32.f32 %v386_v10  ;;  %v6596_v0 = vsel %vm5329_vm2, %v6241_v7, %v6237_v13 }
 0x2c0   :  { %4492 = vmax.xlane.f32.xlu0 %v11321_v27  ;;  %v6245_v27 = vrot.slane %v11571_v32, %v10945_v45  ;;  %15130 = vst [vmem:[#allocation12_spill] sm:$0xff] %v11754_v24  ;;  %v6277_v38 = vrot.slane %v509_v42, %v10945_v45  ;;  %v5056_v44 = vrot.slane %v510_v43, %v10942_v11  ;;  %v357_v32 = vunpack.c.0.s8 %v229_v29 }
 0x2c1   :  { %v5060_v39 = vrot.slane %v11733_v28, %v10942_v11  ;;  %v6603_v23 = vsel %vm5329_vm2, %v6273_v63, %v6269_v19  ;;  %v5386_v41 = vsel %vm5331_vm3, %v5052_v31, %v5385_v15  ;;  %v6249_v5 = vrot.slane %v11595_v51, %v10945_v45  ;;  %v232_v31 = vld [vmem:[%s14519_s4 + $0x25] sm:$0x1] }
 0x2c2   :  { %4495 = vmax.xlane.f32.xlu1 %v11402_v4  ;;  %v230_v4 = vld [vmem:[%s14519_s4 + $0x23] sm:$0x1]  ;;  %v11771_v18 = vcvt.s32.f32 %v355_v52  ;;  %v11773_v61 = vcvt.s32.f32 %v356_v62  ;;  %v5068_v55 = vrot.slane %v11747_v57, %v10942_v11  ;;  %v6597_v51 = vsel %vm5331_vm3, %v6245_v27, %v6596_v0  ;;  %v233_v27 = vld [vmem:[%s14519_s4 + $0x26] sm:$0x1] }
 0x2c3   :  { %v6281_v53 = vrot.slane %v510_v43, %v10945_v45  ;;  %v5072_v36 = vrot.slane %v11756_v21, %v10942_v11  ;;  %v6253_v42 = vrot.slane %v11619_v22, %v10945_v45  ;;  %v6604_v35 = vsel %vm5331_vm3, %v6277_v38, %v6603_v23 }
 0x2c4   :  { %4486 = vmax.xlane.f32.xlu0 %v11374_v16  ;;  %v5064_v16 = vrot.slane %v11745_v20, %v10942_v11  ;;  %v358_v3 = vunpack.c.0.s8 %v230_v4  ;;  %v5387_v9 = vsel %vm5333_vm4, %v5056_v44, %v5386_v41  ;;  %v11797_v34 = vcvt.s32.f32 %v357_v32 }
 0x2c5   :  { %v363_v54 = vunpack.c.0.s8 %v235_v37  ;;  %v364_v10 = vunpack.c.0.s8 %v236_v25  ;;  %v6598_v43 = vsel %vm5333_vm4, %v6249_v5, %v6597_v51  ;;  %v6285_v22 = vrot.slane %v11733_v28, %v10945_v45  ;;  %v234_v5 = vld [vmem:[%s14519_s4 + $0x27] sm:$0x1] }
 0x2c6   :  { %4489 = vmax.xlane.f32.xlu1 %v11474_v60  ;;  %v237_v60 = vld [vmem:[%s14519_s4 + $0x2a] sm:$0x1]  ;;  %v4948_v13 = vrot.slane %v11771_v18, %v10942_v11  ;;  %v4952_v7 = vrot.slane %v11773_v61, %v10942_v11  ;;  %v6257_v47 = vrot.slane %v11643_v6, %v10945_v45  ;;  %v6261_v19 = vrot.slane %v11665_v48, %v10945_v45  ;;  %v238_v6 = vld [vmem:[%s14519_s4 + $0x2b] sm:$0x1] }
 0x2c7   :  { %v6605_v63 = vsel %vm5333_vm4, %v6281_v53, %v6604_v35  ;;  %v359_v29 = vunpack.c.0.s8 %v231_v26  ;;  %v5388_v28 = vsel %vm5335_vm5, %v5060_v39, %v5387_v9  ;;  %v6289_v52 = vrot.slane %v11745_v20, %v10945_v45 }
 0x2c8   :  { %v11820_v62 = vcvt.s32.f32 %v358_v3  ;;  %v365_v15 = vunpack.c.0.s8 %v237_v60  ;;  %v6599_v48 = vsel %vm5335_vm5, %v6253_v42, %v6598_v43  ;;  %v4956_v0 = vrot.slane %v11797_v34, %v10942_v11  ;;  %v240_v43 = vld [vmem:[%s14519_s4 + $0x2d] sm:$0x1] }
 0x2c9   :  { %v11831_v38 = vcvt.s32.f32 %v363_v54  ;;  %v11833_v44 = vcvt.s32.f32 %v364_v10  ;;  %v6265_v20 = vrot.slane %v11672_v46, %v10945_v45  ;;  %v6606_v39 = vsel %vm5335_vm5, %v6285_v22, %v6605_v63 }
 0x2ca   :  { %v360_v23 = vunpack.c.0.s8 %v232_v31  ;;  %v5364_v4 = vsel %vm5329_vm2, %v4952_v7, %v4948_v13  ;;  %v5389_v32 = vsel %vm5337_vm6, %v5064_v16, %v5388_v28  ;;  %v6293_v41 = vrot.slane %v11747_v57, %v10945_v45  ;;  %v239_v16 = vld [vmem:[%s14519_s4 + $0x2c] sm:$0x1] }
 0x2cb   :  { %v11845_v37 = vcvt.s32.f32 %v359_v29  ;;  %v366_v25 = vunpack.c.0.s8 %v238_v6  ;;  %v6600_v51 = vsel %vm5337_vm6, %v6257_v47, %v6599_v48  ;;  %v361_v46 = vunpack.c.0.s8 %v233_v27  ;;  %v241_v29 = vld [vmem:[%s14519_s4 + $0x2e] sm:$0x1] }
 0x2cc   :  { %v4960_v53 = vrot.slane %v11820_v62, %v10942_v11  ;;  %v11853_v42 = vcvt.s32.f32 %v365_v15  ;;  %v6607_v57 = vsel %vm5337_vm6, %v6289_v52, %v6606_v39  ;;  %v5365_v35 = vsel %vm5331_vm3, %v4956_v0, %v5364_v4 }
 0x2cd   :  { %v4980_v26 = vrot.slane %v11831_v38, %v10942_v11  ;;  %v4984_v3 = vrot.slane %v11833_v44, %v10942_v11  ;;  %v5390_v9 = vsel %vm5339_vm7, %v5068_v55, %v5389_v32  ;;  %v6297_v60 = vrot.slane %v11756_v21, %v10945_v45 }
 0x2ce   :  { %v362_v54 = vunpack.c.0.s8 %v234_v5  ;;  %v11864_v10 = vcvt.s32.f32 %v360_v23  ;;  %v6601_v22 = vsel %vm5339_vm7, %v6261_v19, %v6600_v51  ;;  %v4964_v13 = vrot.slane %v11845_v37, %v10942_v11 }
 0x2cf   :  { %v367_v7 = vunpack.c.0.s8 %v239_v16  ;;  %v11872_v47 = vcvt.s32.f32 %v366_v25  ;;  %v6608_v55 = vsel %vm5339_vm7, %v6293_v41, %v6607_v57  ;;  %v11875_v63 = vcvt.s32.f32 %v361_v46 }
 0x2d0   :  { %v5366_v31 = vsel %vm5333_vm4, %v4960_v53, %v5365_v35  ;;  %v4988_v28 = vrot.slane %v11853_v42, %v10942_v11  ;;  %v368_v19 = vunpack.c.0.s8 %v240_v43  ;;  %v5371_v52 = vsel %vm5329_vm2, %v4984_v3, %v4980_v26 }
 0x2d1   :  { %v6173_v6 = vrot.slane %v11771_v18, %v10945_v45  ;;  %v6177_v15 = vrot.slane %v11773_v61, %v10945_v45  ;;  %v11892_v48 = vsel %vm5341_vm8, %v5072_v36, %v5390_v9  ;;  %v11895_v27 = vsel %vm5341_vm8, %v6265_v20, %v6601_v22  ;;  %v242_v18 = vld [vmem:[%s14519_s4 + $0x2f] sm:$0x1] }
 0x2d2   :  { %15131 = vst [vmem:[#allocation67_spill] sm:$0xff] %v11892_v48  ;;  %15132 = vst [vmem:[#allocation68_spill] sm:$0xff] %v11895_v27  ;;  %v11897_v0 = vcvt.s32.f32 %v362_v54  ;;  %v4968_v39 = vrot.slane %v11864_v10, %v10942_v11  ;;  %v5367_v61 = vsel %vm5335_vm5, %v4964_v13, %v5366_v31  ;;  %v369_v4 = vunpack.c.0.s8 %v241_v29  ;;  %v275_v13 = vld [vmem:[%s14519_s4 + $0x50] sm:$0x1] }
 0x2d3   :  { %v11905_v21 = vcvt.s32.f32 %v367_v7  ;;  %v4992_v36 = vrot.slane %v11872_v47, %v10942_v11  ;;  %v11911_v32 = vsel %vm5341_vm8, %v6297_v60, %v6608_v55  ;;  %v5372_v41 = vsel %vm5331_vm3, %v4988_v28, %v5371_v52 }
 0x2d4   :  { %15133 = vst [vmem:[#allocation69_spill] sm:$0xff] %v11911_v32  ;;  %v6181_v5 = vrot.slane %v11797_v34, %v10945_v45  ;;  %v4972_v51 = vrot.slane %v11875_v63, %v10942_v11  ;;  %v370_v46 = vunpack.c.0.s8 %v242_v18  ;;  %v11918_v53 = vcvt.s32.f32 %v368_v19 }
 0x2d5   :  { %v4313_v23 = vpop.xlane.xlu0 %4312  ;;  %v6582_v16 = vsel %vm5329_vm2, %v6177_v15, %v6173_v6  ;;  %v4976_v35 = vrot.slane %v11897_v0, %v10942_v11  ;;  %v5368_v26 = vsel %vm5337_vm6, %v4968_v39, %v5367_v61  ;;  %v11925_v9 = vcvt.s32.f32 %v369_v4 }
 0x2d6   :  { %v4499_v20 = vsub.f32 %v10859_v2, %v4313_v23  ;;  %v4996_v34 = vrot.slane %v11905_v21, %v10942_v11  ;;  %v5373_v60 = vsel %vm5333_vm4, %v4992_v36, %v5372_v41  ;;  %v6185_v54 = vrot.slane %v11820_v62, %v10945_v45  ;;  %v15134_v41 = vld [vmem:[#allocation14_spill] sm:$0xff] }
 0x2d7   :  { %v4316_v25 = vpop.xlane.xlu1 %4315  ;;  %v6583_v22 = vsel %vm5331_vm3, %v6181_v5, %v6582_v16  ;;  %v11937_v55 = vcvt.s32.f32 %v370_v46  ;;  %v5000_v31 = vrot.slane %v11918_v53, %v10942_v11  ;;  %v6205_v29 = vrot.slane %v11831_v38, %v10945_v45 }
 0x2d8   :  { %v4565_v57 = vmul.f32 1.442695, %v4499_v20  ;;  %v4500_v2 = vsub.f32 %v10863_v14, %v4316_v25  ;;  %v6209_v62 = vrot.slane %v11833_v44, %v10945_v45  ;;  %v6189_v52 = vrot.slane %v11845_v37, %v10945_v45 }
 0x2d9   :  { %v4307_v3 = vpop.xlane.xlu0 %4306  ;;  %v5374_v15 = vsel %vm5335_vm5, %v4996_v34, %v5373_v60  ;;  %v6584_v39 = vsel %vm5333_vm4, %v6185_v54, %v6583_v22  ;;  %v6213_v38 = vrot.slane %v11853_v42, %v10945_v45  ;;  %v403_v44 = vunpack.c.0.s8 %v275_v13 }
 0x2da   :  { %8880 = vpow2.f32 %v4565_v57  ;;  %v4567_v43 = vmul.f32 1.442695, %v4500_v2  ;;  %v4497_v14 = vsub.f32 %v10861_v1, %v4307_v3  ;;  %v276_v1 = vld [vmem:[%s14519_s4 + $0x51] sm:$0x1]  ;;  %v11960_v37 = vsel %vm5339_vm7, %v4972_v51, %v5368_v26  ;;  %v278_v2 = vld [vmem:[%s14519_s4 + $0x53] sm:$0x1] }
 0x2db   :  { %v4310_v7 = vpop.xlane.xlu1 %4309  ;;  %v404_v61 = vunpack.c.0.s8 %v276_v1  ;;  %v5004_v36 = vrot.slane %v11925_v9, %v10942_v11  ;;  %v5008_v42 = vrot.slane %v11937_v55, %v10942_v11  ;;  %v6589_v20 = vsel %vm5329_vm2, %v6209_v62, %v6205_v29  ;;  %v279_v29 = vld [vmem:[%s14519_s4 + $0x54] sm:$0x1] }
 0x2dc   :  { %8882 = vpow2.f32 %v4567_v43  ;;  %v4561_v28 = vmul.f32 1.442695, %v4497_v14  ;;  %v4498_v19 = vsub.f32 %v10867_v56, %v4310_v7  ;;  %v277_v56 = vld [vmem:[%s14519_s4 + $0x52] sm:$0x1]  ;;  %v5375_v5 = vsel %vm5337_vm6, %v5000_v31, %v5374_v15 }
 0x2dd   :  { %v4361_v6 = vpop.xlane.xlu0 %4360  ;;  %v6193_v25 = vrot.slane %v11864_v10, %v10945_v45  ;;  %v6197_v51 = vrot.slane %v11875_v63, %v10945_v45  ;;  %v6585_v16 = vsel %vm5335_vm5, %v6189_v52, %v6584_v39  ;;  %v6217_v57 = vrot.slane %v11872_v47, %v10945_v45 }
 0x2de   :  { %8884 = vpow2.f32 %v4561_v28  ;;  %v4563_v18 = vmul.f32 1.442695, %v4498_v19  ;;  %v4515_v23 = vsub.f32 %v10871_v59, %v4361_v6  ;;  %v405_v26 = vunpack.c.0.s8 %v277_v56  ;;  %v15136_v6 = vld [vmem:[#allocation15_spill] sm:$0xff] }
 0x2df   :  { %v4364_v4 = vpop.xlane.xlu1 %4363  ;;  %v6590_v34 = vsel %vm5331_vm3, %v6213_v38, %v6589_v20  ;;  %v11980_v60 = vcvt.s32.f32 %v403_v44  ;;  %v11982_v10 = vcvt.s32.f32 %v404_v61  ;;  %v11985_v63 = vsel %vm5339_vm7, %v5004_v36, %v5375_v5  ;;  %v280_v61 = vld [vmem:[%s14519_s4 + $0x55] sm:$0x1]  ;;  %v15139_v20 = vld [vmem:[#allocation16_spill] sm:$0xff] }
 0x2e0   :  { %8886 = vpow2.f32 %v4563_v18  ;;  %v4516_v59 = vsub.f32 %v15134_v41, %v4364_v4  ;;  %v4597_v3 = vmul.f32 1.442695, %v4515_v23  ;;  %v6201_v43 = vrot.slane %v11897_v0, %v10945_v45 }
 0x2e1   :  { %v4355_v46 = vpop.xlane.xlu0 %4354  ;;  %v6221_v47 = vrot.slane %v11905_v21, %v10945_v45  ;;  %v6225_v14 = vrot.slane %v11918_v53, %v10945_v45  ;;  %v6229_v7 = vrot.slane %v11925_v9, %v10945_v45  ;;  %v406_v62 = vunpack.c.0.s8 %v278_v2 }
 0x2e2   :  { %v4599_v13 = vmul.f32 1.442695, %v4516_v59  ;;  %v6586_v21 = vsel %vm5337_vm6, %v6193_v25, %v6585_v16  ;;  %v6591_v53 = vsel %vm5333_vm4, %v6217_v57, %v6590_v34  ;;  %v12005_v19 = vcvt.s32.f32 %v405_v26  ;;  %v15140_v25 = vld [vmem:[#allocation17_spill] sm:$0xff]  ;;  %v281_v26 = vld [vmem:[%s14519_s4 + $0x56] sm:$0x1] }
 0x2e3   :  { %v4358_v54 = vpop.xlane.xlu1 %4357  ;;  %8888 = vpow2.f32 %v4597_v3  ;;  %v4513_v15 = vsub.f32 %v15136_v6, %v4355_v46  ;;  %v5140_v39 = vrot.slane %v11980_v60, %v10942_v11  ;;  %v5144_v38 = vrot.slane %v11982_v10, %v10942_v11  ;;  %v282_v6 = vld [vmem:[%s14519_s4 + $0x57] sm:$0x1] }
 0x2e4   :  { %v8881_v22 = vpop.eup %8880  ;;  %v407_v4 = vunpack.c.0.s8 %v279_v29  ;;  %8890 = vpow2.f32 %v4599_v13  ;;  %v4514_v41 = vsub.f32 %v15139_v20, %v4358_v54  ;;  %v6592_v59 = vsel %vm5335_vm5, %v6221_v47, %v6591_v53  ;;  %v15142_v29 = vld [vmem:[#allocation18_spill] sm:$0xff] }
 0x2e5   :  { %v4325_v1 = vpop.xlane.xlu0 %4324  ;;  %v12001_v28 = vmul.f32 %v8881_v22, %v11408_v40  ;;  %v12018_v56 = vmul.f32 %v8881_v22, %v11494_v50  ;;  %v12025_v5 = vcvt.s32.f32 %v406_v62  ;;  %v5148_v3 = vrot.slane %v12005_v19, %v10942_v11 }
 0x2e6   :  { %v8883_v52 = vpop.eup %8882  ;;  %v4503_v46 = vsub.f32 %v15140_v25, %v4325_v1  ;;  %v4593_v54 = vmul.f32 1.442695, %v4513_v15  ;;  %v6587_v47 = vsel %vm5339_vm7, %v6197_v51, %v6586_v21  ;;  %v408_v22 = vunpack.c.0.s8 %v280_v61 }
 0x2e7   :  { %15135 = vst [vmem:[#allocation70_spill] sm:$0xff] %v12001_v28  ;;  %v4328_v44 = vpop.xlane.xlu1 %4327  ;;  %v5534_v18 = vsel %vm4304_vm1, %v12001_v28, 0.0  ;;  %v12015_v23 = vmul.f32 %v8883_v52, %v11477_v49  ;;  %15138 = vst [vmem:[#allocation71_spill] sm:$0xff] %v12018_v56  ;;  %v12031_v2 = vmul.f32 %v8883_v52, %v11687_v30  ;;  %v5406_v13 = vsel %vm5329_vm2, %v5144_v38, %v5140_v39 }
 0x2e8   :  { %v8885_v36 = vpop.eup %8884  ;;  %5535 = vadd.xlane.f32.xlu0 %v5534_v18  ;;  %v4504_v62 = vsub.f32 %v15142_v29, %v4328_v44  ;;  %v6752_v53 = vsel %vm4304_vm1, %v12018_v56, 0.0  ;;  %v12049_v15 = vcvt.s32.f32 %v407_v4  ;;  %v4595_v18 = vmul.f32 1.442695, %v4514_v41  ;;  %v15145_v4 = vld [vmem:[#allocation27_spill] sm:$0xff] }
 0x2e9   :  { %15137 = vst [vmem:[#allocation13_spill] sm:$0xff] %v12015_v23  ;;  %v4319_v16 = vpop.xlane.xlu0 %4318  ;;  %v5537_v57 = vsel %vm4304_vm1, %v12015_v23, 0.0  ;;  %15141 = vst [vmem:[#allocation72_spill] sm:$0xff] %v12031_v2  ;;  %v12044_v52 = vmul.f32 %v8885_v36, %v11693_v58  ;;  %v6593_v51 = vsel %vm5337_vm6, %v6225_v14, %v6592_v59  ;;  %v409_v21 = vunpack.c.0.s8 %v281_v26 }
 0x2ea   :  { %v8887_v34 = vpop.eup %8886  ;;  %5538 = vadd.xlane.f32.xlu1 %v5537_v57  ;;  %v5152_v39 = vrot.slane %v12025_v5, %v10942_v11  ;;  %v4573_v38 = vmul.f32 1.442695, %v4503_v46  ;;  %v6755_v61 = vsel %vm4304_vm1, %v12031_v2, 0.0  ;;  %v5407_v25 = vsel %vm5331_vm3, %v5148_v3, %v5406_v13  ;;  %v15147_v3 = vld [vmem:[#allocation30_spill] sm:$0xff] }
 0x2eb   :  { %v4322_v1 = vpop.xlane.xlu1 %4321  ;;  %15143 = vst [vmem:[#allocation73_spill] sm:$0xff] %v12044_v52  ;;  %v12057_v20 = vmul.f32 %v8887_v34, %v11696_v17  ;;  %8892 = vpow2.f32 %v4593_v54  ;;  %v4501_v41 = vsub.f32 %v15145_v4, %v4319_v16  ;;  %v410_v57 = vunpack.c.0.s8 %v282_v6 }
 0x2ec   :  { %6753 = vadd.xlane.f32.xlu0 %v6752_v53  ;;  %v12061_v14 = vcvt.s32.f32 %v408_v22  ;;  %v4575_v59 = vmul.f32 1.442695, %v4504_v62  ;;  %v5528_v46 = vsel %vm4304_vm1, %v12044_v52, 0.0  ;;  %v12066_v29 = vmul.f32 %v8885_v36, %v11705_v12 }
 0x2ed   :  { %v4373_v44 = vpop.xlane.xlu0 %4372  ;;  %15144 = vst [vmem:[#allocation74_spill] sm:$0xff] %v12057_v20  ;;  %v5156_v53 = vrot.slane %v12049_v15, %v10942_v11  ;;  %v8889_v31 = vpop.eup %8888  ;;  %8894 = vpow2.f32 %v4595_v18  ;;  %v4502_v54 = vsub.f32 %v15147_v3, %v4322_v1  ;;  %v6594_v16 = vsel %vm5339_vm7, %v6229_v7, %v6593_v51  ;;  %v285_v3 = vld [vmem:[%s14519_s4 + $0x5a] sm:$0x1] }
 0x2ee   :  { %6756 = vadd.xlane.f32.xlu1 %v6755_v61  ;;  %15146 = vst [vmem:[#allocation75_spill] sm:$0xff] %v12066_v29  ;;  %v5408_v22 = vsel %vm5333_vm4, %v5152_v39, %v5407_v25  ;;  %8896 = vpow2.f32 %v4573_v38  ;;  %v5531_v36 = vsel %vm4304_vm1, %v12057_v20, 0.0  ;;  %v12079_v62 = vmul.f32 %v8887_v34, %v11739_v8  ;;  %v8891_v18 = vpop.eup %8890  ;;  %v15149_v61 = vld [vmem:[#allocation62_spill] sm:$0xff]  ;;  %v15151_v25 = vld [vmem:[#allocation64_spill] sm:$0xff] }
 0x2ef   :  { %v4376_v26 = vpop.xlane.xlu1 %4375  ;;  %v12081_v6 = vcvt.s32.f32 %v409_v21  ;;  %v4569_v1 = vmul.f32 1.442695, %v4501_v41  ;;  %v4519_v4 = vsub.f32 %v15149_v61, %v4373_v44  ;;  %v12084_v9 = vcvt.s32.f32 %v410_v57 }
 0x2f0   :  { %5529 = vadd.xlane.f32.xlu0 %v5528_v46  ;;  %15148 = vst [vmem:[#allocation76_spill] sm:$0xff] %v12079_v62  ;;  %v5160_v7 = vrot.slane %v12061_v14, %v10942_v11  ;;  %8898 = vpow2.f32 %v4575_v59  ;;  %v6746_v39 = vsel %vm4304_vm1, %v12066_v29, 0.0  ;;  %v12093_v34 = vmul.f32 %v8889_v31, %v11408_v40 }
 0x2f1   :  { %v4367_v13 = vpop.xlane.xlu0 %4366  ;;  %v5409_v21 = vsel %vm5335_vm5, %v5156_v53, %v5408_v22  ;;  %v4571_v38 = vmul.f32 1.442695, %v4502_v54  ;;  %v4520_v44 = vsub.f32 %v15151_v25, %v4376_v26  ;;  %v12102_v41 = vsel %vm5341_vm8, %v4976_v35, %v11960_v37  ;;  %v12145_v54 = vld [vmem:[%s14519_s4 + $0x5b] sm:$0x1] }
 0x2f2   :  { %5532 = vadd.xlane.f32.xlu1 %v5531_v36  ;;  %15150 = vst [vmem:[#allocation77_spill] sm:$0xff] %v12093_v34  ;;  %15152 = vst [vmem:[#allocation78_spill] sm:$0xff] %v12102_v41  ;;  %v12109_v57 = vsel %vm5341_vm8, %v5008_v42, %v11985_v63  ;;  %v6749_v26 = vsel %vm4304_vm1, %v12079_v62, 0.0  ;;  %v12116_v46 = vmul.f32 %v8891_v18, %v11477_v49  ;;  %v283_v42 = vld [vmem:[%s14519_s4 + $0x58] sm:$0x1]  ;;  %8900 = vpow2.f32 %v4569_v1 }
 0x2f3   :  { %v12088_v51 = vpop.xlane.xlu1 %4369  ;;  %15153 = vst [vmem:[#allocation8_spill] sm:$0xff] %v12109_v57  ;;  %v12122_v35 = vsel %vm5341_vm8, %v6201_v43, %v6587_v47  ;;  %v5164_v37 = vrot.slane %v12081_v6, %v10942_v11  ;;  %v284_v63 = vld [vmem:[%s14519_s4 + $0x59] sm:$0x1]  ;;  %v4605_v53 = vmul.f32 1.442695, %v4519_v4  ;;  %v15156_v0 = vrot.slane %v11937_v55, %v10945_v45 }
 0x2f4   :  { %6747 = vadd.xlane.f32.xlu0 %v6746_v39  ;;  %15154 = vst [vmem:[#allocation14_spill] sm:$0xff] %v12116_v46  ;;  %15155 = vst [vmem:[#allocation15_spill] sm:$0xff] %v12122_v35  ;;  %v5410_v47 = vsel %vm5337_vm6, %v5160_v7, %v5409_v21  ;;  %v15158_v22 = vld [vmem:[#allocation63_spill] sm:$0xff]  ;;  %v5582_v55 = vsel %vm4304_vm1, %v12093_v34, 0.0  ;;  %v5168_v61 = vrot.slane %v12084_v9, %v10942_v11  ;;  %8902 = vpow2.f32 %v4571_v38 }
 0x2f5   :  { %v12111_v59 = vpop.xlane.xlu0 %4336  ;;  %v12136_v43 = vsel %vm5341_vm8, %v15156_v0, %v6594_v16  ;;  %v4517_v36 = vsub.f32 %v15158_v22, %v4367_v13  ;;  %v12153_v16 = vmul.f32 %v8889_v31, %v11494_v50  ;;  %v12160_v4 = vld [vmem:[%s14519_s4 + $0x5c] sm:$0x1]  ;;  %v12165_v13 = vld [vmem:[%s14519_s4 + $0x5d] sm:$0x1]  ;;  %v8893_v7 = vpop.eup %8892  ;;  %v4607_v39 = vmul.f32 1.442695, %v4520_v44 }
 0x2f6   :  { %6750 = vadd.xlane.f32.xlu1 %v6749_v26  ;;  %15157 = vst [vmem:[#allocation16_spill] sm:$0xff] %v12136_v43  ;;  %v411_v21 = vunpack.c.0.s8 %v283_v42  ;;  %v412_v31 = vunpack.c.0.s8 %v284_v63  ;;  %v5585_v26 = vsel %vm4304_vm1, %v12116_v46, 0.0  ;;  %v12172_v0 = vmul.f32 %v8891_v18, %v11687_v30  ;;  %v12178_v34 = vld [vmem:[%s14519_s4 + $0x5e] sm:$0x1]  ;;  %v12183_v42 = vld [vmem:[%s14519_s4 + $0x5f] sm:$0x1] }
 0x2f7   :  { %v12148_v1 = vpop.xlane.xlu1 %4339  ;;  %15159 = vst [vmem:[#allocation17_spill] sm:$0xff] %v12153_v16  ;;  %v5411_v22 = vsel %vm5339_vm7, %v5164_v37, %v5410_v47  ;;  %v413_v38 = vunpack.c.0.s8 %v285_v3  ;;  %v8895_v44 = vpop.eup %8894  ;;  %8904 = vpow2.f32 %v4605_v53  ;;  %v414_v63 = vunpack.c.0.s8 %v12145_v54  ;;  %v15161_v46 = vld [vmem:[#allocation57_spill] sm:$0xff] }
 0x2f8   :  { %5583 = vadd.xlane.f32.xlu0 %v5582_v55  ;;  %15160 = vst [vmem:[#allocation18_spill] sm:$0xff] %v12172_v0  ;;  %v415_v18 = vunpack.c.0.s8 %v12160_v4  ;;  %v416_v37 = vunpack.c.0.s8 %v12165_v13  ;;  %v8897_v47 = vpop.eup %8896  ;;  %v4601_v55 = vmul.f32 1.442695, %v4517_v36  ;;  %v4518_v28 = vsub.f32 %v15161_v46, %v12088_v51  ;;  %v15165_v51 = vld [vmem:[#allocation56_spill] sm:$0xff] }
 0x2f9   :  { %v12167_v25 = vpop.xlane.xlu0 %4330  ;;  %v6800_v53 = vsel %vm4304_vm1, %v12153_v16, 0.0  ;;  %8906 = vpow2.f32 %v4607_v39  ;;  %v12198_v54 = vmul.f32 %v8893_v7, %v11705_v12  ;;  %v12201_v4 = vsel %vm5341_vm8, %v5168_v61, %v5411_v22 }
 0x2fa   :  { %5586 = vadd.xlane.f32.xlu1 %v5585_v26  ;;  %v12195_v26 = vmul.f32 %v8893_v7, %v11693_v58  ;;  %15164 = vst [vmem:[#allocation62_spill] sm:$0xff] %v12201_v4  ;;  %v417_v36 = vunpack.c.0.s8 %v12178_v34  ;;  %v8899_v13 = vpop.eup %8898  ;;  %v4507_v46 = vsub.f32 %v15165_v51, %v12111_v59  ;;  %v6803_v16 = vsel %vm4304_vm1, %v12172_v0, 0.0 }
 0x2fb   :  { %v12190_v3 = vpop.xlane.xlu1 %4333  ;;  %15163 = vst [vmem:[#allocation30_spill] sm:$0xff] %v12198_v54  ;;  %v12211_v39 = vmul.f32 %v8895_v44, %v11696_v17  ;;  %v418_v7 = vunpack.c.0.s8 %v12183_v42  ;;  %v12215_v61 = vmul.f32 %v8895_v44, %v11739_v8  ;;  %v12218_v34 = vmul.f32 %v8897_v47, %v11754_v24  ;;  %v15170_v44 = vld [vmem:[#allocation59_spill] sm:$0xff]  ;;  %v15200_v17 = vld [vmem:[#allocation85_spill] sm:$0xff] }
 0x2fc   :  { %15162 = vst [vmem:[#allocation27_spill] sm:$0xff] %v12195_v26  ;;  %6801 = vadd.xlane.f32.xlu0 %v6800_v53  ;;  %v12221_v22 = vmul.f32 %v8897_v47, %v11895_v27  ;;  %v12223_v59 = vcvt.s32.f32 %v411_v21  ;;  %8908 = vpow2.f32 %v4601_v55  ;;  %v4603_v53 = vmul.f32 1.442695, %v4518_v28 }
 0x2fd   :  { %v12206_v62 = vpop.xlane.xlu0 %4384  ;;  %15166 = vst [vmem:[#allocation64_spill] sm:$0xff] %v12211_v39  ;;  %15167 = vst [vmem:[#allocation63_spill] sm:$0xff] %v12215_v61  ;;  %v5576_v0 = vsel %vm4304_vm1, %v12195_v26, 0.0  ;;  %v12229_v42 = vcvt.s32.f32 %v412_v31  ;;  %v4508_v29 = vsub.f32 %v15170_v44, %v12148_v1  ;;  %v6794_v47 = vsel %vm4304_vm1, %v12198_v54, 0.0  ;;  %v15173_v54 = vld [vmem:[#allocation58_spill] sm:$0xff] }
 0x2fe   :  { %6804 = vadd.xlane.f32.xlu1 %v6803_v16  ;;  %15168 = vst [vmem:[#allocation57_spill] sm:$0xff] %v12218_v34  ;;  %15169 = vst [vmem:[#allocation56_spill] sm:$0xff] %v12221_v22  ;;  %v8901_v16 = vpop.eup %8900  ;;  %v12236_v21 = vmul.f32 %v8899_v13, %v11892_v48  ;;  %v12238_v55 = vcvt.s32.f32 %v413_v38  ;;  %v4581_v28 = vmul.f32 1.442695, %v4507_v46  ;;  %v5579_v31 = vsel %vm4304_vm1, %v12211_v39, 0.0 }
 0x2ff   :  { %v12225_v51 = vpop.xlane.xlu1 %4387  ;;  %v12245_v26 = vmul.f32 %v8899_v13, %v11911_v32  ;;  %v12247_v52 = vcvt.s32.f32 %v414_v63  ;;  %v8903_v1 = vpop.eup %8902  ;;  %v5546_v38 = vsel %vm4304_vm1, %v12218_v34, 0.0  ;;  %v6764_v46 = vsel %vm4304_vm1, %v12221_v22, 0.0  ;;  %v15176_v34 = vld [vmem:[#allocation83_spill] sm:$0xff] }
 0x300   :  { %5577 = vadd.xlane.f32.xlu0 %v5576_v0  ;;  %15171 = vst [vmem:[#allocation59_spill] sm:$0xff] %v12236_v21  ;;  %v6797_v0 = vsel %vm4304_vm1, %v12215_v61, 0.0  ;;  %v12255_v44 = vcvt.s32.f32 %v415_v18  ;;  %8910 = vpow2.f32 %v4603_v53  ;;  %v4505_v13 = vsub.f32 %v15173_v54, %v12167_v25 }
 0x301   :  { %v12240_v20 = vpop.xlane.xlu0 %4378  ;;  %15172 = vst [vmem:[#allocation89_spill] sm:$0xff] %v12245_v26  ;;  %v12262_v63 = vmul.f32 %v8901_v16, %v12102_v41  ;;  %v8905_v61 = vpop.eup %8904  ;;  %v4583_v56 = vmul.f32 1.442695, %v4508_v29  ;;  %v4506_v23 = vsub.f32 %v15176_v34, %v12190_v3  ;;  %v5549_v18 = vsel %vm4304_vm1, %v12236_v21, 0.0  ;;  %v15178_v3 = vld [vmem:[#allocation87_spill] sm:$0xff] }
 0x302   :  { %5580 = vadd.xlane.f32.xlu1 %v5579_v31  ;;  %v12265_v31 = vmul.f32 %v8901_v16, %v12122_v35  ;;  %v12271_v53 = vcvt.s32.f32 %v416_v37  ;;  %8912 = vpow2.f32 %v4581_v28  ;;  %v6767_v54 = vsel %vm4304_vm1, %v12245_v26, 0.0 }
 0x303   :  { %v12259_v39 = vpop.xlane.xlu1 %4381  ;;  %15174 = vst [vmem:[#allocation58_spill] sm:$0xff] %v12262_v63  ;;  %v12278_v16 = vmul.f32 %v8903_v1, %v12109_v57  ;;  %v12280_v22 = vcvt.s32.f32 %v417_v36  ;;  %v8907_v29 = vpop.eup %8906  ;;  %v4523_v34 = vsub.f32 %v15178_v3, %v12206_v62  ;;  %v5172_v37 = vrot.slane %v12223_v59, %v10942_v11 }
 0x304   :  { %15175 = vst [vmem:[#allocation90_spill] sm:$0xff] %v12265_v31  ;;  %6795 = vadd.xlane.f32.xlu0 %v6794_v47  ;;  %v12285_v47 = vmul.f32 %v8903_v1, %v12136_v43  ;;  %v5176_v28 = vrot.slane %v12229_v42, %v10942_v11  ;;  %v4577_v26 = vmul.f32 1.442695, %v4505_v13  ;;  %v5540_v36 = vsel %vm4304_vm1, %v12262_v63, 0.0 }
 0x305   :  { %v12273_v25 = vpop.xlane.xlu0 %4348  ;;  %15177 = vst [vmem:[#allocation83_spill] sm:$0xff] %v12278_v16  ;;  %v12297_v2 = vsel %vm4304_vm1, %v12265_v31, 0.0  ;;  %v12300_v62 = vmul.f32 %v8905_v61, %v11754_v24  ;;  %8914 = vpow2.f32 %v4583_v56  ;;  %v4579_v1 = vmul.f32 1.442695, %v4506_v23 }
 0x306   :  { %6798 = vadd.xlane.f32.xlu1 %v6797_v0  ;;  %15179 = vst [vmem:[#allocation87_spill] sm:$0xff] %v12285_v47  ;;  %v12303_v0 = vmul.f32 %v8905_v61, %v11895_v27  ;;  %v12305_v3 = vcvt.s32.f32 %v418_v7  ;;  %v8909_v13 = vpop.eup %8908  ;;  %v5543_v63 = vsel %vm4304_vm1, %v12278_v16, 0.0  ;;  %v12312_v31 = vmul.f32 %v8907_v29, %v11892_v48  ;;  %v15184_v61 = vld [vmem:[#allocation86_spill] sm:$0xff] }
 0x307   :  { %v12291_v21 = vpop.xlane.xlu1 %4351  ;;  %15180 = vst [vmem:[#allocation91_spill] sm:$0xff] %v12300_v62  ;;  %v12315_v24 = vmul.f32 %v8907_v29, %v11911_v32  ;;  %v5180_v23 = vrot.slane %v12238_v55, %v10942_v11  ;;  %v4613_v56 = vmul.f32 1.442695, %v4523_v34  ;;  %v4524_v7 = vsub.f32 %v15184_v61, %v12225_v51 }
 0x308   :  { %5547 = vadd.xlane.f32.xlu0 %v5546_v38  ;;  %15181 = vst [vmem:[#allocation92_spill] sm:$0xff] %v12303_v0  ;;  %15182 = vst [vmem:[#allocation93_spill] sm:$0xff] %v12312_v31  ;;  %v12323_v38 = vsel %vm4304_vm1, %v12285_v47, 0.0  ;;  %v5413_v16 = vsel %vm5329_vm2, %v5176_v28, %v5172_v37  ;;  %8916 = vpow2.f32 %v4577_v26  ;;  %v12330_v29 = vsel %vm4304_vm1, %v12300_v62, 0.0 }
 0x309   :  { %v12307_v8 = vpop.xlane.xlu0 %4342  ;;  %15183 = vst [vmem:[#allocation94_spill] sm:$0xff] %v12315_v24  ;;  %v6365_v34 = vrot.slane %v11980_v60, %v10945_v45  ;;  %v6369_v51 = vrot.slane %v11982_v10, %v10945_v45  ;;  %8918 = vpow2.f32 %v4579_v1  ;;  %v12341_v26 = vmul.f32 %v8909_v13, %v12102_v41 }
 0x30a   :  { %5550 = vadd.xlane.f32.xlu1 %v5549_v18  ;;  %v12338_v18 = vsel %vm4304_vm1, %v12303_v0, 0.0  ;;  %v5184_v37 = vrot.slane %v12247_v52, %v10942_v11  ;;  %v8911_v28 = vpop.eup %8910  ;;  %v12349_v60 = vsel %vm4304_vm1, %v12312_v31, 0.0  ;;  %v12353_v10 = vsel %vm4304_vm1, %v12315_v24, 0.0  ;;  %v15187_v0 = vld [vmem:[#allocation79_spill] sm:$0xff] }
 0x30b   :  { %v12326_v27 = vpop.xlane.xlu1 %4345  ;;  %15185 = vst [vmem:[#allocation86_spill] sm:$0xff] %v12341_v26  ;;  %v5414_v1 = vsel %vm5331_vm3, %v5180_v23, %v5413_v16  ;;  %8920 = vpow2.f32 %v4613_v56  ;;  %v4615_v62 = vmul.f32 1.442695, %v4524_v7  ;;  %v4521_v47 = vsub.f32 %v15187_v0, %v12240_v20  ;;  %v15188_v20 = vld [vmem:[#allocation88_spill] sm:$0xff] }
 0x30c   :  { %6765 = vadd.xlane.f32.xlu0 %v6764_v46  ;;  %v12356_v46 = vmul.f32 %v8909_v13, %v12122_v35  ;;  %v6373_v41 = vrot.slane %v12005_v19, %v10945_v45  ;;  %v12363_v31 = vpop.eup %8912  ;;  %v5188_v24 = vrot.slane %v12255_v44, %v10942_v11  ;;  %v6624_v13 = vsel %vm5329_vm2, %v6369_v51, %v6365_v34  ;;  %v15190_v7 = vld [vmem:[#allocation80_spill] sm:$0xff] }
 0x30d   :  { %v12345_v61 = vpop.xlane.xlu0 %4396  ;;  %v6397_v16 = vrot.slane %v12223_v59, %v10945_v45  ;;  %v6401_v23 = vrot.slane %v12229_v42, %v10945_v45  ;;  %v12378_v19 = vsel %vm4304_vm1, %v12341_v26, 0.0  ;;  %v12381_v0 = vmul.f32 %v8911_v28, %v12109_v57 }
 0x30e   :  { %15186 = vst [vmem:[#allocation95_spill] sm:$0xff] %v12356_v46  ;;  %6768 = vadd.xlane.f32.xlu1 %v6767_v54  ;;  %v4522_v54 = vsub.f32 %v15188_v20, %v12259_v39  ;;  %v5415_v56 = vsel %vm5333_vm4, %v5184_v37, %v5414_v1  ;;  %v4511_v34 = vsub.f32 %v15190_v7, %v12273_v25  ;;  %v12390_v42 = vsel %vm4304_vm1, %v12356_v46, 0.0 }
 0x30f   :  { %v12365_v32 = vpop.xlane.xlu1 %4399  ;;  %15189 = vst [vmem:[#allocation79_spill] sm:$0xff] %v12381_v0  ;;  %v6377_v39 = vrot.slane %v12025_v5, %v10945_v45  ;;  %v12396_v51 = vpop.eup %8914  ;;  %v4609_v20 = vmul.f32 1.442695, %v4521_v47  ;;  %v12399_v37 = vmul.f32 %v8911_v28, %v12136_v43  ;;  %v5192_v25 = vrot.slane %v12271_v53, %v10942_v11 }
 0x310   :  { %5541 = vadd.xlane.f32.xlu0 %v5540_v36  ;;  %v6405_v36 = vrot.slane %v12238_v55, %v10945_v45  ;;  %v6625_v1 = vsel %vm5331_vm3, %v6373_v41, %v6624_v13  ;;  %8922 = vpow2.f32 %v4615_v62  ;;  %v5416_v5 = vsel %vm5335_vm5, %v5188_v24, %v5415_v56  ;;  %v261_v56 = vld [vmem:[%s14519_s4 + $0x42] sm:$0x1] }
 0x311   :  { %v12386_v59 = vpop.xlane.xlu0 %4390  ;;  %15191 = vst [vmem:[#allocation88_spill] sm:$0xff] %v12399_v37  ;;  %v6409_v55 = vrot.slane %v12247_v52, %v10945_v45  ;;  %v6631_v46 = vsel %vm5329_vm2, %v6401_v23, %v6397_v16  ;;  %v4611_v47 = vmul.f32 1.442695, %v4522_v54  ;;  %v12416_v41 = vsel %vm4304_vm1, %v12381_v0, 0.0  ;;  %v260_v52 = vld [vmem:[%s14519_s4 + $0x41] sm:$0x1] }
 0x312   :  { %5544 = vadd.xlane.f32.xlu1 %v5543_v63  ;;  %v259_v63 = vld [vmem:[%s14519_s4 + $0x40] sm:$0x1]  ;;  %v12420_v62 = vmul.f32 %v12363_v31, %v12201_v4  ;;  %v6381_v24 = vrot.slane %v12049_v15, %v10945_v45  ;;  %v12427_v28 = vpop.eup %8916  ;;  %v4589_v13 = vmul.f32 1.442695, %v4511_v34  ;;  %v6626_v23 = vsel %vm5333_vm4, %v6377_v39, %v6625_v1 }
 0x313   :  { %v12404_v7 = vpop.xlane.xlu1 %4393  ;;  %v6632_v54 = vsel %vm5331_vm3, %v6405_v36, %v6631_v46  ;;  %v12436_v0 = vpop.eup %8918  ;;  %8924 = vpow2.f32 %v4609_v20  ;;  %v5196_v15 = vrot.slane %v12280_v22, %v10942_v11  ;;  %v5417_v34 = vsel %vm5337_vm6, %v5192_v25, %v5416_v5  ;;  %v262_v46 = vld [vmem:[%s14519_s4 + $0x43] sm:$0x1] }
 0x314   :  { %6759 = vadd.xlane.f32.xlu0 %v12297_v2  ;;  %15192 = vst [vmem:[#allocation80_spill] sm:$0xff] %v12420_v62  ;;  %v15193_v2 = vld [vmem:[#allocation81_spill] sm:$0xff]  ;;  %v6385_v36 = vrot.slane %v12061_v14, %v10945_v45  ;;  %v6633_v20 = vsel %vm5333_vm4, %v6409_v55, %v6632_v54  ;;  %v387_v1 = vunpack.c.0.s8 %v259_v63  ;;  %v388_v25 = vunpack.c.0.s8 %v260_v52  ;;  %v264_v14 = vld [vmem:[%s14519_s4 + $0x45] sm:$0x1] }
 0x315   :  { %v4512_v16 = vsub.f32 %v15193_v2, %v12291_v21  ;;  %v6413_v21 = vrot.slane %v12255_v44, %v10945_v45  ;;  %v12447_v39 = vpop.xlane.xlu0 %4408  ;;  %v12455_v5 = vpop.eup %8920  ;;  %8926 = vpow2.f32 %v4611_v47  ;;  %v5200_v44 = vrot.slane %v12305_v3, %v10942_v11  ;;  %v266_v47 = vld [vmem:[%s14519_s4 + $0x47] sm:$0x1] }
 0x316   :  { %6762 = vadd.xlane.f32.xlu1 %v12323_v38  ;;  %v263_v38 = vld [vmem:[%s14519_s4 + $0x44] sm:$0x1]  ;;  %v6627_v2 = vsel %vm5335_vm5, %v6381_v24, %v6626_v23  ;;  %v389_v55 = vunpack.c.0.s8 %v261_v56  ;;  %8928 = vpow2.f32 %v4589_v13  ;;  %v6417_v63 = vrot.slane %v12271_v53, %v10945_v45 }
 0x317   :  { %v4591_v54 = vmul.f32 1.442695, %v4512_v16  ;;  %v12464_v26 = vpop.xlane.xlu1 %4411  ;;  %v390_v24 = vunpack.c.0.s8 %v262_v46  ;;  %v5418_v52 = vsel %vm5339_vm7, %v5196_v15, %v5417_v34  ;;  %v6389_v13 = vrot.slane %v12081_v6, %v10945_v45 }
 0x318   :  { %5595 = vadd.xlane.f32.xlu0 %v12330_v29  ;;  %v265_v29 = vld [vmem:[%s14519_s4 + $0x46] sm:$0x1]  ;;  %v6634_v16 = vsel %vm5335_vm5, %v6413_v21, %v6633_v20  ;;  %v391_v23 = vunpack.c.0.s8 %v263_v38  ;;  %v6628_v53 = vsel %vm5337_vm6, %v6385_v36, %v6627_v2  ;;  %v392_v56 = vunpack.c.0.s8 %v264_v14  ;;  %v15194_v21 = vld [vmem:[#allocation82_spill] sm:$0xff] }
 0x319   :  { %v12480_v43 = vcvt.s32.f32 %v387_v1  ;;  %v12482_v35 = vcvt.s32.f32 %v388_v25  ;;  %v393_v46 = vunpack.c.0.s8 %v265_v29  ;;  %v394_v15 = vunpack.c.0.s8 %v266_v47  ;;  %v15195_v36 = vld [vmem:[#allocation84_spill] sm:$0xff]  ;;  %v12495_v1 = vpop.xlane.xlu0 %4402 }
 0x31a   :  { %5598 = vadd.xlane.f32.xlu1 %v12349_v60  ;;  %v6421_v60 = vrot.slane %v12280_v22, %v10945_v45  ;;  %v12487_v34 = vcvt.s32.f32 %v389_v55  ;;  %v12489_v6 = vpop.eup %8922  ;;  %v4509_v20 = vsub.f32 %v15194_v21, %v12307_v8  ;;  %v4510_v38 = vsub.f32 %v15195_v36, %v12326_v27  ;;  %v270_v21 = vld [vmem:[%s14519_s4 + $0x4b] sm:$0x1] }
 0x31b   :  { %v6635_v25 = vsel %vm5337_vm6, %v6417_v63, %v6634_v16  ;;  %v12502_v22 = vsel %vm5341_vm8, %v5200_v44, %v5418_v52  ;;  %v6393_v2 = vrot.slane %v12084_v9, %v10945_v45  ;;  %v6425_v8 = vrot.slane %v12305_v3, %v10945_v45  ;;  %v12510_v27 = vpop.xlane.xlu1 %4405  ;;  %v267_v52 = vld [vmem:[%s14519_s4 + $0x48] sm:$0x1] }
 0x31c   :  { %6813 = vadd.xlane.f32.xlu0 %v12338_v18  ;;  %v12498_v18 = vcvt.s32.f32 %v390_v24  ;;  %15196 = vst [vmem:[#allocation81_spill] sm:$0xff] %v12502_v22  ;;  %v12508_v14 = vcvt.s32.f32 %v391_v23  ;;  %v6629_v55 = vsel %vm5339_vm7, %v6389_v13, %v6628_v53  ;;  %v12513_v63 = vcvt.s32.f32 %v392_v56  ;;  %v268_v23 = vld [vmem:[%s14519_s4 + $0x49] sm:$0x1]  ;;  %v269_v53 = vld [vmem:[%s14519_s4 + $0x4a] sm:$0x1] }
 0x31d   :  { %v5080_v44 = vrot.slane %v12482_v35, %v10942_v11  ;;  %v12519_v29 = vpop.eup %8924  ;;  %v6636_v9 = vsel %vm5339_vm7, %v6421_v60, %v6635_v25  ;;  %v12523_v3 = vcvt.s32.f32 %v393_v46  ;;  %v12525_v47 = vcvt.s32.f32 %v394_v15  ;;  %v12558_v25 = vpop.xlane.xlu0 %4456 }
 0x31e   :  { %6816 = vadd.xlane.f32.xlu1 %v12353_v10  ;;  %v5076_v10 = vrot.slane %v12480_v43, %v10942_v11  ;;  %v5084_v24 = vrot.slane %v12487_v34, %v10942_v11  ;;  %8930 = vpow2.f32 %v4591_v54  ;;  %v6809_v13 = vsel %vm4304_vm1, %v12399_v37, 0.0 }
 0x31f   :  { %v5088_v16 = vrot.slane %v12498_v18, %v10942_v11  ;;  %v12544_v56 = vpop.eup %8926  ;;  %v4585_v54 = vmul.f32 1.442695, %v4509_v20  ;;  %v4587_v60 = vmul.f32 1.442695, %v4510_v38  ;;  %v12549_v46 = vmul.f32 %v12396_v51, %v12502_v22 }
 0x320   :  { %5589 = vadd.xlane.f32.xlu0 %v12378_v19  ;;  %v5558_v19 = vsel %vm4304_vm1, %v12420_v62, 0.0  ;;  %v5092_v15 = vrot.slane %v12508_v14, %v10942_v11  ;;  %v12556_v36 = vpop.eup %8928  ;;  %v12561_v20 = vsel %vm5341_vm8, %v6393_v2, %v6629_v55  ;;  %v5096_v38 = vrot.slane %v12513_v63, %v10942_v11  ;;  %v271_v2 = vld [vmem:[%s14519_s4 + $0x4c] sm:$0x1] }
 0x321   :  { %15197 = vst [vmem:[#allocation82_spill] sm:$0xff] %v12549_v46  ;;  %15198 = vst [vmem:[#allocation84_spill] sm:$0xff] %v12561_v20  ;;  %v5392_v62 = vsel %vm5329_vm2, %v5080_v44, %v5076_v10  ;;  %v5100_v37 = vrot.slane %v12523_v3, %v10942_v11  ;;  %v5104_v57 = vrot.slane %v12525_v47, %v10942_v11  ;;  %v395_v55 = vunpack.c.0.s8 %v267_v52  ;;  %v12581_v10 = vpop.xlane.xlu1 %4459  ;;  %v273_v44 = vld [vmem:[%s14519_s4 + $0x4e] sm:$0x1]  ;;  %v12607_v50 = vpop.xlane.xlu0 %4450 }
 0x322   :  { %5592 = vadd.xlane.f32.xlu1 %v12416_v41  ;;  %v12564_v41 = vsel %vm5341_vm8, %v6425_v8, %v6636_v9  ;;  %v5393_v48 = vsel %vm5331_vm3, %v5084_v24, %v5392_v62  ;;  %v272_v8 = vld [vmem:[%s14519_s4 + $0x4d] sm:$0x1]  ;;  %v274_v62 = vld [vmem:[%s14519_s4 + $0x4f] sm:$0x1]  ;;  %v396_v9 = vunpack.c.0.s8 %v268_v23  ;;  %v397_v24 = vunpack.c.0.s8 %v269_v53 }
 0x323   :  { %15199 = vst [vmem:[#allocation96_spill] sm:$0xff] %v12564_v41  ;;  %v398_v12 = vunpack.c.0.s8 %v270_v21  ;;  %v4527_v58 = vsub.f32 %v15200_v17, %v12345_v61  ;;  %v5561_v52 = vsel %vm4304_vm1, %v12549_v46, 0.0  ;;  %v12601_v30 = vmul.f32 %v12396_v51, %v12564_v41 }
 0x324   :  { %6807 = vadd.xlane.f32.xlu0 %v12390_v42  ;;  %v5394_v42 = vsel %vm5333_vm4, %v5088_v16, %v5393_v48  ;;  %v12596_v48 = vmul.f32 %v12363_v31, %v12561_v20  ;;  %v399_v53 = vunpack.c.0.s8 %v271_v2  ;;  %v400_v21 = vunpack.c.0.s8 %v272_v8  ;;  %v15205_v2 = vld [vmem:[#allocation10_spill] sm:$0xff] }
 0x325   :  { %v5395_v16 = vsel %vm5335_vm5, %v5092_v15, %v5394_v42  ;;  %15202 = vst [vmem:[#allocation97_spill] sm:$0xff] %v12601_v30  ;;  %v401_v61 = vunpack.c.0.s8 %v273_v44  ;;  %v12605_v46 = vcvt.s32.f32 %v395_v55  ;;  %v12612_v15 = vcvt.s32.f32 %v396_v9  ;;  %v12624_v44 = vpop.xlane.xlu1 %4453 }
 0x326   :  { %6810 = vadd.xlane.f32.xlu1 %v6809_v13  ;;  %15201 = vst [vmem:[#allocation85_spill] sm:$0xff] %v12596_v48  ;;  %v5396_v23 = vsel %vm5337_vm6, %v5096_v38, %v5395_v16  ;;  %v402_v13 = vunpack.c.0.s8 %v274_v62  ;;  %v12614_v51 = vcvt.s32.f32 %v397_v24  ;;  %v12616_v42 = vcvt.s32.f32 %v398_v12 }
 0x327   :  { %v5397_v17 = vsel %vm5339_vm7, %v5100_v37, %v5396_v23  ;;  %8932 = vpow2.f32 %v4585_v54  ;;  %v4621_v38 = vmul.f32 1.442695, %v4527_v58  ;;  %v4525_v8 = vsub.f32 %v15205_v2, %v12386_v59 }
 0x328   :  { %5559 = vadd.xlane.f32.xlu0 %v5558_v19  ;;  %v12610_v31 = vsel %vm5341_vm8, %v5104_v57, %v5397_v17  ;;  %v15204_v19 = vld [vmem:[#allocation19_spill] sm:$0xff]  ;;  %v12622_v55 = vpop.eup %8930  ;;  %v6776_v57 = vsel %vm4304_vm1, %v12596_v48, 0.0  ;;  %v12632_v54 = vcvt.s32.f32 %v399_v53  ;;  %v12634_v58 = vcvt.s32.f32 %v400_v21  ;;  %v12652_v21 = vpop.xlane.xlu0 %4420 }
 0x329   :  { %15203 = vst [vmem:[#allocation98_spill] sm:$0xff] %v12610_v31  ;;  %v4528_v37 = vsub.f32 %v15204_v19, %v12365_v32  ;;  %v12630_v12 = vmul.f32 %v12427_v28, %v12610_v31  ;;  %8934 = vpow2.f32 %v4587_v60  ;;  %v6779_v32 = vsel %vm4304_vm1, %v12601_v30, 0.0  ;;  %v15207_v19 = vld [vmem:[#allocation20_spill] sm:$0xff] }
 0x32a   :  { %5562 = vadd.xlane.f32.xlu1 %v5561_v52  ;;  %v12638_v59 = vcvt.s32.f32 %v401_v61  ;;  %v12640_v62 = vcvt.s32.f32 %v402_v13  ;;  %v5108_v9 = vrot.slane %v12605_v46, %v10942_v11  ;;  %v5112_v24 = vrot.slane %v12612_v15, %v10942_v11 }
 0x32b   :  { %15206 = vst [vmem:[#allocation19_spill] sm:$0xff] %v12630_v12  ;;  %v5116_v52 = vrot.slane %v12614_v51, %v10942_v11  ;;  %v5120_v60 = vrot.slane %v12616_v42, %v10942_v11  ;;  %8936 = vpow2.f32 %v4621_v38  ;;  %v4623_v16 = vmul.f32 1.442695, %v4528_v37  ;;  %v15208_v38 = vld [vmem:[#allocation21_spill] sm:$0xff] }
 0x32c   :  { %6777 = vadd.xlane.f32.xlu0 %v6776_v57  ;;  %v5124_v23 = vrot.slane %v12632_v54, %v10942_v11  ;;  %v4617_v53 = vmul.f32 1.442695, %v4525_v8  ;;  %v5552_v17 = vsel %vm4304_vm1, %v12630_v12, 0.0  ;;  %v5128_v61 = vrot.slane %v12634_v58, %v10942_v11 }
 0x32d   :  { %v5399_v13 = vsel %vm5329_vm2, %v5112_v24, %v5108_v9  ;;  %v4526_v2 = vsub.f32 %v15207_v19, %v12404_v7  ;;  %v4531_v37 = vsub.f32 %v15208_v38, %v12447_v39  ;;  %v5132_v8 = vrot.slane %v12638_v59, %v10942_v11 }
 0x32e   :  { %6780 = vadd.xlane.f32.xlu1 %v6779_v32  ;;  %v5400_v57 = vsel %vm5331_vm3, %v5116_v52, %v5399_v13  ;;  %v12666_v32 = vpop.xlane.xlu1 %4423  ;;  %v5136_v30 = vrot.slane %v12640_v62, %v10942_v11  ;;  %v6301_v9 = vrot.slane %v12480_v43, %v10945_v45  ;;  %v6305_v7 = vrot.slane %v12482_v35, %v10945_v45 }
 0x32f   :  { %v5401_v48 = vsel %vm5333_vm4, %v5120_v60, %v5400_v57  ;;  %8938 = vpow2.f32 %v4623_v16  ;;  %v6309_v24 = vrot.slane %v12487_v34, %v10945_v45  ;;  %v4619_v60 = vmul.f32 1.442695, %v4526_v2  ;;  %v15211_v2 = vld [vmem:[#allocation22_spill] sm:$0xff] }
 0x330   :  { %5553 = vadd.xlane.f32.xlu0 %v5552_v17  ;;  %v5402_v39 = vsel %vm5335_vm5, %v5124_v23, %v5401_v48  ;;  %8940 = vpow2.f32 %v4617_v53  ;;  %v6313_v17 = vrot.slane %v12498_v18, %v10945_v45  ;;  %v4629_v19 = vmul.f32 1.442695, %v4531_v37  ;;  %v15209_v48 = vld [vmem:[#allocation23_spill] sm:$0xff]  ;;  %v12688_v23 = vpop.xlane.xlu0 %4414 }
 0x331   :  { %v5403_v52 = vsel %vm5337_vm6, %v5128_v61, %v5402_v39  ;;  %v12681_v13 = vpop.eup %8932  ;;  %v6317_v35 = vrot.slane %v12508_v14, %v10945_v45  ;;  %v4532_v16 = vsub.f32 %v15209_v48, %v12464_v26  ;;  %v6321_v18 = vrot.slane %v12513_v63, %v10945_v45 }
 0x332   :  { %v5404_v43 = vsel %vm5339_vm7, %v5132_v8, %v5403_v52  ;;  %v6610_v53 = vsel %vm5329_vm2, %v6305_v7, %v6301_v9  ;;  %v4529_v38 = vsub.f32 %v15211_v2, %v12495_v1  ;;  %v6325_v26 = vrot.slane %v12523_v3, %v10945_v45  ;;  %v12707_v37 = vpop.xlane.xlu1 %4417 }
 0x333   :  { %v12691_v34 = vsel %vm5341_vm8, %v5136_v30, %v5404_v43  ;;  %v12696_v61 = vpop.eup %8934  ;;  %v6611_v30 = vsel %vm5331_vm3, %v6309_v24, %v6610_v53  ;;  %v6329_v63 = vrot.slane %v12525_v47, %v10945_v45  ;;  %v6333_v57 = vrot.slane %v12605_v46, %v10945_v45  ;;  %v15213_v47 = vld [vmem:[#allocation25_spill] sm:$0xff] }
 0x334   :  { %15210 = vst [vmem:[#allocation10_spill] sm:$0xff] %v12691_v34  ;;  %v12702_v14 = vmul.f32 %v12436_v0, %v12691_v34  ;;  %v6612_v8 = vsel %vm5333_vm4, %v6313_v17, %v6611_v30  ;;  %v6337_v1 = vrot.slane %v12612_v15, %v10945_v45  ;;  %8942 = vpow2.f32 %v4619_v60 }
 0x335   :  { %v12716_v9 = vpop.eup %8936  ;;  %v6613_v7 = vsel %vm5335_vm5, %v6317_v35, %v6612_v8  ;;  %v6341_v39 = vrot.slane %v12614_v51, %v10945_v45  ;;  %8944 = vpow2.f32 %v4629_v19  ;;  %v4530_v24 = vsub.f32 %v15213_v47, %v12510_v27  ;;  %v15214_v35 = vld [vmem:[#allocation24_spill] sm:$0xff]  ;;  %v12733_v19 = vpop.xlane.xlu0 %4468 }
 0x336   :  { %15212 = vst [vmem:[#allocation20_spill] sm:$0xff] %v12702_v14  ;;  %v5555_v3 = vsel %vm4304_vm1, %v12702_v14, 0.0  ;;  %v6614_v46 = vsel %vm5337_vm6, %v6321_v18, %v6613_v7  ;;  %v6345_v15 = vrot.slane %v12616_v42, %v10945_v45  ;;  %v4631_v52 = vmul.f32 1.442695, %v4532_v16  ;;  %v15216_v18 = vld [vmem:[#allocation28_spill] sm:$0xff] }
 0x337   :  { %5556 = vadd.xlane.f32.xlu1 %v5555_v3  ;;  %v4625_v17 = vmul.f32 1.442695, %v4529_v38  ;;  %v6615_v60 = vsel %vm5339_vm7, %v6325_v26, %v6614_v46  ;;  %v6349_v43 = vrot.slane %v12632_v54, %v10945_v45  ;;  %v4547_v51 = vsub.f32 %v15214_v35, %v12558_v25  ;;  %v15225_v35 = vld [vmem:[#allocation31_spill] sm:$0xff] }
 0x338   :  { %v12736_v27 = vsel %vm5341_vm8, %v6329_v63, %v6615_v60  ;;  %v6353_v48 = vrot.slane %v12634_v58, %v10945_v45  ;;  %v6617_v42 = vsel %vm5329_vm2, %v6337_v1, %v6333_v57  ;;  %v4548_v53 = vsub.f32 %v15216_v18, %v12581_v10  ;;  %v15218_v58 = vld [vmem:[#allocation26_spill] sm:$0xff]  ;;  %v12756_v63 = vpop.xlane.xlu1 %4471 }
 0x339   :  { %15215 = vst [vmem:[#allocation21_spill] sm:$0xff] %v12736_v27  ;;  %v12741_v16 = vpop.eup %8938  ;;  %v12747_v54 = vmul.f32 %v12427_v28, %v12736_v27  ;;  %v6357_v25 = vrot.slane %v12638_v59, %v10945_v45  ;;  %v6618_v2 = vsel %vm5331_vm3, %v6341_v39, %v6617_v42  ;;  %v4627_v26 = vmul.f32 1.442695, %v4530_v24  ;;  %v15219_v28 = vld [vmem:[#allocation29_spill] sm:$0xff]  ;;  %v12772_v47 = vpop.xlane.xlu0 %4462 }
 0x33a   :  { %v12752_v38 = vpop.eup %8940  ;;  %v4545_v30 = vsub.f32 %v15218_v58, %v12607_v50  ;;  %v6361_v10 = vrot.slane %v12640_v62, %v10945_v45  ;;  %v6619_v8 = vsel %vm5333_vm4, %v6345_v15, %v6618_v2  ;;  %v4546_v57 = vsub.f32 %v15219_v28, %v12624_v44  ;;  %v311_v2 = vld [vmem:[%s14519_s4 + $0x74] sm:$0x1]  ;;  %v312_v58 = vld [vmem:[%s14519_s4 + $0x75] sm:$0x1]  ;;  %v15229_v28 = vld [vmem:[#allocation33_spill] sm:$0xff] }
 0x33b   :  { %15217 = vst [vmem:[#allocation23_spill] sm:$0xff] %v12747_v54  ;;  %v6770_v59 = vsel %vm4304_vm1, %v12747_v54, 0.0  ;;  %v6620_v1 = vsel %vm5335_vm5, %v6349_v43, %v6619_v8  ;;  %v12768_v3 = vmul.f32 %v12455_v5, %v12201_v4  ;;  %8946 = vpow2.f32 %v4631_v52 }
 0x33c   :  { %v4661_v50 = vmul.f32 1.442695, %v4547_v51  ;;  %6771 = vadd.xlane.f32.xlu0 %v6770_v59  ;;  %v6621_v7 = vsel %vm5337_vm6, %v6353_v48, %v6620_v1  ;;  %8948 = vpow2.f32 %v4625_v17  ;;  %v4663_v62 = vmul.f32 1.442695, %v4548_v53  ;;  %v12793_v48 = vpop.xlane.xlu1 %4465  ;;  %v309_v53 = vld [vmem:[%s14519_s4 + $0x72] sm:$0x1] }
 0x33d   :  { %15220 = vst [vmem:[#allocation22_spill] sm:$0xff] %v12768_v3  ;;  %v6622_v39 = vsel %vm5339_vm7, %v6357_v25, %v6621_v7  ;;  %8950 = vpow2.f32 %v4627_v26  ;;  %v4657_v44 = vmul.f32 1.442695, %v4545_v30  ;;  %v4659_v15 = vmul.f32 1.442695, %v4546_v57  ;;  %v12836_v59 = vpop.xlane.xlu0 %4432 }
 0x33e   :  { %v12775_v24 = vsel %vm5341_vm8, %v6361_v10, %v6622_v39  ;;  %v12777_v46 = vpop.eup %8942  ;;  %v5606_v17 = vsel %vm4304_vm1, %v12768_v3, 0.0  ;;  %v12787_v60 = vmul.f32 %v12455_v5, %v12561_v20  ;;  %8952 = vpow2.f32 %v4661_v50  ;;  %v310_v25 = vld [vmem:[%s14519_s4 + $0x73] sm:$0x1]  ;;  %v313_v30 = vld [vmem:[%s14519_s4 + $0x76] sm:$0x1] }
 0x33f   :  { %15221 = vst [vmem:[#allocation25_spill] sm:$0xff] %v12775_v24  ;;  %v12781_v52 = vmul.f32 %v12436_v0, %v12775_v24  ;;  %v12789_v43 = vpop.eup %8944  ;;  %v4535_v51 = vsub.f32 %v15225_v35, %v12652_v21  ;;  %v307_v0 = vld [vmem:[%s14519_s4 + $0x70] sm:$0x1]  ;;  %8954 = vpow2.f32 %v4663_v62  ;;  %v12802_v5 = vmul.f32 %v12489_v6, %v12502_v22  ;;  %v308_v21 = vld [vmem:[%s14519_s4 + $0x71] sm:$0x1]  ;;  %v15230_v62 = vld [vmem:[#allocation32_spill] sm:$0xff] }
 0x340   :  { %15223 = vst [vmem:[#allocation28_spill] sm:$0xff] %v12787_v60  ;;  %15224 = vst [vmem:[#allocation26_spill] sm:$0xff] %v12789_v43  ;;  %5607 = vadd.xlane.f32.xlu0 %v5606_v17  ;;  %v12806_v18 = vmul.f32 %v12489_v6, %v12564_v41  ;;  %8956 = vpow2.f32 %v4657_v44  ;;  %v6824_v6 = vsel %vm4304_vm1, %v12787_v60, 0.0  ;;  %v12824_v26 = vmul.f32 %v12519_v29, %v12610_v31  ;;  %v314_v1 = vld [vmem:[%s14519_s4 + $0x77] sm:$0x1] }
 0x341   :  { %15222 = vst [vmem:[#allocation24_spill] sm:$0xff] %v12781_v52  ;;  %v6773_v42 = vsel %vm4304_vm1, %v12781_v52, 0.0  ;;  %15226 = vst [vmem:[#allocation29_spill] sm:$0xff] %v12802_v5  ;;  %8958 = vpow2.f32 %v4659_v15  ;;  %v435_v10 = vunpack.c.0.s8 %v307_v0  ;;  %v12832_v8 = vmul.f32 1.442695, %v4535_v51  ;;  %v12853_v51 = vpop.xlane.xlu1 %4435 }
 0x342   :  { %15227 = vst [vmem:[#allocation31_spill] sm:$0xff] %v12806_v18  ;;  %6774 = vadd.xlane.f32.xlu1 %v6773_v42  ;;  %15228 = vst [vmem:[#allocation99_spill] sm:$0xff] %v12824_v26  ;;  %v436_v50 = vunpack.c.0.s8 %v308_v21  ;;  %v437_v7 = vunpack.c.0.s8 %v309_v53  ;;  %v5609_v44 = vsel %vm4304_vm1, %v12802_v5, 0.0  ;;  %v6827_v15 = vsel %vm4304_vm1, %v12806_v18, 0.0  ;;  %v322_v41 = vld [vmem:[%s14519_s4 + $0x7f] sm:$0x1] }
 0x343   :  { %v12849_v17 = vmul.f32 %v12544_v56, %v12691_v34  ;;  %v438_v0 = vunpack.c.0.s8 %v310_v25  ;;  %v439_v42 = vunpack.c.0.s8 %v311_v2  ;;  %v440_v21 = vunpack.c.0.s8 %v312_v58  ;;  %v321_v34 = vld [vmem:[%s14519_s4 + $0x7e] sm:$0x1] }
 0x344   :  { %6825 = vadd.xlane.f32.xlu0 %v6824_v6  ;;  %v441_v53 = vunpack.c.0.s8 %v313_v30  ;;  %v5600_v39 = vsel %vm4304_vm1, %v12824_v26, 0.0  ;;  %v12861_v57 = vmul.f32 %v12519_v29, %v12736_v27  ;;  %v442_v3 = vunpack.c.0.s8 %v314_v1  ;;  %v315_v1 = vld [vmem:[%s14519_s4 + $0x78] sm:$0x1]  ;;  %v320_v27 = vld [vmem:[%s14519_s4 + $0x7d] sm:$0x1] }
 0x345   :  { %15231 = vst [vmem:[#allocation33_spill] sm:$0xff] %v12849_v17  ;;  %v12851_v35 = vpop.eup %8946  ;;  %v12863_v60 = vcvt.s32.f32 %v435_v10  ;;  %v12869_v25 = vcvt.s32.f32 %v437_v7  ;;  %v12871_v2 = vcvt.s32.f32 %v438_v0  ;;  %v12873_v58 = vcvt.s32.f32 %v439_v42 }
 0x346   :  { %15232 = vst [vmem:[#allocation32_spill] sm:$0xff] %v12851_v35  ;;  %5610 = vadd.xlane.f32.xlu1 %v5609_v44  ;;  %v12855_v6 = vpop.eup %8948  ;;  %15234 = vst [vmem:[#allocation101_spill] sm:$0xff] %v12861_v57  ;;  %v12867_v44 = vcvt.s32.f32 %v436_v50  ;;  %v5603_v30 = vsel %vm4304_vm1, %v12849_v17, 0.0  ;;  %v12877_v26 = vcvt.s32.f32 %v440_v21  ;;  %v12879_v29 = vcvt.s32.f32 %v441_v53  ;;  %v316_v50 = vld [vmem:[%s14519_s4 + $0x79] sm:$0x1] }
 0x347   :  { %15233 = vst [vmem:[#allocation100_spill] sm:$0xff] %v12855_v6  ;;  %v12865_v5 = vpop.eup %8950  ;;  %v12881_v10 = vcvt.s32.f32 %v442_v3  ;;  %v5268_v0 = vrot.slane %v12863_v60, %v10942_v11  ;;  %v5276_v42 = vrot.slane %v12869_v25, %v10942_v11  ;;  %v5280_v21 = vrot.slane %v12871_v2, %v10942_v11  ;;  %v317_v53 = vld [vmem:[%s14519_s4 + $0x7a] sm:$0x1]  ;;  %v319_v17 = vld [vmem:[%s14519_s4 + $0x7c] sm:$0x1] }
 0x348   :  { %15235 = vst [vmem:[#allocation102_spill] sm:$0xff] %v12865_v5  ;;  %5601 = vadd.xlane.f32.xlu0 %v5600_v39  ;;  %v12889_v7 = vpop.eup %8952  ;;  %v12891_v39 = vpop.xlane.xlu0 %4426  ;;  %v5272_v3 = vrot.slane %v12867_v44, %v10942_v11  ;;  %v6818_v52 = vsel %vm4304_vm1, %v12861_v57, 0.0  ;;  %v12916_v54 = vmul.f32 %v12544_v56, %v12775_v24  ;;  %v5284_v14 = vrot.slane %v12873_v58, %v10942_v11 }
 0x349   :  { %15236 = vst [vmem:[#allocation103_spill] sm:$0xff] %v12889_v7  ;;  %v12910_v18 = vpop.eup %8954  ;;  %v5288_v12 = vrot.slane %v12877_v26, %v10942_v11  ;;  %v12930_v57 = vpop.xlane.xlu1 %4429  ;;  %v5292_v56 = vrot.slane %v12879_v29, %v10942_v11  ;;  %v443_v20 = vunpack.c.0.s8 %v315_v1  ;;  %v444_v22 = vunpack.c.0.s8 %v316_v50 }
 0x34a   :  { %6828 = vadd.xlane.f32.xlu1 %v6827_v15  ;;  %v318_v15 = vld [vmem:[%s14519_s4 + $0x7b] sm:$0x1]  ;;  %15237 = vst [vmem:[#allocation104_spill] sm:$0xff] %v12910_v18  ;;  %15238 = vst [vmem:[#allocation105_spill] sm:$0xff] %v12916_v54  ;;  %v12928_v31 = vpop.eup %8956  ;;  %v5434_v24 = vsel %vm5329_vm2, %v5272_v3, %v5268_v0  ;;  %v445_v7 = vunpack.c.0.s8 %v317_v53  ;;  %v447_v5 = vunpack.c.0.s8 %v319_v17  ;;  %v448_v0 = vunpack.c.0.s8 %v320_v27 }
 0x34b   :  { %15239 = vst [vmem:[#allocation106_spill] sm:$0xff] %v12928_v31  ;;  %v12938_v4 = vpop.eup %8958  ;;  %v5435_v18 = vsel %vm5331_vm3, %v5276_v42, %v5434_v24  ;;  %v446_v31 = vunpack.c.0.s8 %v318_v15  ;;  %v449_v3 = vunpack.c.0.s8 %v321_v34  ;;  %v450_v49 = vunpack.c.0.s8 %v322_v41 }
 0x34c   :  { %6819 = vadd.xlane.f32.xlu0 %v6818_v52  ;;  %15240 = vst [vmem:[#allocation107_spill] sm:$0xff] %v12938_v4  ;;  %v5296_v52 = vrot.slane %v12881_v10, %v10942_v11  ;;  %v5436_v6 = vsel %vm5333_vm4, %v5280_v21, %v5435_v18  ;;  %v12945_v1 = vcvt.s32.f32 %v443_v20  ;;  %v12947_v50 = vcvt.s32.f32 %v444_v22  ;;  %v12949_v4 = vpop.xlane.xlu0 %4480 }
 0x34d   :  { %v5437_v35 = vsel %vm5335_vm5, %v5284_v14, %v5436_v6  ;;  %v6821_v24 = vsel %vm4304_vm1, %v12916_v54, 0.0  ;;  %v12956_v42 = vcvt.s32.f32 %v446_v31  ;;  %v12959_v27 = vcvt.s32.f32 %v447_v5  ;;  %v12965_v22 = vpop.xlane.xlu1 %4483 }
 0x34e   :  { %5604 = vadd.xlane.f32.xlu1 %v5603_v30  ;;  %v5438_v17 = vsel %vm5337_vm6, %v5288_v12, %v5437_v35  ;;  %v12954_v30 = vcvt.s32.f32 %v445_v7  ;;  %v12961_v41 = vcvt.s32.f32 %v448_v0  ;;  %v12963_v20 = vcvt.s32.f32 %v449_v3 }
 0x34f   :  { %v5439_v34 = vsel %vm5339_vm7, %v5292_v56, %v5438_v17  ;;  %v12970_v18 = vcvt.s32.f32 %v450_v49  ;;  %v5300_v31 = vrot.slane %v12945_v1, %v10942_v11  ;;  %v5304_v12 = vrot.slane %v12947_v50, %v10942_v11 }
 0x350   :  { %v12968_v14 = vsel %vm5341_vm8, %v5296_v52, %v5439_v34  ;;  %v5308_v35 = vrot.slane %v12954_v30, %v10942_v11  ;;  %v5312_v6 = vrot.slane %v12956_v42, %v10942_v11  ;;  %v5316_v49 = vrot.slane %v12959_v27, %v10942_v11 }
 0x351   :  { %15241 = vst [vmem:[#allocation108_spill] sm:$0xff] %v12968_v14  ;;  %v12978_v5 = vmul.f32 %v12556_v36, %v12968_v14  ;;  %8960 = vpow2.f32 %v12832_v8  ;;  %v5320_v7 = vrot.slane %v12961_v41, %v10942_v11  ;;  %v5324_v21 = vrot.slane %v12963_v20, %v10942_v11  ;;  %v12999_v8 = vpop.xlane.xlu0 %4474 }
 0x352   :  { %6822 = vadd.xlane.f32.xlu1 %v6821_v24  ;;  %v5441_v53 = vsel %vm5329_vm2, %v5304_v12, %v5300_v31  ;;  %v5328_v56 = vrot.slane %v12970_v18, %v10942_v11  ;;  %v6493_v0 = vrot.slane %v12863_v60, %v10945_v45  ;;  %v6497_v24 = vrot.slane %v12867_v44, %v10945_v45  ;;  %v15245_v44 = vld [vmem:[#allocation35_spill] sm:$0xff] }
 0x353   :  { %15242 = vst [vmem:[#allocation109_spill] sm:$0xff] %v12978_v5  ;;  %v5570_v15 = vsel %vm4304_vm1, %v12978_v5, 0.0  ;;  %v5442_v52 = vsel %vm5331_vm3, %v5308_v35, %v5441_v53  ;;  %v6501_v17 = vrot.slane %v12869_v25, %v10945_v45  ;;  %v6505_v34 = vrot.slane %v12871_v2, %v10945_v45  ;;  %v13019_v25 = vpop.xlane.xlu1 %4477  ;;  %v306_v5 = vld [vmem:[%s14519_s4 + $0x6f] sm:$0x1] }
 0x354   :  { %5571 = vadd.xlane.f32.xlu0 %v5570_v15  ;;  %v5443_v3 = vsel %vm5333_vm4, %v5312_v6, %v5442_v52  ;;  %v15243_v31 = vsub.f32 %v15229_v28, %v12666_v32  ;;  %v15244_v60 = vsub.f32 %v15230_v62, %v12688_v23  ;;  %v6509_v6 = vrot.slane %v12873_v58, %v10945_v45 }
 0x355   :  { %v5444_v53 = vsel %vm5335_vm5, %v5316_v49, %v5443_v3  ;;  %v4534_v15 = vsub.f32 %v15245_v44, %v12707_v37  ;;  %v6513_v32 = vrot.slane %v12877_v26, %v10945_v45  ;;  %v6652_v28 = vsel %vm5329_vm2, %v6497_v24, %v6493_v0  ;;  %v292_v3 = vld [vmem:[%s14519_s4 + $0x61] sm:$0x1]  ;;  %v295_v44 = vld [vmem:[%s14519_s4 + $0x64] sm:$0x1] }
 0x356   :  { %v4639_v12 = vmul.f32 1.442695, %v15243_v31  ;;  %v4633_v35 = vmul.f32 1.442695, %v15244_v60  ;;  %v5445_v2 = vsel %vm5337_vm6, %v5320_v7, %v5444_v53  ;;  %v6517_v62 = vrot.slane %v12879_v29, %v10945_v45  ;;  %v294_v31 = vld [vmem:[%s14519_s4 + $0x63] sm:$0x1] }
 0x357   :  { %v5446_v23 = vsel %vm5339_vm7, %v5324_v21, %v5445_v2  ;;  %v6521_v58 = vrot.slane %v12881_v10, %v10945_v45  ;;  %v6653_v49 = vsel %vm5331_vm3, %v6501_v17, %v6652_v28  ;;  %v6525_v26 = vrot.slane %v12945_v1, %v10945_v45  ;;  %v13070_v60 = vpop.xlane.xlu1 %4447 }
 0x358   :  { %v13032_v37 = vsel %vm5341_vm8, %v5328_v56, %v5446_v23  ;;  %v6654_v7 = vsel %vm5333_vm4, %v6505_v34, %v6653_v49  ;;  %v6529_v52 = vrot.slane %v12947_v50, %v10945_v45  ;;  %8962 = vpow2.f32 %v4639_v12  ;;  %v13046_v56 = vpop.xlane.xlu0 %4444  ;;  %v291_v50 = vld [vmem:[%s14519_s4 + $0x60] sm:$0x1]  ;;  %15249 = vst [vmem:[#allocation112_spill] sm:$0xff] %v13070_v60 }
 0x359   :  { %15246 = vst [vmem:[#allocation35_spill] sm:$0xff] %v13032_v37  ;;  %v13041_v29 = vmul.f32 %v12622_v55, %v13032_v37  ;;  %v6655_v10 = vsel %vm5335_vm5, %v6509_v6, %v6654_v7  ;;  %v6533_v21 = vrot.slane %v12954_v30, %v10945_v45  ;;  %8964 = vpow2.f32 %v4633_v35  ;;  %v293_v30 = vld [vmem:[%s14519_s4 + $0x62] sm:$0x1] }
 0x35a   :  { %v6656_v0 = vsel %vm5337_vm6, %v6513_v32, %v6655_v10  ;;  %v6537_v1 = vrot.slane %v12956_v42, %v10945_v45  ;;  %v4635_v24 = vmul.f32 1.442695, %v4534_v15  ;;  %v6541_v42 = vrot.slane %v12959_v27, %v10945_v45  ;;  %v296_v15 = vld [vmem:[%s14519_s4 + $0x65] sm:$0x1] }
 0x35b   :  { %15247 = vst [vmem:[#allocation110_spill] sm:$0xff] %v13041_v29  ;;  %v5573_v17 = vsel %vm4304_vm1, %v13041_v29, 0.0  ;;  %v6657_v34 = vsel %vm5339_vm7, %v6517_v62, %v6656_v0  ;;  %v13068_v12 = vpop.eup %8960  ;;  %v6545_v53 = vrot.slane %v12961_v41, %v10945_v45  ;;  %v6549_v6 = vrot.slane %v12963_v20, %v10945_v45  ;;  %v297_v41 = vld [vmem:[%s14519_s4 + $0x66] sm:$0x1]  ;;  %v298_v20 = vld [vmem:[%s14519_s4 + $0x67] sm:$0x1] }
 0x35c   :  { %15248 = vst [vmem:[#allocation111_spill] sm:$0xff] %v13068_v12  ;;  %5574 = vadd.xlane.f32.xlu1 %v5573_v17  ;;  %v13073_v35 = vsel %vm5341_vm8, %v6521_v58, %v6657_v34  ;;  %v6659_v27 = vsel %vm5329_vm2, %v6529_v52, %v6525_v26  ;;  %v419_v28 = vunpack.c.0.s8 %v291_v50  ;;  %v420_v23 = vunpack.c.0.s8 %v292_v3  ;;  %v13105_v17 = vpop.xlane.xlu0 %4438 }
 0x35d   :  { %15250 = vst [vmem:[#allocation113_spill] sm:$0xff] %v13073_v35  ;;  %v13088_v2 = vmul.f32 %v12556_v36, %v13073_v35  ;;  %v6660_v32 = vsel %vm5331_vm3, %v6533_v21, %v6659_v27  ;;  %v6553_v62 = vrot.slane %v12970_v18, %v10945_v45  ;;  %v421_v49 = vunpack.c.0.s8 %v293_v30  ;;  %v15252_v21 = vld [vmem:[#allocation34_spill] sm:$0xff] }
 0x35e   :  { %v6661_v58 = vsel %vm5333_vm4, %v6537_v1, %v6660_v32  ;;  %v422_v36 = vunpack.c.0.s8 %v294_v31  ;;  %v423_v52 = vunpack.c.0.s8 %v295_v44  ;;  %v424_v10 = vunpack.c.0.s8 %v296_v15  ;;  %15253 = vst [vmem:[#allocation34_spill] sm:$0xff] %v13105_v17 }
 0x35f   :  { %15251 = vst [vmem:[#allocation114_spill] sm:$0xff] %v13088_v2  ;;  %v6788_v7 = vsel %vm4304_vm1, %v13088_v2, 0.0  ;;  %v6662_v26 = vsel %vm5335_vm5, %v6541_v42, %v6661_v58  ;;  %v4551_v0 = vsub.f32 %v15252_v21, %v12733_v19  ;;  %v425_v18 = vunpack.c.0.s8 %v297_v41  ;;  %v13115_v42 = vpop.xlane.xlu1 %4441 }
 0x360   :  { %6789 = vadd.xlane.f32.xlu0 %v6788_v7  ;;  %v6663_v50 = vsel %vm5337_vm6, %v6545_v53, %v6662_v26  ;;  %v426_v3 = vunpack.c.0.s8 %v298_v20  ;;  %v13109_v30 = vcvt.s32.f32 %v419_v28  ;;  %v13111_v34 = vcvt.s32.f32 %v420_v23  ;;  %15254 = vst [vmem:[#allocation115_spill] sm:$0xff] %v13115_v42  ;;  %v299_v20 = vld [vmem:[%s14519_s4 + $0x68] sm:$0x1]  ;;  %v300_v28 = vld [vmem:[%s14519_s4 + $0x69] sm:$0x1] }
 0x361   :  { %v6664_v1 = vsel %vm5339_vm7, %v6549_v6, %v6663_v50  ;;  %v13113_v31 = vcvt.s32.f32 %v421_v49  ;;  %v13120_v19 = vcvt.s32.f32 %v422_v36  ;;  %v13122_v44 = vcvt.s32.f32 %v423_v52  ;;  %v302_v36 = vld [vmem:[%s14519_s4 + $0x6b] sm:$0x1]  ;;  %v303_v7 = vld [vmem:[%s14519_s4 + $0x6c] sm:$0x1]  ;;  %v304_v26 = vld [vmem:[%s14519_s4 + $0x6d] sm:$0x1] }
 0x362   :  { %v13118_v27 = vsel %vm5341_vm8, %v6553_v62, %v6664_v1  ;;  %v13124_v53 = vcvt.s32.f32 %v424_v10  ;;  %v13126_v15 = vpop.eup %8962  ;;  %8966 = vpow2.f32 %v4635_v24  ;;  %v13132_v32 = vcvt.s32.f32 %v425_v18  ;;  %v301_v24 = vld [vmem:[%s14519_s4 + $0x6a] sm:$0x1]  ;;  %v305_v18 = vld [vmem:[%s14519_s4 + $0x6e] sm:$0x1]  ;;  %s13436_s4 = sld [smem:[#allocation2]] }
 0x363   :  { %15255 = vst [vmem:[#allocation116_spill] sm:$0xff] %v13118_v27  ;;  %15256 = vst [vmem:[#allocation117_spill] sm:$0xff] %v13126_v15  ;;  %v13130_v6 = vmul.f32 %v12622_v55, %v13118_v27  ;;  %v5204_v41 = vrot.slane %v13109_v30, %v10942_v11  ;;  %v13145_v23 = vpop.eup %8964  ;;  %v13147_v55 = vcvt.s32.f32 %v426_v3  ;;  %v5208_v62 = vrot.slane %v13111_v34, %v10942_v11  ;;  %v13173_v3 = vpop.xlane.xlu0 %4492 }
 0x364   :  { %15258 = vst [vmem:[#allocation119_spill] sm:$0xff] %v13145_v23  ;;  %v5212_v58 = vrot.slane %v13113_v31, %v10942_v11  ;;  %v5216_v49 = vrot.slane %v13120_v19, %v10942_v11  ;;  %v4669_v52 = vmul.f32 1.442695, %v4551_v0  ;;  %v5220_v21 = vrot.slane %v13122_v44, %v10942_v11  ;;  %15259 = vst [vmem:[#allocation120_spill] sm:$0xff] %v13173_v3  ;;  %v13182_v23 = vpop.xlane.xlu1 %4495 }
 0x365   :  { %15257 = vst [vmem:[#allocation118_spill] sm:$0xff] %v13130_v6  ;;  %v6791_v10 = vsel %vm4304_vm1, %v13130_v6, 0.0  ;;  %v5224_v50 = vrot.slane %v13124_v53, %v10942_v11  ;;  %v5228_v1 = vrot.slane %v13132_v32, %v10942_v11  ;;  %v5420_v0 = vsel %vm5329_vm2, %v5208_v62, %v5204_v41  ;;  %15260 = vst [vmem:[#allocation121_spill] sm:$0xff] %v13182_v23 }
 0x366   :  { %6792 = vadd.xlane.f32.xlu1 %v6791_v10  ;;  %v427_v2 = vunpack.c.0.s8 %v299_v20  ;;  %v428_v29 = vunpack.c.0.s8 %v300_v28  ;;  %v5421_v6 = vsel %vm5331_vm3, %v5212_v58, %v5420_v0  ;;  %v429_v54 = vunpack.c.0.s8 %v301_v24  ;;  %v15261_v28 = vld [vmem:[#allocation55_spill] sm:$0xff] }
 0x367   :  { %v430_v42 = vunpack.c.0.s8 %v302_v36  ;;  %v431_v17 = vunpack.c.0.s8 %v303_v7  ;;  %v5232_v10 = vrot.slane %v13147_v55, %v10942_v11  ;;  %v5422_v3 = vsel %vm5333_vm4, %v5216_v49, %v5421_v6 }
 0x368   :  { %v432_v15 = vunpack.c.0.s8 %v304_v26  ;;  %v433_v41 = vunpack.c.0.s8 %v305_v18  ;;  %v5423_v62 = vsel %vm5335_vm5, %v5220_v21, %v5422_v3  ;;  %v434_v12 = vunpack.c.0.s8 %v306_v5  ;;  %v13234_v0 = vpop.xlane.xlu1 %4489 }
 0x369   :  { %v13188_v43 = vcvt.s32.f32 %v427_v2  ;;  %v13190_v20 = vcvt.s32.f32 %v428_v29  ;;  %v4552_v24 = vsub.f32 %v15261_v28, %v12756_v63  ;;  %v5424_v58 = vsel %vm5337_vm6, %v5224_v50, %v5423_v62  ;;  %v13209_v2 = vpop.xlane.xlu0 %4486  ;;  %15265 = vst [vmem:[#allocation124_spill] sm:$0xff] %v13234_v0 }
 0x36a   :  { %v13195_v36 = vcvt.s32.f32 %v429_v54  ;;  %v13197_v7 = vcvt.s32.f32 %v430_v42  ;;  %v5425_v6 = vsel %vm5339_vm7, %v5228_v1, %v5424_v58  ;;  %v13200_v49 = vcvt.s32.f32 %v431_v17  ;;  %15263 = vst [vmem:[#allocation122_spill] sm:$0xff] %v13209_v2 }
 0x36b   :  { %v13202_v26 = vcvt.s32.f32 %v432_v15  ;;  %v13204_v5 = vcvt.s32.f32 %v433_v41  ;;  %v13207_v29 = vsel %vm5341_vm8, %v5232_v10, %v5425_v6  ;;  %v13211_v63 = vcvt.s32.f32 %v434_v12 }
 0x36c   :  { %15262 = vst [vmem:[#allocation55_spill] sm:$0xff] %v13207_v29  ;;  %v5236_v54 = vrot.slane %v13188_v43, %v10942_v11  ;;  %v5240_v42 = vrot.slane %v13190_v20, %v10942_v11  ;;  %v13217_v21 = vpop.eup %8966  ;;  %v13221_v17 = vmul.f32 %v12681_v13, %v13207_v29  ;;  %v5244_v15 = vrot.slane %v13195_v36, %v10942_v11 }
 0x36d   :  { %v5248_v50 = vrot.slane %v13197_v7, %v10942_v11  ;;  %v5252_v12 = vrot.slane %v13200_v49, %v10942_v11  ;;  %8968 = vpow2.f32 %v4669_v52  ;;  %v5256_v18 = vrot.slane %v13202_v26, %v10942_v11 }
 0x36e   :  { %15264 = vst [vmem:[#allocation123_spill] sm:$0xff] %v13221_v17  ;;  %v5260_v3 = vrot.slane %v13204_v5, %v10942_v11  ;;  %v5427_v1 = vsel %vm5329_vm2, %v5240_v42, %v5236_v54  ;;  %v5564_v10 = vsel %vm4304_vm1, %v13221_v17, 0.0  ;;  %v5264_v41 = vrot.slane %v13211_v63, %v10942_v11  ;;  %v13564_v17 = vld.sshfl [vmem:[%s14518_s3 + $0x10] sm:$0x33 pattern:$0x73516240] }
 0x36f   :  { %v5428_v62 = vsel %vm5331_vm3, %v5244_v15, %v5427_v1  ;;  %v6429_v52 = vrot.slane %v13109_v30, %v10945_v45  ;;  %5565 = vadd.xlane.f32.xlu0 %v5564_v10  ;;  %v6433_v58 = vrot.slane %v13111_v34, %v10945_v45  ;;  %v6437_v6 = vrot.slane %v13113_v31, %v10945_v45  ;;  %v15266_v15 = vld [vmem:[#allocation36_spill] sm:$0xff] }
 0x370   :  { %v5429_v28 = vsel %vm5333_vm4, %v5248_v50, %v5428_v62  ;;  %v6441_v54 = vrot.slane %v13120_v19, %v10945_v45  ;;  %v4671_v11 = vmul.f32 1.442695, %v4552_v24  ;;  %v4549_v1 = vsub.f32 %v15266_v15, %v12772_v47 }
 0x371   :  { %v5430_v30 = vsel %vm5335_vm5, %v5252_v12, %v5429_v28  ;;  %v6445_v50 = vrot.slane %v13122_v44, %v10945_v45  ;;  %v6449_v34 = vrot.slane %v13124_v53, %v10945_v45  ;;  %v6453_v31 = vrot.slane %v13132_v32, %v10945_v45 }
 0x372   :  { %v5431_v10 = vsel %vm5337_vm6, %v5256_v18, %v5430_v30  ;;  %v6638_v19 = vsel %vm5329_vm2, %v6433_v58, %v6429_v52  ;;  %v6457_v47 = vrot.slane %v13147_v55, %v10945_v45  ;;  %v6461_v44 = vrot.slane %v13188_v43, %v10945_v45  ;;  %v15269_v58 = vld [vmem:[#allocation60_spill] sm:$0xff] }
 0x373   :  { %v5432_v24 = vsel %vm5339_vm7, %v5260_v3, %v5431_v10  ;;  %v6639_v12 = vsel %vm5331_vm3, %v6437_v6, %v6638_v19  ;;  %v6465_v32 = vrot.slane %v13190_v20, %v10945_v45  ;;  %v6469_v52 = vrot.slane %v13195_v36, %v10945_v45  ;;  %v15270_v20 = vld [vmem:[#allocation41_spill] sm:$0xff] }
 0x374   :  { %v13272_v18 = vsel %vm5341_vm8, %v5264_v41, %v5432_v24  ;;  %v6640_v53 = vsel %vm5333_vm4, %v6441_v54, %v6639_v12  ;;  %v4665_v28 = vmul.f32 1.442695, %v4549_v1  ;;  %v6473_v41 = vrot.slane %v13197_v7, %v10945_v45 }
 0x375   :  { %v13250_v42 = vpop.xlane.xlu0 %5535  ;;  %15267 = vst [vmem:[#allocation36_spill] sm:$0xff] %v13272_v18  ;;  %v13283_v55 = vmul.f32 %v12696_v61, %v13272_v18  ;;  %v6641_v43 = vsel %vm5335_vm5, %v6445_v50, %v6640_v53  ;;  %v4550_v6 = vsub.f32 %v15269_v58, %v12793_v48  ;;  %v4539_v54 = vsub.f32 %v15270_v20, %v12836_v59  ;;  %v15271_v59 = vld [vmem:[#allocation37_spill] sm:$0xff] }
 0x376   :  { %v6642_v36 = vsel %vm5337_vm6, %v6449_v34, %v6641_v43  ;;  %v6477_v15 = vrot.slane %v13200_v49, %v10945_v45  ;;  %v6481_v7 = vrot.slane %v13202_v26, %v10945_v45  ;;  %v6645_v48 = vsel %vm5329_vm2, %v6465_v32, %v6461_v44  ;;  %v15273_v26 = vld [vmem:[#allocation42_spill] sm:$0xff] }
 0x377   :  { %v13263_v62 = vpop.xlane.xlu1 %5538  ;;  %15268 = vst [vmem:[#allocation125_spill] sm:$0xff] %v13283_v55  ;;  %v5567_v30 = vsel %vm4304_vm1, %v13283_v55, 0.0  ;;  %v6643_v50 = vsel %vm5339_vm7, %v6453_v31, %v6642_v36  ;;  %v13303_v10 = vpop.eup %8968  ;;  %v4540_v34 = vsub.f32 %v15271_v59, %v12853_v51  ;;  %v6485_v19 = vrot.slane %v13204_v5, %v10945_v45  ;;  %v15275_v5 = vld [vmem:[#allocation38_spill] sm:$0xff] }
 0x378   :  { %5568 = vadd.xlane.f32.xlu1 %v5567_v30  ;;  %v13308_v49 = vsel %vm5341_vm8, %v6457_v47, %v6643_v50  ;;  %v6646_v24 = vsel %vm5331_vm3, %v6469_v52, %v6645_v48  ;;  %v4537_v12 = vsub.f32 %v15273_v26, %v12891_v39  ;;  %v6489_v51 = vrot.slane %v13211_v63, %v10945_v45  ;;  %v15276_v39 = vld [vmem:[#allocation39_spill] sm:$0xff] }
 0x379   :  { %v13279_v3 = vpop.xlane.xlu0 %6753  ;;  %15272 = vst [vmem:[#allocation60_spill] sm:$0xff] %v13308_v49  ;;  %v13319_v44 = vmul.f32 %v12681_v13, %v13308_v49  ;;  %v6647_v47 = vsel %vm5333_vm4, %v6473_v41, %v6646_v24  ;;  %v4667_v53 = vmul.f32 1.442695, %v4550_v6  ;;  %v4645_v32 = vmul.f32 1.442695, %v4539_v54 }
 0x37a   :  { %v4538_v43 = vsub.f32 %v15275_v5, %v12930_v57  ;;  %v6648_v52 = vsel %vm5335_vm5, %v6477_v15, %v6647_v47  ;;  %v4555_v20 = vsub.f32 %v15276_v39, %v12949_v4  ;;  %v13336_v45 = vmul.f32 %v12716_v9, %v12968_v14  ;;  %v15278_v57 = vld [vmem:[#allocation43_spill] sm:$0xff]  ;;  %v15279_v15 = vld [vmem:[#allocation40_spill] sm:$0xff] }
 0x37b   :  { %v13295_v1 = vpop.xlane.xlu1 %6756  ;;  %15274 = vst [vmem:[#allocation41_spill] sm:$0xff] %v13319_v44  ;;  %v6782_v13 = vsel %vm4304_vm1, %v13319_v44, 0.0  ;;  %v6649_v36 = vsel %vm5337_vm6, %v6481_v7, %v6648_v52  ;;  %8970 = vpow2.f32 %v4671_v11  ;;  %v4647_v63 = vmul.f32 1.442695, %v4540_v34  ;;  %v15281_v11 = vld [vmem:[#allocation44_spill] sm:$0xff] }
 0x37c   :  { %15277 = vst [vmem:[#allocation37_spill] sm:$0xff] %v13336_v45  ;;  %v4556_v41 = vsub.f32 %v15278_v57, %v12965_v22  ;;  %6783 = vadd.xlane.f32.xlu0 %v6782_v13  ;;  %v6650_v6 = vsel %vm5339_vm7, %v6485_v19, %v6649_v36  ;;  %8972 = vpow2.f32 %v4665_v28  ;;  %v4641_v4 = vmul.f32 1.442695, %v4537_v12 }
 0x37d   :  { %v13313_v31 = vpop.xlane.xlu0 %5529  ;;  %v4553_v30 = vsub.f32 %v15279_v15, %v12999_v8  ;;  %v13346_v50 = vsel %vm5341_vm8, %v6489_v51, %v6650_v6  ;;  %8974 = vpow2.f32 %v4667_v53  ;;  %v4643_v7 = vmul.f32 1.442695, %v4538_v43 }
 0x37e   :  { %15280 = vst [vmem:[#allocation42_spill] sm:$0xff] %v13346_v50  ;;  %v4554_v48 = vsub.f32 %v15281_v11, %v13019_v25  ;;  %v13352_v22 = vmul.f32 %v12696_v61, %v13346_v50  ;;  %8976 = vpow2.f32 %v4645_v32  ;;  %v4677_v28 = vmul.f32 1.442695, %v4555_v20 }
 0x37f   :  { %v13327_v58 = vpop.xlane.xlu1 %5532  ;;  %v5618_v34 = vsel %vm4304_vm1, %v13336_v45, 0.0  ;;  %v13360_v8 = vmul.f32 %v12716_v9, %v13073_v35  ;;  %8978 = vpow2.f32 %v4647_v63  ;;  %v4679_v19 = vmul.f32 1.442695, %v4556_v41 }
 0x380   :  { %15282 = vst [vmem:[#allocation38_spill] sm:$0xff] %v13352_v22  ;;  %v6785_v25 = vsel %vm4304_vm1, %v13352_v22, 0.0  ;;  %5619 = vadd.xlane.f32.xlu0 %v5618_v34  ;;  %v13366_v61 = vmul.f32 %v12741_v16, %v13032_v37  ;;  %8980 = vpow2.f32 %v4641_v4  ;;  %v4673_v26 = vmul.f32 1.442695, %v4553_v30  ;;  %v15293_v4 = vld [vmem:[#allocation26_spill] sm:$0xff]  ;;  %v15295_v30 = vld [vmem:[#allocation51_spill] sm:$0xff] }
 0x381   :  { %v13341_v54 = vpop.xlane.xlu0 %6747  ;;  %15283 = vst [vmem:[#allocation39_spill] sm:$0xff] %v13360_v8  ;;  %6786 = vadd.xlane.f32.xlu1 %v6785_v25  ;;  %8982 = vpow2.f32 %v4643_v7  ;;  %v4675_v12 = vmul.f32 1.442695, %v4554_v48  ;;  %v4543_v9 = vsub.f32 %v11251_v33, %v13046_v56  ;;  %v6836_v47 = vsel %vm4304_vm1, %v13360_v8, 0.0  ;;  %v15296_v7 = vld [vmem:[#allocation32_spill] sm:$0xff] }
 0x382   :  { %15284 = vst [vmem:[#allocation43_spill] sm:$0xff] %v13366_v61  ;;  %8984 = vpow2.f32 %v4677_v28  ;;  %v13378_v53 = vmul.f32 %v12752_v38, %v13207_v29  ;;  %v5621_v32 = vsel %vm4304_vm1, %v13366_v61, 0.0  ;;  %v13384_v5 = vmul.f32 %v12741_v16, %v13118_v27  ;;  %v15300_v34 = vld [vmem:[#allocation52_spill] sm:$0xff] }
 0x383   :  { %v13354_v59 = vpop.xlane.xlu1 %6750  ;;  %8986 = vpow2.f32 %v4679_v19  ;;  %v5723_v56 = vmax.f32 %v13263_v62, 1e-30  ;;  %v13391_v52 = vmul.f32 1.442695, %v4543_v9  ;;  %v6940_v13 = vmax.f32 %v13279_v3, 1e-30 }
 0x384   :  { %15285 = vst [vmem:[#allocation40_spill] sm:$0xff] %v13378_v53  ;;  %6837 = vadd.xlane.f32.xlu0 %v6836_v47  ;;  %15286 = vst [vmem:[#allocation44_spill] sm:$0xff] %v13384_v5  ;;  %8988 = vpow2.f32 %v4673_v26  ;;  %v5612_v63 = vsel %vm4304_vm1, %v13378_v53, 0.0  ;;  %v13404_v62 = vmul.f32 %v12777_v46, %v13272_v18  ;;  %v13408_v57 = vmul.f32 %v12752_v38, %v13308_v49  ;;  %v15305_v9 = vld [vmem:[#allocation54_spill] sm:$0xff]  ;;  %v15306_v47 = vld [vmem:[#allocation100_spill] sm:$0xff] }
 0x385   :  { %v13368_v24 = vpop.xlane.xlu0 %5583  ;;  %5622 = vadd.xlane.f32.xlu1 %v5621_v32  ;;  %v13389_v43 = vpop.eup %8970  ;;  %8990 = vpow2.f32 %v4675_v12  ;;  %v6941_v41 = vmax.f32 %v13295_v1, 1e-30  ;;  %v6839_v3 = vsel %vm4304_vm1, %v13384_v5, 0.0  ;;  %v13417_v15 = vmul.f32 %v15293_v4, %v11408_v40  ;;  %v15312_v53 = vld [vmem:[#allocation102_spill] sm:$0xff] }
 0x386   :  { %15287 = vst [vmem:[#allocation126_spill] sm:$0xff] %v13389_v43  ;;  %v13398_v16 = vpop.eup %8972  ;;  %15290 = vst [vmem:[#allocation128_spill] sm:$0xff] %v13404_v62  ;;  %v13421_v11 = vmul.f32 %v15296_v7, %v15295_v30  ;;  %v5720_v48 = vmax.f32 %v13313_v31, 1e-30  ;;  %v13430_v1 = vmul.f32 %v12777_v46, %v13346_v50  ;;  %v13434_v19 = vmul.f32 %v15293_v4, %v15300_v34  ;;  %v15303_v31 = vld [vmem:[#allocation53_spill] sm:$0xff] }
 0x387   :  { %v13372_v51 = vpop.xlane.xlu1 %5586  ;;  %15289 = vst [vmem:[#allocation127_spill] sm:$0xff] %v13398_v16  ;;  %15291 = vst [vmem:[#allocation129_spill] sm:$0xff] %v13408_v57  ;;  %v13411_v6 = vpop.eup %8974  ;;  %8992 = vrcp.f32 %v5723_v56  ;;  %v5721_v25 = vmax.f32 %v13327_v58, 1e-30  ;;  %v13443_v12 = vmul.f32 %v15296_v7, %v15303_v31  ;;  %v13447_v32 = vmul.f32 %v15306_v47, %v15305_v9 }
 0x388   :  { %15292 = vst [vmem:[#allocation130_spill] sm:$0xff] %v13411_v6  ;;  %5613 = vadd.xlane.f32.xlu0 %v5612_v63  ;;  %15294 = vst [vmem:[#allocation26_spill] sm:$0xff] %v13417_v15  ;;  %v13426_v28 = vpop.eup %8976  ;;  %8994 = vrcp.f32 %v6940_v13  ;;  %v6938_v46 = vmax.f32 %v13341_v54, 1e-30  ;;  %v5615_v58 = vsel %vm4304_vm1, %v13404_v62, 0.0  ;;  %v5630_v13 = vsel %vm4304_vm1, %v13417_v15, 0.0 }
 0x389   :  { %v13386_v33 = vpop.xlane.xlu0 %6801  ;;  %15297 = vst [vmem:[#allocation51_spill] sm:$0xff] %v13421_v11  ;;  %15298 = vst [vmem:[#allocation32_spill] sm:$0xff] %v13426_v28  ;;  %6840 = vadd.xlane.f32.xlu1 %v6839_v3  ;;  %v13439_v26 = vpop.eup %8978  ;;  %v6830_v3 = vsel %vm4304_vm1, %v13408_v57, 0.0  ;;  %8996 = vrcp.f32 %v6941_v41  ;;  %v6939_v4 = vmax.f32 %v13354_v59, 1e-30  ;;  %v5633_v54 = vsel %vm4304_vm1, %v13421_v11, 0.0 }
 0x38a   :  { %15299 = vst [vmem:[#allocation131_spill] sm:$0xff] %v13430_v1  ;;  %15301 = vst [vmem:[#allocation52_spill] sm:$0xff] %v13434_v19  ;;  %v13454_v56 = vpop.eup %8980  ;;  %v5722_v20 = vmax.f32 %v13250_v42, 1e-30  ;;  %8998 = vrcp.f32 %v5720_v48  ;;  %v6833_v59 = vsel %vm4304_vm1, %v13430_v1, 0.0  ;;  %v6848_v41 = vsel %vm4304_vm1, %v13434_v19, 0.0 }
 0x38b   :  { %v13396_v36 = vpop.xlane.xlu1 %6804  ;;  %15302 = vst [vmem:[#allocation132_spill] sm:$0xff] %v13439_v26  ;;  %15304 = vst [vmem:[#allocation53_spill] sm:$0xff] %v13443_v12  ;;  %v13461_v7 = vpop.eup %8982  ;;  %9000 = vrcp.f32 %v5721_v25  ;;  %v13484_v42 = vsel %vm4304_vm1, %v13443_v12, 0.0  ;;  %v5624_v48 = vsel %vm4304_vm1, %v13447_v32, 0.0  ;;  %v15318_v25 = vld [vmem:[#allocation11_spill] sm:$0xff]  ;;  %v15340_v28 = vld [vmem:[#allocation73_spill] sm:$0xff] }
 0x38c   :  { %15307 = vst [vmem:[#allocation54_spill] sm:$0xff] %v13447_v32  ;;  %15308 = vst [vmem:[#allocation100_spill] sm:$0xff] %v13454_v56  ;;  %6831 = vadd.xlane.f32.xlu0 %v6830_v3  ;;  %v13470_v62 = vpop.eup %8984  ;;  %v15311_v3 = vld [vmem:[#allocation65_spill] sm:$0xff]  ;;  %9002 = vrcp.f32 %v6938_v46  ;;  %v13498_v61 = vmul.f32 %v15312_v53, %v15318_v25  ;;  %v15320_v12 = vld [vmem:[#allocation103_spill] sm:$0xff] }
 0x38d   :  { %v13424_v38 = vpop.xlane.xlu0 %5577  ;;  %15309 = vst [vmem:[#allocation133_spill] sm:$0xff] %v13461_v7  ;;  %15310 = vst [vmem:[#allocation134_spill] sm:$0xff] %v13470_v62  ;;  %5616 = vadd.xlane.f32.xlu1 %v5615_v58  ;;  %v13478_v15 = vmul.f32 %v15312_v53, %v15311_v3  ;;  %v13480_v11 = vpop.eup %8986  ;;  %v15315_v58 = vld [vmem:[#allocation66_spill] sm:$0xff]  ;;  %v13502_v57 = vmul.f32 %v15320_v12, %v11408_v40  ;;  %v15322_v32 = vld [vmem:[#allocation104_spill] sm:$0xff]  ;;  %9004 = vrcp.f32 %v6939_v4  ;;  %v5738_v40 = vmax.f32 %v13368_v24, 1e-30 }
 0x38e   :  { %15314 = vst [vmem:[#allocation102_spill] sm:$0xff] %v13480_v11  ;;  %v13490_v1 = vmul.f32 %v15306_v47, %v15315_v58  ;;  %v13494_v8 = vpop.eup %8988  ;;  %15319 = vst [vmem:[#allocation11_spill] sm:$0xff] %v13498_v61  ;;  %v13506_v5 = vmul.f32 %v15322_v32, %v15295_v30  ;;  %9006 = vrcp.f32 %v5722_v20  ;;  %v13512_v46 = vmul.f32 %v15320_v12, %v15300_v34  ;;  %v13524_v30 = vld.sshfl [vmem:[%s14518_s3] sm:$0x33 pattern:$0x73516240] }
 0x38f   :  { %v13452_v63 = vpop.xlane.xlu1 %5580  ;;  %15313 = vst [vmem:[#allocation65_spill] sm:$0xff] %v13478_v15  ;;  %15317 = vst [vmem:[#allocation135_spill] sm:$0xff] %v13494_v8  ;;  %v13508_v47 = vpop.eup %8990  ;;  %v13516_v53 = vmul.f32 %v15322_v32, %v15303_v31  ;;  %v13529_v20 = vld.sshfl [vmem:[%s14518_s3 + $0x2] sm:$0x33 pattern:$0x73516240]  ;;  %v13532_v34 = vstv %s13436_s4  ;;  %9008 = vrcp.f32 %v5738_v40 }
 0x390   :  { %15316 = vst [vmem:[#allocation66_spill] sm:$0xff] %v13490_v1  ;;  %15321 = vst [vmem:[#allocation103_spill] sm:$0xff] %v13502_v57  ;;  %5631 = vadd.xlane.f32.xlu0 %v5630_v13  ;;  %v15327_v31 = vld [vmem:[#allocation106_spill] sm:$0xff]  ;;  %v15329_v24 = vld [vmem:[#allocation107_spill] sm:$0xff]  ;;  %v5739_v4 = vmax.f32 %v13372_v51, 1e-30 }
 0x391   :  { %v13468_v45 = vpop.xlane.xlu0 %6795  ;;  %15323 = vst [vmem:[#allocation104_spill] sm:$0xff] %v13506_v5  ;;  %15324 = vst [vmem:[#allocation136_spill] sm:$0xff] %v13508_v47  ;;  %6834 = vadd.xlane.f32.xlu1 %v6833_v59  ;;  %v13536_v12 = vmul.f32 %v15327_v31, %v15305_v9  ;;  %v13540_v32 = vmul.f32 %v15329_v24, %v15311_v3  ;;  %v13546_v13 = vld.sshfl [vmem:[%s14518_s3 + $0x8] sm:$0x33 pattern:$0x73516240]  ;;  %v13558_v3 = vstv %s13449_s25  ;;  %v8993_v50 = vpop.eup %8992 }
 0x392   :  { %15325 = vst [vmem:[#allocation137_spill] sm:$0xff] %v13512_v46  ;;  %15326 = vst [vmem:[#allocation138_spill] sm:$0xff] %v13516_v53  ;;  %v13551_v59 = vld.sshfl [vmem:[%s14518_s3 + $0xa] sm:$0x33 pattern:$0x73516240]  ;;  %v8995_v49 = vpop.eup %8994  ;;  %9010 = vrcp.f32 %v5739_v4  ;;  %v5853_v37 = vmul.f32 %v8993_v50, %v13532_v34 }
 0x393   :  { %v13492_v19 = vpop.xlane.xlu1 %6798  ;;  %15328 = vst [vmem:[#allocation106_spill] sm:$0xff] %v13536_v12  ;;  %15330 = vst [vmem:[#allocation107_spill] sm:$0xff] %v13540_v32  ;;  %v5627_v9 = vsel %vm4304_vm1, %v13478_v15, 0.0  ;;  %v6842_v55 = vsel %vm4304_vm1, %v13490_v1, 0.0  ;;  %v6956_v51 = vmax.f32 %v13386_v33, 1e-30  ;;  %v7070_v14 = vmul.f32 %v8995_v49, %v13558_v3 }
 0x394   :  { %v13570_v18 = vsel %vm4304_vm1, %v13498_v61, 0.0  ;;  %v13574_v15 = vsel %vm4304_vm1, %v13502_v57, 0.0  ;;  %v13578_v1 = vsel %vm4304_vm1, %v13506_v5, 0.0  ;;  %v6957_v33 = vmax.f32 %v13396_v36, 1e-30  ;;  %6849 = vadd.xlane.f32.xlu0 %v6848_v41  ;;  %v8997_v36 = vpop.eup %8996  ;;  %v15332_v62 = vld [vmem:[#allocation12_spill] sm:$0xff] }
 0x395   :  { %v13519_v22 = vpop.xlane.xlu0 %5547  ;;  %v13583_v27 = vsel %vm4304_vm1, %v13512_v46, 0.0  ;;  %v13587_v61 = vsel %vm4304_vm1, %v13516_v53, 0.0  ;;  %v5736_v57 = vmax.f32 %v13424_v38, 1e-30  ;;  %5634 = vadd.xlane.f32.xlu1 %v5633_v54  ;;  %v13599_v41 = vsel %vm4304_vm1, %v13536_v12, 0.0  ;;  %v8999_v12 = vpop.eup %8998 }
 0x396   :  { %v13593_v5 = vld.sshfl [vmem:[%s14518_s3 + $0x12] sm:$0x33 pattern:$0x73516240]  ;;  %v13603_v46 = vsel %vm4304_vm1, %v13540_v32, 0.0  ;;  %v13607_v38 = vmul.f32 %v15327_v31, %v15315_v58  ;;  %v13621_v32 = vmul.f32 %v15329_v24, %v15318_v25  ;;  %9012 = vrcp.f32 %v6956_v51  ;;  %v9001_v58 = vpop.eup %9000 }
 0x397   :  { %v13566_v44 = vpop.xlane.xlu1 %5550  ;;  %v13612_v40 = vld.sshfl [vmem:[%s14518_s3 + $0x18] sm:$0x33 pattern:$0x73516240]  ;;  %9014 = vrcp.f32 %v6957_v33  ;;  %v5737_v31 = vmax.f32 %v13452_v63, 1e-30  ;;  %v9003_v4 = vpop.eup %9002  ;;  %v7071_v25 = vmul.f32 %v8997_v36, %v13558_v3  ;;  %v7366_v63 = vpack.i.b16 %v13529_v20, %v13524_v30 }
 0x398   :  { %v13617_v54 = vld.sshfl [vmem:[%s14518_s3 + $0x1a] sm:$0x33 pattern:$0x73516240]  ;;  %5625 = vadd.xlane.f32.xlu0 %v5624_v48  ;;  %9016 = vrcp.f32 %v5736_v57  ;;  %v9005_v0 = vpop.eup %9004  ;;  %v6954_v24 = vmax.f32 %v13468_v45, 1e-30  ;;  %v7378_v50 = vpack.i.b16 %v13551_v59, %v13546_v13  ;;  %v5850_v48 = vmul.f32 %v8999_v12, %v13532_v34 }
 0x399   :  { %v13595_v29 = vpop.xlane.xlu0 %6765  ;;  %6852 = vadd.xlane.f32.xlu1 %v13484_v42  ;;  %v9007_v51 = vpop.eup %9006  ;;  %v6955_v33 = vmax.f32 %v13492_v19, 1e-30  ;;  %9018 = vrcp.f32 %v5737_v31  ;;  %v7390_v42 = vpack.i.b16 %v13593_v5, %v13564_v17  ;;  %v7402_v45 = vpack.i.b16 %v13617_v54, %v13612_v40  ;;  %v15331_v31 = vld [vmem:[#allocation72_spill] sm:$0xff]  ;;  %s9378_s3 = smov 32  }
 0x39a   :  { %v5851_v49 = vmul.f32 %v9001_v58, %v13532_v34  ;;  %v7068_v19 = vmul.f32 %v9003_v4, %v13558_v3  ;;  %v7069_v36 = vmul.f32 %v9005_v0, %v13558_v3  ;;  %v7412_v2 = vcombine.low %v7366_v63, %v7378_v50  ;;  %v13652_v11 = vpop.eup %9008  ;;  %v15335_v58 = vld [vmem:[#allocation67_spill] sm:$0xff]  ;;  %v15336_v4 = vld [vmem:[#allocation117_spill] sm:$0xff] }
 0x39b   :  { %v13623_v53 = vpop.xlane.xlu1 %6768  ;;  %v5852_v12 = vmul.f32 %v9007_v51, %v13532_v34  ;;  %v7135_v47 = vmul.f32 %v7071_v25, %v15331_v31  ;;  %9020 = vrcp.f32 %v6954_v24  ;;  %v7413_v8 = vcombine.low %v7390_v42, %v7402_v45  ;;  %v15337_v0 = vld [vmem:[#allocation9_spill] sm:$0xff]  ;;  %v15339_v24 = vld [vmem:[#allocation71_spill] sm:$0xff] }
 0x39c   :  { %6843 = vadd.xlane.f32.xlu0 %v6842_v55  ;;  %v15333_v55 = vld [vmem:[#allocation111_spill] sm:$0xff]  ;;  %v13660_v56 = vmul.f32 %v15336_v4, %v15335_v58  ;;  %9022 = vrcp.f32 %v6955_v33  ;;  %v7420_v63 = vrot.slane %v7412_v2, %v15337_v0  ;;  %v9011_v51 = vpop.eup %9010  ;;  %v15338_v50 = vld [vmem:[#allocation13_spill] sm:$0xff]  ;;  %v7134_v42 = vmul.f32 %v7070_v14, %v15339_v24  ;;  %v15341_v33 = vld [vmem:[#allocation74_spill] sm:$0xff] }
 0x39d   :  { %v13627_v35 = vpop.xlane.xlu0 %5541  ;;  %5628 = vadd.xlane.f32.xlu1 %v5627_v9  ;;  %v13656_v7 = vmul.f32 %v15333_v55, %v15332_v62  ;;  %v5917_v25 = vmul.f32 %v5853_v37, %v15338_v50  ;;  %v5726_v45 = vmax.f32 %v13519_v22, 1e-30  ;;  %v7427_v31 = vrot.slane %v7413_v8, %v15337_v0  ;;  %v15342_v2 = vld [vmem:[#allocation75_spill] sm:$0xff]  ;;  %v15343_v58 = vld [vmem:[#allocation76_spill] sm:$0xff]  ;;  %v15344_v14 = vld [vmem:[#allocation70_spill] sm:$0xff] }
 0x39e   :  { %v5914_v6 = vmul.f32 %v5850_v48, %v15340_v28  ;;  %v5915_v16 = vmul.f32 %v5851_v49, %v15341_v33  ;;  %v7132_v43 = vmul.f32 %v7068_v19, %v15342_v2  ;;  %v7133_v60 = vmul.f32 %v7069_v36, %v15343_v58 }
 0x39f   :  { %v13638_v57 = vpop.xlane.xlu1 %5544  ;;  %15334 = vst [vmem:[#allocation72_spill] sm:$0xff] %v13656_v7  ;;  %v5916_v50 = vmul.f32 %v5852_v12, %v15344_v14  ;;  %v7199_v22 = vadd.f32 %v7135_v47, %v5917_v25  ;;  %v7428_v8 = vcombine.low %v7420_v63, %v7427_v31  ;;  %v5727_v24 = vmax.f32 %v13566_v44, 1e-30  ;;  %v15345_v47 = vld [vmem:[#allocation68_spill] sm:$0xff] }
 0x3a0   :  { %v13669_v26 = vpop.eup %9012  ;;  %5679 = vadd.xlane.f32.xlu0 %v13574_v15  ;;  %v6890_v28 = vsel %vm4304_vm1, %v13607_v38, 0.0  ;;  %v13685_v48 = vsel %vm4304_vm1, %v13621_v32, 0.0  ;;  %v7196_v49 = vadd.f32 %v7132_v43, %v5914_v6  ;;  %v7197_v19 = vadd.f32 %v7133_v60, %v5915_v16 }
 0x3a1   :  { %v13648_v23 = vpop.xlane.xlu0 %6759  ;;  %v9015_v37 = vpop.eup %9014  ;;  %6846 = vadd.xlane.f32.xlu1 %v13570_v18  ;;  %v7198_v58 = vadd.f32 %v7134_v42, %v5916_v50  ;;  %v13691_v18 = vsel %vm4304_vm1, %v13656_v7, 0.0  ;;  %v13695_v44 = vmul.f32 %v15333_v55, %v15345_v47  ;;  %8607 = vmatprep.subr.bf16.mxu0 %v7428_v8  ;;  %v5724_v12 = vmax.f32 %v13627_v35, 1e-30  ;;  %v15346_v55 = vld [vmem:[#allocation69_spill] sm:$0xff]  ;;  %v15425_v7 = vld [vmem:[#allocation82_spill] sm:$0xff] }
 0x3a2   :  { %v9017_v15 = vpop.eup %9016  ;;  %v13701_v43 = vsel %vm4304_vm1, %v13660_v56, 0.0  ;;  %9024 = vrcp.f32 %v5726_v45  ;;  %8608 = vmatpush3.bf16.msra.mxu0 %v7428_v8  ;;  %v7260_v60 = vpack.c.bf16 %v7197_v19, %v7196_v49  ;;  %v5725_v16 = vmax.f32 %v13638_v57, 1e-30 }
 0x3a3   :  { %v13663_v9 = vpop.xlane.xlu1 %6762  ;;  %v9019_v63 = vpop.eup %9018  ;;  %v13709_v25 = vmul.f32 %v15336_v4, %v15346_v55  ;;  %9026 = vrcp.f32 %v5727_v24  ;;  %v7261_v35 = vpack.c.bf16 %v7199_v22, %v7198_v58  ;;  %v5869_v42 = vmul.f32 %v9011_v51, %v13532_v34 }
 0x3a4   :  { %6897 = vadd.xlane.f32.xlu0 %v13583_v27  ;;  %v6942_v27 = vmax.f32 %v13648_v23, 1e-30  ;;  %v7087_v45 = vmul.f32 %v9015_v37, %v13558_v3  ;;  %8609 = vmatprep.mubr.msk.bf16.mxu0 %vm4304_vm1, %v7260_v60  ;;  %9028 = vrcp.f32 %v5724_v12  ;;  %v6943_v57 = vmax.f32 %v13663_v9, 1e-30 }
 0x3a5   :  { %v13676_v39 = vpop.xlane.xlu0 %5595  ;;  %5682 = vadd.xlane.f32.xlu1 %v13578_v1  ;;  %v9021_v1 = vpop.eup %9020  ;;  %v5866_v33 = vmul.f32 %v9017_v15, %v13532_v34  ;;  %v6944_v4 = vmax.f32 %v13595_v29, 1e-30  ;;  %8610 = vmatmul.mubr.msk.bf16.vlgmr.msra.gmra.mrb[32].mxu0 %vm4304_vm1, %v7261_v35  ;;  %9030 = vrcp.f32 %v5725_v16  ;;  %v7367_v23 = vshrl.u32 %v13524_v30, 16  ;;  %v15347_v35 = vld [vmem:[#allocation18_spill] sm:$0xff] }
 0x3a6   :  { %v9023_v51 = vpop.eup %9022  ;;  %v6945_v2 = vmax.f32 %v13623_v53, 1e-30  ;;  %9032 = vrcp.f32 %v6942_v27  ;;  %v7368_v9 = vshrl.u32 %v13529_v20, 16  ;;  %v7379_v37 = vshrl.u32 %v13546_v13, 16 }
 0x3a7   :  { %v13687_v36 = vpop.xlane.xlu1 %5598  ;;  %v5867_v29 = vmul.f32 %v9019_v63, %v13532_v34  ;;  %9034 = vrcp.f32 %v6943_v57  ;;  %v7380_v50 = vshrl.u32 %v13551_v59, 16  ;;  %v7391_v22 = vshrl.u32 %v13564_v17, 16 }
 0x3a8   :  { %5673 = vadd.xlane.f32.xlu0 %v13599_v41  ;;  %v7369_v8 = vpack.i.b16 %v7368_v9, %v7367_v23  ;;  %v7392_v41 = vshrl.u32 %v13593_v5, 16  ;;  %v7403_v53 = vshrl.u32 %v13612_v40, 16  ;;  %v7404_v24 = vshrl.u32 %v13617_v54, 16 }
 0x3a9   :  { %v13704_v6 = vpop.xlane.xlu0 %6813  ;;  %6900 = vadd.xlane.f32.xlu1 %v13587_v61  ;;  %v7084_v49 = vmul.f32 %v9021_v1, %v13558_v3  ;;  %v7085_v61 = vmul.f32 %v9023_v51, %v13558_v3  ;;  %9036 = vrcp.f32 %v6944_v4  ;;  %v7381_v19 = vpack.i.b16 %v7380_v50, %v7379_v37  ;;  %v15348_v51 = vld [vmem:[#allocation27_spill] sm:$0xff] }
 0x3aa   :  { %v7086_v58 = vmul.f32 %v13669_v26, %v13558_v3  ;;  %9038 = vrcp.f32 %v6945_v2  ;;  %v7393_v12 = vpack.i.b16 %v7392_v41, %v7391_v22  ;;  %v7405_v60 = vpack.i.b16 %v7404_v24, %v7403_v53  ;;  %v15350_v22 = vld [vmem:[#allocation30_spill] sm:$0xff]  ;;  %v15351_v41 = vld [vmem:[#allocation63_spill] sm:$0xff] }
 0x3ab   :  { %v13716_v31 = vpop.xlane.xlu1 %6816  ;;  %v5868_v63 = vmul.f32 %v13652_v11, %v13532_v34  ;;  %v7151_v27 = vmul.f32 %v7087_v45, %v15347_v35  ;;  %v5742_v57 = vmax.f32 %v13676_v39, 1e-30  ;;  %v7551_v1 = vcombine.low %v7369_v8, %v7381_v19  ;;  %v15352_v8 = vld [vmem:[#allocation14_spill] sm:$0xff] }
 0x3ac   :  { %6891 = vadd.xlane.f32.xlu0 %v6890_v28  ;;  %v9025_v4 = vpop.eup %9024  ;;  %v7552_v28 = vcombine.low %v7393_v12, %v7405_v60  ;;  %v5743_v23 = vmax.f32 %v13687_v36, 1e-30  ;;  %v6960_v26 = vmax.f32 %v13704_v6, 1e-30  ;;  %v5930_v2 = vmul.f32 %v5866_v33, %v15348_v51  ;;  %v15353_v36 = vld [vmem:[#allocation17_spill] sm:$0xff]  ;;  %v15354_v6 = vld [vmem:[#allocation78_spill] sm:$0xff] }
 0x3ad   :  { %v13726_v14 = vpop.xlane.xlu0 %5589  ;;  %5676 = vadd.xlane.f32.xlu1 %v13603_v46  ;;  %v9027_v9 = vpop.eup %9026  ;;  %v7559_v37 = vrot.slane %v7551_v1, %v15337_v0  ;;  %v15349_v46 = vld [vmem:[#allocation64_spill] sm:$0xff]  ;;  %v7148_v11 = vmul.f32 %v7084_v49, %v15350_v22  ;;  %v7149_v45 = vmul.f32 %v7085_v61, %v15351_v41  ;;  %v5933_v24 = vmul.f32 %v5869_v42, %v15352_v8  ;;  %v15355_v12 = vld [vmem:[#allocation119_spill] sm:$0xff] }
 0x3ae   :  { %v5931_v50 = vmul.f32 %v5867_v29, %v15349_v46  ;;  %v9029_v39 = vpop.eup %9028  ;;  %v7150_v19 = vmul.f32 %v7086_v58, %v15353_v36  ;;  %v13760_v33 = vmul.f32 %v15355_v12, %v15354_v6  ;;  %v7566_v60 = vrot.slane %v7552_v28, %v15337_v0 }
 0x3af   :  { %v13735_v15 = vpop.xlane.xlu1 %5592  ;;  %v9031_v35 = vpop.eup %9030  ;;  %9040 = vrcp.f32 %v5742_v57  ;;  %v7212_v29 = vadd.f32 %v7148_v11, %v5930_v2  ;;  %v6961_v61 = vmax.f32 %v13716_v31, 1e-30  ;;  %v7215_v58 = vadd.f32 %v7151_v27, %v5933_v24 }
 0x3b0   :  { %5643 = vadd.xlane.f32.xlu0 %v13691_v18  ;;  %v7213_v49 = vadd.f32 %v7149_v45, %v5931_v50  ;;  %v9033_v42 = vpop.eup %9032  ;;  %v15356_v18 = vld [vmem:[#allocation77_spill] sm:$0xff]  ;;  %v7567_v46 = vcombine.low %v7559_v37, %v7566_v60  ;;  %9042 = vrcp.f32 %v5743_v23  ;;  %v6860_v28 = vsel %vm4304_vm1, %v13695_v44, 0.0  ;;  %v15357_v23 = vld [vmem:[#allocation8_spill] sm:$0xff] }
 0x3b1   :  { %v13741_v16 = vpop.xlane.xlu0 %6807  ;;  %6894 = vadd.xlane.f32.xlu1 %v13685_v48  ;;  %v5932_v51 = vmul.f32 %v5868_v63, %v15356_v18  ;;  %v9035_v22 = vpop.eup %9034  ;;  %9044 = vrcp.f32 %v6960_v26  ;;  %v5740_v48 = vmax.f32 %v13726_v14, 1e-30  ;;  %v5636_v31 = vsel %vm4304_vm1, %v13760_v33, 0.0  ;;  %v15359_v26 = vld [vmem:[#allocation15_spill] sm:$0xff]  ;;  %v15361_v60 = vld [vmem:[#allocation45_spill] sm:$0xff] }
 0x3b2   :  { %v7268_v41 = vpack.c.bf16 %v7213_v49, %v7212_v29  ;;  %8625 = vmatprep.subr.bf16.mxu1 %v7567_v46  ;;  %9046 = vrcp.f32 %v6961_v61  ;;  %v5741_v63 = vmax.f32 %v13735_v15, 1e-30  ;;  %v13777_v2 = vmul.f32 %v13217_v21, %v15357_v23 }
 0x3b3   :  { %v6811_v53 = vpop.xlane.xlu1 %6810  ;;  %v7214_v57 = vadd.f32 %v7150_v19, %v5932_v51  ;;  %v9037_v27 = vpop.eup %9036  ;;  %v13781_v37 = vmul.f32 %v15355_v12, %v15359_v26  ;;  %8626 = vmatpush3.bf16.msra.mxu1 %v7567_v46  ;;  %9048 = vrcp.f32 %v5740_v48  ;;  %v6958_v14 = vmax.f32 %v13741_v16, 1e-30  ;;  %v15366_v46 = vld [vmem:[#allocation58_spill] sm:$0xff] }
 0x3b4   :  { %6861 = vadd.xlane.f32.xlu0 %v6860_v28  ;;  %15358 = vst [vmem:[#allocation12_spill] sm:$0xff] %v13777_v2  ;;  %v9039_v11 = vpop.eup %9038  ;;  %v5854_v15 = vmul.f32 %v9029_v39, %v13532_v34  ;;  %8627 = vmatprep.mubr.msk.bf16.mxu1 %vm4304_vm1, %v7268_v41  ;;  %9050 = vrcp.f32 %v5741_v63  ;;  %v6959_v45 = vmax.f32 %v6811_v53, 1e-30  ;;  %v5855_v8 = vmul.f32 %v9031_v35, %v13532_v34  ;;  %v15360_v53 = vld [vmem:[#allocation34_spill] sm:$0xff]  ;;  %v15367_v28 = vld [vmem:[#allocation83_spill] sm:$0xff] }
 0x3b5   :  { %v13765_v1 = vpop.xlane.xlu0 %5559  ;;  %5646 = vadd.xlane.f32.xlu1 %v13701_v43  ;;  %v7269_v43 = vpack.c.bf16 %v7215_v58, %v7214_v57  ;;  %v7072_v24 = vmul.f32 %v9033_v42, %v13558_v3  ;;  %v7073_v36 = vmul.f32 %v9035_v22, %v13558_v3  ;;  %9052 = vrcp.f32 %v6958_v14  ;;  %v15368_v48 = vld [vmem:[#allocation90_spill] sm:$0xff] }
 0x3b6   :  { %v6863_v16 = vsel %vm4304_vm1, %v13709_v25, 0.0  ;;  %v5856_v39 = vmul.f32 %v9025_v4, %v13532_v34  ;;  %v5857_v12 = vmul.f32 %v9027_v9, %v13532_v34  ;;  %9054 = vrcp.f32 %v6959_v45  ;;  %v15362_v4 = vld [vmem:[#allocation16_spill] sm:$0xff] }
 0x3b7   :  { %v13784_v50 = vpop.xlane.xlu1 %5562  ;;  %8628 = vmatmul.mubr.msk.bf16.vlgmr.msra.gmra.mrb[32].mxu1 %vm4304_vm1, %v7269_v43  ;;  %v4541_v35 = vsub.f32 %v15361_v60, %v15360_v53  ;;  %v5639_v29 = vsel %vm4304_vm1, %v13777_v2, 0.0  ;;  %v7074_v49 = vmul.f32 %v9037_v27, %v13558_v3  ;;  %v7075_v61 = vmul.f32 %v9039_v11, %v13558_v3  ;;  %v15370_v11 = vld [vmem:[#allocation57_spill] sm:$0xff] }
 0x3b8   :  { %5637 = vadd.xlane.f32.xlu0 %v5636_v31  ;;  %v6854_v42 = vsel %vm4304_vm1, %v13781_v37, 0.0  ;;  %v13808_v9 = vmul.f32 %v13217_v21, %v15362_v4  ;;  %v13812_v18 = vmul.f32 %v13303_v10, %v15332_v62  ;;  %v13816_v51 = vmul.f32 %v13303_v10, %v15345_v47  ;;  %v15369_v31 = vld [vmem:[#allocation87_spill] sm:$0xff]  ;;  %v15373_v53 = vld [vmem:[#allocation89_spill] sm:$0xff] }
 0x3b9   :  { %v13791_v19 = vpop.xlane.xlu0 %6777  ;;  %6864 = vadd.xlane.f32.xlu1 %v6863_v16  ;;  %v9041_v58 = vpop.eup %9040  ;;  %v5918_v22 = vmul.f32 %v5854_v15, %v15366_v46  ;;  %v5919_v41 = vmul.f32 %v5855_v8, %v15367_v28  ;;  %v7136_v57 = vmul.f32 %v7072_v24, %v15368_v48  ;;  %v7137_v63 = vmul.f32 %v7073_v36, %v15369_v31  ;;  %v15371_v47 = vld [vmem:[#allocation59_spill] sm:$0xff]  ;;  %v15372_v16 = vld [vmem:[#allocation56_spill] sm:$0xff]  ;;  %v15378_v31 = vld [vmem:[#allocation126_spill] sm:$0xff] }
 0x3ba   :  { %15363 = vst [vmem:[#allocation111_spill] sm:$0xff] %v13808_v9  ;;  %15364 = vst [vmem:[#allocation117_spill] sm:$0xff] %v13812_v18  ;;  %v9043_v21 = vpop.eup %9042  ;;  %v5730_v62 = vmax.f32 %v13765_v1, 1e-30  ;;  %v5731_v14 = vmax.f32 %v13784_v50, 1e-30  ;;  %v5920_v10 = vmul.f32 %v5856_v39, %v15370_v11  ;;  %v5921_v43 = vmul.f32 %v5857_v12, %v15371_v47 }
 0x3bb   :  { %15365 = vst [vmem:[#allocation9_spill] sm:$0xff] %v13816_v51  ;;  %v13822_v27 = vpop.xlane.xlu1 %6780  ;;  %v9045_v45 = vpop.eup %9044  ;;  %v7200_v15 = vadd.f32 %v7136_v57, %v5918_v22  ;;  %v7201_v8 = vadd.f32 %v7137_v63, %v5919_v41  ;;  %v7138_v24 = vmul.f32 %v7074_v49, %v15372_v16  ;;  %v7139_v36 = vmul.f32 %v7075_v61, %v15373_v53  ;;  %v15375_v1 = vld [vmem:[#allocation112_spill] sm:$0xff]  ;;  %v15381_v53 = vld [vmem:[#allocation127_spill] sm:$0xff] }
 0x3bc   :  { %6855 = vadd.xlane.f32.xlu0 %v6854_v42  ;;  %v9047_v46 = vpop.eup %9046  ;;  %9056 = vpow2.f32 %v13391_v52  ;;  %v15374_v42 = vld [vmem:[#allocation46_spill] sm:$0xff]  ;;  %v13834_v48 = vmul.f32 1.442695, %v4541_v35  ;;  %v5690_v39 = vsel %vm4304_vm1, %v13812_v18, 0.0  ;;  %v6857_v57 = vsel %vm4304_vm1, %v13808_v9, 0.0  ;;  %v15377_v52 = vld [vmem:[#allocation67_spill] sm:$0xff] }
 0x3bd   :  { %5640 = vadd.xlane.f32.xlu1 %v5639_v29  ;;  %v5554_v60 = vpop.xlane.xlu0 %5553  ;;  %v15376_v28 = vsub.f32 %v15374_v42, %v15375_v1  ;;  %v9049_v12 = vpop.eup %9048  ;;  %v6948_v29 = vmax.f32 %v13791_v19, 1e-30  ;;  %v7262_v22 = vpack.c.bf16 %v7201_v8, %v7200_v15  ;;  %v7202_v49 = vadd.f32 %v7138_v24, %v5920_v10  ;;  %v15419_v18 = vld [vmem:[#allocation134_spill] sm:$0xff] }
 0x3be   :  { %v7203_v41 = vadd.f32 %v7139_v36, %v5921_v43  ;;  %v9051_v61 = vpop.eup %9050  ;;  %v13843_v63 = vmul.f32 %v15378_v31, %v15377_v52  ;;  %9058 = vrcp.f32 %v5730_v62  ;;  %v5728_v35 = vmax.f32 %v5554_v60, 1e-30 }
 0x3bf   :  { %v4655_v50 = vmul.f32 1.442695, %v15376_v28  ;;  %v9053_v11 = vpop.eup %9052  ;;  %v6908_v47 = vsel %vm4304_vm1, %v13816_v51, 0.0  ;;  %v13849_v19 = vmul.f32 %v15378_v31, %v15346_v55  ;;  %9060 = vrcp.f32 %v5731_v14  ;;  %8613 = vmatprep.mubr.msk.bf16.mxu0 %vm4304_vm1, %v7262_v22 }
 0x3c0   :  { %5691 = vadd.xlane.f32.xlu0 %v5690_v39  ;;  %15379 = vst [vmem:[#allocation13_spill] sm:$0xff] %v13843_v63  ;;  %v7263_v10 = vpack.c.bf16 %v7203_v41, %v7202_v49  ;;  %v9055_v15 = vpop.eup %9054  ;;  %v5870_v8 = vmul.f32 %v9049_v12, %v13532_v34  ;;  %v5871_v62 = vmul.f32 %v9051_v61, %v13532_v34  ;;  %9062 = vrcp.f32 %v6948_v29  ;;  %v15385_v29 = vld [vmem:[#allocation79_spill] sm:$0xff]  ;;  %v15387_v61 = vld [vmem:[#allocation88_spill] sm:$0xff] }
 0x3c1   :  { %6858 = vadd.xlane.f32.xlu1 %v6857_v57  ;;  %15380 = vst [vmem:[#allocation71_spill] sm:$0xff] %v13849_v19  ;;  %v7088_v16 = vmul.f32 %v9053_v11, %v13558_v3  ;;  %v13857_v36 = vmul.f32 %v15381_v53, %v15354_v6  ;;  %v7089_v55 = vmul.f32 %v9055_v15, %v13558_v3  ;;  %v6949_v14 = vmax.f32 %v13822_v27, 1e-30  ;;  %v15384_v27 = vld [vmem:[#allocation86_spill] sm:$0xff]  ;;  %v15386_v49 = vld [vmem:[#allocation95_spill] sm:$0xff] }
 0x3c2   :  { %8614 = vmatmul.mubr.msk.bf16.gmra.mrb[36].mxu0 %vm4304_vm1, %v7263_v10  ;;  %v5693_v60 = vsel %vm4304_vm1, %v13843_v63, 0.0  ;;  %v13866_v42 = vmul.f32 %v15381_v53, %v15359_v26  ;;  %v7090_v1 = vmul.f32 %v9045_v45, %v13558_v3  ;;  %9064 = vrcp.f32 %v5728_v35 }
 0x3c3   :  { %15382 = vst [vmem:[#allocation73_spill] sm:$0xff] %v13857_v36  ;;  %v5872_v6 = vmul.f32 %v9041_v58, %v13532_v34  ;;  %v5873_v28 = vmul.f32 %v9043_v21, %v13532_v34  ;;  %v7091_v39 = vmul.f32 %v9047_v46, %v13558_v3  ;;  %v5934_v12 = vmul.f32 %v5870_v8, %v15384_v27  ;;  %v15388_v58 = vld [vmem:[#allocation130_spill] sm:$0xff]  ;;  %v15392_v8 = vld [vmem:[#allocation93_spill] sm:$0xff] }
 0x3c4   :  { %v5557_v43 = vpop.xlane.xlu1 %5556  ;;  %6909 = vadd.xlane.f32.xlu0 %v6908_v47  ;;  %15383 = vst [vmem:[#allocation74_spill] sm:$0xff] %v13866_v42  ;;  %v5935_v22 = vmul.f32 %v5871_v62, %v15385_v29  ;;  %v7152_v41 = vmul.f32 %v7088_v16, %v15386_v49  ;;  %v7153_v26 = vmul.f32 %v7089_v55, %v15387_v61  ;;  %v6911_v45 = vsel %vm4304_vm1, %v13849_v19, 0.0  ;;  %v15390_v47 = vld [vmem:[#allocation92_spill] sm:$0xff]  ;;  %v15393_v16 = vld [vmem:[#allocation94_spill] sm:$0xff]  ;;  %v15398_v29 = vld [vmem:[#allocation81_spill] sm:$0xff] }
 0x3c5   :  { %v5729_v24 = vmax.f32 %v5557_v43, 1e-30  ;;  %5694 = vadd.xlane.f32.xlu1 %v5693_v60  ;;  %v5684_v57 = vsel %vm4304_vm1, %v13857_v36, 0.0  ;;  %v13882_v21 = vmul.f32 %v15388_v58, %v15357_v23  ;;  %v7154_v10 = vmul.f32 %v7090_v1, %v15390_v47  ;;  %v15391_v43 = vld [vmem:[#allocation91_spill] sm:$0xff]  ;;  %v15395_v1 = vld [vmem:[#allocation62_spill] sm:$0xff]  ;;  %v15423_v19 = vld [vmem:[#allocation80_spill] sm:$0xff] }
 0x3c6   :  { %v13884_v52 = vpop.eup %9056  ;;  %v7216_v35 = vadd.f32 %v7152_v41, %v5934_v12  ;;  %v7217_v11 = vadd.f32 %v7153_v26, %v5935_v22  ;;  %v5936_v15 = vmul.f32 %v5872_v6, %v15391_v43  ;;  %v5937_v62 = vmul.f32 %v5873_v28, %v15392_v8  ;;  %v15399_v22 = vld [vmem:[#allocation132_spill] sm:$0xff]  ;;  %v15409_v47 = vld [vmem:[#allocation47_spill] sm:$0xff] }
 0x3c7   :  { %9066 = vrcp.f32 %v5729_v24  ;;  %15389 = vst [vmem:[#allocation75_spill] sm:$0xff] %v13882_v21  ;;  %v7155_v24 = vmul.f32 %v7091_v39, %v15393_v16  ;;  %v6902_v53 = vsel %vm4304_vm1, %v13866_v42, 0.0  ;;  %v13894_v60 = vmul.f32 %v15388_v58, %v15362_v4  ;;  %v15401_v41 = vld [vmem:[#allocation84_spill] sm:$0xff]  ;;  %v15413_v16 = vld [vmem:[#allocation133_spill] sm:$0xff]  ;;  %v15422_v42 = vld [vmem:[#allocation19_spill] sm:$0xff] }
 0x3c8   :  { %9068 = vrcp.f32 %v6949_v14  ;;  %5685 = vadd.xlane.f32.xlu0 %v5684_v57  ;;  %v9059_v23 = vpop.eup %9058  ;;  %v7270_v55 = vpack.c.bf16 %v7217_v11, %v7216_v35  ;;  %v7218_v12 = vadd.f32 %v7154_v10, %v5936_v15  ;;  %v5687_v39 = vsel %vm4304_vm1, %v13882_v21, 0.0  ;;  %v15403_v26 = vld [vmem:[#allocation96_spill] sm:$0xff]  ;;  %v15408_v11 = vld [vmem:[#allocation115_spill] sm:$0xff]  ;;  %v15411_v15 = vld [vmem:[#allocation61_spill] sm:$0xff] }
 0x3c9   :  { %v6772_v46 = vpop.xlane.xlu0 %6771  ;;  %9070 = vpow2.f32 %v4655_v50  ;;  %6912 = vadd.xlane.f32.xlu1 %v6911_v45  ;;  %v9061_v14 = vpop.eup %9060  ;;  %15394 = vst [vmem:[#allocation76_spill] sm:$0xff] %v13894_v60  ;;  %v15396_v50 = vld [vmem:[#allocation32_spill] sm:$0xff]  ;;  %v7219_v28 = vadd.f32 %v7155_v24, %v5937_v62  ;;  %v13905_v49 = vmul.f32 %v15399_v22, %v15398_v29  ;;  %v13914_v45 = vmul.f32 %v15399_v22, %v15403_v26  ;;  %v15412_v62 = vld [vmem:[#allocation10_spill] sm:$0xff]  ;;  %v15417_v22 = vld [vmem:[#allocation25_spill] sm:$0xff] }
 0x3ca   :  { %v6946_v31 = vmax.f32 %v6772_v46, 1e-30  ;;  %v13898_v27 = vmul.f32 %v15396_v50, %v15395_v1  ;;  %8631 = vmatprep.mubr.msk.bf16.mxu1 %vm4304_vm1, %v7270_v55  ;;  %v9063_v4 = vpop.eup %9062  ;;  %v13910_v61 = vmul.f32 %v15396_v50, %v15401_v41  ;;  %v15406_v57 = vld [vmem:[#allocation100_spill] sm:$0xff]  ;;  %v13926_v24 = vmul.f32 %v15413_v16, %v15412_v62 }
 0x3cb   :  { %15400 = vst [vmem:[#allocation68_spill] sm:$0xff] %v13905_v49  ;;  %15404 = vst [vmem:[#allocation18_spill] sm:$0xff] %v13914_v45  ;;  %v15410_v43 = vld [vmem:[#allocation120_spill] sm:$0xff]  ;;  %v6905_v50 = vsel %vm4304_vm1, %v13894_v60, 0.0  ;;  %v13938_v10 = vmul.f32 %v15413_v16, %v15417_v22  ;;  %v13945_v60 = vmul.f32 %v15419_v18, %v15395_v1  ;;  %v6875_v16 = vsel %vm4304_vm1, %v13914_v45, 0.0 }
 0x3cc   :  { %9072 = vrcp.f32 %v6946_v31  ;;  %15397 = vst [vmem:[#allocation70_spill] sm:$0xff] %v13898_v27  ;;  %6903 = vadd.xlane.f32.xlu0 %v6902_v53  ;;  %15402 = vst [vmem:[#allocation69_spill] sm:$0xff] %v13910_v61  ;;  %v7271_v31 = vpack.c.bf16 %v7219_v28, %v7218_v12  ;;  %v9065_v35 = vpop.eup %9064  ;;  %v15415_v12 = vld [vmem:[#allocation21_spill] sm:$0xff]  ;;  %v5860_v1 = vmul.f32 %v9059_v23, %v13532_v34 }
 0x3cd   :  { %v5608_v6 = vpop.xlane.xlu0 %5607  ;;  %9074 = vpow2.f32 %v13834_v48  ;;  %5688 = vadd.xlane.f32.xlu1 %v5687_v39  ;;  %v15405_v48 = vld [vmem:[#allocation98_spill] sm:$0xff]  ;;  %15414 = vst [vmem:[#allocation64_spill] sm:$0xff] %v13926_v24  ;;  %v5654_v39 = vsel %vm4304_vm1, %v13898_v27, 0.0  ;;  %v13934_v28 = vmul.f32 %v15406_v57, %v15415_v12  ;;  %15418 = vst [vmem:[#allocation63_spill] sm:$0xff] %v13938_v10  ;;  %v13963_v45 = vsel %vm4304_vm1, %v13938_v10, 0.0 }
 0x3ce   :  { %v13918_v58 = vmul.f32 %v15406_v57, %v15405_v48  ;;  %8632 = vmatmul.mubr.msk.bf16.gmra.mrb[36].mxu1 %vm4304_vm1, %v7271_v31  ;;  %15420 = vst [vmem:[#allocation14_spill] sm:$0xff] %v13945_v60  ;;  %v5746_v27 = vmax.f32 %v5608_v6, 1e-30  ;;  %v6872_v57 = vsel %vm4304_vm1, %v13910_v61, 0.0  ;;  %v5858_v6 = vmul.f32 %v9065_v35, %v13532_v34  ;;  %v15421_v35 = vld [vmem:[#allocation102_spill] sm:$0xff] }
 0x3cf   :  { %v6775_v46 = vpop.xlane.xlu1 %6774  ;;  %15416 = vst [vmem:[#allocation30_spill] sm:$0xff] %v13934_v28  ;;  %v6866_v61 = vsel %vm4304_vm1, %v13934_v28, 0.0  ;;  %v5702_v23 = vsel %vm4304_vm1, %v13945_v60, 0.0  ;;  %v7078_v10 = vmul.f32 %v9063_v4, %v13558_v3 }
 0x3d0   :  { %15407 = vst [vmem:[#allocation27_spill] sm:$0xff] %v13918_v58  ;;  %v6947_v53 = vmax.f32 %v6775_v46, 1e-30  ;;  %5655 = vadd.xlane.f32.xlu0 %v5654_v39  ;;  %v5657_v46 = vsel %vm4304_vm1, %v13905_v49, 0.0  ;;  %v5648_v31 = vsel %vm4304_vm1, %v13918_v58, 0.0  ;;  %v5651_v49 = vsel %vm4304_vm1, %v13926_v24, 0.0 }
 0x3d1   :  { %v9067_v55 = vpop.eup %9066  ;;  %v6826_v8 = vpop.xlane.xlu0 %6825  ;;  %6906 = vadd.xlane.f32.xlu1 %v6905_v50  ;;  %v5861_v58 = vmul.f32 %v9061_v14, %v13532_v34  ;;  %v13977_v14 = vmul.f32 %v15419_v18, %v15401_v41 }
 0x3d2   :  { %9076 = vrcp.f32 %v6947_v53  ;;  %v9069_v21 = vpop.eup %9068  ;;  %v6964_v36 = vmax.f32 %v6826_v8, 1e-30  ;;  %v5859_v8 = vmul.f32 %v9067_v55, %v13532_v34 }
 0x3d3   :  { %v5611_v39 = vpop.xlane.xlu1 %5610  ;;  %v13957_v50 = vpop.eup %9070  ;;  %9078 = vrcp.f32 %v5746_v27  ;;  %v7079_v63 = vmul.f32 %v9069_v21, %v13558_v3  ;;  %v5924_v27 = vmul.f32 %v5860_v1, %v15423_v19  ;;  %v5925_v9 = vmul.f32 %v5861_v58, %v15425_v7  ;;  %v15428_v1 = vld [vmem:[#allocation97_spill] sm:$0xff] }
 0x3d4   :  { %v5747_v53 = vmax.f32 %v5611_v39, 1e-30  ;;  %6873 = vadd.xlane.f32.xlu0 %v6872_v57  ;;  %v13971_v39 = vmul.f32 %v15421_v35, %v15398_v29  ;;  %9080 = vrcp.f32 %v6964_v36  ;;  %v5922_v29 = vmul.f32 %v5858_v6, %v15422_v42 }
 0x3d5   :  { %v5602_v51 = vpop.xlane.xlu0 %5601  ;;  %5658 = vadd.xlane.f32.xlu1 %v5657_v46  ;;  %v15424_v46 = vld [vmem:[#allocation20_spill] sm:$0xff]  ;;  %v15426_v36 = vmov 0   ;;  %v7143_v6 = vmul.f32 %v7079_v63, %v15428_v1 }
 0x3d6   :  { %v9073_v24 = vpop.eup %9072  ;;  %v5744_v28 = vmax.f32 %v5602_v51, 1e-30  ;;  %9082 = vrcp.f32 %v5747_v53  ;;  %v5923_v21 = vmul.f32 %v5859_v8, %v15424_v46  ;;  %v7300_v41 = vcombine.high %v13524_v30, %v15426_v36 }
 0x3d7   :  { %v6829_v55 = vpop.xlane.xlu1 %6828  ;;  %v13979_v57 = vpop.eup %9074  ;;  %v7076_v51 = vmul.f32 %v9073_v24, %v13558_v3  ;;  %v7309_v53 = vcombine.high %v13529_v20, %v15426_v36  ;;  %v7318_v42 = vcombine.high %v13546_v13, %v15426_v36  ;;  %v15427_v24 = vld [vmem:[#allocation85_spill] sm:$0xff]  ;;  %v7327_v7 = vcombine.high %v13551_v59, %v15426_v36 }
 0x3d8   :  { %v6965_v60 = vmax.f32 %v6829_v55, 1e-30  ;;  %9084 = vrcp.f32 %v5744_v28  ;;  %5649 = vadd.xlane.f32.xlu0 %v5648_v31  ;;  %v7142_v28 = vmul.f32 %v7078_v10, %v15427_v24  ;;  %v7336_v30 = vcombine.high %v13564_v17, %v15426_v36 }
 0x3d9   :  { %v6820_v4 = vpop.xlane.xlu0 %6819  ;;  %6876 = vadd.xlane.f32.xlu1 %v6875_v16  ;;  %v7345_v20 = vcombine.high %v13593_v5, %v15426_v36  ;;  %v7354_v10 = vcombine.high %v13612_v40, %v15426_v36  ;;  %v7363_v63 = vcombine.high %v13617_v54, %v15426_v36  ;;  %v7372_v59 = vpack.i.b16 %v7309_v53, %v7300_v41 }
 0x3da   :  { %v6962_v18 = vmax.f32 %v6820_v4, 1e-30  ;;  %9086 = vrcp.f32 %v6965_v60  ;;  %v15429_v60 = vld [vmem:[#allocation23_spill] sm:$0xff]  ;;  %v7384_v8 = vpack.i.b16 %v7327_v7, %v7318_v42  ;;  %v15430_v4 = vld [vmem:[#allocation24_spill] sm:$0xff]  ;;  %v7207_v5 = vadd.f32 %v7143_v6, %v5925_v9 }
 0x3db   :  { %v5605_v19 = vpop.xlane.xlu1 %5604  ;;  %v7140_v16 = vmul.f32 %v7076_v51, %v15429_v60  ;;  %v7396_v55 = vpack.i.b16 %v7345_v20, %v7336_v30  ;;  %v7374_v40 = vshrl.u32 %v7309_v53, 16  ;;  %v7206_v36 = vadd.f32 %v7142_v28, %v5924_v27 }
 0x3dc   :  { %v9077_v58 = vpop.eup %9076  ;;  %v5745_v31 = vmax.f32 %v5605_v19, 1e-30  ;;  %9088 = vrcp.f32 %v6962_v18  ;;  %6867 = vadd.xlane.f32.xlu0 %v6866_v61  ;;  %v7408_v18 = vpack.i.b16 %v7363_v63, %v7354_v10  ;;  %v7373_v19 = vshrl.u32 %v7300_v41, 16 }
 0x3dd   :  { %v7077_v13 = vmul.f32 %v9077_v58, %v13558_v3  ;;  %5652 = vadd.xlane.f32.xlu1 %v5651_v49  ;;  %v14007_v24 = vpop.eup %9078  ;;  %v7690_v1 = vcombine.low %v7372_v59, %v7384_v8  ;;  %v7385_v58 = vshrl.u32 %v7318_v42, 16  ;;  %v7204_v54 = vadd.f32 %v7140_v16, %v5922_v29 }
 0x3de   :  { %9090 = vrcp.f32 %v5745_v31  ;;  %v9081_v60 = vpop.eup %9080  ;;  %v7691_v31 = vcombine.low %v7396_v55, %v7408_v18  ;;  %v7386_v9 = vshrl.u32 %v7327_v7, 16  ;;  %v15431_v41 = vsub.f32 %v15409_v47, %v15408_v11  ;;  %v15433_v47 = vld [vmem:[#allocation135_spill] sm:$0xff] }
 0x3df   :  { %v6823_v17 = vpop.xlane.xlu1 %6822  ;;  %v7141_v46 = vmul.f32 %v7077_v13, %v15430_v4  ;;  %v7698_v49 = vrot.slane %v7690_v1, %v15337_v0  ;;  %v7375_v13 = vpack.i.b16 %v7374_v40, %v7373_v19  ;;  %v15432_v53 = vsub.f32 %v15411_v15, %v15410_v43 }
 0x3e0   :  { %v6963_v51 = vmax.f32 %v6823_v17, 1e-30  ;;  %v9083_v2 = vpop.eup %9082  ;;  %5703 = vadd.xlane.f32.xlu0 %v5702_v23  ;;  %v4651_v17 = vmul.f32 1.442695, %v15431_v41  ;;  %v14019_v29 = vmul.f32 %v15421_v35, %v15403_v26  ;;  %v7265_v27 = vpack.c.bf16 %v7207_v5, %v7206_v36  ;;  %v15434_v5 = vld [vmem:[#allocation136_spill] sm:$0xff]  ;;  %v15439_v41 = vld [vmem:[#allocation31_spill] sm:$0xff] }
 0x3e1   :  { %v7205_v61 = vadd.f32 %v7141_v46, %v5923_v21  ;;  %v4685_v42 = vmul.f32 1.442695, %v15432_v53  ;;  %6870 = vadd.xlane.f32.xlu1 %v13963_v45  ;;  %v7705_v21 = vrot.slane %v7691_v31, %v15337_v0  ;;  %v7387_v28 = vpack.i.b16 %v7386_v9, %v7385_v58  ;;  %v15438_v31 = vld [vmem:[#allocation48_spill] sm:$0xff] }
 0x3e2   :  { %9092 = vrcp.f32 %v6963_v51  ;;  %v9085_v6 = vpop.eup %9084  ;;  %v7397_v7 = vshrl.u32 %v7336_v30, 16  ;;  %v6920_v11 = vsel %vm4304_vm1, %v13977_v14, 0.0  ;;  %v14026_v43 = vmul.f32 %v15433_v47, %v15405_v48 }
 0x3e3   :  { %v7264_v23 = vpack.c.bf16 %v7205_v61, %v7204_v54  ;;  %v7398_v45 = vshrl.u32 %v7345_v20, 16  ;;  %v7409_v15 = vshrl.u32 %v7354_v10, 16  ;;  %v5705_v35 = vsel %vm4304_vm1, %v13971_v39, 0.0  ;;  %v15435_v54 = vld [vmem:[#allocation121_spill] sm:$0xff] }
 0x3e4   :  { %v9087_v16 = vpop.eup %9086  ;;  %6921 = vadd.xlane.f32.xlu0 %v6920_v11  ;;  %v7706_v30 = vcombine.low %v7698_v49, %v7705_v21  ;;  %v7410_v59 = vshrl.u32 %v7363_v63, 16  ;;  %v7829_v8 = vcombine.low %v7375_v13, %v7387_v28  ;;  %9094 = vpow2.f32 %v4651_v17  ;;  %v15436_v61 = vld [vmem:[#allocation49_spill] sm:$0xff] }
 0x3e5   :  { %8617 = vmatprep.mubr.msk.bf16.mxu0 %vm4304_vm1, %v7264_v23  ;;  %5706 = vadd.xlane.f32.xlu1 %v5705_v35  ;;  %v7399_v55 = vpack.i.b16 %v7398_v45, %v7397_v7  ;;  %9096 = vpow2.f32 %v4685_v42  ;;  %v6923_v48 = vsel %vm4304_vm1, %v14019_v29, 0.0  ;;  %v7095_v20 = vmul.f32 %v9087_v16, %v13558_v3  ;;  %v15440_v23 = vld [vmem:[#allocation108_spill] sm:$0xff]  ;;  %v15441_v21 = vld [vmem:[#allocation101_spill] sm:$0xff]  ;;  %v15444_v45 = vld [vmem:[#allocation99_spill] sm:$0xff] }
 0x3e6   :  { %v9089_v26 = vpop.eup %9088  ;;  %8618 = vmatmul.mubr.msk.bf16.gmra.mrb[40].mxu0 %vm4304_vm1, %v7265_v27  ;;  %8643 = vmatprep.subr.bf16.mxu0 %v7706_v30  ;;  %v7411_v10 = vpack.i.b16 %v7410_v59, %v7409_v15  ;;  %v5696_v46 = vsel %vm4304_vm1, %v14026_v43, 0.0  ;;  %v14039_v18 = vmul.f32 %v15434_v5, %v15412_v62  ;;  %v14043_v63 = vmul.f32 %v15433_v47, %v15415_v12  ;;  %v15437_v62 = vld [vmem:[#allocation122_spill] sm:$0xff]  ;;  %v15443_v16 = vld [vmem:[#allocation28_spill] sm:$0xff] }
 0x3e7   :  { %v7092_v19 = vmul.f32 %v9089_v26, %v13558_v3  ;;  %8644 = vmatpush3.bf16.msra.mxu0 %v7706_v30  ;;  %v5877_v51 = vmul.f32 %v9083_v2, %v13532_v34  ;;  %v7094_v1 = vmul.f32 %v9081_v60, %v13558_v3  ;;  %v7837_v58 = vrot.slane %v7829_v8, %v15337_v0  ;;  %v15445_v26 = vld [vmem:[#allocation33_spill] sm:$0xff] }
 0x3e8   :  { %v9091_v4 = vpop.eup %9090  ;;  %5697 = vadd.xlane.f32.xlu0 %v5696_v46  ;;  %v7830_v40 = vcombine.low %v7399_v55, %v7411_v10  ;;  %v4560_v36 = vsub.f32 %v15436_v61, %v15435_v54  ;;  %v4557_v49 = vsub.f32 %v15438_v31, %v15437_v62  ;;  %v5874_v12 = vmul.f32 %v9085_v6, %v13532_v34  ;;  %v15446_v30 = vld [vmem:[#allocation105_spill] sm:$0xff]  ;;  %v15447_v55 = vld [vmem:[#allocation124_spill] sm:$0xff] }
 0x3e9   :  { %6924 = vadd.xlane.f32.xlu1 %v6923_v48  ;;  %v5875_v13 = vmul.f32 %v9091_v4, %v13532_v34  ;;  %v5876_v2 = vmul.f32 %v14007_v24, %v13532_v34  ;;  %v14059_v60 = vmul.f32 %v15434_v5, %v15417_v22  ;;  %v7159_v17 = vmul.f32 %v7095_v20, %v15439_v41  ;;  %v15442_v22 = vld [vmem:[#allocation29_spill] sm:$0xff]  ;;  %v15448_v4 = vld [vmem:[#allocation50_spill] sm:$0xff] }
 0x3ea   :  { %v7844_v53 = vrot.slane %v7830_v40, %v15337_v0  ;;  %v6914_v42 = vsel %vm4304_vm1, %v14043_v63, 0.0  ;;  %v14067_v6 = vmul.f32 %v13884_v52, %v15440_v23  ;;  %v7156_v28 = vmul.f32 %v7092_v19, %v15441_v21  ;;  %v15449_v20 = vld [vmem:[#allocation22_spill] sm:$0xff] }
 0x3eb   :  { %v5699_v24 = vsel %vm4304_vm1, %v14039_v18, 0.0  ;;  %v5941_v7 = vmul.f32 %v5877_v51, %v15442_v22  ;;  %v7158_v11 = vmul.f32 %v7094_v1, %v15443_v16  ;;  %v4687_v47 = vmul.f32 1.442695, %v4560_v36  ;;  %v15450_v51 = vld [vmem:[#allocation113_spill] sm:$0xff]  ;;  %v15451_v36 = vld [vmem:[#allocation35_spill] sm:$0xff]  ;;  %v15455_v22 = vld [vmem:[#allocation36_spill] sm:$0xff] }
 0x3ec   :  { %v9093_v9 = vpop.eup %9092  ;;  %6915 = vadd.xlane.f32.xlu0 %v6914_v42  ;;  %v7845_v0 = vcombine.low %v7837_v58, %v7844_v53  ;;  %v5938_v15 = vmul.f32 %v5874_v12, %v15444_v45  ;;  %v5939_v35 = vmul.f32 %v5875_v13, %v15445_v26  ;;  %v4681_v8 = vmul.f32 1.442695, %v4557_v49 }
 0x3ed   :  { %v7093_v27 = vmul.f32 %v9093_v9, %v13558_v3  ;;  %5700 = vadd.xlane.f32.xlu1 %v5699_v24  ;;  %v4558_v48 = vsub.f32 %v15448_v4, %v15447_v55  ;;  %v5940_v10 = vmul.f32 %v5876_v2, %v15449_v20  ;;  %v7223_v46 = vadd.f32 %v7159_v17, %v5941_v7  ;;  %v15452_v9 = vld [vmem:[#allocation55_spill] sm:$0xff]  ;;  %v15453_v17 = vld [vmem:[#allocation116_spill] sm:$0xff] }
 0x3ee   :  { %8661 = vmatprep.subr.bf16.mxu1 %v7845_v0  ;;  %v9095_v5 = vpop.eup %9094  ;;  %v5666_v19 = vsel %vm4304_vm1, %v14067_v6, 0.0  ;;  %v14085_v1 = vmul.f32 %v13884_v52, %v15450_v51  ;;  %v7220_v40 = vadd.f32 %v7156_v28, %v5938_v15  ;;  %v6917_v61 = vsel %vm4304_vm1, %v14059_v60, 0.0  ;;  %v5572_v28 = vpop.xlane.xlu0 %5571 }
 0x3ef   :  { %v7157_v59 = vmul.f32 %v7093_v27, %v15446_v30  ;;  %8662 = vmatpush3.bf16.msra.mxu1 %v7845_v0  ;;  %v9097_v54 = vpop.eup %9096  ;;  %v14091_v62 = vmul.f32 %v13957_v50, %v15451_v36  ;;  %v7222_v31 = vadd.f32 %v7158_v11, %v5940_v10  ;;  %9098 = vpow2.f32 %v4681_v8  ;;  %v15454_v27 = vld [vmem:[#allocation60_spill] sm:$0xff] }
 0x3f0   :  { %5667 = vadd.xlane.f32.xlu0 %v5666_v19  ;;  %9100 = vpow2.f32 %v4687_v47  ;;  %v4683_v52 = vmul.f32 1.442695, %v4558_v48  ;;  %v6884_v13 = vsel %vm4304_vm1, %v14085_v1, 0.0  ;;  %v14097_v2 = vmul.f32 %v13979_v57, %v15452_v9  ;;  %v15456_v47 = vld [vmem:[#allocation42_spill] sm:$0xff] }
 0x3f1   :  { %v7221_v58 = vadd.f32 %v7157_v59, %v5939_v35  ;;  %6918 = vadd.xlane.f32.xlu1 %v6917_v61  ;;  %v7273_v12 = vpack.c.bf16 %v7223_v46, %v7222_v31  ;;  %v5669_v41 = vsel %vm4304_vm1, %v14091_v62, 0.0  ;;  %v14104_v53 = vmul.f32 %v13957_v50, %v15453_v17  ;;  %v5575_v50 = vpop.xlane.xlu1 %5574 }
 0x3f2   :  { %9102 = vpow2.f32 %v4683_v52  ;;  %v5660_v42 = vsel %vm4304_vm1, %v14097_v2, 0.0  ;;  %v14111_v21 = vmul.f32 %v13979_v57, %v15454_v27  ;;  %v14116_v7 = vmul.f32 %v9095_v5, %v15455_v22  ;;  %v6790_v26 = vpop.xlane.xlu0 %6789 }
 0x3f3   :  { %v7272_v49 = vpack.c.bf16 %v7221_v58, %v7220_v40  ;;  %v6887_v24 = vsel %vm4304_vm1, %v14104_v53, 0.0  ;;  %v14121_v11 = vmul.f32 %v9097_v54, %v15440_v23  ;;  %v14126_v45 = vmul.f32 %v9095_v5, %v15456_v47 }
 0x3f4   :  { %6885 = vadd.xlane.f32.xlu0 %v6884_v13  ;;  %v6878_v16 = vsel %vm4304_vm1, %v14111_v21, 0.0  ;;  %v5663_v57 = vsel %vm4304_vm1, %v14116_v7, 0.0  ;;  %v5735_v10 = vmax.f32 %v5575_v50, 1e-30  ;;  %v6952_v19 = vmax.f32 %v6790_v26, 1e-30 }
 0x3f5   :  { %8635 = vmatprep.mubr.msk.bf16.mxu1 %vm4304_vm1, %v7272_v49  ;;  %5670 = vadd.xlane.f32.xlu1 %v5669_v41  ;;  %v5714_v35 = vsel %vm4304_vm1, %v14121_v11, 0.0  ;;  %v6881_v23 = vsel %vm4304_vm1, %v14126_v45, 0.0  ;;  %v6793_v8 = vpop.xlane.xlu1 %6792  ;;  %v14151_v31 = vmul.f32 %v9097_v54, %v15450_v51 }
 0x3f6   :  { %8636 = vmatmul.mubr.msk.bf16.gmra.mrb[40].mxu1 %vm4304_vm1, %v7273_v12  ;;  %v6953_v40 = vmax.f32 %v6793_v8, 1e-30  ;;  %9104 = vrcp.f32 %v5735_v10 }
 0x3f7   :  { %9106 = vrcp.f32 %v6952_v19  ;;  %v6932_v51 = vsel %vm4304_vm1, %v14151_v31, 0.0 }
 0x3f8   :  { %5661 = vadd.xlane.f32.xlu0 %v5660_v42  ;;  %9108 = vrcp.f32 %v6953_v40 }
 0x3f9   :  { %6888 = vadd.xlane.f32.xlu1 %v6887_v24  ;;  %v9099_v0 = vpop.eup %9098 }
 0x3fa   :  { %v9101_v15 = vpop.eup %9100  ;;  %v14131_v30 = vmul.f32 %v9099_v0, %v15452_v9  ;;  %v14141_v20 = vmul.f32 %v9099_v0, %v15454_v27  ;;  %v5734_v9 = vmax.f32 %v5572_v28, 1e-30 }
 0x3fb   :  { %v14136_v59 = vmul.f32 %v9101_v15, %v15451_v36  ;;  %v14163_v42 = vmul.f32 %v9101_v15, %v15453_v17 }
 0x3fc   :  { %6879 = vadd.xlane.f32.xlu0 %v6878_v16  ;;  %v9103_v55 = vpop.eup %9102  ;;  %v5708_v4 = vsel %vm4304_vm1, %v14131_v30, 0.0  ;;  %v5566_v48 = vpop.xlane.xlu0 %5565  ;;  %v6926_v36 = vsel %vm4304_vm1, %v14141_v20, 0.0 }
 0x3fd   :  { %5664 = vadd.xlane.f32.xlu1 %v5663_v57  ;;  %v5717_v46 = vsel %vm4304_vm1, %v14136_v59, 0.0  ;;  %v14146_v5 = vmul.f32 %v9103_v55, %v15455_v22  ;;  %v5732_v61 = vmax.f32 %v5566_v48, 1e-30  ;;  %v14156_v12 = vmul.f32 %v9103_v55, %v15456_v47 }
 0x3fe   :  { %v6935_v22 = vsel %vm4304_vm1, %v14163_v42, 0.0 }
 0x3ff   :  { %v5711_v49 = vsel %vm4304_vm1, %v14146_v5, 0.0  ;;  %9110 = vrcp.f32 %v5732_v61  ;;  %v6929_v54 = vsel %vm4304_vm1, %v14156_v12, 0.0 }
 0x400   :  { %5715 = vadd.xlane.f32.xlu0 %v5714_v35  ;;  %v9105_v16 = vpop.eup %9104 }
 0x401   :  { %6882 = vadd.xlane.f32.xlu1 %v6881_v23  ;;  %v9107_v57 = vpop.eup %9106  ;;  %v5865_v40 = vmul.f32 %v9105_v16, %v13532_v34 }
 0x402   :  { %v9109_v47 = vpop.eup %9108 }
 0x404   :  { %5709 = vadd.xlane.f32.xlu0 %v5708_v4  ;;  %v7083_v4 = vmul.f32 %v9109_v47, %v13558_v3 }
 0x405   :  { %5718 = vadd.xlane.f32.xlu1 %v5717_v46  ;;  %v5569_v58 = vpop.xlane.xlu1 %5568 }
 0x406   :  { %v5733_v52 = vmax.f32 %v5569_v58, 1e-30  ;;  %v7082_v58 = vmul.f32 %v9107_v57, %v13558_v3  ;;  %v15459_v57 = vld [vmem:[#allocation110_spill] sm:$0xff] }
 0x407   :  { %v5929_v47 = vmul.f32 %v5865_v40, %v15459_v57 }
 0x408   :  { %6927 = vadd.xlane.f32.xlu0 %v6926_v36 }
 0x409   :  { %5712 = vadd.xlane.f32.xlu1 %v5711_v49  ;;  %v6784_v13 = vpop.xlane.xlu0 %6783  ;;  %v9111_v35 = vpop.eup %9110 }
 0x40a   :  { %v6950_v41 = vmax.f32 %v6784_v13, 1e-30  ;;  %v5862_v61 = vmul.f32 %v9111_v35, %v13532_v34 }
 0x40c   :  { %9112 = vrcp.f32 %v6950_v41  ;;  %6933 = vadd.xlane.f32.xlu0 %v6932_v51 }
 0x40d   :  { %9114 = vrcp.f32 %v5733_v52  ;;  %6930 = vadd.xlane.f32.xlu1 %v6929_v54  ;;  %v5620_v27 = vpop.xlane.xlu0 %5619 }
 0x40e   :  { %9116 = vrcp.f32 %v5734_v9  ;;  %v6787_v24 = vpop.xlane.xlu1 %6786  ;;  %v5750_v52 = vmax.f32 %v5620_v27, 1e-30  ;;  %v15460_v27 = vld [vmem:[#allocation114_spill] sm:$0xff] }
 0x40f   :  { %v6951_v28 = vmax.f32 %v6787_v24, 1e-30  ;;  %v15457_v24 = vld [vmem:[#allocation118_spill] sm:$0xff] }
 0x411   :  { %9118 = vrcp.f32 %v6951_v28  ;;  %6936 = vadd.xlane.f32.xlu1 %v6935_v22  ;;  %v6838_v50 = vpop.xlane.xlu0 %6837  ;;  %v7147_v28 = vmul.f32 %v7083_v4, %v15457_v24 }
 0x412   :  { %v5623_v0 = vpop.xlane.xlu1 %5622  ;;  %v6968_v26 = vmax.f32 %v6838_v50, 1e-30  ;;  %v15458_v50 = vld [vmem:[#allocation41_spill] sm:$0xff] }
 0x413   :  { %v5751_v17 = vmax.f32 %v5623_v0, 1e-30 }
 0x414   :  { %9120 = vrcp.f32 %v6968_v26  ;;  %v7146_v26 = vmul.f32 %v7082_v58, %v15460_v27 }
 0x415   :  { %v5614_v15 = vpop.xlane.xlu0 %5613  ;;  %9122 = vrcp.f32 %v5751_v17  ;;  %v15461_v17 = vld [vmem:[#allocation123_spill] sm:$0xff] }
 0x416   :  { %v9113_v23 = vpop.eup %9112  ;;  %v6841_v8 = vpop.xlane.xlu1 %6840  ;;  %v5748_v10 = vmax.f32 %v5614_v15, 1e-30  ;;  %v5926_v15 = vmul.f32 %v5862_v61, %v15461_v17 }
 0x417   :  { %v9115_v55 = vpop.eup %9114  ;;  %v6969_v48 = vmax.f32 %v6841_v8, 1e-30  ;;  %v7080_v19 = vmul.f32 %v9113_v23, %v13558_v3  ;;  %v15462_v23 = vld [vmem:[#allocation125_spill] sm:$0xff] }
 0x418   :  { %v9117_v46 = vpop.eup %9116  ;;  %v5863_v49 = vmul.f32 %v9115_v55, %v13532_v34  ;;  %v15463_v55 = vld [vmem:[#allocation38_spill] sm:$0xff] }
 0x419   :  { %v6832_v36 = vpop.xlane.xlu0 %6831  ;;  %9124 = vrcp.f32 %v6969_v48  ;;  %v5864_v51 = vmul.f32 %v9117_v46, %v13532_v34  ;;  %v7144_v16 = vmul.f32 %v7080_v19, %v15458_v50 }
 0x41a   :  { %v5617_v13 = vpop.xlane.xlu1 %5616  ;;  %v6966_v9 = vmax.f32 %v6832_v36, 1e-30  ;;  %9126 = vrcp.f32 %v5748_v10  ;;  %v5927_v8 = vmul.f32 %v5863_v49, %v15462_v23  ;;  %v15464_v10 = vld [vmem:[#allocation109_spill] sm:$0xff]  ;;  %v7211_v36 = vadd.f32 %v7147_v28, %v5929_v47 }
 0x41b   :  { %v9119_v41 = vpop.eup %9118  ;;  %v5749_v54 = vmax.f32 %v5617_v13, 1e-30  ;;  %v5928_v46 = vmul.f32 %v5864_v51, %v15464_v10  ;;  %v7208_v13 = vadd.f32 %v7144_v16, %v5926_v15 }
 0x41c   :  { %v7081_v22 = vmul.f32 %v9119_v41, %v13558_v3  ;;  %9128 = vrcp.f32 %v6966_v9 }
 0x41d   :  { %9130 = vrcp.f32 %v5749_v54  ;;  %v5632_v0 = vpop.xlane.xlu0 %5631  ;;  %v7210_v41 = vadd.f32 %v7146_v26, %v5928_v46 }
 0x41e   :  { %9132 = vrcp.f32 %v5750_v52  ;;  %v6835_v35 = vpop.xlane.xlu1 %6834  ;;  %v7145_v48 = vmul.f32 %v7081_v22, %v15463_v55  ;;  %v9121_v40 = vpop.eup %9120 }
 0x41f   :  { %v6967_v4 = vmax.f32 %v6835_v35, 1e-30  ;;  %v9123_v52 = vpop.eup %9122  ;;  %v7267_v24 = vpack.c.bf16 %v7211_v36, %v7210_v41  ;;  %v7098_v23 = vmul.f32 %v9121_v40, %v13558_v3 }
 0x420   :  { %v7209_v19 = vadd.f32 %v7145_v48, %v5927_v8  ;;  %v5881_v15 = vmul.f32 %v9123_v52, %v13532_v34  ;;  %v5754_v8 = vmax.f32 %v5632_v0, 1e-30  ;;  %v15466_v0 = vld [vmem:[#allocation129_spill] sm:$0xff]  ;;  %v15467_v52 = vld [vmem:[#allocation43_spill] sm:$0xff] }
 0x421   :  { %9134 = vrcp.f32 %v6967_v4  ;;  %v6850_v9 = vpop.xlane.xlu0 %6849 }
 0x422   :  { %v5635_v54 = vpop.xlane.xlu1 %5634  ;;  %v7266_v58 = vpack.c.bf16 %v7209_v19, %v7208_v13  ;;  %v6972_v61 = vmax.f32 %v6850_v9, 1e-30  ;;  %v15465_v9 = vld [vmem:[#allocation44_spill] sm:$0xff] }
 0x423   :  { %v9125_v50 = vpop.eup %9124  ;;  %v5755_v22 = vmax.f32 %v5635_v54, 1e-30 }
 0x424   :  { %8621 = vmatprep.mubr.msk.bf16.mxu0 %vm4304_vm1, %v7266_v58  ;;  %v9127_v49 = vpop.eup %9126  ;;  %v7099_v47 = vmul.f32 %v9125_v50, %v13558_v3  ;;  %9136 = vrcp.f32 %v6972_v61  ;;  %v15468_v50 = vld [vmem:[#allocation39_spill] sm:$0xff] }
 0x425   :  { %8622 = vmatmul.mubr.msk.bf16.gmra.mrb[44].mxu0 %vm4304_vm1, %v7267_v24  ;;  %v5626_v51 = vpop.xlane.xlu0 %5625  ;;  %9138 = vrcp.f32 %v5755_v22  ;;  %v5878_v48 = vmul.f32 %v9127_v49, %v13532_v34  ;;  %v5945_v24 = vmul.f32 %v5881_v15, %v15467_v52  ;;  %v7162_v61 = vmul.f32 %v7098_v23, %v15468_v50  ;;  %v15469_v22 = vld [vmem:[#allocation40_spill] sm:$0xff] }
 0x426   :  { %v9129_v28 = vpop.eup %9128  ;;  %v6853_v16 = vpop.xlane.xlu1 %6852  ;;  %v5752_v26 = vmax.f32 %v5626_v51, 1e-30  ;;  %v7163_v41 = vmul.f32 %v7099_v47, %v15465_v9 }
 0x427   :  { %v9131_v57 = vpop.eup %9130  ;;  %v6973_v27 = vmax.f32 %v6853_v16, 1e-30  ;;  %v7096_v17 = vmul.f32 %v9129_v28, %v13558_v3  ;;  %v5942_v51 = vmul.f32 %v5878_v48, %v15469_v22  ;;  %v15470_v28 = vld [vmem:[#allocation128_spill] sm:$0xff] }
 0x428   :  { %v9133_v35 = vpop.eup %9132  ;;  %v5879_v4 = vmul.f32 %v9131_v57, %v13532_v34  ;;  %v15471_v57 = vld [vmem:[#allocation131_spill] sm:$0xff] }
 0x429   :  { %v6844_v55 = vpop.xlane.xlu0 %6843  ;;  %9140 = vrcp.f32 %v6973_v27  ;;  %v5880_v13 = vmul.f32 %v9133_v35, %v13532_v34  ;;  %v7160_v40 = vmul.f32 %v7096_v17, %v15466_v0 }
 0x42a   :  { %v5629_v10 = vpop.xlane.xlu1 %5628  ;;  %v6970_v46 = vmax.f32 %v6844_v55, 1e-30  ;;  %9142 = vrcp.f32 %v5752_v26  ;;  %v5943_v16 = vmul.f32 %v5879_v4, %v15470_v28  ;;  %v15472_v26 = vld [vmem:[#allocation37_spill] sm:$0xff]  ;;  %v7227_v55 = vadd.f32 %v7163_v41, %v5945_v24 }
 0x42b   :  { %v9135_v36 = vpop.eup %9134  ;;  %v5753_v19 = vmax.f32 %v5629_v10, 1e-30  ;;  %v5944_v35 = vmul.f32 %v5880_v13, %v15472_v26  ;;  %v7224_v10 = vadd.f32 %v7160_v40, %v5942_v51 }
 0x42c   :  { %v7097_v54 = vmul.f32 %v9135_v36, %v13558_v3  ;;  %9144 = vrcp.f32 %v6970_v46 }
 0x42d   :  { %9146 = vrcp.f32 %v5753_v19  ;;  %v5680_v58 = vpop.xlane.xlu0 %5679  ;;  %v7226_v36 = vadd.f32 %v7162_v61, %v5944_v35 }
 0x42e   :  { %9148 = vrcp.f32 %v5754_v8  ;;  %v6847_v49 = vpop.xlane.xlu1 %6846  ;;  %v7161_v27 = vmul.f32 %v7097_v54, %v15471_v57  ;;  %v9137_v15 = vpop.eup %9136 }
 0x42f   :  { %v6971_v47 = vmax.f32 %v6847_v49, 1e-30  ;;  %v9139_v8 = vpop.eup %9138  ;;  %v7275_v9 = vpack.c.bf16 %v7227_v55, %v7226_v36  ;;  %v7102_v28 = vmul.f32 %v9137_v15, %v13558_v3 }
 0x430   :  { %v7225_v17 = vadd.f32 %v7161_v27, %v5943_v16  ;;  %v5885_v51 = vmul.f32 %v9139_v8, %v13532_v34  ;;  %v5770_v16 = vmax.f32 %v5680_v58, 1e-30  ;;  %v15474_v58 = vld [vmem:[#allocation66_spill] sm:$0xff] }
 0x431   :  { %9150 = vrcp.f32 %v6971_v47  ;;  %v6898_v46 = vpop.xlane.xlu0 %6897 }
 0x432   :  { %v5683_v19 = vpop.xlane.xlu1 %5682  ;;  %v7274_v23 = vpack.c.bf16 %v7225_v17, %v7224_v10  ;;  %v6988_v48 = vmax.f32 %v6898_v46, 1e-30  ;;  %v15473_v17 = vld [vmem:[#allocation53_spill] sm:$0xff] }
 0x433   :  { %v9141_v0 = vpop.eup %9140  ;;  %v5771_v54 = vmax.f32 %v5683_v19, 1e-30 }
 0x434   :  { %8639 = vmatprep.mubr.msk.bf16.mxu1 %vm4304_vm1, %v7274_v23  ;;  %v9143_v4 = vpop.eup %9142  ;;  %v7103_v24 = vmul.f32 %v9141_v0, %v13558_v3  ;;  %9152 = vrcp.f32 %v6988_v48  ;;  %v15475_v23 = vld [vmem:[#allocation51_spill] sm:$0xff] }
 0x435   :  { %8640 = vmatmul.mubr.msk.bf16.gmra.mrb[44].mxu1 %vm4304_vm1, %v7275_v9  ;;  %v5674_v13 = vpop.xlane.xlu0 %5673  ;;  %9154 = vrcp.f32 %v5771_v54  ;;  %v5882_v27 = vmul.f32 %v9143_v4, %v13532_v34  ;;  %v5949_v8 = vmul.f32 %v5885_v51, %v15475_v23  ;;  %v15476_v9 = vld [vmem:[#allocation52_spill] sm:$0xff]  ;;  %v15477_v54 = vld [vmem:[#allocation54_spill] sm:$0xff] }
 0x436   :  { %v9145_v41 = vpop.eup %9144  ;;  %v6901_v40 = vpop.xlane.xlu1 %6900  ;;  %v5768_v61 = vmax.f32 %v5674_v13, 1e-30  ;;  %v7167_v46 = vmul.f32 %v7103_v24, %v15473_v17  ;;  %v7166_v0 = vmul.f32 %v7102_v28, %v15476_v9 }
 0x437   :  { %v9147_v52 = vpop.eup %9146  ;;  %v6989_v50 = vmax.f32 %v6901_v40, 1e-30  ;;  %v7100_v22 = vmul.f32 %v9145_v41, %v13558_v3  ;;  %v5946_v13 = vmul.f32 %v5882_v27, %v15477_v54  ;;  %v15478_v41 = vld [vmem:[#allocation65_spill] sm:$0xff] }
 0x438   :  { %v9149_v49 = vpop.eup %9148  ;;  %v5883_v47 = vmul.f32 %v9147_v52, %v13532_v34  ;;  %v15479_v52 = vld [vmem:[#allocation11_spill] sm:$0xff] }
 0x439   :  { %v6892_v57 = vpop.xlane.xlu0 %6891  ;;  %9156 = vrcp.f32 %v6989_v50  ;;  %v5884_v10 = vmul.f32 %v9149_v49, %v13532_v34  ;;  %v7164_v15 = vmul.f32 %v7100_v22, %v15474_v58  ;;  %v15480_v50 = vld [vmem:[#allocation26_spill] sm:$0xff]  ;;  %v7231_v49 = vadd.f32 %v7167_v46, %v5949_v8 }
 0x43a   :  { %v5677_v26 = vpop.xlane.xlu1 %5676  ;;  %v6986_v35 = vmax.f32 %v6892_v57, 1e-30  ;;  %9158 = vrcp.f32 %v5768_v61  ;;  %v5947_v40 = vmul.f32 %v5883_v47, %v15478_v41 }
 0x43b   :  { %v9151_v55 = vpop.eup %9150  ;;  %v5769_v36 = vmax.f32 %v5677_v26, 1e-30  ;;  %v5948_v61 = vmul.f32 %v5884_v10, %v15480_v50  ;;  %v7228_v26 = vadd.f32 %v7164_v15, %v5946_v13 }
 0x43c   :  { %v7101_v19 = vmul.f32 %v9151_v55, %v13558_v3  ;;  %9160 = vrcp.f32 %v6986_v35 }
 0x43d   :  { %9162 = vrcp.f32 %v5769_v36  ;;  %v5644_v48 = vpop.xlane.xlu0 %5643  ;;  %v7230_v35 = vadd.f32 %v7166_v0, %v5948_v61 }
 0x43e   :  { %9164 = vrcp.f32 %v5770_v16  ;;  %v6895_v4 = vpop.xlane.xlu1 %6894  ;;  %v7165_v24 = vmul.f32 %v7101_v19, %v15479_v52  ;;  %v9153_v28 = vpop.eup %9152 }
 0x43f   :  { %v6987_v57 = vmax.f32 %v6895_v4, 1e-30  ;;  %v9155_v16 = vpop.eup %9154  ;;  %v7277_v36 = vpack.c.bf16 %v7231_v49, %v7230_v35  ;;  %v7118_v41 = vmul.f32 %v9153_v28, %v13558_v3  ;;  %v15482_v28 = vld [vmem:[#allocation104_spill] sm:$0xff] }
 0x440   :  { %v7229_v22 = vadd.f32 %v7165_v24, %v5947_v40  ;;  %v5901_v13 = vmul.f32 %v9155_v16, %v13532_v34  ;;  %v5758_v40 = vmax.f32 %v5644_v48, 1e-30  ;;  %v15483_v16 = vld [vmem:[#allocation137_spill] sm:$0xff] }
 0x441   :  { %9166 = vrcp.f32 %v6987_v57  ;;  %v6862_v51 = vpop.xlane.xlu0 %6861 }
 0x442   :  { %v5647_v55 = vpop.xlane.xlu1 %5646  ;;  %v7276_v17 = vpack.c.bf16 %v7229_v22, %v7228_v26  ;;  %v6976_v27 = vmax.f32 %v6862_v51, 1e-30  ;;  %v15481_v22 = vld [vmem:[#allocation138_spill] sm:$0xff] }
 0x443   :  { %v9157_v58 = vpop.eup %9156  ;;  %v5759_v19 = vmax.f32 %v5647_v55, 1e-30 }
 0x444   :  { %8645 = vmatprep.mubr.msk.bf16.mxu0 %vm4304_vm1, %v7276_v17  ;;  %v9159_v47 = vpop.eup %9158  ;;  %v7119_v8 = vmul.f32 %v9157_v58, %v13558_v3  ;;  %9168 = vrcp.f32 %v6976_v27  ;;  %v5965_v17 = vmul.f32 %v5901_v13, %v15482_v28 }
 0x445   :  { %8646 = vmatmul.mubr.msk.bf16.vlgmr.msra.gmra.mrb[48].mxu0 %vm4304_vm1, %v7277_v36  ;;  %v5638_v10 = vpop.xlane.xlu0 %5637  ;;  %9170 = vrcp.f32 %v5759_v19  ;;  %v5898_v24 = vmul.f32 %v9159_v47, %v13532_v34  ;;  %v7182_v36 = vmul.f32 %v7118_v41, %v15483_v16  ;;  %v15484_v47 = vld [vmem:[#allocation106_spill] sm:$0xff] }
 0x446   :  { %v9161_v46 = vpop.eup %9160  ;;  %v6865_v15 = vpop.xlane.xlu1 %6864  ;;  %v5756_v0 = vmax.f32 %v5638_v10, 1e-30  ;;  %v7183_v35 = vmul.f32 %v7119_v8, %v15481_v22  ;;  %v15485_v10 = vld [vmem:[#allocation107_spill] sm:$0xff] }
 0x447   :  { %v9163_v23 = vpop.eup %9162  ;;  %v6977_v9 = vmax.f32 %v6865_v15, 1e-30  ;;  %v7116_v54 = vmul.f32 %v9161_v46, %v13558_v3  ;;  %v5962_v19 = vmul.f32 %v5898_v24, %v15484_v47 }
 0x448   :  { %v9165_v4 = vpop.eup %9164  ;;  %v5899_v50 = vmul.f32 %v9163_v23, %v13532_v34  ;;  %v15486_v23 = vld [vmem:[#allocation103_spill] sm:$0xff] }
 0x449   :  { %v6856_v52 = vpop.xlane.xlu0 %6855  ;;  %9172 = vrcp.f32 %v6977_v9  ;;  %v5900_v26 = vmul.f32 %v9165_v4, %v13532_v34  ;;  %v7180_v48 = vmul.f32 %v7116_v54, %v13607_v38  ;;  %v7247_v9 = vadd.f32 %v7183_v35, %v5965_v17 }
 0x44a   :  { %v5641_v61 = vpop.xlane.xlu1 %5640  ;;  %v6974_v49 = vmax.f32 %v6856_v52, 1e-30  ;;  %9174 = vrcp.f32 %v5756_v0  ;;  %v5963_v46 = vmul.f32 %v5899_v50, %v15485_v10 }
 0x44b   :  { %v9167_v57 = vpop.eup %9166  ;;  %v5757_v51 = vmax.f32 %v5641_v61, 1e-30  ;;  %v5964_v8 = vmul.f32 %v5900_v26, %v15486_v23  ;;  %v7244_v4 = vadd.f32 %v7180_v48, %v5962_v19 }
 0x44c   :  { %v7117_v55 = vmul.f32 %v9167_v57, %v13558_v3  ;;  %9176 = vrcp.f32 %v6974_v49 }
 0x44d   :  { %9178 = vrcp.f32 %v5757_v51  ;;  %v5692_v58 = vpop.xlane.xlu0 %5691  ;;  %v7246_v54 = vadd.f32 %v7182_v36, %v5964_v8 }
 0x44e   :  { %9180 = vrcp.f32 %v5758_v40  ;;  %v6859_v27 = vpop.xlane.xlu1 %6858  ;;  %v7181_v15 = vmul.f32 %v7117_v55, %v13621_v32  ;;  %v9169_v41 = vpop.eup %9168  ;;  %v5774_v47 = vmax.f32 %v5692_v58, 1e-30 }
 0x44f   :  { %v6975_v0 = vmax.f32 %v6859_v27, 1e-30  ;;  %v9171_v40 = vpop.eup %9170  ;;  %v7285_v49 = vpack.c.bf16 %v7247_v9, %v7246_v54  ;;  %v7106_v27 = vmul.f32 %v9169_v41, %v13558_v3 }
 0x450   :  { %v7245_v38 = vadd.f32 %v7181_v15, %v5963_v46  ;;  %v5889_v36 = vmul.f32 %v9171_v40, %v13532_v34  ;;  %v15487_v40 = vld [vmem:[#allocation12_spill] sm:$0xff] }
 0x451   :  { %9182 = vrcp.f32 %v6975_v0  ;;  %v6910_v13 = vpop.xlane.xlu0 %6909  ;;  %v7170_v41 = vmul.f32 %v7106_v27, %v13695_v44 }
 0x452   :  { %v5695_v52 = vpop.xlane.xlu1 %5694  ;;  %v7284_v61 = vpack.c.bf16 %v7245_v38, %v7244_v4  ;;  %v6992_v24 = vmax.f32 %v6910_v13, 1e-30  ;;  %v5953_v13 = vmul.f32 %v5889_v36, %v13660_v56 }
 0x453   :  { %v9173_v57 = vpop.eup %9172  ;;  %v5775_v32 = vmax.f32 %v5695_v52, 1e-30 }
 0x454   :  { %8663 = vmatprep.mubr.msk.bf16.mxu1 %vm4304_vm1, %v7284_v61  ;;  %v9175_v50 = vpop.eup %9174  ;;  %v7107_v55 = vmul.f32 %v9173_v57, %v13558_v3  ;;  %9184 = vrcp.f32 %v6992_v24  ;;  %v15488_v57 = vld [vmem:[#allocation111_spill] sm:$0xff] }
 0x455   :  { %8664 = vmatmul.mubr.msk.bf16.vlgmr.msra.gmra.mrb[48].mxu1 %vm4304_vm1, %v7285_v49  ;;  %v5686_v26 = vpop.xlane.xlu0 %5685  ;;  %9186 = vrcp.f32 %v5775_v32  ;;  %v5886_v10 = vmul.f32 %v9175_v50, %v13532_v34  ;;  %v15489_v50 = vld [vmem:[#allocation72_spill] sm:$0xff] }
 0x456   :  { %v9177_v22 = vpop.eup %9176  ;;  %v6913_v35 = vpop.xlane.xlu1 %6912  ;;  %v5772_v28 = vmax.f32 %v5686_v26, 1e-30  ;;  %v7171_v4 = vmul.f32 %v7107_v55, %v13709_v25 }
 0x457   :  { %v9179_v51 = vpop.eup %9178  ;;  %v6993_v48 = vmax.f32 %v6913_v35, 1e-30  ;;  %v7104_v16 = vmul.f32 %v9177_v22, %v13558_v3  ;;  %v5950_v61 = vmul.f32 %v5886_v10, %v13760_v33 }
 0x458   :  { %v9181_v17 = vpop.eup %9180  ;;  %v5887_v46 = vmul.f32 %v9179_v51, %v13532_v34  ;;  %v7235_v26 = vadd.f32 %v7171_v4, %v5953_v13 }
 0x459   :  { %v6904_v19 = vpop.xlane.xlu0 %6903  ;;  %9188 = vrcp.f32 %v6993_v48  ;;  %v5888_v9 = vmul.f32 %v9181_v17, %v13532_v34  ;;  %v7168_v58 = vmul.f32 %v7104_v16, %v13781_v37 }
 0x45a   :  { %v5689_v15 = vpop.xlane.xlu1 %5688  ;;  %v6990_v23 = vmax.f32 %v6904_v19, 1e-30  ;;  %9190 = vrcp.f32 %v5772_v28  ;;  %v5951_v49 = vmul.f32 %v5887_v46, %v15487_v40 }
 0x45b   :  { %v9183_v8 = vpop.eup %9182  ;;  %v5773_v0 = vmax.f32 %v5689_v15, 1e-30  ;;  %v5952_v32 = vmul.f32 %v5888_v9, %v15489_v50  ;;  %v7232_v22 = vadd.f32 %v7168_v58, %v5950_v61 }
 0x45c   :  { %v7105_v38 = vmul.f32 %v9183_v8, %v13558_v3  ;;  %9192 = vrcp.f32 %v6990_v23 }
 0x45d   :  { %9194 = vrcp.f32 %v5773_v0  ;;  %v5656_v54 = vpop.xlane.xlu0 %5655  ;;  %v7234_v51 = vadd.f32 %v7170_v41, %v5952_v32 }
 0x45e   :  { %9196 = vrcp.f32 %v5774_v47  ;;  %v6907_v52 = vpop.xlane.xlu1 %6906  ;;  %v7169_v24 = vmul.f32 %v7105_v38, %v15488_v57  ;;  %v9185_v56 = vpop.eup %9184  ;;  %v5762_v38 = vmax.f32 %v5656_v54, 1e-30  ;;  %v15491_v54 = vld [vmem:[#allocation74_spill] sm:$0xff] }
 0x45f   :  { %v6991_v25 = vmax.f32 %v6907_v52, 1e-30  ;;  %v9187_v48 = vpop.eup %9186  ;;  %v7279_v28 = vpack.c.bf16 %v7235_v26, %v7234_v51  ;;  %v7122_v4 = vmul.f32 %v9185_v56, %v13558_v3 }
 0x460   :  { %v7233_v37 = vadd.f32 %v7169_v24, %v5951_v49  ;;  %v5905_v0 = vmul.f32 %v9187_v48, %v13532_v34  ;;  %v15490_v24 = vld [vmem:[#allocation71_spill] sm:$0xff] }
 0x461   :  { %9198 = vrcp.f32 %v6991_v25  ;;  %v6874_v35 = vpop.xlane.xlu0 %6873  ;;  %v15495_v48 = vld [vmem:[#allocation75_spill] sm:$0xff] }
 0x462   :  { %v5659_v55 = vpop.xlane.xlu1 %5658  ;;  %v7278_v44 = vpack.c.bf16 %v7233_v37, %v7232_v22  ;;  %v6980_v33 = vmax.f32 %v6874_v35, 1e-30  ;;  %v15492_v22 = vld [vmem:[#allocation13_spill] sm:$0xff] }
 0x463   :  { %v9189_v17 = vpop.eup %9188  ;;  %v5763_v36 = vmax.f32 %v5659_v55, 1e-30  ;;  %v5969_v37 = vmul.f32 %v5905_v0, %v15492_v22  ;;  %v15493_v35 = vld [vmem:[#allocation9_spill] sm:$0xff] }
 0x464   :  { %8649 = vmatprep.mubr.msk.bf16.mxu0 %vm4304_vm1, %v7278_v44  ;;  %v9191_v16 = vpop.eup %9190  ;;  %v7123_v46 = vmul.f32 %v9189_v17, %v13558_v3  ;;  %9200 = vrcp.f32 %v6980_v33  ;;  %v7186_v51 = vmul.f32 %v7122_v4, %v15493_v35  ;;  %v15494_v55 = vld [vmem:[#allocation73_spill] sm:$0xff]  ;;  %v15496_v17 = vld [vmem:[#allocation76_spill] sm:$0xff] }
 0x465   :  { %8650 = vmatmul.mubr.msk.bf16.gmra.mrb[52].mxu0 %vm4304_vm1, %v7279_v28  ;;  %v5650_v27 = vpop.xlane.xlu0 %5649  ;;  %9202 = vrcp.f32 %v5763_v36  ;;  %v5902_v13 = vmul.f32 %v9191_v16, %v13532_v34  ;;  %v15497_v36 = vld [vmem:[#allocation117_spill] sm:$0xff] }
 0x466   :  { %v9193_v47 = vpop.eup %9192  ;;  %v6877_v19 = vpop.xlane.xlu1 %6876  ;;  %v5760_v23 = vmax.f32 %v5650_v27, 1e-30  ;;  %v7187_v25 = vmul.f32 %v7123_v46, %v15490_v24 }
 0x467   :  { %v9195_v10 = vpop.eup %9194  ;;  %v6981_v15 = vmax.f32 %v6877_v19, 1e-30  ;;  %v7120_v9 = vmul.f32 %v9193_v47, %v13558_v3  ;;  %v5966_v44 = vmul.f32 %v5902_v13, %v15494_v55 }
 0x468   :  { %v9197_v8 = vpop.eup %9196  ;;  %v5903_v41 = vmul.f32 %v9195_v10, %v13532_v34  ;;  %v7251_v47 = vadd.f32 %v7187_v25, %v5969_v37 }
 0x469   :  { %v6868_v58 = vpop.xlane.xlu0 %6867  ;;  %9204 = vrcp.f32 %v6981_v15  ;;  %v5904_v49 = vmul.f32 %v9197_v8, %v13532_v34  ;;  %v7184_v32 = vmul.f32 %v7120_v9, %v15491_v54 }
 0x46a   :  { %v5653_v52 = vpop.xlane.xlu1 %5652  ;;  %v6978_v61 = vmax.f32 %v6868_v58, 1e-30  ;;  %9206 = vrcp.f32 %v5760_v23  ;;  %v5967_v28 = vmul.f32 %v5903_v41, %v15495_v48 }
 0x46b   :  { %v9199_v40 = vpop.eup %9198  ;;  %v5761_v57 = vmax.f32 %v5653_v52, 1e-30  ;;  %v5968_v27 = vmul.f32 %v5904_v49, %v15497_v36  ;;  %v7248_v19 = vadd.f32 %v7184_v32, %v5966_v44 }
 0x46c   :  { %v7121_v50 = vmul.f32 %v9199_v40, %v13558_v3  ;;  %9208 = vrcp.f32 %v6978_v61 }
 0x46d   :  { %9210 = vrcp.f32 %v5761_v57  ;;  %v14267_v26 = vpop.xlane.xlu0 %5703  ;;  %v7250_v15 = vadd.f32 %v7186_v51, %v5968_v27 }
 0x46e   :  { %9212 = vrcp.f32 %v5762_v38  ;;  %v6871_v56 = vpop.xlane.xlu1 %6870  ;;  %v7185_v33 = vmul.f32 %v7121_v50, %v15496_v17  ;;  %v9201_v23 = vpop.eup %9200  ;;  %v5778_v37 = vmax.f32 %v14267_v26, 1e-30 }
 0x46f   :  { %v6979_v16 = vmax.f32 %v6871_v56, 1e-30  ;;  %v9203_v0 = vpop.eup %9202  ;;  %v7287_v4 = vpack.c.bf16 %v7251_v47, %v7250_v15  ;;  %v7110_v22 = vmul.f32 %v9201_v23, %v13558_v3  ;;  %v15499_v47 = vld [vmem:[#allocation30_spill] sm:$0xff]  ;;  %v15500_v15 = vld [vmem:[#allocation68_spill] sm:$0xff] }
 0x470   :  { %v7249_v10 = vadd.f32 %v7185_v33, %v5967_v28  ;;  %v5893_v32 = vmul.f32 %v9203_v0, %v13532_v34 }
 0x471   :  { %9214 = vrcp.f32 %v6979_v16  ;;  %v6922_v46 = vpop.xlane.xlu0 %6921  ;;  %v15498_v16 = vld [vmem:[#allocation18_spill] sm:$0xff] }
 0x472   :  { %v5707_v8 = vpop.xlane.xlu1 %5706  ;;  %v7286_v9 = vpack.c.bf16 %v7249_v10, %v7248_v19  ;;  %v6996_v58 = vmax.f32 %v6922_v46, 1e-30  ;;  %v5957_v23 = vmul.f32 %v5893_v32, %v15500_v15 }
 0x473   :  { %v9205_v38 = vpop.eup %9204  ;;  %v5779_v41 = vmax.f32 %v5707_v8, 1e-30  ;;  %v15501_v8 = vld [vmem:[#allocation69_spill] sm:$0xff] }
 0x474   :  { %8667 = vmatprep.mubr.msk.bf16.mxu1 %vm4304_vm1, %v7286_v9  ;;  %v9207_v13 = vpop.eup %9206  ;;  %v7111_v57 = vmul.f32 %v9205_v38, %v13558_v3  ;;  %9216 = vrcp.f32 %v6996_v58  ;;  %v7174_v9 = vmul.f32 %v7110_v22, %v15501_v8  ;;  %v15502_v38 = vld [vmem:[#allocation27_spill] sm:$0xff] }
 0x475   :  { %8668 = vmatmul.mubr.msk.bf16.gmra.mrb[52].mxu1 %vm4304_vm1, %v7287_v4  ;;  %v5698_v52 = vpop.xlane.xlu0 %5697  ;;  %9218 = vrcp.f32 %v5779_v41  ;;  %v5890_v51 = vmul.f32 %v9207_v13, %v13532_v34  ;;  %v15503_v13 = vld [vmem:[#allocation64_spill] sm:$0xff] }
 0x476   :  { %v9209_v61 = vpop.eup %9208  ;;  %v6925_v40 = vpop.xlane.xlu1 %6924  ;;  %v5776_v25 = vmax.f32 %v5698_v52, 1e-30  ;;  %v7175_v36 = vmul.f32 %v7111_v57, %v15498_v16  ;;  %v15504_v52 = vld [vmem:[#allocation63_spill] sm:$0xff] }
 0x477   :  { %v9211_v49 = vpop.eup %9210  ;;  %v6997_v24 = vmax.f32 %v6925_v40, 1e-30  ;;  %v7108_v54 = vmul.f32 %v9209_v61, %v13558_v3  ;;  %v5954_v58 = vmul.f32 %v5890_v51, %v15502_v38 }
 0x478   :  { %v9213_v50 = vpop.eup %9212  ;;  %v5891_v56 = vmul.f32 %v9211_v49, %v13532_v34  ;;  %v14284_v48 = vpop.f32.mrb[32].mxu0  ;;  %v15505_v49 = vld [vmem:[#allocation70_spill] sm:$0xff] }
 0x479   :  { %v6916_v35 = vpop.xlane.xlu0 %6915  ;;  %9220 = vrcp.f32 %v6997_v24  ;;  %v5892_v17 = vmul.f32 %v9213_v50, %v13532_v34  ;;  %v14288_v27 = vpop.f32.mrb[33].mxu0  ;;  %v7172_v19 = vmul.f32 %v7108_v54, %v15499_v47  ;;  %v7239_v24 = vadd.f32 %v7175_v36, %v5957_v23 }
 0x47a   :  { %v5701_v55 = vpop.xlane.xlu1 %5700  ;;  %v6994_v44 = vmax.f32 %v6916_v35, 1e-30  ;;  %9222 = vrcp.f32 %v5776_v25  ;;  %v14292_v10 = vpop.f32.mrb[34].mxu0  ;;  %v5955_v41 = vmul.f32 %v5891_v56, %v15503_v13 }
 0x47b   :  { %v9215_v28 = vpop.eup %9214  ;;  %v5777_v33 = vmax.f32 %v5701_v55, 1e-30  ;;  %v14296_v0 = vpop.f32.mrb[35].mxu0  ;;  %v5956_v57 = vmul.f32 %v5892_v17, %v15505_v49  ;;  %v7236_v25 = vadd.f32 %v7172_v19, %v5954_v58 }
 0x47c   :  { %v7109_v26 = vmul.f32 %v9215_v28, %v13558_v3  ;;  %9224 = vrcp.f32 %v6994_v44 }
 0x47d   :  { %9226 = vrcp.f32 %v5777_v33  ;;  %v5668_v46 = vpop.xlane.xlu0 %5667  ;;  %v7238_v32 = vadd.f32 %v7174_v9, %v5956_v57 }
 0x47e   :  { %9228 = vrcp.f32 %v5778_v37  ;;  %v6919_v4 = vpop.xlane.xlu1 %6918  ;;  %v7173_v61 = vmul.f32 %v7109_v26, %v15504_v52  ;;  %v9217_v22 = vpop.eup %9216  ;;  %v5766_v44 = vmax.f32 %v5668_v46, 1e-30 }
 0x47f   :  { %v6995_v40 = vmax.f32 %v6919_v4, 1e-30  ;;  %v9219_v37 = vpop.eup %9218  ;;  %v7281_v28 = vpack.c.bf16 %v7239_v24, %v7238_v32  ;;  %v7126_v4 = vmul.f32 %v9217_v22, %v13558_v3 }
 0x480   :  { %v7237_v50 = vadd.f32 %v7173_v61, %v5955_v41  ;;  %v5909_v9 = vmul.f32 %v9219_v37, %v13532_v34 }
 0x481   :  { %9230 = vrcp.f32 %v6995_v40  ;;  %v6886_v54 = vpop.xlane.xlu0 %6885 }
 0x482   :  { %v5671_v35 = vpop.xlane.xlu1 %5670  ;;  %v7280_v55 = vpack.c.bf16 %v7237_v50, %v7236_v25  ;;  %v6984_v33 = vmax.f32 %v6886_v54, 1e-30  ;;  %9232 = vrcp.f32 %v5766_v44  ;;  %v5973_v22 = vmul.f32 %v5909_v9, %v13971_v39 }
 0x483   :  { %v9221_v51 = vpop.eup %9220  ;;  %v5767_v16 = vmax.f32 %v5671_v35, 1e-30  ;;  %v7190_v35 = vmul.f32 %v7126_v4, %v13977_v14 }
 0x484   :  { %8653 = vmatprep.mubr.msk.bf16.mxu0 %vm4304_vm1, %v7280_v55  ;;  %v9223_v56 = vpop.eup %9222  ;;  %v7127_v19 = vmul.f32 %v9221_v51, %v13558_v3  ;;  %9234 = vrcp.f32 %v6984_v33 }
 0x485   :  { %8654 = vmatmul.mubr.msk.bf16.gmra.mrb[56].mxu0 %vm4304_vm1, %v7281_v28  ;;  %v5662_v17 = vpop.xlane.xlu0 %5661  ;;  %9236 = vrcp.f32 %v5767_v16  ;;  %v5906_v58 = vmul.f32 %v9223_v56, %v13532_v34  ;;  %v15506_v16 = vld [vmem:[#allocation14_spill] sm:$0xff] }
 0x486   :  { %v9225_v36 = vpop.eup %9224  ;;  %v6889_v26 = vpop.xlane.xlu1 %6888  ;;  %v5764_v23 = vmax.f32 %v5662_v17, 1e-30  ;;  %v7191_v57 = vmul.f32 %v7127_v19, %v14019_v29 }
 0x487   :  { %v9227_v47 = vpop.eup %9226  ;;  %v6985_v15 = vmax.f32 %v6889_v26, 1e-30  ;;  %v7124_v46 = vmul.f32 %v9225_v36, %v13558_v3  ;;  %v5970_v44 = vmul.f32 %v5906_v58, %v14026_v43 }
 0x488   :  { %v9229_v8 = vpop.eup %9228  ;;  %v5907_v13 = vmul.f32 %v9227_v47, %v13532_v34  ;;  %v7255_v17 = vadd.f32 %v7191_v57, %v5973_v22 }
 0x489   :  { %v6880_v38 = vpop.xlane.xlu0 %6879  ;;  %9238 = vrcp.f32 %v6985_v15  ;;  %v5908_v40 = vmul.f32 %v9229_v8, %v13532_v34  ;;  %v7188_v50 = vmul.f32 %v7124_v46, %v14043_v63 }
 0x48a   :  { %v5665_v41 = vpop.xlane.xlu1 %5664  ;;  %v6982_v52 = vmax.f32 %v6880_v38, 1e-30  ;;  %9240 = vrcp.f32 %v5764_v23  ;;  %v8629_v24 = vpop.f32.mrb[32].mxu1  ;;  %v5971_v28 = vmul.f32 %v5907_v13, %v14039_v18 }
 0x48b   :  { %v9231_v61 = vpop.eup %9230  ;;  %v5765_v49 = vmax.f32 %v5665_v41, 1e-30  ;;  %v7627_v54 = vpop.f32.mrb[33].mxu1  ;;  %v5972_v63 = vmul.f32 %v5908_v40, %v15506_v16  ;;  %v7252_v26 = vadd.f32 %v7188_v50, %v5970_v44 }
 0x48c   :  { %v7125_v25 = vmul.f32 %v9231_v61, %v13558_v3  ;;  %9242 = vrcp.f32 %v6982_v52  ;;  %v8630_v55 = vpop.f32.mrb[34].mxu1  ;;  %v9233_v39 = vpop.eup %9232 }
 0x48d   :  { %9244 = vrcp.f32 %v5765_v49  ;;  %v5716_v32 = vpop.xlane.xlu0 %5715  ;;  %v8688_v51 = vpack.i.bf16 %v8630_v55, %v8629_v24  ;;  %v7630_v33 = vpop.f32.mrb[35].mxu1  ;;  %v7254_v43 = vadd.f32 %v7190_v35, %v5972_v63 }
 0x48e   :  { %v6883_v37 = vpop.xlane.xlu1 %6882  ;;  %v7189_v29 = vmul.f32 %v7125_v25, %v14059_v60  ;;  %v8693_v36 = vpack.i.bf16 %v7630_v33, %v7627_v54  ;;  %v9235_v18 = vpop.eup %9234  ;;  %v5782_v58 = vmax.f32 %v5716_v32, 1e-30 }
 0x48f   :  { %v6983_v56 = vmax.f32 %v6883_v37, 1e-30  ;;  %8689 = vrot.lane.b32.xlu1 %v8688_v51, %s9378_s3  ;;  %v9237_v15 = vpop.eup %9236  ;;  %v7289_v8 = vpack.c.bf16 %v7255_v17, %v7254_v43  ;;  %v7114_v32 = vmul.f32 %v9235_v18, %v13558_v3  ;;  %v5896_v51 = vmul.f32 %v9233_v39, %v13532_v34 }
 0x490   :  { %v7253_v47 = vadd.f32 %v7189_v29, %v5971_v28  ;;  %8694 = vrot.lane.b32.xlu0 %v8693_v36, %s9378_s3  ;;  %v5897_v54 = vmul.f32 %v9237_v15, %v13532_v34 }
 0x491   :  { %9246 = vrcp.f32 %v6983_v56  ;;  %v5710_v14 = vpop.xlane.xlu0 %5709  ;;  %v7178_v36 = vmul.f32 %v7114_v32, %v14085_v1 }
 0x492   :  { %v5719_v60 = vpop.xlane.xlu1 %5718  ;;  %v7288_v19 = vpack.c.bf16 %v7253_v47, %v7252_v26  ;;  %v5780_v23 = vmax.f32 %v5710_v14, 1e-30  ;;  %v5961_v17 = vmul.f32 %v5897_v54, %v14091_v62 }
 0x493   :  { %v9239_v46 = vpop.eup %9238  ;;  %v5783_v49 = vmax.f32 %v5719_v60, 1e-30 }
 0x494   :  { %8671 = vmatprep.mubr.msk.bf16.mxu1 %vm4304_vm1, %v7288_v19  ;;  %v9241_v9 = vpop.eup %9240  ;;  %v7115_v40 = vmul.f32 %v9239_v46, %v13558_v3  ;;  %9248 = vrcp.f32 %v5780_v23 }
 0x495   :  { %8672 = vmatmul.mubr.msk.bf16.gmra.mrb[56].mxu1 %vm4304_vm1, %v7289_v8  ;;  %v6928_v4 = vpop.xlane.xlu0 %6927  ;;  %v14324_v52 = vpop.f32.mrb[36].mxu0  ;;  %v5894_v55 = vmul.f32 %v9241_v9, %v13532_v34 }
 0x496   :  { %v9243_v38 = vpop.eup %9242  ;;  %v5713_v13 = vpop.xlane.xlu1 %5712  ;;  %v6998_v41 = vmax.f32 %v6928_v4, 1e-30  ;;  %v7179_v56 = vmul.f32 %v7115_v40, %v14104_v53  ;;  %v5960_v53 = vmul.f32 %v5896_v51, %v14067_v6 }
 0x497   :  { %v9245_v61 = vpop.eup %9244  ;;  %v5781_v57 = vmax.f32 %v5713_v13, 1e-30  ;;  %v14327_v24 = vpop.f32.mrb[37].mxu0  ;;  %v7112_v25 = vmul.f32 %v9243_v38, %v13558_v3  ;;  %v5958_v47 = vmul.f32 %v5894_v55, %v14097_v2 }
 0x498   :  { %9250 = vrcp.f32 %v6998_v41  ;;  %v14330_v50 = vpop.f32.mrb[38].mxu0  ;;  %v5895_v37 = vmul.f32 %v9245_v61, %v13532_v34  ;;  %v7243_v18 = vadd.f32 %v7179_v56, %v5961_v17 }
 0x499   :  { %9252 = vrcp.f32 %v5781_v57  ;;  %v6934_v22 = vpop.xlane.xlu0 %6933  ;;  %v14334_v35 = vpop.f32.mrb[39].mxu0  ;;  %v7176_v63 = vmul.f32 %v7112_v25, %v14111_v21  ;;  %v7242_v21 = vadd.f32 %v7178_v36, %v5960_v53 }
 0x49a   :  { %9254 = vrcp.f32 %v5782_v58  ;;  %v6931_v44 = vpop.xlane.xlu1 %6930  ;;  %v7000_v28 = vmax.f32 %v6934_v22, 1e-30  ;;  %v5959_v14 = vmul.f32 %v5895_v37, %v14116_v7 }
 0x49b   :  { %v9247_v29 = vpop.eup %9246  ;;  %9256 = vrcp.f32 %v5783_v49  ;;  %v6999_v33 = vmax.f32 %v6931_v44, 1e-30  ;;  %v7240_v60 = vadd.f32 %v7176_v63, %v5958_v47  ;;  %v7283_v46 = vpack.c.bf16 %v7243_v18, %v7242_v21 }
 0x49c   :  { %v7113_v16 = vmul.f32 %v9247_v29, %v13558_v3  ;;  %9258 = vrcp.f32 %v7000_v28 }
 0x49d   :  { %9260 = vrcp.f32 %v6999_v33 }
 0x49e   :  { %v6937_v26 = vpop.xlane.xlu1 %6936  ;;  %v7177_v39 = vmul.f32 %v7113_v16, %v14126_v45  ;;  %v9249_v15 = vpop.eup %9248 }
 0x49f   :  { %v7001_v43 = vmax.f32 %v6937_v26, 1e-30  ;;  %v5910_v13 = vmul.f32 %v9249_v15, %v13532_v34 }
 0x4a0   :  { %v7241_v19 = vadd.f32 %v7177_v39, %v5959_v14 }
 0x4a1   :  { %9262 = vrcp.f32 %v7001_v43  ;;  %v8633_v8 = vpop.f32.mrb[36].mxu1  ;;  %v5974_v22 = vmul.f32 %v5910_v13, %v14131_v30 }
 0x4a2   :  { %v9251_v23 = vpop.eup %9250  ;;  %v7282_v62 = vpack.c.bf16 %v7241_v19, %v7240_v60  ;;  %v7643_v9 = vpop.f32.mrb[37].mxu1 }
 0x4a3   :  { %v9253_v1 = vpop.eup %9252  ;;  %v7128_v7 = vmul.f32 %v9251_v23, %v13558_v3  ;;  %v8634_v45 = vpop.f32.mrb[38].mxu1 }
 0x4a4   :  { %v9255_v2 = vpop.eup %9254  ;;  %8657 = vmatprep.mubr.msk.bf16.mxu0 %vm4304_vm1, %v7282_v62  ;;  %v8698_v6 = vpack.i.bf16 %v8634_v45, %v8633_v8  ;;  %v7646_v38 = vpop.f32.mrb[39].mxu1  ;;  %v5911_v41 = vmul.f32 %v9253_v1, %v13532_v34 }
 0x4a5   :  { %v9257_v4 = vpop.eup %9256  ;;  %8658 = vmatmul.mubr.msk.bf16.gmra.mrb[60].mxu0 %vm4304_vm1, %v7283_v46  ;;  %v8703_v61 = vpack.i.bf16 %v7646_v38, %v7643_v9  ;;  %v7192_v25 = vmul.f32 %v7128_v7, %v14141_v20  ;;  %v5912_v54 = vmul.f32 %v9255_v2, %v13532_v34 }
 0x4a6   :  { %v9259_v58 = vpop.eup %9258  ;;  %8699 = vrot.lane.b32.xlu1 %v8698_v6, %s9378_s3  ;;  %v5913_v32 = vmul.f32 %v9257_v4, %v13532_v34  ;;  %v5975_v55 = vmul.f32 %v5911_v41, %v14146_v5 }
 0x4a7   :  { %v9261_v40 = vpop.eup %9260  ;;  %v7130_v57 = vmul.f32 %v9259_v58, %v13558_v3  ;;  %v7256_v29 = vadd.f32 %v7192_v25, %v5974_v22  ;;  %v5976_v56 = vmul.f32 %v5912_v54, %v14121_v11 }
 0x4a8   :  { %v7129_v49 = vmul.f32 %v9261_v40, %v13558_v3  ;;  %v5977_v34 = vmul.f32 %v5913_v32, %v14136_v59 }
 0x4a9   :  { %v7194_v33 = vmul.f32 %v7130_v57, %v14151_v31 }
 0x4aa   :  { %v7193_v37 = vmul.f32 %v7129_v49, %v14156_v12  ;;  %8704 = vrot.lane.b32.xlu1 %v8703_v61, %s9378_s3 }
 0x4ab   :  { %v9263_v44 = vpop.eup %9262  ;;  %v7258_v5 = vadd.f32 %v7194_v33, %v5976_v56 }
 0x4ac   :  { %v7131_v28 = vmul.f32 %v9263_v44, %v13558_v3  ;;  %v7257_v51 = vadd.f32 %v7193_v37, %v5975_v55 }
 0x4ae   :  { %v7290_v20 = vpack.c.bf16 %v7257_v51, %v7256_v29  ;;  %v7195_v30 = vmul.f32 %v7131_v28, %v14163_v42 }
 0x4b0   :  { %8675 = vmatprep.mubr.msk.bf16.mxu1 %vm4304_vm1, %v7290_v20  ;;  %v7259_v12 = vadd.f32 %v7195_v30, %v5977_v34 }
 0x4b2   :  { %v7291_v16 = vpack.c.bf16 %v7259_v12, %v7258_v5 }
 0x4b4   :  { %8676 = vmatmul.mubr.msk.bf16.gmra.mrb[60].mxu1 %vm4304_vm1, %v7291_v16 }
 0x4b9   :  { %v8619_v63 = vpop.f32.mrb[40].mxu0 }
 0x4ba   :  { %v14370_v3 = vpop.f32.mrb[41].mxu0 }
 0x4bb   :  { %v8620_v17 = vpop.f32.mrb[42].mxu0 }
 0x4bc   :  { %v7523_v36 = vpop.f32.mrb[43].mxu0 }
 0x4c9   :  { %v8637_v31 = vpop.f32.mrb[40].mxu1 }
 0x4ca   :  { %v7659_v26 = vpop.f32.mrb[41].mxu1 }
 0x4cb   :  { %v8638_v47 = vpop.f32.mrb[42].mxu1 }
 0x4cc   :  { %v8708_v11 = vpack.i.bf16 %v8638_v47, %v8637_v31  ;;  %v7662_v14 = vpop.f32.mrb[43].mxu1 }
 0x4cd   :  { %v8713_v59 = vpack.i.bf16 %v7662_v14, %v7659_v26 }
 0x4ce   :  { %8709 = vrot.lane.b32.xlu1 %v8708_v11, %s9378_s3 }
 0x4cf   :  { %8714 = vrot.lane.b32.xlu0 %v8713_v59, %s9378_s3 }
 0x4f8   :  { %v14374_v42 = vpop.f32.mrb[44].mxu0 }
 0x4f9   :  { %v14376_v39 = vpop.f32.mrb[45].mxu0 }
 0x4fa   :  { %v14378_v43 = vpop.f32.mrb[46].mxu0 }
 0x4fb   :  { %v14380_v53 = vpop.f32.mrb[47].mxu0 }
 0x501   :  { %v14388_v13 = vpop.permute.xlu1 %8689 }
 0x502   :  { %v14394_v25 = vpop.permute.xlu0 %8694 }
 0x508   :  { %v8641_v18 = vpop.f32.mrb[44].mxu1 }
 0x509   :  { %v7675_v60 = vpop.f32.mrb[45].mxu1 }
 0x50a   :  { %v8642_v19 = vpop.f32.mrb[46].mxu1 }
 0x50b   :  { %v8718_v15 = vpack.i.bf16 %v8642_v19, %v8641_v18  ;;  %v7678_v21 = vpop.f32.mrb[47].mxu1 }
 0x50c   :  { %v8723_v23 = vpack.i.bf16 %v7678_v21, %v7675_v60 }
 0x50d   :  { %8719 = vrot.lane.b32.xlu1 %v8718_v15, %s9378_s3 }
 0x50e   :  { %8724 = vrot.lane.b32.xlu0 %v8723_v23, %s9378_s3 }
 0x518   :  { %v8647_v62 = vpop.f32.mrb[48].mxu0  ;;  %v14390_v41 = vpop.permute.xlu1 %8699 }
 0x519   :  { %v7766_v8 = vpop.f32.mrb[49].mxu0 }
 0x51a   :  { %v8648_v1 = vpop.f32.mrb[50].mxu0 }
 0x51b   :  { %v8728_v46 = vpack.i.bf16 %v8648_v1, %v8647_v62  ;;  %v7769_v9 = vpop.f32.mrb[51].mxu0 }
 0x51c   :  { %v8733_v2 = vpack.i.bf16 %v7769_v9, %v7766_v8  ;;  %v14392_v57 = vpop.permute.xlu1 %8704 }
 0x51d   :  { %8729 = vrot.lane.b32.xlu1 %v8728_v46, %s9379_s15 }
 0x51e   :  { %8734 = vrot.lane.b32.xlu0 %v8733_v2, %s9379_s15 }
 0x528   :  { %v8665_v7 = vpop.f32.mrb[48].mxu1 }
 0x529   :  { %v7905_v45 = vpop.f32.mrb[49].mxu1 }
 0x52a   :  { %v8666_v4 = vpop.f32.mrb[50].mxu1 }
 0x52b   :  { %v8738_v6 = vpack.i.bf16 %v8666_v4, %v8665_v7  ;;  %v7908_v38 = vpop.f32.mrb[51].mxu1 }
 0x52c   :  { %v8743_v58 = vpack.i.bf16 %v7908_v38, %v7905_v45 }
 0x52d   :  { %8739 = vrot.lane.b32.xlu1 %v8738_v6, %s9380_s16 }
 0x52e   :  { %8744 = vrot.lane.b32.xlu0 %v8743_v58, %s9380_s16 }
 0x538   :  { %v8651_v61 = vpop.f32.mrb[52].mxu0 }
 0x539   :  { %v7782_v40 = vpop.f32.mrb[53].mxu0 }
 0x53a   :  { %v8652_v49 = vpop.f32.mrb[54].mxu0 }
 0x53b   :  { %v8748_v54 = vpack.i.bf16 %v8652_v49, %v8651_v61  ;;  %v7785_v32 = vpop.f32.mrb[55].mxu0 }
 0x53c   :  { %v8753_v22 = vpack.i.bf16 %v7785_v32, %v7782_v40 }
 0x53d   :  { %8749 = vrot.lane.b32.xlu1 %v8748_v54, %s9379_s15 }
 0x53e   :  { %8754 = vrot.lane.b32.xlu0 %v8753_v22, %s9379_s15 }
 0x540   :  { %v8710_v55 = vpop.permute.xlu1 %8709 }
 0x541   :  { %v8712_v37 = vunpack.i.h.bf16 %v8710_v55  ;;  %v8711_v44 = vunpack.i.l.bf16 %v8710_v55  ;;  %v8715_v28 = vpop.permute.xlu0 %8714 }
 0x542   :  { %v8717_v29 = vunpack.i.h.bf16 %v8715_v28  ;;  %v8716_v51 = vunpack.i.l.bf16 %v8715_v28  ;;  %v8697_v28 = vunpack.i.h.bf16 %v14394_v25 }
 0x543   :  { %v14399_v33 = vsel %vm3347_vm0, %v8620_v17, %v8712_v37  ;;  %v14402_v20 = vsel %vm3347_vm0, %v8619_v63, %v8711_v44 }
 0x544   :  { %v14405_v56 = vsel %vm3347_vm0, %v7523_v36, %v8717_v29  ;;  %v14409_v34 = vsel %vm3347_vm0, %v14370_v3, %v8716_v51 }
 0x548   :  { %v8669_v30 = vpop.f32.mrb[52].mxu1 }
 0x549   :  { %v7921_v5 = vpop.f32.mrb[53].mxu1 }
 0x54a   :  { %v8670_v12 = vpop.f32.mrb[54].mxu1 }
 0x54b   :  { %v8758_v16 = vpack.i.bf16 %v8670_v12, %v8669_v30  ;;  %v7924_v31 = vpop.f32.mrb[55].mxu1 }
 0x54c   :  { %v8763_v26 = vpack.i.bf16 %v7924_v31, %v7921_v5 }
 0x54d   :  { %8759 = vrot.lane.b32.xlu1 %v8758_v16, %s9380_s16 }
 0x54e   :  { %8764 = vrot.lane.b32.xlu0 %v8763_v26, %s9380_s16 }
 0x558   :  { %v8655_v17 = vpop.f32.mrb[56].mxu0 }
 0x559   :  { %v7798_v63 = vpop.f32.mrb[57].mxu0 }
 0x55a   :  { %v8656_v47 = vpop.f32.mrb[58].mxu0 }
 0x55b   :  { %v8768_v11 = vpack.i.bf16 %v8656_v47, %v8655_v17  ;;  %v7801_v36 = vpop.f32.mrb[59].mxu0 }
 0x55c   :  { %v8773_v14 = vpack.i.bf16 %v7801_v36, %v7798_v63 }
 0x55d   :  { %8769 = vrot.lane.b32.xlu1 %v8768_v11, %s9379_s15 }
 0x55e   :  { %8774 = vrot.lane.b32.xlu0 %v8773_v14, %s9379_s15 }
 0x568   :  { %v8673_v3 = vpop.f32.mrb[56].mxu1 }
 0x569   :  { %v7937_v59 = vpop.f32.mrb[57].mxu1 }
 0x56a   :  { %v8674_v18 = vpop.f32.mrb[58].mxu1 }
 0x56b   :  { %v8778_v60 = vpack.i.bf16 %v8674_v18, %v8673_v3  ;;  %v7940_v19 = vpop.f32.mrb[59].mxu1 }
 0x56c   :  { %v8783_v15 = vpack.i.bf16 %v7940_v19, %v7937_v59 }
 0x56d   :  { %8779 = vrot.lane.b32.xlu1 %v8778_v60, %s9380_s16 }
 0x56e   :  { %8784 = vrot.lane.b32.xlu0 %v8783_v15, %s9380_s16  ;;  %v8702_v15 = vunpack.i.h.bf16 %v14390_v41 }
 0x578   :  { %v8659_v21 = vpop.f32.mrb[60].mxu0 }
 0x579   :  { %v7814_v23 = vpop.f32.mrb[61].mxu0 }
 0x57a   :  { %v8660_v62 = vpop.f32.mrb[62].mxu0 }
 0x57b   :  { %v8788_v8 = vpack.i.bf16 %v8660_v62, %v8659_v21  ;;  %v7817_v1 = vpop.f32.mrb[63].mxu0  ;;  %v8701_v21 = vunpack.i.l.bf16 %v14390_v41  ;;  %v8707_v62 = vunpack.i.h.bf16 %v14392_v57 }
 0x57c   :  { %v8793_v46 = vpack.i.bf16 %v7817_v1, %v7814_v23 }
 0x57d   :  { %8789 = vrot.lane.b32.xlu1 %v8788_v8, %s9379_s15  ;;  %v8706_v8 = vunpack.i.l.bf16 %v14392_v57 }
 0x57e   :  { %8794 = vrot.lane.b32.xlu0 %v8793_v46, %s9379_s15 }
 0x57f   :  { %v8720_v9 = vpop.permute.xlu1 %8719  ;;  %v8164_v41 = vsel %vm3347_vm0, %v14327_v24, %v8706_v8 }
 0x580   :  { %v8722_v2 = vunpack.i.h.bf16 %v8720_v9  ;;  %v8721_v7 = vunpack.i.l.bf16 %v8720_v9  ;;  %v8725_v45 = vpop.permute.xlu0 %8724 }
 0x581   :  { %v8727_v4 = vunpack.i.h.bf16 %v8725_v45  ;;  %v8726_v6 = vunpack.i.l.bf16 %v8725_v45  ;;  %v8166_v45 = vsel %vm3347_vm0, %v14324_v52, %v8701_v21 }
 0x582   :  { %v14421_v38 = vsel %vm3347_vm0, %v14378_v43, %v8722_v2  ;;  %v14425_v58 = vsel %vm3347_vm0, %v14374_v42, %v8721_v7  ;;  %v8692_v43 = vunpack.i.h.bf16 %v14388_v13  ;;  %v8167_v7 = vsel %vm3347_vm0, %v14330_v50, %v8702_v15 }
 0x583   :  { %v14429_v61 = vsel %vm3347_vm0, %v14380_v53, %v8727_v4  ;;  %v14433_v40 = vsel %vm3347_vm0, %v14376_v39, %v8726_v6  ;;  %v8691_v53 = vunpack.i.l.bf16 %v14388_v13  ;;  %v8696_v39 = vunpack.i.l.bf16 %v14394_v25 }
 0x584   :  { %v8163_v12 = vsel %vm3347_vm0, %v14292_v10, %v8692_v43  ;;  %v8161_v13 = vsel %vm3347_vm0, %v14296_v0, %v8697_v28  ;;  %v8165_v6 = vsel %vm3347_vm0, %v14334_v35, %v8707_v62 }
 0x585   :  { %v8162_v16 = vsel %vm3347_vm0, %v14284_v48, %v8691_v53  ;;  %v8160_v26 = vsel %vm3347_vm0, %v14288_v27, %v8696_v39 }
 0x587   :  { %v8677_v49 = vpop.f32.mrb[60].mxu1 }
 0x588   :  { %v7953_v54 = vpop.f32.mrb[61].mxu1 }
 0x589   :  { %v8678_v32 = vpop.f32.mrb[62].mxu1 }
 0x58a   :  { %v8803_v22 = vpack.i.bf16 %v8678_v32, %v8677_v49  ;;  %v7956_v55 = vpop.f32.mrb[63].mxu1 }
 0x58b   :  { %v8798_v37 = vpack.i.bf16 %v7956_v55, %v7953_v54 }
 0x58c   :  { %8804 = vrot.lane.b32.xlu1 %v8803_v22, %s9380_s16 }
 0x58d   :  { %8799 = vrot.lane.b32.xlu0 %v8798_v37, %s9380_s16 }
 0x58f   :  { %v8730_v42 = vpop.permute.xlu1 %8729 }
 0x590   :  { %v8735_v44 = vpop.permute.xlu0 %8734  ;;  %v8732_v29 = vunpack.i.h.bf16 %v8730_v42  ;;  %v8731_v51 = vunpack.i.l.bf16 %v8730_v42 }
 0x591   :  { %v8737_v30 = vunpack.i.h.bf16 %v8735_v44  ;;  %v8736_v5 = vunpack.i.l.bf16 %v8735_v44 }
 0x592   :  { %v8179_v47 = vsel %vm8176_vm9, %v8162_v16, %v8731_v51  ;;  %v8180_v11 = vsel %vm8176_vm9, %v8163_v12, %v8732_v29 }
 0x593   :  { %v8178_v14 = vsel %vm8176_vm9, %v8161_v13, %v8737_v30  ;;  %v8177_v48 = vsel %vm8176_vm9, %v8160_v26, %v8736_v5 }
 0x59f   :  { %v8740_v31 = vpop.permute.xlu1 %8739 }
 0x5a0   :  { %v8742_v25 = vunpack.i.h.bf16 %v8740_v31  ;;  %v8741_v17 = vunpack.i.l.bf16 %v8740_v31  ;;  %v8745_v63 = vpop.permute.xlu0 %8744 }
 0x5a1   :  { %v8747_v36 = vunpack.i.h.bf16 %v8745_v63  ;;  %v8746_v10 = vunpack.i.l.bf16 %v8745_v63 }
 0x5a2   :  { %v8196_v3 = vsel %vm8193_vm10, %v8179_v47, %v8741_v17  ;;  %v8197_v0 = vsel %vm8193_vm10, %v8180_v11, %v8742_v25 }
 0x5a3   :  { %v8412_v59 = vpack.c.bf16 %v8197_v0, %v8196_v3  ;;  %v8195_v27 = vsel %vm8193_vm10, %v8178_v14, %v8747_v36  ;;  %v8194_v18 = vsel %vm8193_vm10, %v8177_v48, %v8746_v10 }
 0x5a4   :  { %v8407_v60 = vpack.c.bf16 %v8195_v27, %v8194_v18 }
 0x5a5   :  { %8444 = vst [vmem:[#allocation5 + $0x8] sm:$0xff] %v8412_v59  }
 0x5a6   :  { %8408 = vst [vmem:[#allocation5] sm:$0xff] %v8407_v60  }
 0x5af   :  { %v8750_v19 = vpop.permute.xlu1 %8749 }
 0x5b0   :  { %v8755_v23 = vpop.permute.xlu0 %8754  ;;  %v8752_v1 = vunpack.i.h.bf16 %v8750_v19  ;;  %v8751_v46 = vunpack.i.l.bf16 %v8750_v19 }
 0x5b1   :  { %v8757_v9 = vunpack.i.h.bf16 %v8755_v23  ;;  %v8756_v2 = vunpack.i.l.bf16 %v8755_v23 }
 0x5b2   :  { %v8183_v32 = vsel %vm8176_vm9, %v8166_v45, %v8751_v46  ;;  %v8184_v22 = vsel %vm8176_vm9, %v8167_v7, %v8752_v1 }
 0x5b3   :  { %v8181_v50 = vsel %vm8176_vm9, %v8164_v41, %v8756_v2  ;;  %v8182_v52 = vsel %vm8176_vm9, %v8165_v6, %v8757_v9 }
 0x5bf   :  { %v8760_v4 = vpop.permute.xlu1 %8759 }
 0x5c0   :  { %v8762_v49 = vunpack.i.h.bf16 %v8760_v4  ;;  %v8761_v54 = vunpack.i.l.bf16 %v8760_v4  ;;  %v8765_v57 = vpop.permute.xlu0 %8764 }
 0x5c1   :  { %v8767_v55 = vunpack.i.h.bf16 %v8765_v57  ;;  %v8766_v37 = vunpack.i.l.bf16 %v8765_v57 }
 0x5c2   :  { %v8200_v42 = vsel %vm8193_vm10, %v8183_v32, %v8761_v54  ;;  %v8201_v35 = vsel %vm8193_vm10, %v8184_v22, %v8762_v49 }
 0x5c3   :  { %v8422_v43 = vpack.c.bf16 %v8201_v35, %v8200_v42  ;;  %v8198_v24 = vsel %vm8193_vm10, %v8181_v50, %v8766_v37  ;;  %v8199_v53 = vsel %vm8193_vm10, %v8182_v52, %v8767_v55 }
 0x5c4   :  { %v8417_v44 = vpack.c.bf16 %v8199_v53, %v8198_v24 }
 0x5c5   :  { %8446 = vst [vmem:[#allocation5 + $0x18] sm:$0xff] %v8422_v43  }
 0x5c6   :  { %8445 = vst [vmem:[#allocation5 + $0x10] sm:$0xff] %v8417_v44  }
 0x5cf   :  { %v8770_v28 = vpop.permute.xlu1 %8769 }
 0x5d0   :  { %v8775_v39 = vpop.permute.xlu0 %8774  ;;  %v8772_v29 = vunpack.i.h.bf16 %v8770_v28  ;;  %v8771_v51 = vunpack.i.l.bf16 %v8770_v28 }
 0x5d1   :  { %v8777_v30 = vunpack.i.h.bf16 %v8775_v39  ;;  %v8776_v5 = vunpack.i.l.bf16 %v8775_v39 }
 0x5d2   :  { %v8187_v26 = vsel %vm8176_vm9, %v14402_v20, %v8771_v51  ;;  %v8188_v25 = vsel %vm8176_vm9, %v14399_v33, %v8772_v29 }
 0x5d3   :  { %v8186_v47 = vsel %vm8176_vm9, %v14405_v56, %v8777_v30  ;;  %v8185_v11 = vsel %vm8176_vm9, %v14409_v34, %v8776_v5 }
 0x5df   :  { %v8780_v12 = vpop.permute.xlu1 %8779 }
 0x5e0   :  { %v8782_v16 = vunpack.i.h.bf16 %v8780_v12  ;;  %v8781_v31 = vunpack.i.l.bf16 %v8780_v12  ;;  %v8785_v13 = vpop.permute.xlu0 %8784 }
 0x5e1   :  { %v8787_v17 = vunpack.i.h.bf16 %v8785_v13  ;;  %v8786_v63 = vunpack.i.l.bf16 %v8785_v13 }
 0x5e2   :  { %v8204_v36 = vsel %vm8193_vm10, %v8187_v26, %v8781_v31  ;;  %v8205_v10 = vsel %vm8193_vm10, %v8188_v25, %v8782_v16 }
 0x5e3   :  { %v8432_v14 = vpack.c.bf16 %v8205_v10, %v8204_v36  ;;  %v8203_v48 = vsel %vm8193_vm10, %v8186_v47, %v8787_v17  ;;  %v8202_v20 = vsel %vm8193_vm10, %v8185_v11, %v8786_v63 }
 0x5e4   :  { %v8427_v3 = vpack.c.bf16 %v8203_v48, %v8202_v20 }
 0x5e5   :  { %8448 = vst [vmem:[#allocation5 + $0x28] sm:$0xff] %v8432_v14  }
 0x5e6   :  { %8447 = vst [vmem:[#allocation5 + $0x20] sm:$0xff] %v8427_v3  }
 0x5ef   :  { %v8790_v33 = vpop.permute.xlu1 %8789 }
 0x5f0   :  { %v8795_v0 = vpop.permute.xlu0 %8794  ;;  %v8792_v59 = vunpack.i.h.bf16 %v8790_v33  ;;  %v8791_v27 = vunpack.i.l.bf16 %v8790_v33 }
 0x5f1   :  { %v8797_v56 = vunpack.i.h.bf16 %v8795_v0  ;;  %v8796_v18 = vunpack.i.l.bf16 %v8795_v0 }
 0x5f2   :  { %v8191_v21 = vsel %vm8176_vm9, %v14425_v58, %v8791_v27  ;;  %v8192_v23 = vsel %vm8176_vm9, %v14421_v38, %v8792_v59 }
 0x5f3   :  { %v8190_v1 = vsel %vm8176_vm9, %v14429_v61, %v8797_v56  ;;  %v8189_v46 = vsel %vm8176_vm9, %v14433_v40, %v8796_v18 }
 0x5fe   :  { %v8805_v60 = vpop.permute.xlu1 %8804 }
 0x5ff   :  { %v8807_v34 = vunpack.i.h.bf16 %v8805_v60  ;;  %v8806_v19 = vunpack.i.l.bf16 %v8805_v60  ;;  %v8800_v15 = vpop.permute.xlu0 %8799 }
 0x600   :  { %v8802_v62 = vunpack.i.h.bf16 %v8800_v15  ;;  %v8801_v8 = vunpack.i.l.bf16 %v8800_v15 }
 0x601   :  { %v8208_v9 = vsel %vm8193_vm10, %v8191_v21, %v8806_v19  ;;  %v8209_v2 = vsel %vm8193_vm10, %v8192_v23, %v8807_v34 }
 0x602   :  { %v8442_v7 = vpack.c.bf16 %v8209_v2, %v8208_v9  ;;  %v8207_v58 = vsel %vm8193_vm10, %v8190_v1, %v8802_v62  ;;  %v8206_v45 = vsel %vm8193_vm10, %v8189_v46, %v8801_v8 }
 0x603   :  { %v8437_v38 = vpack.c.bf16 %v8207_v58, %v8206_v45 }
 0x604   :  { %8450 = vst [vmem:[#allocation5 + $0x38] sm:$0xff] %v8442_v7  }
 0x605   :  { %8449 = vst [vmem:[#allocation5 + $0x30] sm:$0xff] %v8437_v38  }
 0x606   :  { %9359 = shalt.err (!%p9356_p9)
}
 0x607   :  { %s9360_s1 = scalar_lea.hbm %s14520_s5, 1024 }
 0x608   :  { %p9361_p10 = scmp.ne.s32.totalorder %s14520_s5, %s9360_s1  ;;  %p9364_p11 = scmp.lt.u32.totalorder %s9360_s1, %s14520_s5 }
 0x60a   :  { %p9366_p12 = pnand %p9364_p11, %p9361_p10 }
 0x60c   :  { %9369 = shalt.err (!%p9366_p12)
}
 0x60d   :  { %s9382_s25 = smov 4  }
 0x60e   :  { %8301 = dma.vmem_to_hbm [thread:$0]  %s8296_s18, 1024, %s14520_s5, [#allocation3], %s9379_s15, %s9379_s15, %s9382_s25  }
 0x60f   :  { %9372 = dma.done.wait [#allocation3], 1024  }
 0x610   :  { %9373 = vsyncadd [#allocation3], 4294966272 }
 0x611   :  { %8305 = vsyncpa [#allocation3], 1 }
 0x612   :  { %8306 = vsyncpa [#allocation4], 1 }

</bundles_post_ra>
